<compile_context>
chip_gen: v6e
topology: v6e:2x2x1
jax: 0.10.0
libtpu: 0.0.40
codegen_flags: <defaults>
</compile_context>

<pallas_src>
import numpy as np
import jax
import jax.numpy as jnp
from jax import lax
from jax.experimental import pallas as pl
from jax.experimental.pallas import tpu as pltpu

POOL = 4                         # adaptive_avg_pool2d target (4, 4)
CONV_OUT = 128                   # BasicConv2d out channels
FC1_OUT = 1024
FC1_IN = CONV_OUT * POOL * POOL  # 2048


def _round_up(a, b):
    return -(-a // b) * b


def _adaptive_pool_matrix(H, W):
    """(16, H*W) matrix implementing F.adaptive_avg_pool2d(., (4,4)) as a matmul."""
    P = np.zeros((POOL * POOL, H * W), dtype=np.float32)
    for i in range(POOL):
        h0, h1 = (i * H) // POOL, -((-(i + 1) * H) // POOL)
        for j in range(POOL):
            w0, w1 = (j * W) // POOL, -((-(j + 1) * W) // POOL)
            cnt = (h1 - h0) * (w1 - w0)
            for h in range(h0, h1):
                for w in range(w0, w1):
                    P[i * POOL + j, h * W + w] = 1.0 / cnt
    return P


def _aux_kernel(x_ref, pool_ref, wconv_ref, bnb_ref, w1_ref, b1_ref,
                w2_ref, b2_ref, out_ref, hflat_ref):
    NB = x_ref.shape[0]
    # Loop-invariant weight loads, hoisted out of the per-sample loop.
    wconv = wconv_ref[...]          # (128, C)  bf16, BN scale already folded in
    poolT = pool_ref[...]           # (HW, 16)  bf16
    bnb = bnb_ref[...]              # (128, 1)  f32 folded BN bias

    # Per-sample conv-first: conv over all HW positions (lane-dense matmul),
    # then pool down to 16 positions (tiny matmul), then BN bias + ReLU.
    def body(n, carry):
        xn = x_ref[n].astype(jnp.bfloat16)                              # (C, HW)
        hn = jnp.dot(wconv, xn, preferred_element_type=jnp.float32)     # (128, HW)
        pn = jnp.dot(hn.astype(jnp.bfloat16), poolT,
                     preferred_element_type=jnp.float32)                # (128, 16)
        pn = jnp.maximum(pn + bnb, 0.0)
        hflat_ref[n] = pn.astype(jnp.bfloat16)      # o*16+p == PyTorch flatten order
        return carry

    lax.fori_loop(0, NB, body, None)

    # Single bf16 flatten relayout for the whole block, then batched fc1/fc2.
    hf = hflat_ref[...].reshape(NB, FC1_IN)                             # (NB, 2048)
    z = jnp.dot(hf, w1_ref[...], preferred_element_type=jnp.float32) + b1_ref[...]
    z = jnp.maximum(z, 0.0).astype(jnp.bfloat16)
    # Dropout(p=0.7) is identity at inference time.
    out_ref[...] = (jnp.dot(z, w2_ref[...], preferred_element_type=jnp.float32)
                    + b2_ref[...])                                      # (NB, NCp)


def _build_call(NB, C, HW, NCp, n_blocks, vmem_limit):
    def wspec(shape):
        # Constant index_map -> DMA'd once (pipeline skips copies when the block
        # index does not change); double-buffer cost is accounted in the budget.
        return pl.BlockSpec(shape, lambda n, _s=shape: (0,) * len(_s))

    return pl.pallas_call(
        _aux_kernel,
        out_shape=jax.ShapeDtypeStruct((n_blocks * NB, NCp), jnp.float32),
        grid_spec=pltpu.PrefetchScalarGridSpec(
            num_scalar_prefetch=0,
            grid=(n_blocks,),
            in_specs=[
                pl.BlockSpec((NB, C, HW), lambda n: (n, 0, 0)),  # x, f32, native layout
                wspec((HW, POOL * POOL)),                         # pool^T
                wspec((CONV_OUT, C)),                             # conv w (BN folded)
                wspec((CONV_OUT, 1)),                             # BN bias
                wspec((FC1_IN, FC1_OUT)),                         # fc1 w
                wspec((1, FC1_OUT)),                              # fc1 b
                wspec((FC1_OUT, NCp)),                            # fc2 w (padded)
                wspec((1, NCp)),                                  # fc2 b (padded)
            ],
            out_specs=pl.BlockSpec((NB, NCp), lambda n: (n, 0)),  # lane-dense output
            scratch_shapes=[pltpu.VMEM((NB, CONV_OUT, POOL * POOL), jnp.bfloat16)],
        ),
        compiler_params=pltpu.CompilerParams(
            dimension_semantics=("parallel",),        # independent batch blocks
            vmem_limit_bytes=int(vmem_limit)),
    )


def inception_aux_forward(x_nchw, params):
    N, C, H, W = x_nchw.shape
    num_classes = int(params["fc2_b"].shape[0])
    HW = H * W
    NCp = _round_up(num_classes, 128)       # lane-dense output block

    # ---- generation-aware VMEM budget (v5e/v6e: 128 MiB, v7x: 64 MiB) ----
    try:
        vmem_cap = int(pltpu.get_tpu_info().vmem_capacity_bytes)
    except Exception:                        # capability probe only; conservative default
        vmem_cap = 64 * 1024 * 1024
    vmem_limit = min((vmem_cap * 3) // 4, 112 * 1024 * 1024)

    # Weight tensors (double-buffered by the pipeline, DMA'd once), lane padding
    # of the narrow ones included.
    weight_bytes = (HW * 128 * 2                     # pool^T (HW,16) bf16, lane-padded
                    + CONV_OUT * max(C, 128) * 2     # conv w bf16
                    + CONV_OUT * 128 * 4             # bn bias (128,1) f32, lane-padded
                    + FC1_IN * FC1_OUT * 2           # fc1 w bf16  (4 MiB)
                    + 8 * FC1_OUT * 4                # fc1 b
                    + FC1_OUT * NCp * 2              # fc2 w bf16
                    + 8 * NCp * 4)                   # fc2 b
    fixed_bytes = 2 * weight_bytes + 8 * 1024 * 1024   # + slack for temporaries
    per_sample = (2 * C * HW * 4          # x block, f32, double-buffered
                  + 2 * NCp * 4           # out block, f32, double-buffered
                  + CONV_OUT * 128 * 2    # flatten scratch row (lane-padded bf16)
                  + FC1_IN * 2 + FC1_OUT * 4)
    nb_budget = max(1, (vmem_limit - fixed_bytes) // per_sample)

    if N <= 8:
        NB, n_blocks = N, 1                # single block equals full dims -> exempt
    else:
        N8 = _round_up(N, 8)
        nb_cap = int(min(128, max(8, nb_budget)))
        nb_cap = max(8, (nb_cap // 8) * 8)
        n_blocks = -(-N8 // nb_cap)
        if n_blocks == 1 and N8 >= 16:
            n_blocks = 2                   # >=2 blocks so both v7x TensorCores get work
        NB = _round_up(-(-N8 // n_blocks), 8)
        n_blocks = -(-N8 // NB)
    N_pad = NB * n_blocks

    # ---- weight prep only; x stays in native f32 (N, C, H*W) ----
    x3 = x_nchw.astype(jnp.float32).reshape(N, C, HW)
    if N_pad != N:
        x3 = jnp.pad(x3, ((0, N_pad - N), (0, 0), (0, 0)))

    poolT = jnp.asarray(_adaptive_pool_matrix(H, W).T, dtype=jnp.bfloat16)   # (HW, 16)

    scale = params["bn_gamma"] / jnp.sqrt(params["bn_var"] + 1e-3)
    wconv = (params["conv_w"].reshape(CONV_OUT, C)
             * scale[:, None]).astype(jnp.bfloat16)                          # (128, C)
    bnb = (params["bn_beta"] - params["bn_mean"] * scale)
    bnb = bnb.reshape(CONV_OUT, 1).astype(jnp.float32)

    w1 = params["fc1_w"].T.astype(jnp.bfloat16)        # (2048, 1024), rows = o*16+p
    b1 = params["fc1_b"].reshape(1, FC1_OUT).astype(jnp.float32)
    w2 = jnp.pad(params["fc2_w"].T,
                 ((0, 0), (0, NCp - num_classes))).astype(jnp.bfloat16)      # (1024, NCp)
    b2 = jnp.pad(params["fc2_b"], (0, NCp - num_classes))
    b2 = b2.reshape(1, NCp).astype(jnp.float32)

    out = _build_call(NB, C, HW, NCp, n_blocks, vmem_limit)(
        x3, poolT, wconv, bnb, w1, b1, w2, b2)
    return out[:N, :num_classes]           # async result; caller blocks if needed


def _ref_forward(x, params):
    """Pure-JAX reference mirroring the PyTorch module (inference mode)."""
    N, C, H, W = x.shape
    P = jnp.asarray(_adaptive_pool_matrix(H, W))                             # (16, HW)
    xp = jnp.einsum("ncs,ps->ncp", x.reshape(N, C, H * W), P, precision="highest")
    h = jnp.einsum("ncp,oc->nop", xp, params["conv_w"].reshape(CONV_OUT, C),
                   precision="highest")                                      # (N, 128, 16)
    scale = params["bn_gamma"] / jnp.sqrt(params["bn_var"] + 1e-3)
    bias = params["bn_beta"] - params["bn_mean"] * scale
    h = jnp.maximum(h * scale[None, :, None] + bias[None, :, None], 0.0)
    hf = h.reshape(N, CONV_OUT * POOL * POOL)                                # f = o*16 + p
    z = jnp.maximum(
        jnp.dot(hf, params["fc1_w"].T, precision="highest") + params["fc1_b"], 0.0)
    return jnp.dot(z, params["fc2_w"].T, precision="highest") + params["fc2_b"]


if __name__ == "__main__":
    N, C, H, W = 2, 4, 16, 16
    num_classes = 10

    key = jax.random.PRNGKey(0)
    ks = jax.random.split(key, 10)
    x = jax.random.normal(ks[0], (N, C, H, W), jnp.float32)
    params = {
        "conv_w": 0.1 * jax.random.normal(ks[1], (CONV_OUT, C, 1, 1), jnp.float32),
        "bn_gamma": 1.0 + 0.1 * jax.random.normal(ks[2], (CONV_OUT,), jnp.float32),
        "bn_beta": 0.1 * jax.random.normal(ks[3], (CONV_OUT,), jnp.float32),
        "bn_mean": 0.1 * jax.random.normal(ks[4], (CONV_OUT,), jnp.float32),
        "bn_var": jax.random.uniform(ks[5], (CONV_OUT,), jnp.float32, 0.5, 1.5),
        "fc1_w": 0.02 * jax.random.normal(ks[6], (FC1_OUT, CONV_OUT * POOL * POOL),
                                          jnp.float32),
        "fc1_b": 0.01 * jax.random.normal(ks[7], (FC1_OUT,), jnp.float32),
        "fc2_w": 0.02 * jax.random.normal(ks[8], (num_classes, FC1_OUT), jnp.float32),
        "fc2_b": 0.01 * jax.random.normal(ks[9], (num_classes,), jnp.float32),
    }

    out = jax.block_until_ready(inception_aux_forward(x, params))
    ref = _ref_forward(x, params)
    assert out.shape == (N, num_classes), out.shape
    err = float(jnp.max(jnp.abs(out - ref)))
    assert jnp.allclose(out, ref, atol=1e-2, rtol=1e-2), err
    print("KERNEL_OK")
</pallas_src>

<mosaic_0001>
module attributes {stable_mosaic.version = 11 : i64} {
  func.func @_aux_kernel(%arg0: i32, %arg1: memref<2x4x256xf32, #tpu.memory_space<vmem>>, %arg2: memref<256x16xbf16, #tpu.memory_space<vmem>>, %arg3: memref<128x4xbf16, #tpu.memory_space<vmem>>, %arg4: memref<128x1xf32, #tpu.memory_space<vmem>>, %arg5: memref<2048x1024xbf16, #tpu.memory_space<vmem>>, %arg6: memref<1x1024xf32, #tpu.memory_space<vmem>>, %arg7: memref<1024x128xbf16, #tpu.memory_space<vmem>>, %arg8: memref<1x128xf32, #tpu.memory_space<vmem>>, %arg9: memref<2x128xf32, #tpu.memory_space<vmem>>, %arg10: memref<2x128x16xbf16, #tpu.memory_space<vmem>>) attributes {dimension_semantics = [#tpu.dimension_semantics<parallel>], iteration_bounds = array<i64: 1>, scalar_prefetch = 0 : i64, scratch_operands = 1 : i64, tpu.core_type = #tpu.core_type<tc>, window_params = [{transform_indices = @transform_0, window_bounds = array<i64: 2, 4, 256>}, {pipeline_mode = #tpu.pipeline_mode<synchronous>, transform_indices = @transform_1, window_bounds = array<i64: 256, 16>}, {pipeline_mode = #tpu.pipeline_mode<synchronous>, transform_indices = @transform_2, window_bounds = array<i64: 128, 4>}, {pipeline_mode = #tpu.pipeline_mode<synchronous>, transform_indices = @transform_3, window_bounds = array<i64: 128, 1>}, {pipeline_mode = #tpu.pipeline_mode<synchronous>, transform_indices = @transform_4, window_bounds = array<i64: 2048, 1024>}, {pipeline_mode = #tpu.pipeline_mode<synchronous>, transform_indices = @transform_5, window_bounds = array<i64: 1, 1024>}, {pipeline_mode = #tpu.pipeline_mode<synchronous>, transform_indices = @transform_6, window_bounds = array<i64: 1024, 128>}, {pipeline_mode = #tpu.pipeline_mode<synchronous>, transform_indices = @transform_7, window_bounds = array<i64: 1, 128>}, {transform_indices = @transform_8, window_bounds = array<i64: 2, 128>}]} {
    %c0 = arith.constant 0 : index
    %c0_0 = arith.constant 0 : index
    %0 = vector.load %arg3[%c0, %c0_0] : memref<128x4xbf16, #tpu.memory_space<vmem>>, vector<128x4xbf16>
    %c0_1 = arith.constant 0 : index
    %c0_2 = arith.constant 0 : index
    %1 = vector.load %arg2[%c0_1, %c0_2] : memref<256x16xbf16, #tpu.memory_space<vmem>>, vector<256x16xbf16>
    %c0_3 = arith.constant 0 : index
    %c0_4 = arith.constant 0 : index
    %2 = vector.load %arg4[%c0_3, %c0_4] : memref<128x1xf32, #tpu.memory_space<vmem>>, vector<128x1xf32>
    %c0_i32 = arith.constant 0 : i32
    %c2_i32 = arith.constant 2 : i32
    %3 = arith.addi %c0_i32, %c2_i32 : i32
    %c1_i32 = arith.constant 1 : i32
    scf.for %arg11 = %c0_i32 to %3 step %c1_i32  : i32 {
      %20 = arith.index_cast %arg11 : i32 to index
      %c0_21 = arith.constant 0 : index
      %c0_22 = arith.constant 0 : index
      %21 = vector.load %arg1[%20, %c0_21, %c0_22] : memref<2x4x256xf32, #tpu.memory_space<vmem>>, vector<1x4x256xf32>
      %22 = vector.shape_cast %21 : vector<1x4x256xf32> to vector<4x256xf32>
      %23 = arith.truncf %22 : vector<4x256xf32> to vector<4x256xbf16>
      %cst_23 = arith.constant dense<0.000000e+00> : vector<128x256xf32>
      %24 = tpu.matmul %0, %23, %cst_23 {dimension_numbers = #tpu.dot_dimension_numbers<[1], [0], [0], [1], [0, 0, 1, 1], [], []>} : vector<128x4xbf16>, vector<4x256xbf16>, vector<128x256xf32> -> vector<128x256xf32>
      %25 = arith.truncf %24 : vector<128x256xf32> to vector<128x256xbf16>
      %cst_24 = arith.constant dense<0.000000e+00> : vector<128x16xf32>
      %26 = tpu.matmul %25, %1, %cst_24 {dimension_numbers = #tpu.dot_dimension_numbers<[1], [0], [0], [1], [0, 0, 1, 1], [], []>} : vector<128x256xbf16>, vector<256x16xbf16>, vector<128x16xf32> -> vector<128x16xf32>
      %27 = vector.broadcast %2 : vector<128x1xf32> to vector<128x16xf32>
      %28 = arith.addf %26, %27 : vector<128x16xf32>
      %cst_25 = arith.constant 0.000000e+00 : f32
      %29 = vector.broadcast %cst_25 : f32 to vector<128x16xf32>
      %30 = arith.maximumf %28, %29 : vector<128x16xf32>
      %31 = arith.truncf %30 : vector<128x16xf32> to vector<128x16xbf16>
      %32 = arith.index_cast %arg11 : i32 to index
      %c0_26 = arith.constant 0 : index
      %c0_27 = arith.constant 0 : index
      %33 = vector.load %arg10[%32, %c0_26, %c0_27] : memref<2x128x16xbf16, #tpu.memory_space<vmem>>, vector<1x128x16xbf16>
      %34 = vector.shape_cast %33 : vector<1x128x16xbf16> to vector<128x16xbf16>
      %35 = vector.shape_cast %31 : vector<128x16xbf16> to vector<1x128x16xbf16>
      tpu.vector_store %arg10[%32, %c0_26, %c0_27], %35 {strides = array<i32>} : memref<2x128x16xbf16, #tpu.memory_space<vmem>>, vector<1x128x16xbf16>,
    }
    %c2_i32_5 = arith.constant 2 : i32
    %c0_6 = arith.constant 0 : index
    %c0_7 = arith.constant 0 : index
    %c0_8 = arith.constant 0 : index
    %4 = vector.load %arg10[%c0_6, %c0_7, %c0_8] : memref<2x128x16xbf16, #tpu.memory_space<vmem>>, vector<2x128x16xbf16>
    %5 = vector.shape_cast %4 : vector<2x128x16xbf16> to vector<2x2048xbf16>
    %c0_9 = arith.constant 0 : index
    %c0_10 = arith.constant 0 : index
    %6 = vector.load %arg5[%c0_9, %c0_10] : memref<2048x1024xbf16, #tpu.memory_space<vmem>>, vector<2048x1024xbf16>
    %cst = arith.constant dense<0.000000e+00> : vector<2x1024xf32>
    %7 = tpu.matmul %5, %6, %cst {dimension_numbers = #tpu.dot_dimension_numbers<[1], [0], [0], [1], [0, 0, 1, 1], [], []>} : vector<2x2048xbf16>, vector<2048x1024xbf16>, vector<2x1024xf32> -> vector<2x1024xf32>
    %c0_11 = arith.constant 0 : index
    %c0_12 = arith.constant 0 : index
    %8 = vector.load %arg6[%c0_11, %c0_12] : memref<1x1024xf32, #tpu.memory_space<vmem>>, vector<1x1024xf32>
    %9 = vector.broadcast %8 : vector<1x1024xf32> to vector<2x1024xf32>
    %10 = arith.addf %7, %9 : vector<2x1024xf32>
    %cst_13 = arith.constant 0.000000e+00 : f32
    %11 = vector.broadcast %cst_13 : f32 to vector<2x1024xf32>
    %12 = arith.maximumf %10, %11 : vector<2x1024xf32>
    %13 = arith.truncf %12 : vector<2x1024xf32> to vector<2x1024xbf16>
    %c0_14 = arith.constant 0 : index
    %c0_15 = arith.constant 0 : index
    %14 = vector.load %arg7[%c0_14, %c0_15] : memref<1024x128xbf16, #tpu.memory_space<vmem>>, vector<1024x128xbf16>
    %cst_16 = arith.constant dense<0.000000e+00> : vector<2x128xf32>
    %15 = tpu.matmul %13, %14, %cst_16 {dimension_numbers = #tpu.dot_dimension_numbers<[1], [0], [0], [1], [0, 0, 1, 1], [], []>} : vector<2x1024xbf16>, vector<1024x128xbf16>, vector<2x128xf32> -> vector<2x128xf32>
    %c0_17 = arith.constant 0 : index
    %c0_18 = arith.constant 0 : index
    %16 = vector.load %arg8[%c0_17, %c0_18] : memref<1x128xf32, #tpu.memory_space<vmem>>, vector<1x128xf32>
    %17 = vector.broadcast %16 : vector<1x128xf32> to vector<2x128xf32>
    %18 = arith.addf %15, %17 : vector<2x128xf32>
    %c0_19 = arith.constant 0 : index
    %c0_20 = arith.constant 0 : index
    %19 = vector.load %arg9[%c0_19, %c0_20] : memref<2x128xf32, #tpu.memory_space<vmem>>, vector<2x128xf32>
    tpu.vector_store %arg9[%c0_19, %c0_20], %18 {strides = array<i32>} : memref<2x128xf32, #tpu.memory_space<vmem>>, vector<2x128xf32>,
    return
  }
  func.func @transform_0(%arg0: i32) -> (i32, i32, i32) {
    %c0_i32 = arith.constant 0 : i32
    %c0_i32_0 = arith.constant 0 : i32
    %c0_i32_1 = arith.constant 0 : i32
    return %arg0, %c0_i32, %c0_i32_0 : i32, i32, i32
  }
  func.func @transform_1(%arg0: i32) -> (i32, i32) {
    %c0_i32 = arith.constant 0 : i32
    %c0_i32_0 = arith.constant 0 : i32
    %c0_i32_1 = arith.constant 0 : i32
    return %c0_i32, %c0_i32_0 : i32, i32
  }
  func.func @transform_2(%arg0: i32) -> (i32, i32) {
    %c0_i32 = arith.constant 0 : i32
    %c0_i32_0 = arith.constant 0 : i32
    %c0_i32_1 = arith.constant 0 : i32
    return %c0_i32, %c0_i32_0 : i32, i32
  }
  func.func @transform_3(%arg0: i32) -> (i32, i32) {
    %c0_i32 = arith.constant 0 : i32
    %c0_i32_0 = arith.constant 0 : i32
    %c0_i32_1 = arith.constant 0 : i32
    return %c0_i32, %c0_i32_0 : i32, i32
  }
  func.func @transform_4(%arg0: i32) -> (i32, i32) {
    %c0_i32 = arith.constant 0 : i32
    %c0_i32_0 = arith.constant 0 : i32
    %c0_i32_1 = arith.constant 0 : i32
    return %c0_i32, %c0_i32_0 : i32, i32
  }
  func.func @transform_5(%arg0: i32) -> (i32, i32) {
    %c0_i32 = arith.constant 0 : i32
    %c0_i32_0 = arith.constant 0 : i32
    %c0_i32_1 = arith.constant 0 : i32
    return %c0_i32, %c0_i32_0 : i32, i32
  }
  func.func @transform_6(%arg0: i32) -> (i32, i32) {
    %c0_i32 = arith.constant 0 : i32
    %c0_i32_0 = arith.constant 0 : i32
    %c0_i32_1 = arith.constant 0 : i32
    return %c0_i32, %c0_i32_0 : i32, i32
  }
  func.func @transform_7(%arg0: i32) -> (i32, i32) {
    %c0_i32 = arith.constant 0 : i32
    %c0_i32_0 = arith.constant 0 : i32
    %c0_i32_1 = arith.constant 0 : i32
    return %c0_i32, %c0_i32_0 : i32, i32
  }
  func.func @transform_8(%arg0: i32) -> (i32, i32) {
    %c0_i32 = arith.constant 0 : i32
    %c0_i32_0 = arith.constant 0 : i32
    return %arg0, %c0_i32 : i32, i32
  }
}

</mosaic_0001>

<bundles_post_ra>
// kernel: tpu_custom_call.1
= control target key start
LH: loop header
LB: loop body
LE: loop exit
PB: predicated region body
PF: predicated region fallthrough
CT: control target
= control target key end

     0   :  { %13 = vsyncpa [#allocation4], 0  ;;  %s14214_s0 = inlined_call_operand.hbm [shape: f32[2,4,256], index: 0, kind: input, shape index: {}]   ;;  %s14215_s1 = inlined_call_operand.vmem [shape: bf16[256,16], index: 1, kind: input, shape index: {}]   ;;  %s14216_s2 = inlined_call_operand.vmem [shape: bf16[128,4], index: 2, kind: input, shape index: {}]   ;;  %s14217_s3 = inlined_call_operand.vmem [shape: f32[128,1], index: 3, kind: input, shape index: {}]   ;;  %s14218_s4 = inlined_call_operand.hbm [shape: bf16[2048,1024], index: 4, kind: input, shape index: {}]   ;;  %s14219_s5 = inlined_call_operand.hbm [shape: f32[1,1024], index: 5, kind: input, shape index: {}]   ;;  %s14220_s6 = inlined_call_operand.hbm [shape: bf16[1024,128], index: 6, kind: input, shape index: {}]   ;;  %s14221_s7 = inlined_call_operand.hbm [shape: f32[1,128], index: 7, kind: input, shape index: {}]   ;;  %s14222_s8 = inlined_call_operand.hbm [shape: f32[2,128], index: 8, kind: output, shape index: {}]  }
   0x1   :  { %14 = vsyncpa [#allocation7], 0 }
   0x2   :  { %15 = vsyncpa [#allocation10], 0 }
   0x3   :  { %16 = vsyncpa [#allocation5], 0  ;;  %s12458_s27 = smov [#allocation6]  }
   0x4   :  { %s40_s28 = sshll.u32 %s12458_s27, 4  ;;  %s41_s28 = int_to_ptr.vmem [resolvable:$true] %s40_s28 }
   0x5   :  { %s12330_s29 = scalar_lea.vmem %s41_s28, 131072  ;;  %p12335_p1 = scmp.lt.s32.totalorder %s41_s28, %s41_s28 }
   0x6   :  { %p12331_p0 = scmp.ne.s32.totalorder %s41_s28, %s12330_s29  ;;  %p12336_p2 = scmp.lt.s32.totalorder %s12330_s29, %s12330_s29 }
   0x8   :  { %p12337_p3 = por %p12336_p2, %p12335_p1 }
   0xa   :  { %p12338_p4 = pnand %p12337_p3, %p12331_p0 }
   0xc   :  { %12341 = shalt.err (!%p12338_p4)
}
   0xd   :  { %s12459_s30 = smov 512   ;;  %s12460_s9 = smov 32  }
   0xe   :  { %46 = dma.hbm_to_vmem [thread:$0]  %s14218_s4, 131072, %s41_s28, [#allocation7], %s12459_s30, %s12459_s30, %s12460_s9  }
   0xf   :  { %s12461_s12 = smov [#allocation9]  }
  0x10   :  { %s62_s13 = sshll.u32 %s12461_s12, 4  ;;  %s63_s13 = int_to_ptr.vmem [resolvable:$true] %s62_s13 }
  0x11   :  { %s12350_s14 = scalar_lea.vmem %s63_s13, 8192  ;;  %p12355_p6 = scmp.lt.s32.totalorder %s63_s13, %s63_s13 }
  0x12   :  { %p12351_p5 = scmp.ne.s32.totalorder %s63_s13, %s12350_s14  ;;  %p12356_p7 = scmp.lt.s32.totalorder %s12350_s14, %s12350_s14 }
  0x14   :  { %p12357_p8 = por %p12356_p7, %p12355_p6 }
  0x16   :  { %p12358_p9 = pnand %p12357_p8, %p12351_p5 }
  0x18   :  { %12361 = shalt.err (!%p12358_p9)
}
  0x19   :  { %s12462_s15 = smov 64   ;;  %s12463_s16 = smov 4  }
  0x1a   :  { %68 = dma.hbm_to_vmem [thread:$0]  %s14220_s6, 8192, %s63_s13, [#allocation10], %s12462_s15, %s12462_s15, %s12463_s16  }
  0x1b   :  { %s12464_s19 = smov [#allocation3]  }
  0x1c   :  { %s22_s4 = sshll.u32 %s12464_s19, 4  ;;  %s23_s4 = int_to_ptr.vmem [resolvable:$true] %s22_s4 }
  0x1d   :  { %s12370_s20 = scalar_lea.vmem %s23_s4, 256  ;;  %p12375_p11 = scmp.lt.s32.totalorder %s23_s4, %s23_s4 }
  0x1e   :  { %p12371_p10 = scmp.ne.s32.totalorder %s23_s4, %s12370_s20  ;;  %p12376_p12 = scmp.lt.s32.totalorder %s12370_s20, %s12370_s20 }
  0x20   :  { %p12377_p13 = por %p12376_p12, %p12375_p11 }
  0x22   :  { %p12378_p0 = pnand %p12377_p13, %p12371_p10 }
  0x24   :  { %12381 = shalt.err (!%p12378_p0)
}
  0x25   :  { %s12465_s21 = smov 128   ;;  %s12466_s22 = smov 8  }
  0x26   :  { %28 = dma.hbm_to_vmem [thread:$0]  %s14214_s0, 256, %s23_s4, [#allocation4], %s12465_s21, %s12465_s21, %s12466_s22  }
  0x27   :  { %s12467_s25 = smov [#allocation8]   ;;  %s12468_s6 = smov [#allocation11]  }
  0x28   :  { %s53_s26 = sshll.u32 %s12467_s25, 4  ;;  %s75_s27 = sshll.u32 %s12468_s6, 4  ;;  %s54_s26 = int_to_ptr.vmem [resolvable:$true] %s53_s26  ;;  %s76_s27 = int_to_ptr.vmem [resolvable:$true] %s75_s27 }
  0x29   :  { %s12390_s28 = scalar_lea.vmem %s54_s26, 128  ;;  %p12395_p2 = scmp.lt.s32.totalorder %s54_s26, %s54_s26 }
  0x2a   :  { %p12391_p1 = scmp.ne.s32.totalorder %s54_s26, %s12390_s28  ;;  %p12396_p3 = scmp.lt.s32.totalorder %s12390_s28, %s12390_s28 }
  0x2c   :  { %p12397_p4 = por %p12396_p3, %p12395_p2 }
  0x2e   :  { %p12398_p5 = pnand %p12397_p4, %p12391_p1 }
  0x30   :  { %12401 = shalt.err (!%p12398_p5)
}
  0x31   :  { %56 = dma.hbm_to_vmem [thread:$0]  %s14219_s5, 128, %s54_s26, [#allocation7]  }
  0x32   :  { %s12410_s10 = scalar_lea.vmem %s76_s27, 16  ;;  %s12414_s0 = scalar_lea.vmem %s76_s27, 32 }
  0x33   :  { %p12411_p6 = scmp.ne.s32.totalorder %s76_s27, %s12410_s10  ;;  %p12415_p7 = scmp.lt.s32.totalorder %s76_s27, %s76_s27 }
  0x34   :  { %p12416_p8 = scmp.lt.s32.totalorder %s12414_s0, %s12410_s10 }
  0x36   :  { %p12417_p9 = por %p12416_p8, %p12415_p7 }
  0x38   :  { %p12418_p10 = pnand %p12417_p9, %p12411_p6 }
  0x3a   :  { %12421 = shalt.err (!%p12418_p10)
}
  0x3b   :  { %78 = dma.hbm_to_vmem [thread:$0]  %s14221_s7, 16, %s76_s27, [#allocation10]  }
  0x3c   :  { %12446 = dma.done.wait [#allocation4], 256  }
  0x3d   :  { %12447 = vsyncadd [#allocation4], 4294967040 }
  0x3e   :  { %12448 = dma.done.wait [#allocation7], 131200  }
  0x3f   :  { %12449 = vsyncadd [#allocation7], 4294836096 }
  0x40   :  { %12450 = dma.done.wait [#allocation10], 8208  }
  0x41   :  { %12451 = vsyncadd [#allocation10], 4294959088  ;;  %v12545_v0 = vld [vmem:[%s14216_s2] sm:$0xf]  ;;  %v12550_v1 = vld [vmem:[%s14216_s2 + $0x4] sm:$0xf] }
  0x42   :  { %14223 = vst [vmem:[#allocation17_spill] sm:$0xff] %v12545_v0  ;;  %14224 = vst [vmem:[#allocation18_spill] sm:$0xff] %v12550_v1  ;;  %v12555_v2 = vld [vmem:[%s14216_s2 + $0x8] sm:$0xf]  ;;  %v12560_v3 = vld [vmem:[%s14216_s2 + $0xc] sm:$0xf] }
  0x43   :  { %14225 = vst [vmem:[#allocation19_spill] sm:$0xff] %v12555_v2  ;;  %14226 = vst [vmem:[#allocation20_spill] sm:$0xff] %v12560_v3  ;;  %v12565_v4 = vld [vmem:[%s14216_s2 + $0x10] sm:$0xf]  ;;  %v12570_v5 = vld [vmem:[%s14216_s2 + $0x14] sm:$0xf] }
  0x44   :  { %14227 = vst [vmem:[#allocation21_spill] sm:$0xff] %v12565_v4  ;;  %14228 = vst [vmem:[#allocation22_spill] sm:$0xff] %v12570_v5  ;;  %v12575_v6 = vld [vmem:[%s14216_s2 + $0x18] sm:$0xf]  ;;  %v12580_v7 = vld [vmem:[%s14216_s2 + $0x1c] sm:$0xf] }
  0x45   :  { %14229 = vst [vmem:[#allocation23_spill] sm:$0xff] %v12575_v6  ;;  %14230 = vst [vmem:[#allocation24_spill] sm:$0xff] %v12580_v7  ;;  %v12585_v8 = vld [vmem:[%s14216_s2 + $0x20] sm:$0xf]  ;;  %v12590_v9 = vld [vmem:[%s14216_s2 + $0x24] sm:$0xf] }
  0x46   :  { %14231 = vst [vmem:[#allocation25_spill] sm:$0xff] %v12585_v8  ;;  %v12595_v10 = vld [vmem:[%s14216_s2 + $0x28] sm:$0xf]  ;;  %v12600_v11 = vld [vmem:[%s14216_s2 + $0x2c] sm:$0xf]  ;;  %v12785_v48 = vld [vmem:[%s14217_s3] sm:$0xff] }
  0x47   :  { %v12605_v12 = vld [vmem:[%s14216_s2 + $0x30] sm:$0xf]  ;;  %v12610_v13 = vld [vmem:[%s14216_s2 + $0x34] sm:$0xf]  ;;  %v12615_v14 = vld [vmem:[%s14216_s2 + $0x38] sm:$0xf] }
  0x48   :  { %v12620_v15 = vld [vmem:[%s14216_s2 + $0x3c] sm:$0xf]  ;;  %v12625_v16 = vld [vmem:[%s14215_s1] sm:$0xf]  ;;  %v12630_v17 = vld [vmem:[%s14215_s1 + $0x4] sm:$0xf] }
  0x49   :  { %14232 = vst [vmem:[#allocation26_spill] sm:$0xff] %v12625_v16  ;;  %14233 = vst [vmem:[#allocation27_spill] sm:$0xff] %v12630_v17  ;;  %v12635_v18 = vld [vmem:[%s14215_s1 + $0x8] sm:$0xf]  ;;  %v12640_v19 = vld [vmem:[%s14215_s1 + $0xc] sm:$0xf] }
  0x4a   :  { %14234 = vst [vmem:[#allocation28_spill] sm:$0xff] %v12635_v18  ;;  %14235 = vst [vmem:[#allocation29_spill] sm:$0xff] %v12640_v19  ;;  %v12645_v20 = vld [vmem:[%s14215_s1 + $0x10] sm:$0xf]  ;;  %v12650_v21 = vld [vmem:[%s14215_s1 + $0x14] sm:$0xf] }
  0x4b   :  { %v12655_v22 = vld [vmem:[%s14215_s1 + $0x18] sm:$0xf]  ;;  %v12660_v23 = vld [vmem:[%s14215_s1 + $0x1c] sm:$0xf]  ;;  %v12665_v24 = vld [vmem:[%s14215_s1 + $0x20] sm:$0xf] }
  0x4c   :  { %v12670_v25 = vld [vmem:[%s14215_s1 + $0x24] sm:$0xf]  ;;  %v12675_v26 = vld [vmem:[%s14215_s1 + $0x28] sm:$0xf]  ;;  %v12680_v27 = vld [vmem:[%s14215_s1 + $0x2c] sm:$0xf] }
  0x4d   :  { %v12685_v28 = vld [vmem:[%s14215_s1 + $0x30] sm:$0xf]  ;;  %v12690_v29 = vld [vmem:[%s14215_s1 + $0x34] sm:$0xf]  ;;  %v12695_v30 = vld [vmem:[%s14215_s1 + $0x38] sm:$0xf] }
  0x4e   :  { %14236 = vst [vmem:[#allocation30_spill] sm:$0xff] %v12695_v30  ;;  %v12700_v31 = vld [vmem:[%s14215_s1 + $0x3c] sm:$0xf]  ;;  %v12705_v32 = vld [vmem:[%s14215_s1 + $0x40] sm:$0xf]  ;;  %v12790_v49 = vld [vmem:[%s14217_s3 + $0x8] sm:$0xff] }
  0x4f   :  { %14237 = vst [vmem:[#allocation31_spill] sm:$0xff] %v12700_v31  ;;  %14238 = vst [vmem:[#allocation32_spill] sm:$0xff] %v12705_v32  ;;  %v12710_v33 = vld [vmem:[%s14215_s1 + $0x44] sm:$0xf]  ;;  %v12715_v34 = vld [vmem:[%s14215_s1 + $0x48] sm:$0xf] }
  0x50   :  { %14239 = vst [vmem:[#allocation33_spill] sm:$0xff] %v12710_v33  ;;  %14240 = vst [vmem:[#allocation34_spill] sm:$0xff] %v12715_v34  ;;  %v12720_v35 = vld [vmem:[%s14215_s1 + $0x4c] sm:$0xf]  ;;  %v12725_v36 = vld [vmem:[%s14215_s1 + $0x50] sm:$0xf] }
  0x51   :  { %v12730_v37 = vld [vmem:[%s14215_s1 + $0x54] sm:$0xf]  ;;  %v12735_v38 = vld [vmem:[%s14215_s1 + $0x58] sm:$0xf]  ;;  %v12740_v39 = vld [vmem:[%s14215_s1 + $0x5c] sm:$0xf] }
  0x52   :  { %v12745_v40 = vld [vmem:[%s14215_s1 + $0x60] sm:$0xf]  ;;  %v12750_v41 = vld [vmem:[%s14215_s1 + $0x64] sm:$0xf]  ;;  %v12755_v42 = vld [vmem:[%s14215_s1 + $0x68] sm:$0xf] }
  0x53   :  { %v12760_v43 = vld [vmem:[%s14215_s1 + $0x6c] sm:$0xf]  ;;  %v12765_v44 = vld [vmem:[%s14215_s1 + $0x70] sm:$0xf]  ;;  %v12770_v45 = vld [vmem:[%s14215_s1 + $0x74] sm:$0xf] }
  0x54   :  { %v12775_v46 = vld [vmem:[%s14215_s1 + $0x78] sm:$0xf]  ;;  %v12780_v47 = vld [vmem:[%s14215_s1 + $0x7c] sm:$0xf]  ;;  %v12795_v50 = vld [vmem:[%s14217_s3 + $0x10] sm:$0xff]  ;;  %s12862_s11 = smov 0  }
  0x55   :  { %14241 = vst [vmem:[#allocation35_spill] sm:$0xff] %v12775_v46  ;;  %14242 = vst [vmem:[#allocation36_spill] sm:$0xff] %v12780_v47  ;;  %v12800_v51 = vld [vmem:[%s14217_s3 + $0x18] sm:$0xff]  ;;  %v12805_v52 = vld [vmem:[%s14217_s3 + $0x20] sm:$0xff] }
  0x56   :  { %v12810_v53 = vld [vmem:[%s14217_s3 + $0x28] sm:$0xff]  ;;  %v12815_v54 = vld [vmem:[%s14217_s3 + $0x30] sm:$0xff]  ;;  %v12820_v55 = vld [vmem:[%s14217_s3 + $0x38] sm:$0xff] }
  0x57   :  { %v12825_v56 = vld [vmem:[%s14217_s3 + $0x40] sm:$0xff]  ;;  %v12830_v57 = vld [vmem:[%s14217_s3 + $0x48] sm:$0xff]  ;;  %v12835_v58 = vld [vmem:[%s14217_s3 + $0x50] sm:$0xff] }
  0x58   :  { %v12840_v59 = vld [vmem:[%s14217_s3 + $0x58] sm:$0xff]  ;;  %v12845_v60 = vld [vmem:[%s14217_s3 + $0x60] sm:$0xff]  ;;  %v12850_v61 = vld [vmem:[%s14217_s3 + $0x68] sm:$0xff] }
  0x59   :  { %v12855_v62 = vld [vmem:[%s14217_s3 + $0x70] sm:$0xff]  ;;  %v12860_v63 = vld [vmem:[%s14217_s3 + $0x78] sm:$0xff] }
  0x5a LB: > { %v12469_v16 = vmov 0   ;;  %s11973_s12 = sshll.u32 %s12456_s11, 3  ;;  %v14245_v31 = vld [vmem:[#allocation31_spill] sm:$0xff]  ;;  %v14246_v30 = vld [vmem:[#allocation30_spill] sm:$0xff]  ;;  %vm239_vm0 = vcmask 1041408   ;;  %v10752_v18 = vcombine.low %v12765_v44, %v12770_v45  ;;  %v14248_v0 = vld [vmem:[#allocation17_spill] sm:$0xff]  ;;  %s12456_s11 = sphi %s12862_s11, %s164_s11  }
  0x5b   : > { %278 = vmatprep.mubr.bf16.mxu0 %v12469_v16  ;;  %12252 = vset.pattern.permute.xlu0 %v12469_v16  ;;  %v10745_v32 = vcombine.low %v14246_v30, %v14245_v31  ;;  %s167_s3 = scalar_lea.vmem [#allocation3], %s11973_s12  ;;  %v10744_v30 = vcombine.low %v12685_v28, %v12690_v29  ;;  %v10751_v31 = vcombine.low %v12755_v42, %v12760_v43  ;;  %v14247_v1 = vld [vmem:[#allocation18_spill] sm:$0xff]  ;;  %vm214_vm1 = vcmask 31744   ;;  %v14249_v3 = vld [vmem:[#allocation20_spill] sm:$0xff]  ;;  %v14250_v2 = vld [vmem:[#allocation19_spill] sm:$0xff]  ;;  %s11990_s5 = sshll.u32 %s12456_s11, 6 }
  0x5c   : > { %v14243_v47 = vld [vmem:[#allocation36_spill] sm:$0xff]  ;;  %v14244_v46 = vld [vmem:[#allocation35_spill] sm:$0xff]  ;;  %377 = vperm.xlu0 %12252, %v12785_v48   ;;  %v168_v33 = vld [vmem:[%s167_s3] sm:$0xff]  ;;  %12253 = vset.pattern.permute.xlu1 %v12469_v16  ;;  %vm731_vm2 = vcmask 125952   ;;  %s12951_s1 = scalar_lea.vmem [#allocation2], %s11990_s5  ;;  %s164_s11 = sadd.s32 1, %s12456_s11  }
  0x5d   : > { %v10753_v17 = vcombine.low %v14244_v46, %v14243_v47  ;;  %v170_v19 = vcombine.high %v168_v33, %v168_v33  ;;  %v172_v34 = vpack.c.bf16 %v168_v33, %v168_v33  ;;  %387 = vperm.xlu1 %12253, %v12795_v50   ;;  %v10721_v33 = vcombine.low %v14248_v0, %v14247_v1  ;;  %v14251_v5 = vld [vmem:[#allocation22_spill] sm:$0xff]  ;;  %v14252_v4 = vld [vmem:[#allocation21_spill] sm:$0xff]  ;;  %v14253_v7 = vld [vmem:[#allocation24_spill] sm:$0xff]  ;;  %p161_p11 = scmp.ge.s32.totalorder %s164_s11, 2  }
  0x5e   : > { %v14254_v6 = vld [vmem:[#allocation23_spill] sm:$0xff]  ;;  %v14255_v8 = vld [vmem:[#allocation25_spill] sm:$0xff]  ;;  %s12472_s13 = smov (%p161_p11), 16   ;;  %v12473_v48 = vmov (%p161_p11), 0   ;;  %s12474_s14 = smov (%p161_p11), 48   ;;  %vm2236_vm3 = vcmask (%p161_p11), 130048  }
  0x5f   : > { %12207 = vmatprep.subr.bf16.mxu1 %v10753_v17  ;;  %v173_v46 = vpack.c.bf16 %v170_v19, %v170_v19  ;;  %v241_v47 = vsel %vm239_vm0, %v172_v34, 0  ;;  %v10743_v19 = vcombine.low %v12675_v26, %v12680_v27  ;;  %v10750_v34 = vcombine.low %v12745_v40, %v12750_v41  ;;  %s12475_s16 = smov (%p161_p11), 80   ;;  %s12476_s17 = smov (%p161_p11), 96  }
  0x60   : > { %12215 = vmatpush3.bf16.msra.mxu1 %v10745_v32  ;;  %382 = vperm.xlu0 %12252, %v12790_v49   ;;  %s12477_s18 = smov (%p161_p11), 112   ;;  %vm2240_vm4 = vcmask (%p161_p11), 261120   ;;  %vm2243_vm5 = vcmask (%p161_p11), 392192   ;;  %vm2246_vm6 = vcmask (%p161_p11), 523264   ;;  %vm2249_vm7 = vcmask (%p161_p11), 654336  }
  0x61   : > { %12208 = vmatprep.subr.bf16.mxu1 %v10752_v18  ;;  %10729 = vmatprep.subr.msk.bf16.mxu0 %vm239_vm0, %v173_v46  ;;  %v10749_v46 = vcombine.low %v12735_v38, %v12740_v39  ;;  %vm2252_vm8 = vcmask (%p161_p11), 785408   ;;  %vm2255_vm9 = vcmask (%p161_p11), 916480  }
  0x62   : > { %261 = vmatpush1.bf16.msra.mxu0 %v241_v47  ;;  %392 = vperm.xlu1 %12253, %v12800_v51   ;;  %v10722_v47 = vcombine.low %v14250_v2, %v14249_v3 }
  0x63   : > { %12055 = vmatprep.subr.bf16.mxu0 %v10753_v17  ;;  %v10742_v17 = vcombine.low %v12665_v24, %v12670_v25 }
  0x64   : > { %12216 = vmatpush3.bf16.msra.mxu1 %v10744_v30  ;;  %397 = vperm.xlu0 %12252, %v12805_v52  }
  0x65   : > { %12209 = vmatprep.subr.bf16.mxu1 %v10751_v31  ;;  %10730 = vmatmul.mubr.msk.bf16.vlgmr.msra.gmra.mxu0 %vm214_vm1, %v10721_v33  ;;  %v10724_v33 = vcombine.low %v14254_v6, %v14253_v7 }
  0x66   : > { %288 = vmatprep.mubr.bf16.mxu0 %v12469_v16  ;;  %12056 = vmatpush3.bf16.msra.mxu0 %v10745_v32  ;;  %v10748_v32 = vcombine.low %v12725_v36, %v12730_v37 }
  0x67   : > { %12057 = vmatprep.subr.bf16.mxu0 %v10752_v18  ;;  %402 = vperm.xlu1 %12253, %v12810_v53   ;;  %v10741_v18 = vcombine.low %v12655_v22, %v12660_v23 }
  0x68   : > { %12217 = vmatpush3.bf16.msra.mxu1 %v10743_v19  ;;  %407 = vperm.xlu0 %12252, %v12815_v54  }
  0x69   : > { %12210 = vmatprep.subr.bf16.mxu1 %v10750_v34 }
  0x6a   : > { %12058 = vmatpush3.bf16.msra.mxu0 %v10744_v30  ;;  %v10740_v30 = vcombine.low %v12645_v20, %v12650_v21 }
  0x6b   : > { %12059 = vmatprep.subr.bf16.mxu0 %v10751_v31  ;;  %412 = vperm.xlu1 %12253, %v12820_v55   ;;  %v10723_v31 = vcombine.low %v14252_v4, %v14251_v5 }
  0x6c   : > { %12218 = vmatpush3.bf16.msra.mxu1 %v10742_v17  ;;  %417 = vperm.xlu0 %12252, %v12825_v56  }
  0x6d   : > { %12211 = vmatprep.subr.bf16.mxu1 %v10749_v46  ;;  %10731 = vmatmul.mubr.msk.bf16.gmra.mxu0 %vm214_vm1, %v10722_v47  ;;  %v14256_v47 = vld [vmem:[#allocation34_spill] sm:$0xff] }
  0x6e   : > { %298 = vmatprep.mubr.bf16.mxu0 %v12469_v16  ;;  %12060 = vmatpush3.bf16.msra.mxu0 %v10743_v19  ;;  %v10725_v19 = vcombine.low %v14255_v8, %v12590_v9 }
  0x6f   : > { %12061 = vmatprep.subr.bf16.mxu0 %v10750_v34  ;;  %422 = vperm.xlu1 %12253, %v12830_v57   ;;  %v10726_v34 = vcombine.low %v12595_v10, %v12600_v11 }
  0x70   : > { %12219 = vmatpush3.bf16.msra.mxu1 %v10741_v18  ;;  %427 = vperm.xlu0 %12252, %v12835_v58  }
  0x71   : > { %12212 = vmatprep.subr.bf16.mxu1 %v10748_v32 }
  0x72   : > { %12062 = vmatpush3.bf16.msra.mxu0 %v10742_v17  ;;  %v10727_v17 = vcombine.low %v12605_v12, %v12610_v13 }
  0x73   : > { %12063 = vmatprep.subr.bf16.mxu0 %v10749_v46  ;;  %432 = vperm.xlu1 %12253, %v12840_v59   ;;  %v10728_v46 = vcombine.low %v12615_v14, %v12620_v15 }
  0x74   : > { %12220 = vmatpush3.bf16.msra.mxu1 %v10740_v30  ;;  %437 = vperm.xlu0 %12252, %v12845_v60  }
  0x75   : > { %10732 = vmatmul.mubr.msk.bf16.gmra.mxu0 %vm214_vm1, %v10723_v31 }
  0x76   : > { %308 = vmatprep.mubr.bf16.mxu0 %v12469_v16  ;;  %12064 = vmatpush3.bf16.msra.mxu0 %v10741_v18  ;;  %v10747_v18 = vcombine.low %v14256_v47, %v12720_v35 }
  0x77   : > { %12065 = vmatprep.subr.bf16.mxu0 %v10748_v32  ;;  %442 = vperm.xlu1 %12253, %v12850_v61   ;;  %v14257_v32 = vld [vmem:[#allocation29_spill] sm:$0xff] }
  0x78   : > { %447 = vperm.xlu0 %12252, %v12855_v62   ;;  %12213 = vmatprep.subr.bf16.mxu1 %v10747_v18 }
  0x7a   : > { %12066 = vmatpush3.bf16.msra.mxu0 %v10740_v30  ;;  %v14258_v30 = vld [vmem:[#allocation28_spill] sm:$0xff] }
  0x7b   : > { %452 = vperm.xlu1 %12253, %v12860_v63   ;;  %v10739_v31 = vcombine.low %v14258_v30, %v14257_v32  ;;  %12067 = vmatprep.subr.bf16.mxu0 %v10747_v18 }
  0x7d   : > { %10733 = vmatmul.mubr.msk.bf16.gmra.mxu0 %vm214_vm1, %v10724_v33  ;;  %12221 = vmatpush3.bf16.msra.mxu1 %v10739_v31  ;;  %v14259_v33 = vld [vmem:[#allocation33_spill] sm:$0xff] }
  0x7e   : > { %318 = vmatprep.mubr.bf16.mxu0 %v12469_v16  ;;  %12068 = vmatpush3.bf16.msra.mxu0 %v10739_v31 }
  0x85   : > { %10734 = vmatmul.mubr.msk.bf16.gmra.mxu0 %vm214_vm1, %v10725_v19  ;;  %v14260_v19 = vld [vmem:[#allocation32_spill] sm:$0xff] }
  0x86   : > { %328 = vmatprep.mubr.bf16.mxu0 %v12469_v16 }
  0x8d   : > { %10735 = vmatmul.mubr.msk.bf16.gmra.mxu0 %vm214_vm1, %v10726_v34  ;;  %v10746_v34 = vcombine.low %v14260_v19, %v14259_v33 }
  0x8e   : > { %338 = vmatprep.mubr.bf16.mxu0 %v12469_v16 }
  0x8f   : > { %12069 = vmatprep.subr.bf16.mxu0 %v10746_v34  ;;  %12214 = vmatprep.subr.bf16.mxu1 %v10746_v34 }
  0x95   : > { %10736 = vmatmul.mubr.msk.bf16.gmra.mxu0 %vm214_vm1, %v10727_v17  ;;  %v14261_v17 = vld [vmem:[#allocation27_spill] sm:$0xff] }
  0x96   : > { %348 = vmatprep.mubr.bf16.mxu0 %v12469_v16  ;;  %v14262_v16 = vld [vmem:[#allocation26_spill] sm:$0xff] }
  0x97   : > { %v10738_v0 = vcombine.low %v14262_v16, %v14261_v17 }
  0x99   : > { %12070 = vmatpush3.bf16.msra.mxu0 %v10738_v0  ;;  %12222 = vmatpush3.bf16.msra.mxu1 %v10738_v0 }
  0x9d   : > { %10737 = vmatmul.mubr.msk.bf16.gmra.mxu0 %vm214_vm1, %v10728_v46 }
  0xd8   : > { %v388_v8 = vpop.permute.xlu1 %387 }
 0x125   : > { %v280_v46 = vpop.f32.mrf.mxu0 }
 0x127   : > { %v282_v1 = vpop.f32.mrf.mxu0 }
 0x129   : > { %v284_v47 = vpop.f32.mrf.mxu0 }
 0x12a   : > { %v359_v32 = vpack.c.bf16 %v284_v47, %v280_v46 }
 0x12b   : > { %v286_v2 = vpop.f32.mrf.mxu0 }
 0x12c   : > { %v360_v3 = vpack.c.bf16 %v286_v2, %v282_v1 }
 0x12d   : > { %v290_v30 = vpop.f32.mrf.mxu0 }
 0x12e   : > { %583 = vmatprep.mubr.bf16.mxu0 %v360_v3 }
 0x12f   : > { %v292_v18 = vpop.f32.mrf.mxu0  ;;  %584 = vmatmul.mubr.bf16.vlgmr.msra.gmra.mxu0 %v359_v32 }
 0x131   : > { %v294_v31 = vpop.f32.mrf.mxu0 }
 0x132   : > { %v361_v19 = vpack.c.bf16 %v294_v31, %v290_v30 }
 0x133   : > { %v296_v4 = vpop.f32.mrf.mxu0 }
 0x134   : > { %v362_v33 = vpack.c.bf16 %v296_v4, %v292_v18 }
 0x135   : > { %v300_v5 = vpop.f32.mrf.mxu0 }
 0x136   : > { %591 = vmatprep.mubr.bf16.mxu1 %v362_v33 }
 0x137   : > { %v302_v17 = vpop.f32.mrf.mxu0  ;;  %592 = vmatmul.mubr.bf16.vlgmr.msra.gmra.mxu1 %v361_v19 }
 0x139   : > { %v304_v34 = vpop.f32.mrf.mxu0 }
 0x13a   : > { %v363_v6 = vpack.c.bf16 %v304_v34, %v300_v5 }
 0x13b   : > { %v306_v0 = vpop.f32.mrf.mxu0 }
 0x13c   : > { %v364_v16 = vpack.c.bf16 %v306_v0, %v302_v17 }
 0x13d   : > { %v310_v7 = vpop.f32.mrf.mxu0 }
 0x13e   : > { %599 = vmatprep.mubr.bf16.mxu1 %v364_v16 }
 0x13f   : > { %v312_v1 = vpop.f32.mrf.mxu0  ;;  %600 = vmatmul.mubr.bf16.gmra.mxu1 %v363_v6 }
 0x141   : > { %v314_v2 = vpop.f32.mrf.mxu0 }
 0x142   : > { %v365_v47 = vpack.c.bf16 %v314_v2, %v310_v7 }
 0x143   : > { %v316_v3 = vpop.f32.mrf.mxu0 }
 0x144   : > { %v366_v46 = vpack.c.bf16 %v316_v3, %v312_v1 }
 0x145   : > { %v320_v32 = vpop.f32.mrf.mxu0 }
 0x146   : > { %607 = vmatprep.mubr.bf16.mxu1 %v366_v46 }
 0x147   : > { %v322_v4 = vpop.f32.mrf.mxu0  ;;  %608 = vmatmul.mubr.bf16.gmra.mxu1 %v365_v47 }
 0x149   : > { %v324_v30 = vpop.f32.mrf.mxu0 }
 0x14a   : > { %v367_v33 = vpack.c.bf16 %v324_v30, %v320_v32 }
 0x14b   : > { %v326_v18 = vpop.f32.mrf.mxu0 }
 0x14c   : > { %v368_v31 = vpack.c.bf16 %v326_v18, %v322_v4 }
 0x14d   : > { %v330_v19 = vpop.f32.mrf.mxu0 }
 0x14e   : > { %615 = vmatprep.mubr.bf16.mxu1 %v368_v31 }
 0x14f   : > { %v332_v17 = vpop.f32.mrf.mxu0  ;;  %616 = vmatmul.mubr.bf16.gmra.mxu1 %v367_v33 }
 0x151   : > { %v334_v5 = vpop.f32.mrf.mxu0 }
 0x152   : > { %v369_v6 = vpack.c.bf16 %v334_v5, %v330_v19  ;;  %v378_v19 = vpop.permute.xlu0 %377 }
 0x153   : > { %v336_v34 = vpop.f32.mrf.mxu0 }
 0x154   : > { %v370_v0 = vpack.c.bf16 %v336_v34, %v332_v17 }
 0x155   : > { %v340_v16 = vpop.f32.mrf.mxu0 }
 0x156   : > { %623 = vmatprep.mubr.bf16.mxu1 %v370_v0 }
 0x157   : > { %v342_v1 = vpop.f32.mrf.mxu0  ;;  %624 = vmatmul.mubr.bf16.gmra.mxu1 %v369_v6 }
 0x159   : > { %v344_v7 = vpop.f32.mrf.mxu0 }
 0x15a   : > { %v371_v46 = vpack.c.bf16 %v344_v7, %v340_v16  ;;  %v383_v16 = vpop.permute.xlu0 %382 }
 0x15b   : > { %v346_v2 = vpop.f32.mrf.mxu0 }
 0x15c   : > { %v372_v3 = vpack.c.bf16 %v346_v2, %v342_v1 }
 0x15d   : > { %v350_v47 = vpop.f32.mrf.mxu0 }
 0x15e   : > { %631 = vmatprep.mubr.bf16.mxu1 %v372_v3 }
 0x15f   : > { %v352_v32 = vpop.f32.mrf.mxu0  ;;  %632 = vmatmul.mubr.bf16.gmra.mxu1 %v371_v46 }
 0x161   : > { %v354_v4 = vpop.f32.mrf.mxu0 }
 0x162   : > { %v373_v31 = vpack.c.bf16 %v354_v4, %v350_v47 }
 0x163   : > { %v356_v30 = vpop.f32.mrf.mxu0 }
 0x164   : > { %v374_v18 = vpack.c.bf16 %v356_v30, %v352_v32 }
 0x166   : > { %639 = vmatprep.mubr.bf16.mxu1 %v374_v18 }
 0x167   : > { %640 = vmatmul.mubr.bf16.gmra.mxu1 %v373_v31 }
 0x1ef   : > { %v12071_v33 = vpop.f32.mrf.mxu0 }
 0x1f1   : > { %v12072_v17 = vpop.f32.mrf.mxu0 }
 0x1f2   : > { %v12073_v5 = vadd.f32 %v12072_v17, %v12071_v33 }
 0x1f3   : > { %v12074_v34 = vpop.f32.mrf.mxu0 }
 0x1f4   : > { %v586_v0 = vadd.f32 %v12073_v5, %v378_v19  ;;  %v393_v5 = vpop.permute.xlu1 %392 }
 0x1f5   : > { %v12075_v6 = vpop.f32.mrf.mxu0 }
 0x1f6   : > { %v648_v1 = vmax.f32 %v586_v0, 0.0  ;;  %v12076_v7 = vadd.f32 %v12075_v6, %v12074_v34 }
 0x1f7   : > { %v12077_v2 = vpop.f32.mrf.mxu1 }
 0x1f8   : > { %v11974_v3 = vpack.c.bf16 %v648_v1, %v648_v1  ;;  %v589_v46 = vadd.f32 %v12076_v7, %v383_v16 }
 0x1f9   : > { %v12078_v32 = vpop.f32.mrf.mxu1 }
 0x1fa   : > { %732 = vst.msk [vmem:[%s12951_s1] sm:$0xf] %vm731_vm2, %v11974_v3  ;;  %v649_v47 = vmax.f32 %v589_v46, 0.0  ;;  %v12079_v4 = vadd.f32 %v12078_v32, %v12077_v2  ;;  %v398_v2 = vpop.permute.xlu0 %397 }
 0x1fb   : > { %v12080_v30 = vpop.f32.mrf.mxu1 }
 0x1fc   : > { %v11975_v18 = vpack.c.bf16 %v649_v47, %v649_v47  ;;  %v594_v31 = vadd.f32 %v12079_v4, %v388_v8 }
 0x1fd   : > { %v12081_v33 = vpop.f32.mrf.mxu1 }
 0x1fe   : > { %733 = vst.msk [vmem:[%s12951_s1 + $0x4] sm:$0xf] %vm731_vm2, %v11975_v18  ;;  %v650_v19 = vmax.f32 %v594_v31, 0.0  ;;  %v12082_v17 = vadd.f32 %v12081_v33, %v12080_v30  ;;  %v403_v30 = vpop.permute.xlu1 %402 }
 0x1ff   : > { %v12083_v34 = vpop.f32.mrf.mxu1 }
 0x200   : > { %v11976_v0 = vpack.c.bf16 %v650_v19, %v650_v19  ;;  %v597_v6 = vadd.f32 %v12082_v17, %v393_v5 }
 0x201   : > { %v12084_v16 = vpop.f32.mrf.mxu1 }
 0x202   : > { %734 = vst.msk [vmem:[%s12951_s1 + $0x8] sm:$0xf] %vm731_vm2, %v11976_v0  ;;  %v651_v1 = vmax.f32 %v597_v6, 0.0  ;;  %v12085_v7 = vadd.f32 %v12084_v16, %v12083_v34  ;;  %v408_v34 = vpop.permute.xlu0 %407 }
 0x203   : > { %v12086_v3 = vpop.f32.mrf.mxu1 }
 0x204   : > { %v11977_v46 = vpack.c.bf16 %v651_v1, %v651_v1  ;;  %v602_v8 = vadd.f32 %v12085_v7, %v398_v2 }
 0x205   : > { %v12087_v32 = vpop.f32.mrf.mxu1 }
 0x206   : > { %735 = vst.msk [vmem:[%s12951_s1 + $0xc] sm:$0xf] %vm731_vm2, %v11977_v46  ;;  %v652_v47 = vmax.f32 %v602_v8, 0.0  ;;  %v12088_v4 = vadd.f32 %v12087_v32, %v12086_v3  ;;  %v413_v3 = vpop.permute.xlu1 %412 }
 0x207   : > { %v12089_v18 = vpop.f32.mrf.mxu1 }
 0x208   : > { %v11978_v31 = vpack.c.bf16 %v652_v47, %v652_v47  ;;  %v605_v33 = vadd.f32 %v12088_v4, %v403_v30 }
 0x209   : > { %v12090_v19 = vpop.f32.mrf.mxu1 }
 0x20a   : > { %736 = vst.msk [vmem:[%s12951_s1 + $0x10] sm:$0xf] %vm731_vm2, %v11978_v31  ;;  %v653_v17 = vmax.f32 %v605_v33, 0.0  ;;  %v12091_v5 = vadd.f32 %v12090_v19, %v12089_v18  ;;  %v418_v18 = vpop.permute.xlu0 %417 }
 0x20b   : > { %v12092_v0 = vpop.f32.mrf.mxu1 }
 0x20c   : > { %v11979_v6 = vpack.c.bf16 %v653_v17, %v653_v17  ;;  %v610_v16 = vadd.f32 %v12091_v5, %v408_v34 }
 0x20d   : > { %v12093_v1 = vpop.f32.mrf.mxu1 }
 0x20e   : > { %737 = vst.msk [vmem:[%s12951_s1 + $0x14] sm:$0xf] %vm731_vm2, %v11979_v6  ;;  %v654_v7 = vmax.f32 %v610_v16, 0.0  ;;  %v12094_v2 = vadd.f32 %v12093_v1, %v12092_v0  ;;  %v423_v0 = vpop.permute.xlu1 %422 }
 0x20f   : > { %v12095_v46 = vpop.f32.mrf.mxu1 }
 0x210   : > { %v11980_v8 = vpack.c.bf16 %v654_v7, %v654_v7  ;;  %v613_v32 = vadd.f32 %v12094_v2, %v413_v3 }
 0x211   : > { %v12096_v47 = vpop.f32.mrf.mxu1 }
 0x212   : > { %738 = vst.msk [vmem:[%s12951_s1 + $0x18] sm:$0xf] %vm731_vm2, %v11980_v8  ;;  %v655_v4 = vmax.f32 %v613_v32, 0.0  ;;  %v12097_v30 = vadd.f32 %v12096_v47, %v12095_v46  ;;  %v428_v46 = vpop.permute.xlu0 %427 }
 0x213   : > { %v12098_v31 = vpop.f32.mrf.mxu1 }
 0x214   : > { %v11981_v33 = vpack.c.bf16 %v655_v4, %v655_v4  ;;  %v618_v19 = vadd.f32 %v12097_v30, %v418_v18 }
 0x215   : > { %v12099_v17 = vpop.f32.mrf.mxu1 }
 0x216   : > { %739 = vst.msk [vmem:[%s12951_s1 + $0x1c] sm:$0xf] %vm731_vm2, %v11981_v33  ;;  %v656_v5 = vmax.f32 %v618_v19, 0.0  ;;  %v12100_v34 = vadd.f32 %v12099_v17, %v12098_v31  ;;  %v433_v31 = vpop.permute.xlu1 %432 }
 0x217   : > { %v12101_v6 = vpop.f32.mrf.mxu1 }
 0x218   : > { %v11982_v16 = vpack.c.bf16 %v656_v5, %v656_v5  ;;  %v621_v1 = vadd.f32 %v12100_v34, %v423_v0 }
 0x219   : > { %v12102_v7 = vpop.f32.mrf.mxu1 }
 0x21a   : > { %740 = vst.msk [vmem:[%s12951_s1 + $0x20] sm:$0xf] %vm731_vm2, %v11982_v16  ;;  %v657_v2 = vmax.f32 %v621_v1, 0.0  ;;  %v12103_v3 = vadd.f32 %v12102_v7, %v12101_v6  ;;  %v438_v6 = vpop.permute.xlu0 %437 }
 0x21b   : > { %v12104_v8 = vpop.f32.mrf.mxu1 }
 0x21c   : > { %v11983_v32 = vpack.c.bf16 %v657_v2, %v657_v2  ;;  %v626_v47 = vadd.f32 %v12103_v3, %v428_v46 }
 0x21d   : > { %v12105_v4 = vpop.f32.mrf.mxu1 }
 0x21e   : > { %741 = vst.msk [vmem:[%s12951_s1 + $0x24] sm:$0xf] %vm731_vm2, %v11983_v32  ;;  %v658_v30 = vmax.f32 %v626_v47, 0.0  ;;  %v12106_v18 = vadd.f32 %v12105_v4, %v12104_v8  ;;  %v443_v8 = vpop.permute.xlu1 %442 }
 0x21f   : > { %v12107_v33 = vpop.f32.mrf.mxu1 }
 0x220   : > { %v11984_v19 = vpack.c.bf16 %v658_v30, %v658_v30  ;;  %v629_v17 = vadd.f32 %v12106_v18, %v433_v31 }
 0x221   : > { %v12108_v5 = vpop.f32.mrf.mxu1 }
 0x222   : > { %742 = vst.msk [vmem:[%s12951_s1 + $0x28] sm:$0xf] %vm731_vm2, %v11984_v19  ;;  %v659_v34 = vmax.f32 %v629_v17, 0.0  ;;  %v12109_v0 = vadd.f32 %v12108_v5, %v12107_v33  ;;  %v448_v33 = vpop.permute.xlu0 %447 }
 0x223   : > { %v12110_v16 = vpop.f32.mrf.mxu1 }
 0x224   : > { %v11985_v1 = vpack.c.bf16 %v659_v34, %v659_v34  ;;  %v634_v7 = vadd.f32 %v12109_v0, %v438_v6 }
 0x225   : > { %v12111_v2 = vpop.f32.mrf.mxu1 }
 0x226   : > { %743 = vst.msk [vmem:[%s12951_s1 + $0x2c] sm:$0xf] %vm731_vm2, %v11985_v1  ;;  %v660_v3 = vmax.f32 %v634_v7, 0.0  ;;  %v12112_v46 = vadd.f32 %v12111_v2, %v12110_v16  ;;  %v453_v16 = vpop.permute.xlu1 %452 }
 0x227   : > { %v12113_v32 = vpop.f32.mrf.mxu1 }
 0x228   : > { %v11986_v47 = vpack.c.bf16 %v660_v3, %v660_v3  ;;  %v637_v4 = vadd.f32 %v12112_v46, %v443_v8 }
 0x229   : > { %v12114_v30 = vpop.f32.mrf.mxu1 }
 0x22a   : > { %744 = vst.msk [vmem:[%s12951_s1 + $0x30] sm:$0xf] %vm731_vm2, %v11986_v47  ;;  %v661_v18 = vmax.f32 %v637_v4, 0.0  ;;  %v12115_v31 = vadd.f32 %v12114_v30, %v12113_v32  ;;  %v880_v32 = vlaneseq (%p161_p11)  ;;  %v12470_v30 = vmov (%p161_p11), 1983009808  }
 0x22b   : > { %v12116_v19 = vpop.f32.mrf.mxu1 }
 0x22c   : > { %v11987_v17 = vpack.c.bf16 %v661_v18, %v661_v18  ;;  %v642_v5 = vadd.f32 %v12115_v31, %v448_v33  ;;  %v878_v18 = vunpack.c.l.s4 (%p161_p11), %v12470_v30  ;;  %v12988_v33 = vshrl.u32 (%p161_p11), %v880_v32, 7 }
 0x22d   : > { %v12117_v34 = vpop.f32.mrf.mxu1 }
 0x22e   : > { %745 = vst.msk [vmem:[%s12951_s1 + $0x34] sm:$0xf] %vm731_vm2, %v11987_v17  ;;  %v662_v0 = vmax.f32 %v642_v5, 0.0  ;;  %v12118_v6 = vadd.f32 %v12117_v34, %v12116_v19 }
 0x230   : > { %v11988_v1 = vpack.c.bf16 %v662_v0, %v662_v0  ;;  %v645_v7 = vadd.f32 %v12118_v6, %v453_v16  ;;  %v879_v0 = vunpack.c.0.s8 (%p161_p11), %v878_v18  ;;  %v12471_v6 = vmov (%p161_p11), 1934713408  }
 0x231   :  { %v886_v16 = vunpack.c.l.s4 (%p161_p11), %v12471_v6  ;;  %v2551_v6 = vld [vmem:[#allocation6 + $0x1a0] sm:$0xff] (%p161_p11) }
 0x232   : > { %746 = vst.msk [vmem:[%s12951_s1 + $0x38] sm:$0xf] %vm731_vm2, %v11988_v1  ;;  %v663_v2 = vmax.f32 %v645_v7, 0.0  ;;  %163 = sbr.rel (!%p161_p11) target bundleno = 90 (0x5a), region = 81  ;;  %v12991_v12 = vsub.s32 (%p161_p11), %v879_v0, %v12988_v33  ;;  %v2547_v0 = vld [vmem:[#allocation6 + $0x180] sm:$0xff] (%p161_p11) }
 0x233   :  { %v887_v13 = vunpack.c.0.s8 (%p161_p11), %v886_v16 }
 0x234   : > { %v11989_v3 = vpack.c.bf16 %v663_v2, %v663_v2 }
 0x235   :  { %v12994_v22 = vsub.s32 (%p161_p11), %v887_v13, %v12988_v33  ;;  %v2687_v13 = vld [vmem:[#allocation6 + $0x5e0] sm:$0xff] (%p161_p11) }
 0x236   : > { %747 = vst.msk [vmem:[%s12951_s1 + $0x3c] sm:$0xf] %vm731_vm2, %v11989_v3 }
 0x23d   :  { %v749_v46 = vld [vmem:[#allocation2 + $0x4] sm:$0xf]  ;;  %v748_v31 = vld [vmem:[#allocation2] sm:$0xf]  ;;  %v751_v7 = vld [vmem:[#allocation2 + $0xc] sm:$0xf] }
 0x23e   :  { %v765_v8 = vld [vmem:[#allocation2 + $0x44] sm:$0xf]  ;;  %v789_v47 = vshrl.u32 %v749_v46, 16  ;;  %v764_v17 = vld [vmem:[#allocation2 + $0x40] sm:$0xf]  ;;  %v783_v5 = vshrl.u32 %v748_v31, 16 }
 0x23f   :  { %v790_v4 = vshrl.u32 %v765_v8, 16  ;;  %v788_v19 = vpack.i.b16 %v765_v8, %v749_v46  ;;  %v784_v1 = vshrl.u32 %v764_v17, 16  ;;  %v767_v2 = vld [vmem:[#allocation2 + $0x4c] sm:$0xf]  ;;  %v782_v9 = vpack.i.b16 %v764_v17, %v748_v31  ;;  %v750_v15 = vld [vmem:[#allocation2 + $0x8] sm:$0xf] }
 0x240   :  { %v801_v10 = vshrl.u32 %v751_v7, 16  ;;  %v802_v11 = vshrl.u32 %v767_v2, 16  ;;  %v766_v20 = vld [vmem:[#allocation2 + $0x48] sm:$0xf]  ;;  %v795_v28 = vshrl.u32 %v750_v15, 16  ;;  %v800_v43 = vpack.i.b16 %v767_v2, %v751_v7 }
 0x241   :  { %v791_v34 = vpack.i.b16 %v790_v4, %v789_v47  ;;  %v785_v14 = vpack.i.b16 %v784_v1, %v783_v5  ;;  %v933_v24 = vrot.slane %v788_v19, %v12991_v12  ;;  %v883_v26 = vrot.slane %v782_v9, %v12991_v12  ;;  %v2555_v5 = vld [vmem:[#allocation6 + $0x1c0] sm:$0xff] }
 0x242   :  { %v803_v21 = vpack.i.b16 %v802_v11, %v801_v10  ;;  %v796_v29 = vshrl.u32 %v766_v20, 16  ;;  %v1033_v51 = vrot.slane %v800_v43, %v12991_v12  ;;  %v794_v58 = vpack.i.b16 %v766_v20, %v750_v15  ;;  %v2539_v9 = vld [vmem:[#allocation6 + $0x140] sm:$0xff] }
 0x243   :  { %v958_v23 = vrot.slane %v791_v34, %v12991_v12  ;;  %v908_v25 = vrot.slane %v785_v14, %v12991_v12  ;;  %v13005_v36 = vrot.slane %v933_v24, %v12994_v22  ;;  %v13009_v38 = vrot.slane %v883_v26, %v12994_v22  ;;  %v2559_v34 = vld [vmem:[#allocation6 + $0x1e0] sm:$0xff] }
 0x244   :  { %v13001_v27 = vrot.slane %v803_v21, %v12991_v12  ;;  %v797_v42 = vpack.i.b16 %v796_v29, %v795_v28  ;;  %v934_v49 = vcombine.high %v933_v24, %v12473_v48  ;;  %v13035_v60 = vrot.slane %v1033_v51, %v12994_v22  ;;  %v2683_v11 = vld [vmem:[#allocation6 + $0x5c0] sm:$0xff] }
 0x245   :  { %v966_v35 = vrot.slane %v958_v23, %v12994_v22  ;;  %v916_v37 = vrot.slane %v908_v25, %v12994_v22  ;;  %v11995_v40 = vcombine.high %v13005_v36, %v13005_v36  ;;  %v11991_v45 = vcombine.high %v13009_v38, %v13009_v38  ;;  %v2543_v15 = vld [vmem:[#allocation6 + $0x160] sm:$0xff] }
 0x246   :  { %v1066_v41 = vrot.slane %v13001_v27, %v12994_v22  ;;  %v13021_v50 = vrot.slane %v797_v42, %v12991_v12  ;;  %v948_v54 = vrot.slane %v934_v49, %v12994_v22  ;;  %v959_v55 = vcombine.high %v958_v23, %v12473_v48  ;;  %v2675_v20 = vld [vmem:[#allocation6 + $0x580] sm:$0xff] }
 0x247   :  { %v10779_v39 = vcombine.low %v966_v35, %v966_v35  ;;  %1719 = vrot.lane.b32.xlu1 %v11995_v40, %s12460_s9  ;;  %v10772_v44 = vcombine.low %v916_v37, %v916_v37  ;;  %v11996_v52 = vcombine.high %v966_v35, %v966_v35  ;;  %v11992_v56 = vcombine.high %v916_v37, %v916_v37  ;;  %v2679_v29 = vld [vmem:[#allocation6 + $0x5a0] sm:$0xff] }
 0x248   :  { %v10793_v53 = vcombine.low %v1066_v41, %v1066_v41  ;;  %v13030_v57 = vrot.slane %v13021_v50, %v12994_v22  ;;  %v10782_v59 = vcombine.low %v948_v54, %v948_v54  ;;  %v884_v61 = vcombine.high %v883_v26, %v12473_v48  ;;  %v2667_v42 = vld [vmem:[#allocation6 + $0x540] sm:$0xff] }
 0x249   :  { %1714 = vrot.lane.b32.xlu0 %v10779_v39, %s12472_s13  ;;  %v13039_v62 = vrot.slane %v959_v55, %v12994_v22  ;;  %v983_v63 = vrot.slane %v794_v58, %v12991_v12  ;;  %v12003_v46 = vcombine.high %v13035_v60, %v13035_v60  ;;  %v909_v30 = vcombine.high %v908_v25, %v12473_v48  ;;  %v2531_v39 = vld [vmem:[#allocation6 + $0x100] sm:$0xff] }
 0x24a   :  { %v10786_v3 = vcombine.low %v13030_v57, %v13030_v57  ;;  %v13049_v8 = vrot.slane %v884_v61, %v12994_v22  ;;  %v12004_v18 = vcombine.high %v1066_v41, %v1066_v41  ;;  %v1034_v17 = vcombine.high %v1033_v51, %v12473_v48  ;;  %v2535_v41 = vld [vmem:[#allocation6 + $0x120] sm:$0xff] }
 0x24b   :  { %1684 = vrot.lane.b32.xlu1 %v11991_v45, %s12460_s9  ;;  %v10783_v32 = vcombine.low %v13039_v62, %v13039_v62  ;;  %v13058_v4 = vrot.slane %v983_v63, %v12994_v22  ;;  %v13066_v19 = vrot.slane %v909_v30, %v12994_v22  ;;  %v11997_v16 = vcombine.high %v948_v54, %v948_v54  ;;  %v2671_v43 = vld [vmem:[#allocation6 + $0x560] sm:$0xff] }
 0x24c   :  { %v10775_v47 = vcombine.low %v13049_v8, %v13049_v8  ;;  %v13074_v7 = vrot.slane %v1034_v17, %v12994_v22  ;;  %v10941_v2 = vcombine.high %v2555_v5, %v2559_v34  ;;  %v10940_v10 = vcombine.low %v2555_v5, %v2559_v34  ;;  %v13092_v45 = vld [vmem:[#allocation2 + $0x10] sm:$0xf]  ;;  %v13103_v55 = vld [vmem:[#allocation2 + $0x14] sm:$0xf] }
 0x24d   :  { %1679 = vrot.lane.b32.xlu0 %v10772_v44, %s12472_s13  ;;  %v11999_v31 = vcombine.high %v13058_v4, %v13058_v4  ;;  %v10776_v1 = vcombine.low %v13066_v19, %v13066_v19  ;;  %v10933_v14 = vcombine.high %v2547_v0, %v2551_v6  ;;  %v12000_v21 = vcombine.high %v13030_v57, %v13030_v57  ;;  %v13094_v49 = vld [vmem:[#allocation2 + $0x50] sm:$0xf] }
 0x24e   :  { %8685 = vmatprep.subr.bf16.mxu0 %v10941_v2  ;;  %v1059_v23 = vcombine.high %v13001_v27, %v12473_v48  ;;  %v10932_v24 = vcombine.low %v2547_v0, %v2551_v6  ;;  %v10796_v25 = vcombine.low %v13074_v7, %v13074_v7  ;;  %v984_v26 = vcombine.high %v983_v63, %v12473_v48  ;;  %v2527_v61 = vld [vmem:[#allocation6 + $0xe0] sm:$0xff] }
 0x24f   :  { %1784 = vrot.lane.b32.xlu1 %v10793_v53, %s12472_s13  ;;  %8686 = vmatpush1.bf16.msra.mxu0 %v10940_v10  ;;  %v11069_v28 = vcombine.high %v2683_v11, %v2687_v13  ;;  %v10925_v35 = vcombine.high %v2539_v9, %v2543_v15  ;;  %v11068_v37 = vcombine.low %v2683_v11, %v2687_v13  ;;  %v807_v63 = vshrl.u32 %v13092_v45, 16  ;;  %v2515_v34 = vld [vmem:[#allocation6 + $0x80] sm:$0xff]  ;;  %v13124_v10 = vld [vmem:[#allocation2 + $0x5c] sm:$0xf] }
 0x250   :  { %8687 = vmatprep.subr.bf16.mxu0 %v10933_v14  ;;  %v11998_v27 = vcombine.high %v13039_v62, %v13039_v62  ;;  %v11993_v40 = vcombine.high %v13049_v8, %v13049_v8  ;;  %v13090_v44 = vrot.slane %v1059_v23, %v12994_v22  ;;  %v10924_v51 = vcombine.low %v2539_v9, %v2543_v15  ;;  %v2519_v0 = vld [vmem:[#allocation6 + $0xa0] sm:$0xff]  ;;  %v13122_v9 = vld [vmem:[#allocation2 + $0x1c] sm:$0xf] }
 0x251   :  { %1724 = vrot.lane.b32.xlu0 %v11996_v52, %s12474_s14  ;;  %8726 = vmatprep.subr.bf16.mxu1 %v11069_v28  ;;  %v11061_v52 = vcombine.high %v2675_v20, %v2679_v29  ;;  %v13099_v53 = vrot.slane %v984_v26, %v12994_v22  ;;  %v1009_v54 = vcombine.high %v13021_v50, %v12473_v48  ;;  %v808_v8 = vshrl.u32 %v13094_v49, 16  ;;  %v2511_v23 = vld [vmem:[#allocation6 + $0x60] sm:$0xff] }
 0x252   :  { %8727 = vmatpush1.bf16.msra.mxu1 %v11068_v37  ;;  %v11060_v57 = vcombine.low %v2675_v20, %v2679_v29  ;;  %v10917_v58 = vcombine.high %v2531_v39, %v2535_v41  ;;  %v11053_v62 = vcombine.high %v2667_v42, %v2671_v43  ;;  %v10916_v50 = vcombine.low %v2531_v39, %v2535_v41  ;;  %v2643_v29 = vld [vmem:[#allocation6 + $0x480] sm:$0xff] }
 0x253   :  { %1729 = vrot.lane.b32.xlu1 %v10782_v59, %s12462_s15  ;;  %8688 = vmatpush1.bf16.msra.mxu0 %v10932_v24  ;;  %v2523_v59 = vld [vmem:[#allocation6 + $0xc0] sm:$0xff]  ;;  %v10797_v30 = vcombine.low %v13090_v44, %v13090_v44  ;;  %v11994_v2 = vcombine.high %v13066_v19, %v13066_v19  ;;  %v809_v15 = vpack.i.b16 %v808_v8, %v807_v63  ;;  %v825_v41 = vshrl.u32 %v13122_v9, 16 }
 0x254   :  { %8689 = vmatprep.subr.bf16.mxu0 %v10925_v35  ;;  %8728 = vmatprep.subr.bf16.mxu1 %v11061_v52  ;;  %v10909_v5 = vcombine.high %v2523_v59, %v2527_v61  ;;  %v10908_v11 = vcombine.low %v2523_v59, %v2527_v61  ;;  %v10901_v19 = vcombine.high %v2515_v34, %v2519_v0  ;;  %v2647_v35 = vld [vmem:[#allocation6 + $0x4a0] sm:$0xff] }
 0x255   :  { %1689 = vrot.lane.b32.xlu0 %v11992_v56, %s12474_s14  ;;  %v13105_v56 = vld [vmem:[#allocation2 + $0x54] sm:$0xf]  ;;  %v806_v26 = vpack.i.b16 %v13094_v49, %v13092_v45  ;;  %v12001_v37 = vcombine.high %v13099_v53, %v13099_v53  ;;  %v10900_v39 = vcombine.low %v2515_v34, %v2519_v0  ;;  %v11028_v61 = vcombine.low %v2643_v29, %v2647_v35 }
 0x256   :  { %8729 = vmatpush1.bf16.msra.mxu1 %v11060_v57  ;;  %v814_v17 = vshrl.u32 %v13105_v56, 16  ;;  %v812_v28 = vpack.i.b16 %v13105_v56, %v13103_v55  ;;  %v2503_v49 = vld [vmem:[#allocation6 + $0x20] sm:$0xff] }
 0x257   :  { %1789 = vrot.lane.b32.xlu1 %v12003_v46, %s12460_s9  ;;  %v2663_v46 = vld [vmem:[#allocation6 + $0x520] sm:$0xff]  ;;  %8690 = vmatpush1.bf16.msra.mxu0 %v10924_v51  ;;  %v11029_v51 = vcombine.high %v2643_v29, %v2647_v35 }
 0x258   :  { %8691 = vmatprep.subr.bf16.mxu0 %v10917_v58  ;;  %8730 = vmatprep.subr.bf16.mxu1 %v11053_v62  ;;  %v2639_v56 = vld [vmem:[#allocation6 + $0x460] sm:$0xff]  ;;  %v1133_v57 = vrot.slane %v812_v28, %v12991_v12  ;;  %v13156_v58 = vld [vmem:[#allocation2 + $0x18] sm:$0xf] }
 0x259   :  { %1749 = vrot.lane.b32.xlu0 %v10786_v3, %s12472_s13  ;;  %v2659_v3 = vld [vmem:[#allocation6 + $0x500] sm:$0xff] }
 0x25a   :  { %v11045_v6 = vcombine.high %v2659_v3, %v2663_v46  ;;  %v11044_v13 = vcombine.low %v2659_v3, %v2663_v46  ;;  %v13168_v3 = vld [vmem:[#allocation2 + $0x58] sm:$0xf]  ;;  %v2619_v46 = vld [vmem:[#allocation6 + $0x3c0] sm:$0xff] }
 0x25b   :  { %1734 = vrot.lane.b32.xlu1 %v10783_v32, %s12475_s16  ;;  %v813_v32 = vshrl.u32 %v13103_v55, 16  ;;  %8692 = vmatpush1.bf16.msra.mxu0 %v10916_v50  ;;  %v2635_v55 = vld [vmem:[#allocation6 + $0x440] sm:$0xff] }
 0x25c   :  { %8693 = vmatprep.subr.bf16.mxu0 %v10909_v5  ;;  %v11021_v50 = vcombine.high %v2635_v55, %v2639_v56  ;;  %v11020_v34 = vcombine.low %v2635_v55, %v2639_v56  ;;  %v2607_v29 = vld [vmem:[#allocation6 + $0x360] sm:$0xff] }
 0x25d   :  { %1694 = vrot.lane.b32.xlu0 %v10775_v47, %s12462_s15  ;;  %v11052_v47 = vcombine.low %v2667_v42, %v2671_v43  ;;  %v815_v20 = vpack.i.b16 %v814_v17, %v813_v32  ;;  %v826_v42 = vshrl.u32 %v13124_v10, 16  ;;  %v2499_v43 = vld [vmem:[#allocation6] sm:$0xff]  ;;  %v819_v17 = vshrl.u32 %v13156_v58, 16 }
 0x25e   :  { %v10885_v8 = vcombine.high %v2499_v43, %v2503_v49  ;;  %v2623_v32 = vld [vmem:[#allocation6 + $0x3e0] sm:$0xff]  ;;  %v10884_v5 = vcombine.low %v2499_v43, %v2503_v49 }
 0x25f   :  { %1794 = vrot.lane.b32.xlu1 %v12004_v18, %s12474_s14  ;;  %v10789_v18 = vcombine.low %v13099_v53, %v13099_v53  ;;  %8731 = vmatpush1.bf16.msra.mxu1 %v11052_v47  ;;  %v12006_v53 = vcombine.high %v13090_v44, %v13090_v44  ;;  %v827_v63 = vpack.i.b16 %v826_v42, %v825_v41  ;;  %v2739_v41 = vld [vmem:[#allocation6 + $0x780] sm:$0xff] }
 0x260   :  { %8732 = vmatprep.subr.bf16.mxu1 %v11045_v6  ;;  %8694 = vmatpush1.bf16.msra.mxu0 %v10908_v11  ;;  %v11005_v11 = vcombine.high %v2619_v46, %v2623_v32  ;;  %v2743_v42 = vld [vmem:[#allocation6 + $0x7a0] sm:$0xff] }
 0x261   :  { %1754 = vrot.lane.b32.xlu0 %v11999_v31, %s12460_s9  ;;  %v13117_v31 = vrot.slane %v1009_v54, %v12994_v22  ;;  %8695 = vmatprep.subr.bf16.mxu0 %v10901_v19  ;;  %v13153_v54 = vrot.slane %v806_v26, %v12991_v12  ;;  %v2751_v19 = vld [vmem:[#allocation6 + $0x7e0] sm:$0xff] }
 0x262   :  { %v2599_v55 = vld [vmem:[#allocation6 + $0x320] sm:$0xff] }
 0x263   :  { %1739 = vrot.lane.b32.xlu1 %v11997_v16, %s12476_s17  ;;  %v2651_v16 = vld [vmem:[#allocation6 + $0x4c0] sm:$0xff]  ;;  %v10790_v14 = vcombine.low %v13117_v31, %v13117_v31  ;;  %8733 = vmatpush1.bf16.msra.mxu1 %v11044_v13  ;;  %v12002_v52 = vcombine.high %v13117_v31, %v13117_v31  ;;  %v13172_v47 = vrot.slane %v13153_v54, %v12994_v22 }
 0x264   :  { %8696 = vmatpush1.bf16.msra.mxu0 %v10900_v39  ;;  %v13175_v31 = vrot.slane %v1133_v57, %v12994_v22  ;;  %v2615_v13 = vld [vmem:[#allocation6 + $0x3a0] sm:$0xff] }
 0x265   :  { %1699 = vrot.lane.b32.xlu0 %v10776_v1, %s12475_s16  ;;  %v2655_v1 = vld [vmem:[#allocation6 + $0x4e0] sm:$0xff] }
 0x266   :  { %v11037_v24 = vcombine.high %v2651_v16, %v2655_v1  ;;  %v12011_v26 = vcombine.high %v13175_v31, %v13175_v31 }
 0x267   :  { %1799 = vrot.lane.b32.xlu1 %v10796_v25, %s12462_s15  ;;  %v12005_v25 = vcombine.high %v13074_v7, %v13074_v7  ;;  %v13141_v7 = vrot.slane %v809_v15, %v12991_v12  ;;  %v1134_v15 = vcombine.high %v1133_v57, %v12473_v48  ;;  %v11125_v57 = vcombine.high %v2739_v41, %v2743_v42 }
 0x268   :  { %8734 = vmatprep.subr.bf16.mxu1 %v11037_v24  ;;  %v11004_v24 = vcombine.low %v2619_v46, %v2623_v32  ;;  %v2735_v46 = vld [vmem:[#allocation6 + $0x760] sm:$0xff] }
 0x269   :  { %1759 = vrot.lane.b32.xlu0 %v12000_v21, %s12474_s14  ;;  %v2507_v21 = vld [vmem:[#allocation6 + $0x40] sm:$0xff]  ;;  %v13162_v44 = vrot.slane %v13141_v7, %v12994_v22  ;;  %v13202_v39 = vrot.slane %v1134_v15, %v12994_v22 }
 0x26a   :  { %v10893_v45 = vcombine.high %v2507_v21, %v2511_v23  ;;  %v10892_v59 = vcombine.low %v2507_v21, %v2511_v23  ;;  %v2747_v21 = vld [vmem:[#allocation6 + $0x7c0] sm:$0xff]  ;;  %v12007_v23 = vcombine.high %v13172_v47, %v13172_v47 }
 0x26b   :  { %1744 = vrot.lane.b32.xlu1 %v11998_v27, %s12477_s18  ;;  %v11036_v27 = vcombine.low %v2651_v16, %v2655_v1  ;;  %v10800_v0 = vcombine.low %v13162_v44, %v13162_v44  ;;  %v13185_v16 = vrot.slane %v827_v63, %v12991_v12  ;;  %v820_v1 = vshrl.u32 %v13168_v3, 16  ;;  %v13249_v15 = vld [vmem:[#allocation6 + $0xde0] sm:$0xff] }
 0x26c   :  { %8697 = vmatprep.subr.bf16.mxu0 %v10893_v45  ;;  %v11132_v45 = vcombine.low %v2747_v21, %v2751_v19 }
 0x26d   :  { %1704 = vrot.lane.b32.xlu0 %v11993_v40, %s12476_s17  ;;  %v13144_v40 = vrot.slane %v815_v20, %v12991_v12  ;;  %8735 = vmatpush1.bf16.msra.mxu1 %v11036_v27  ;;  %v824_v20 = vpack.i.b16 %v13124_v10, %v13122_v9  ;;  %v13199_v28 = vrot.slane %v13185_v16, %v12994_v22  ;;  %v2603_v10 = vld [vmem:[#allocation6 + $0x340] sm:$0xff] }
 0x26e   :  { %8736 = vmatprep.subr.bf16.mxu1 %v11029_v51  ;;  %8698 = vmatpush1.bf16.msra.mxu0 %v10892_v59  ;;  %v821_v9 = vpack.i.b16 %v820_v1, %v819_v17  ;;  %v10989_v56 = vcombine.high %v2603_v10, %v2607_v29  ;;  %v10810_v59 = vcombine.low %v13202_v39, %v13202_v39 }
 0x26f   :  { %1804 = vrot.lane.b32.xlu1 %v10797_v30, %s12475_s16  ;;  %v13166_v62 = vrot.slane %v13144_v40, %v12994_v22  ;;  %v2627_v30 = vld [vmem:[#allocation6 + $0x400] sm:$0xff]  ;;  %8699 = vmatprep.subr.bf16.mxu0 %v10885_v8  ;;  %v13205_v27 = vrot.slane %v824_v20, %v12991_v12  ;;  %v10821_v49 = vcombine.low %v13199_v28, %v13199_v28 }
 0x270   :  { %v1159_v8 = vcombine.high %v13144_v40, %v12473_v48  ;;  %v10988_v32 = vcombine.low %v2603_v10, %v2607_v29  ;;  %v1084_v17 = vcombine.high %v13153_v54, %v12473_v48  ;;  %v818_v40 = vpack.i.b16 %v13168_v3, %v13156_v58  ;;  %v13247_v3 = vld [vmem:[#allocation6 + $0xdc0] sm:$0xff] }
 0x271   :  { %1764 = vrot.lane.b32.xlu0 %v10789_v18, %s12462_s15  ;;  %v2631_v18 = vld [vmem:[#allocation6 + $0x420] sm:$0xff]  ;;  %8737 = vmatpush1.bf16.msra.mxu1 %v11028_v61  ;;  %v10807_v6 = vcombine.low %v13166_v62, %v13166_v62  ;;  %v12012_v51 = vcombine.high %v13166_v62, %v13166_v62  ;;  %v12008_v61 = vcombine.high %v13162_v44, %v13162_v44 }
 0x272   :  { %8738 = vmatprep.subr.bf16.mxu1 %v11021_v50  ;;  %8700 = vmatpush1.bf16.msra.mxu0 %v10884_v5  ;;  %v13222_v63 = vrot.slane %v13205_v27, %v12994_v22  ;;  %v2731_v62 = vld [vmem:[#allocation6 + $0x740] sm:$0xff]  ;;  %v11124_v50 = vcombine.low %v2739_v41, %v2743_v42  ;;  %v11324_v41 = vcombine.low %v13247_v3, %v13249_v15 }
 0x273   :  { %1769 = vrot.lane.b32.xlu1 %v10790_v14, %s12475_s16  ;;  %v11013_v14 = vcombine.high %v2627_v30, %v2631_v18  ;;  %8701 = vmatprep.subr.bf16.mxu0 %v11005_v11  ;;  %v2587_v5 = vld [vmem:[#allocation6 + $0x2c0] sm:$0xff]  ;;  %v11116_v58 = vcombine.low %v2731_v62, %v2735_v46 }
 0x274   :  { %v12019_v1 = vcombine.high %v13222_v63, %v13222_v63  ;;  %v2727_v11 = vld [vmem:[#allocation6 + $0x720] sm:$0xff] }
 0x275   :  { %1709 = vrot.lane.b32.xlu0 %v11994_v2, %s12477_s18  ;;  %v2611_v2 = vld [vmem:[#allocation6 + $0x380] sm:$0xff]  ;;  %8739 = vmatpush1.bf16.msra.mxu1 %v11020_v34 }
 0x276   :  { %v10997_v35 = vcombine.high %v2611_v2, %v2615_v13  ;;  %8740 = vmatprep.subr.bf16.mxu1 %v11013_v14  ;;  %8702 = vmatpush2.bf16.msra.mxu0 %v11004_v24  ;;  %v10996_v43 = vcombine.low %v2611_v2, %v2615_v13  ;;  %v2591_v34 = vld [vmem:[#allocation6 + $0x2e0] sm:$0xff]  ;;  %v13245_v14 = vrot.slane %v1159_v8, %v12994_v22 }
 0x277   :  { %1774 = vrot.lane.b32.xlu1 %v12001_v37, %s12476_s17  ;;  %v11133_v37 = vcombine.high %v2747_v21, %v2751_v19  ;;  %v2723_v2 = vld [vmem:[#allocation6 + $0x700] sm:$0xff]  ;;  %v13256_v21 = vrot.slane %v1084_v17, %v12994_v22  ;;  %v13259_v19 = vrot.slane %v818_v40, %v12991_v12  ;;  %v1234_v8 = vcombine.high %v13205_v27, %v12473_v48 }
 0x278   :  { %8703 = vmatprep.subr.bf16.mxu0 %v10997_v35  ;;  %v2583_v24 = vld [vmem:[#allocation6 + $0x2a0] sm:$0xff]  ;;  %v10972_v35 = vcombine.low %v2587_v5, %v2591_v34  ;;  %v10811_v42 = vcombine.low %v13245_v14, %v13245_v14 }
 0x279   :  { %1809 = vrot.lane.b32.xlu0 %v12005_v25, %s12476_s17  ;;  %v11012_v25 = vcombine.low %v2627_v30, %v2631_v18  ;;  %v13226_v30 = vld [vmem:[#allocation6 + $0x9c0] sm:$0xff] }
 0x27a   :  { %8704 = vmatpush2.bf16.msra.mxu0 %v10996_v43  ;;  %v13228_v18 = vld [vmem:[#allocation6 + $0x9e0] sm:$0xff]  ;;  %v10803_v43 = vcombine.low %v13256_v21, %v13256_v21 }
 0x27b   :  { %1779 = vrot.lane.b32.xlu1 %v12002_v52, %s12477_s18  ;;  %8741 = vmatpush1.bf16.msra.mxu1 %v11012_v25  ;;  %v13214_v52 = vrot.slane %v821_v9, %v12991_v12  ;;  %v11196_v13 = vcombine.low %v13226_v30, %v13228_v18  ;;  %v10973_v25 = vcombine.high %v2587_v5, %v2591_v34  ;;  %v2715_v10 = vld [vmem:[#allocation6 + $0x6c0] sm:$0xff] }
 0x27c   :  { %8742 = vmatprep.subr.bf16.mxu1 %v11133_v37  ;;  %8705 = vmatprep.subr.bf16.mxu0 %v10989_v56  ;;  %v1109_v9 = vcombine.high %v13141_v7, %v12473_v48  ;;  %v2719_v29 = vld [vmem:[#allocation6 + $0x6e0] sm:$0xff]  ;;  %v11108_v37 = vcombine.low %v2723_v2, %v2727_v11  ;;  %v13273_v7 = vrot.slane %v13259_v19, %v12994_v22 }
 0x27d   :  { %1814 = vrot.lane.b32.xlu0 %v12006_v53, %s12477_s18  ;;  %v2595_v53 = vld [vmem:[#allocation6 + $0x300] sm:$0xff]  ;;  %v13234_v44 = vrot.slane %v13214_v52, %v12994_v22 }
 0x27e   :  { %8706 = vmatpush2.bf16.msra.mxu0 %v10988_v32  ;;  %v10980_v54 = vcombine.low %v2595_v53, %v2599_v55  ;;  %v2711_v56 = vld [vmem:[#allocation6 + $0x6a0] sm:$0xff] }
 0x27f   :  { %1819 = vrot.lane.b32.xlu1 %v10800_v0, %s12472_s13  ;;  %8743 = vmatpush2.bf16.msra.mxu1 %v11132_v45  ;;  %v10981_v0 = vcombine.high %v2595_v53, %v2599_v55  ;;  %v10814_v20 = vcombine.low %v13234_v44, %v13234_v44  ;;  %v2571_v45 = vld [vmem:[#allocation6 + $0x240] sm:$0xff]  ;;  %v11101_v53 = vcombine.high %v2715_v10, %v2719_v29 }
 0x280   :  { %8744 = vmatprep.subr.bf16.mxu1 %v11125_v57  ;;  %v2707_v55 = vld [vmem:[#allocation6 + $0x680] sm:$0xff]  ;;  %v12020_v57 = vcombine.high %v13199_v28, %v13199_v28 }
 0x281   :  { %1854 = vrot.lane.b32.xlu0 %v10807_v6, %s12472_s13  ;;  %v11117_v6 = vcombine.high %v2731_v62, %v2735_v46  ;;  %8707 = vmatprep.subr.bf16.mxu0 %v10981_v0  ;;  %v12015_v62 = vcombine.high %v13273_v7, %v13273_v7  ;;  %v13282_v46 = vrot.slane %v1109_v9, %v12994_v22  ;;  %v2563_v32 = vld [vmem:[#allocation6 + $0x200] sm:$0xff] }
 0x282   :  { %8708 = vmatpush2.bf16.msra.mxu0 %v10980_v54  ;;  %v11093_v17 = vcombine.high %v2707_v55, %v2711_v56  ;;  %v2699_v40 = vld [vmem:[#allocation6 + $0x640] sm:$0xff]  ;;  %v11092_v0 = vcombine.low %v2707_v55, %v2711_v56 }
 0x283   :  { %1824 = vrot.lane.b32.xlu1 %v12007_v23, %s12460_s9  ;;  %8745 = vmatpush2.bf16.msra.mxu1 %v11124_v50  ;;  %v2579_v23 = vld [vmem:[#allocation6 + $0x280] sm:$0xff]  ;;  %v10804_v27 = vcombine.low %v13282_v46, %v13282_v46 }
 0x284   :  { %8746 = vmatprep.subr.bf16.mxu1 %v11117_v6  ;;  %8709 = vmatprep.subr.bf16.mxu0 %v10973_v25  ;;  %v2567_v50 = vld [vmem:[#allocation6 + $0x220] sm:$0xff]  ;;  %v12013_v6 = vcombine.high %v13202_v39, %v13202_v39  ;;  %v1259_v25 = vcombine.high %v13185_v16, %v12473_v48 }
 0x285   :  { %1859 = vrot.lane.b32.xlu0 %v12011_v26, %s12460_s9  ;;  %v11109_v26 = vcombine.high %v2723_v2, %v2727_v11  ;;  %v2703_v5 = vld [vmem:[#allocation6 + $0x660] sm:$0xff]  ;;  %v10949_v2 = vcombine.high %v2563_v32, %v2567_v50 }
 0x286   :  { %8710 = vmatpush2.bf16.msra.mxu0 %v10972_v35  ;;  %v11085_v11 = vcombine.high %v2699_v40, %v2703_v5  ;;  %v2691_v54 = vld [vmem:[#allocation6 + $0x600] sm:$0xff]  ;;  %v756_v35 = vld [vmem:[#allocation2 + $0x20] sm:$0xf] }
 0x287   :  { %1924 = vrot.lane.b32.xlu1 %v10821_v49, %s12472_s13  ;;  %8747 = vmatpush2.bf16.msra.mxu1 %v11116_v58  ;;  %v2575_v49 = vld [vmem:[#allocation6 + $0x260] sm:$0xff] }
 0x288   :  { %8748 = vmatprep.subr.bf16.mxu1 %v11109_v26  ;;  %v10957_v28 = vcombine.high %v2571_v45, %v2575_v49  ;;  %v10956_v34 = vcombine.low %v2571_v45, %v2575_v49  ;;  %v2695_v58 = vld [vmem:[#allocation6 + $0x620] sm:$0xff]  ;;  %v1184_v26 = vcombine.high %v13259_v19, %v12473_v48  ;;  %v1273_v19 = vrot.slane %v1259_v25, %v12994_v22  ;;  %v773_v45 = vld [vmem:[#allocation2 + $0x64] sm:$0xf] }
 0x289   :  { %1864 = vrot.lane.b32.xlu0 %v12012_v51, %s12474_s14  ;;  %v10965_v51 = vcombine.high %v2579_v23, %v2583_v24  ;;  %v11077_v9 = vcombine.high %v2691_v54, %v2695_v58  ;;  %v11076_v16 = vcombine.low %v2691_v54, %v2695_v58  ;;  %v831_v49 = vshrl.u32 %v756_v35, 16 }
 0x28a   :  { %v10825_v55 = vcombine.low %v1273_v19, %v1273_v19  ;;  %v12022_v54 = vcombine.high %v1273_v19, %v1273_v19 }
 0x28b   :  { %1869 = vrot.lane.b32.xlu1 %v10810_v59, %s12462_s15  ;;  %v10964_v59 = vcombine.low %v2579_v23, %v2583_v24  ;;  %8749 = vmatpush2.bf16.msra.mxu1 %v11108_v37  ;;  %v10948_v23 = vcombine.low %v2563_v32, %v2567_v50  ;;  %v11084_v24 = vcombine.low %v2699_v40, %v2703_v5  ;;  %v772_v37 = vld [vmem:[#allocation2 + $0x60] sm:$0xf]  ;;  %v759_v32 = vld [vmem:[#allocation2 + $0x2c] sm:$0xf] }
 0x28c   :  { %8711 = vmatprep.subr.bf16.mxu0 %v10965_v51  ;;  %8750 = vmatprep.subr.bf16.mxu1 %v11101_v53  ;;  %v832_v51 = vshrl.u32 %v772_v37, 16  ;;  %v775_v50 = vld [vmem:[#allocation2 + $0x6c] sm:$0xf]  ;;  %v830_v40 = vpack.i.b16 %v772_v37, %v756_v35 }
 0x28d   :  { %1829 = vrot.lane.b32.xlu0 %v12008_v61, %s12474_s14  ;;  %v11100_v61 = vcombine.low %v2715_v10, %v2719_v29  ;;  %8712 = vmatpush2.bf16.msra.mxu0 %v10964_v59  ;;  %v12014_v10 = vcombine.high %v13245_v14, %v13245_v14  ;;  %v12009_v29 = vcombine.high %v13256_v21, %v13256_v21  ;;  %v757_v14 = vld [vmem:[#allocation2 + $0x24] sm:$0xf] }
 0x28e   :  { %8713 = vmatprep.subr.bf16.mxu0 %v10957_v28  ;;  %v11325_v21 = vcombine.high %v13247_v3, %v13249_v15  ;;  %v837_v53 = vshrl.u32 %v757_v14, 16  ;;  %v833_v59 = vpack.i.b16 %v832_v51, %v831_v49  ;;  %v836_v5 = vpack.i.b16 %v773_v45, %v757_v14 }
 0x28f   :  { %1929 = vrot.lane.b32.xlu1 %v12019_v1, %s12460_s9  ;;  %8751 = vmatpush2.bf16.msra.mxu1 %v11100_v61  ;;  %v13293_v1 = vrot.slane %v1234_v8, %v12994_v22 }
 0x290   :  { %8752 = vmatprep.subr.bf16.mxu1 %v11093_v17  ;;  %v13329_v17 = vrot.slane %v833_v59, %v12991_v12 }
 0x291   :  { %1889 = vrot.lane.b32.xlu0 %v10814_v20, %s12472_s13  ;;  %v12016_v20 = vcombine.high %v13234_v44, %v13234_v44  ;;  %8714 = vmatpush2.bf16.msra.mxu0 %v10956_v34  ;;  %v10824_v39 = vcombine.low %v13293_v1, %v13293_v1  ;;  %v11197_v44 = vcombine.high %v13226_v30, %v13228_v18 }
 0x292   :  { %8715 = vmatprep.subr.bf16.mxu0 %v10949_v2  ;;  %v12021_v28 = vcombine.high %v13293_v1, %v13293_v1  ;;  %v1316_v2 = vrot.slane %v13329_v17, %v12994_v22  ;;  %v1283_v1 = vrot.slane %v830_v40, %v12991_v12 }
 0x293   :  { %1874 = vrot.lane.b32.xlu1 %v10811_v42, %s12475_s16  ;;  %8753 = vmatpush2.bf16.msra.mxu1 %v11092_v0  ;;  %v1198_v42 = vrot.slane %v1184_v26, %v12994_v22 }
 0x294   :  { %8754 = vmatprep.subr.bf16.mxu1 %v11085_v11  ;;  %v1333_v11 = vrot.slane %v836_v5, %v12991_v12  ;;  %v13342_v25 = vrot.slane %v1283_v1, %v12994_v22  ;;  %v12024_v59 = vcombine.high %v1316_v2, %v1316_v2 }
 0x295   :  { %1834 = vrot.lane.b32.xlu0 %v10803_v43, %s12462_s15  ;;  %8716 = vmatpush2.bf16.msra.mxu0 %v10948_v23  ;;  %v1209_v43 = vcombine.high %v13214_v52, %v12473_v48  ;;  %v10817_v56 = vcombine.low %v1198_v42, %v1198_v42  ;;  %v838_v52 = vshrl.u32 %v773_v45, 16  ;;  %v12017_v34 = vcombine.high %v1198_v42, %v1198_v42  ;;  %v758_v23 = vld [vmem:[#allocation2 + $0x28] sm:$0xf] }
 0x296   :  { %8767 = vmatprep.subr.bf16.mxu0 %v11197_v44  ;;  %v13345_v26 = vrot.slane %v1333_v11, %v12994_v22  ;;  %v12023_v35 = vcombine.high %v13342_v25, %v13342_v25  ;;  %v848_v42 = vpack.i.b16 %v775_v50, %v759_v32 }
 0x297   :  { %1934 = vrot.lane.b32.xlu1 %v12020_v57, %s12474_s14  ;;  %8755 = vmatpush2.bf16.msra.mxu1 %v11084_v24  ;;  %v1223_v57 = vrot.slane %v1209_v43, %v12994_v22  ;;  %v839_v8 = vpack.i.b16 %v838_v52, %v837_v53  ;;  %v774_v24 = vld [vmem:[#allocation2 + $0x68] sm:$0xf] }
 0x298   :  { %8756 = vmatprep.subr.bf16.mxu1 %v11077_v9  ;;  %v12027_v37 = vcombine.high %v13345_v26, %v13345_v26  ;;  %v1433_v53 = vrot.slane %v848_v42, %v12991_v12 }
 0x299   :  { %1894 = vrot.lane.b32.xlu0 %v12015_v62, %s12460_s9  ;;  %v10818_v61 = vcombine.low %v1223_v57, %v1223_v57  ;;  %v12010_v62 = vcombine.high %v13282_v46, %v13282_v46  ;;  %v1358_v0 = vrot.slane %v839_v8, %v12991_v12  ;;  %v850_v46 = vshrl.u32 %v775_v50, 16 }
 0x29a   :  { %v13381_v8 = vrot.slane %v1433_v53, %v12994_v22  ;;  %v842_v50 = vpack.i.b16 %v774_v24, %v758_v23 }
 0x29b   :  { %1879 = vrot.lane.b32.xlu1 %v12013_v6, %s12476_s17  ;;  %8757 = vmatpush2.bf16.msra.mxu1 %v11076_v16  ;;  %v849_v6 = vshrl.u32 %v759_v32, 16  ;;  %v1366_v58 = vrot.slane %v1358_v0, %v12994_v22  ;;  %v1334_v16 = vcombine.high %v1333_v11, %v12473_v48 }
 0x29c   :  { %8808 = vmatprep.subr.bf16.mxu1 %v11325_v21 }
 0x29d   :  { %1839 = vrot.lane.b32.xlu0 %v10804_v27, %s12475_s16  ;;  %v12018_v27 = vcombine.high %v1223_v57, %v1223_v57  ;;  %v10835_v44 = vcombine.low %v1366_v58, %v1366_v58  ;;  %v12028_v21 = vcombine.high %v1366_v58, %v1366_v58  ;;  %v1348_v49 = vrot.slane %v1334_v16, %v12994_v22 }
 0x29e   :  { %v1309_v58 = vcombine.high %v13329_v17, %v12473_v48 }
 0x29f   :  { %1939 = vrot.lane.b32.xlu1 %v10824_v39, %s12462_s15  ;;  %v10828_v39 = vcombine.low %v1316_v2, %v1316_v2  ;;  %v10838_v52 = vcombine.low %v1348_v49, %v1348_v49  ;;  %v12029_v17 = vcombine.high %v1348_v49, %v1348_v49 }
 0x2a1   :  { %1899 = vrot.lane.b32.xlu0 %v12016_v20, %s12474_s14  ;;  %v851_v20 = vpack.i.b16 %v850_v46, %v849_v6  ;;  %v1383_v46 = vrot.slane %v842_v50, %v12991_v12  ;;  %v13461_v50 = vld [vmem:[#allocation2 + $0x30] sm:$0xf] }
 0x2a3   :  { %1884 = vrot.lane.b32.xlu1 %v12014_v10, %s12477_s18  ;;  %v13350_v9 = vrot.slane %v851_v20, %v12991_v12  ;;  %v843_v10 = vshrl.u32 %v758_v23, 16 }
 0x2a5   :  { %1844 = vrot.lane.b32.xlu0 %v12009_v29, %s12476_s17  ;;  %v844_v29 = vshrl.u32 %v774_v24, 16  ;;  %v1466_v19 = vrot.slane %v13350_v9, %v12994_v22  ;;  %v1459_v49 = vcombine.high %v13350_v9, %v12473_v48 }
 0x2a7   :  { %1944 = vrot.lane.b32.xlu1 %v10825_v55, %s12475_s16  ;;  %v845_v43 = vpack.i.b16 %v844_v29, %v843_v10  ;;  %v10849_v51 = vcombine.low %v1466_v19, %v1466_v19  ;;  %v12036_v24 = vcombine.high %v1466_v19, %v1466_v19  ;;  %v1434_v10 = vcombine.high %v1433_v53, %v12473_v48 }
 0x2a9   :  { %1904 = vrot.lane.b32.xlu0 %v10817_v56, %s12462_s15  ;;  %v13370_v55 = vrot.slane %v845_v43, %v12991_v12  ;;  %v13432_v16 = vrot.slane %v1434_v10, %v12994_v22 }
 0x2ab   :  { %1909 = vrot.lane.b32.xlu1 %v10818_v61, %s12475_s16  ;;  %v1359_v61 = vcombine.high %v1358_v0, %v12473_v48  ;;  %v1416_v32 = vrot.slane %v13370_v55, %v12994_v22  ;;  %v12035_v0 = vcombine.high %v13381_v8, %v13381_v8  ;;  %v10852_v43 = vcombine.low %v13432_v16, %v13432_v16 }
 0x2ad   :  { %1849 = vrot.lane.b32.xlu0 %v12010_v62, %s12477_s18  ;;  %v1284_v62 = vcombine.high %v1283_v1, %v12473_v48  ;;  %v13390_v5 = vrot.slane %v1359_v61, %v12994_v22  ;;  %v10842_v6 = vcombine.low %v1416_v32, %v1416_v32 }
 0x2af   :  { %1914 = vrot.lane.b32.xlu1 %v12017_v34, %s12476_s17  ;;  %v13393_v34 = vrot.slane %v1284_v62, %v12994_v22  ;;  %v10839_v1 = vcombine.low %v13390_v5, %v13390_v5  ;;  %v12030_v61 = vcombine.high %v13390_v5, %v13390_v5  ;;  %v13457_v62 = vrot.slane %v1459_v49, %v12994_v22 }
 0x2b1   :  { %1949 = vrot.lane.b32.xlu0 %v12021_v28, %s12476_s17  ;;  %v10831_v11 = vcombine.low %v13393_v34, %v13393_v34  ;;  %v12025_v9 = vcombine.high %v13393_v34, %v13393_v34 }
 0x2b3   :  { %1919 = vrot.lane.b32.xlu1 %v12018_v27, %s12477_s18 }
 0x2b5   :  { %1954 = vrot.lane.b32.xlu0 %v12022_v54, %s12477_s18  ;;  %v13409_v54 = vrot.slane %v1383_v46, %v12994_v22 }
 0x2b7   :  { %1959 = vrot.lane.b32.xlu1 %v10828_v39, %s12472_s13  ;;  %v12031_v39 = vcombine.high %v13409_v54, %v13409_v54 }
 0x2b9   :  { %1994 = vrot.lane.b32.xlu0 %v10835_v44, %s12472_s13  ;;  %v13363_v45 = vpop.permute.xlu1 %1719  ;;  %v13422_v44 = vrot.slane %v1309_v58, %v12994_v22 }
 0x2bb   :  { %v13361_v14 = vpop.permute.xlu0 %1714  ;;  %1964 = vrot.lane.b32.xlu1 %v12023_v35, %s12460_s9 }
 0x2bd   :  { %1999 = vrot.lane.b32.xlu0 %v12027_v37, %s12460_s9  ;;  %v13374_v57 = vpop.permute.xlu1 %1684  ;;  %v10832_v37 = vcombine.low %v13422_v44, %v13422_v44 }
 0x2bf   :  { %v13372_v56 = vpop.permute.xlu0 %1679  ;;  %2064 = vrot.lane.b32.xlu1 %v10849_v51, %s12472_s13  ;;  %v1384_v51 = vcombine.high %v1383_v46, %v12473_v48  ;;  %v777_v46 = vld [vmem:[#allocation2 + $0x74] sm:$0xf] }
 0x2c1   :  { %2004 = vrot.lane.b32.xlu0 %v12028_v21, %s12474_s14  ;;  %v13387_v40 = vpop.permute.xlu1 %1784  ;;  %v12032_v21 = vcombine.high %v1416_v32, %v1416_v32  ;;  %v1409_v32 = vcombine.high %v13370_v55, %v12473_v48 }
 0x2c3   :  { %v13385_v28 = vpop.permute.xlu0 %1724  ;;  %2009 = vrot.lane.b32.xlu1 %v10838_v52, %s12462_s15  ;;  %v13483_v58 = vrot.slane %v1409_v32, %v12994_v22 }
 0x2c5   :  { %1969 = vrot.lane.b32.xlu0 %v12024_v59, %s12474_s14  ;;  %v1730_v2 = vpop.permute.xlu1 %1729  ;;  %v2261_v59 = vsel %vm2236_vm3, %v13005_v36, %v13361_v14  ;;  %v13464_v36 = vrot.slane %v1384_v51, %v12994_v22  ;;  %v13466_v14 = vld [vmem:[#allocation2 + $0x70] sm:$0xf] }
 0x2c6   :  { %v2263_v5 = vsel %vm2240_vm4, %v2261_v59, %v13363_v45  ;;  %v10853_v45 = vcombine.low %v13457_v62, %v13457_v62  ;;  %v13500_v59 = vld [vmem:[#allocation2 + $0x3c] sm:$0xf] }
 0x2c7   :  { %v13400_v27 = vpop.permute.xlu0 %1689  ;;  %2069 = vrot.lane.b32.xlu1 %v12035_v0, %s12460_s9  ;;  %v2265_v55 = vsel %vm2243_vm5, %v2263_v5, %v13385_v28 }
 0x2c9   :  { %2029 = vrot.lane.b32.xlu0 %v10842_v6, %s12472_s13  ;;  %v13415_v23 = vpop.permute.xlu1 %1789  ;;  %v761_v6 = vld [vmem:[#allocation2 + $0x34] sm:$0xf] }
 0x2ca   :  { %v861_v10 = vshrl.u32 %v761_v6, 16 }
 0x2cb   :  { %v13413_v20 = vpop.permute.xlu0 %1749  ;;  %2014 = vrot.lane.b32.xlu1 %v10839_v1, %s12475_s16  ;;  %v855_v1 = vshrl.u32 %v13461_v50, 16 }
 0x2cd   :  { %1974 = vrot.lane.b32.xlu0 %v10831_v11, %s12462_s15  ;;  %v1735_v29 = vpop.permute.xlu1 %1734  ;;  %v2267_v11 = vsel %vm2246_vm6, %v2265_v55, %v1730_v2  ;;  %v2803_v55 = vld [vmem:[#allocation6 + $0x980] sm:$0xff] }
 0x2ce   :  { %v2269_v28 = vsel %vm2249_vm7, %v2267_v11, %v1735_v29  ;;  %v10846_v29 = vcombine.low %v13483_v58, %v13483_v58  ;;  %v854_v11 = vpack.i.b16 %v13466_v14, %v13461_v50  ;;  %v12037_v50 = vcombine.high %v13432_v16, %v13432_v16 }
 0x2cf   :  { %v13425_v35 = vpop.permute.xlu0 %1694  ;;  %2074 = vrot.lane.b32.xlu1 %v12036_v24, %s12474_s14  ;;  %v856_v24 = vshrl.u32 %v13466_v14, 16 }
 0x2d0   :  { %v13540_v16 = vrot.slane %v854_v11, %v12991_v12  ;;  %v2791_v11 = vld [vmem:[#allocation6 + $0x920] sm:$0xff] }
 0x2d1   :  { %2034 = vrot.lane.b32.xlu0 %v12031_v39, %s12460_s9  ;;  %v13434_v19 = vpop.permute.xlu1 %1794  ;;  %v10845_v39 = vcombine.low %v13464_v36, %v13464_v36  ;;  %v857_v51 = vpack.i.b16 %v856_v24, %v855_v1  ;;  %v2807_v1 = vld [vmem:[#allocation6 + $0x9a0] sm:$0xff]  ;;  %v873_v24 = vshrl.u32 %v13500_v59, 16 }
 0x2d3   :  { %v13436_v42 = vpop.permute.xlu0 %1754  ;;  %2019 = vrot.lane.b32.xlu1 %v12029_v17, %s12476_s17  ;;  %v862_v17 = vshrl.u32 %v777_v46, 16 }
 0x2d5   :  { %1979 = vrot.lane.b32.xlu0 %v10832_v37, %s12475_s16  ;;  %v1740_v53 = vpop.permute.xlu1 %1739 }
 0x2d6   :  { %v2271_v2 = vsel %vm2252_vm8, %v2269_v28, %v1740_v53  ;;  %v12026_v53 = vcombine.high %v13422_v44, %v13422_v44  ;;  %v13520_v28 = vrot.slane %v857_v51, %v12991_v12 }
 0x2d7   :  { %v13445_v52 = vpop.permute.xlu0 %1699  ;;  %2079 = vrot.lane.b32.xlu1 %v10852_v43, %s12462_s15 }
 0x2d8   :  { %v13549_v51 = vrot.slane %v13520_v28, %v12994_v22 }
 0x2d9   :  { %2039 = vrot.lane.b32.xlu0 %v12032_v21, %s12474_s14  ;;  %v13470_v0 = vpop.permute.xlu1 %1799  ;;  %v2239_v21 = vsel %vm2236_vm3, %v13009_v38, %v13372_v56  ;;  %v13505_v38 = vld [vmem:[#allocation2 + $0x7c] sm:$0xf] }
 0x2da   :  { %v2242_v56 = vsel %vm2240_vm4, %v2239_v21, %v13374_v57  ;;  %v12033_v57 = vcombine.high %v13464_v36, %v13464_v36  ;;  %v2799_v21 = vld [vmem:[#allocation6 + $0x960] sm:$0xff] }
 0x2db   :  { %v13472_v34 = vpop.permute.xlu0 %1759  ;;  %2024 = vrot.lane.b32.xlu1 %v12030_v61, %s12477_s18  ;;  %v863_v61 = vpack.i.b16 %v862_v17, %v861_v10  ;;  %v2245_v5 = vsel %vm2243_vm5, %v2242_v56, %v13400_v27  ;;  %v874_v27 = vshrl.u32 %v13505_v38, 16  ;;  %v11189_v10 = vcombine.high %v2803_v55, %v2807_v1  ;;  %v13532_v17 = vld [vmem:[#allocation2 + $0x38] sm:$0xf] }
 0x2dc   :  { %v2248_v44 = vsel %vm2246_vm6, %v2245_v5, %v13425_v35  ;;  %v867_v56 = vshrl.u32 %v13532_v17, 16 }
 0x2dd   :  { %1984 = vrot.lane.b32.xlu0 %v12025_v9, %s12476_s17  ;;  %v1745_v37 = vpop.permute.xlu1 %1744  ;;  %v13529_v35 = vrot.slane %v863_v61, %v12991_v12  ;;  %v2277_v61 = vsel %vm2236_vm3, %v13058_v4, %v13413_v20 }
 0x2de   :  { %v13494_v49 = vsel %vm2255_vm9, %v2271_v2, %v1745_v37  ;;  %v2795_v37 = vld [vmem:[#allocation6 + $0x940] sm:$0xff] }
 0x2df   :  { %v1705_v43 = vpop.permute.xlu0 %1704  ;;  %2084 = vrot.lane.b32.xlu1 %v10853_v45, %s12475_s16  ;;  %8717 = vmatprep.mubr.bf16.mxu0 %v13494_v49  ;;  %v860_v45 = vpack.i.b16 %v777_v46, %v761_v6  ;;  %v11188_v46 = vcombine.low %v2803_v55, %v2807_v1  ;;  %v11180_v20 = vcombine.low %v2795_v37, %v2799_v21  ;;  %v13570_v1 = vld [vmem:[#allocation2 + $0x78] sm:$0xf] }
 0x2e0   :  { %v11181_v55 = vcombine.high %v2795_v37, %v2799_v21  ;;  %v2779_v21 = vld [vmem:[#allocation6 + $0x8c0] sm:$0xff] }
 0x2e1   :  { %2044 = vrot.lane.b32.xlu0 %v10845_v39, %s12462_s15  ;;  %v1805_v9 = vpop.permute.xlu1 %1804  ;;  %v2251_v39 = vsel %vm2249_vm7, %v2248_v44, %v13445_v52  ;;  %v12034_v52 = vcombine.high %v13483_v58, %v13483_v58  ;;  %v2293_v58 = vsel %vm2236_vm3, %v13035_v60, %v13387_v40  ;;  %v2279_v60 = vsel %vm2240_vm4, %v2277_v61, %v13436_v42  ;;  %v2935_v44 = vld [vmem:[#allocation6 + $0xda0] sm:$0xff] }
 0x2e2   :  { %v2254_v14 = vsel %vm2252_vm8, %v2251_v39, %v1705_v43  ;;  %v12038_v43 = vcombine.high %v13457_v62, %v13457_v62  ;;  %v13563_v62 = vrot.slane %v13529_v35, %v12994_v22  ;;  %v2295_v5 = vsel %vm2240_vm4, %v2293_v58, %v13415_v23  ;;  %v2923_v58 = vld [vmem:[#allocation6 + $0xd40] sm:$0xff] }
 0x2e3   :  { %v1765_v32 = vpop.permute.xlu0 %1764  ;;  %2049 = vrot.lane.b32.xlu1 %v10846_v29, %s12475_s16  ;;  %v1533_v29 = vrot.slane %v860_v45, %v12991_v12  ;;  %v2297_v30 = vsel %vm2243_vm5, %v2295_v5, %v13434_v19  ;;  %v2281_v18 = vsel %vm2243_vm5, %v2279_v60, %v13472_v34  ;;  %v13578_v23 = vrot.slane %v13540_v16, %v12994_v22  ;;  %v2931_v34 = vld [vmem:[#allocation6 + $0xd80] sm:$0xff] }
 0x2e4   :  { %v2299_v45 = vsel %vm2246_vm6, %v2297_v30, %v13470_v0  ;;  %v10856_v19 = vcombine.low %v13549_v51, %v13549_v51  ;;  %v10863_v0 = vcombine.low %v13563_v62, %v13563_v62  ;;  %v11317_v37 = vcombine.high %v2931_v34, %v2935_v44  ;;  %v2927_v61 = vld [vmem:[#allocation6 + $0xd60] sm:$0xff] }
 0x2e5   :  { %1989 = vrot.lane.b32.xlu0 %v12026_v53, %s12477_s18  ;;  %v1770_v6 = vpop.permute.xlu1 %1769  ;;  %v875_v53 = vpack.i.b16 %v874_v27, %v873_v24  ;;  %v13581_v42 = vrot.slane %v1533_v29, %v12994_v22  ;;  %v2283_v24 = vsel %vm2246_vm6, %v2281_v18, %v1765_v32  ;;  %v2301_v27 = vsel %vm2249_vm7, %v2299_v45, %v1805_v9 }
 0x2e6   :  { %v2285_v39 = vsel %vm2249_vm7, %v2283_v24, %v1770_v6  ;;  %v868_v32 = vshrl.u32 %v13570_v1, 16  ;;  %v1534_v5 = vcombine.high %v1533_v29, %v12473_v48  ;;  %v872_v60 = vpack.i.b16 %v13505_v38, %v13500_v59  ;;  %v2771_v29 = vld [vmem:[#allocation6 + $0x880] sm:$0xff] }
 0x2e7   :  { %v1710_v36 = vpop.permute.xlu0 %1709  ;;  %2054 = vrot.lane.b32.xlu1 %v12033_v57, %s12476_s17  ;;  %v13590_v57 = vrot.slane %v875_v53, %v12991_v12  ;;  %v11316_v59 = vcombine.low %v2931_v34, %v2935_v44  ;;  %v11309_v38 = vcombine.high %v2923_v58, %v2927_v61  ;;  %v2919_v24 = vld [vmem:[#allocation6 + $0xd20] sm:$0xff]  ;;  %v12044_v15 = vcombine.high %v13563_v62, %v13563_v62 }
 0x2e8   :  { %v13535_v2 = vsel %vm2255_vm9, %v2254_v14, %v1710_v36 }
 0x2e9   :  { %8718 = vmatmul.mubr.bf16.vlgmr.msra.gmra.mxu0 %v13535_v2  ;;  %2089 = vrot.lane.b32.xlu0 %v12037_v50, %s12476_s17  ;;  %v1775_v40 = vpop.permute.xlu1 %1774  ;;  %v13612_v53 = vrot.slane %v13590_v57, %v12994_v22 }
 0x2ea   :  { %8768 = vmatpush1.bf16.msra.mxu0 %v11196_v13  ;;  %v2787_v13 = vld [vmem:[#allocation6 + $0x900] sm:$0xff]  ;;  %v2287_v50 = vsel %vm2252_vm8, %v2285_v39, %v1775_v40  ;;  %v11308_v39 = vcombine.low %v2923_v58, %v2927_v61 }
 0x2eb   :  { %v1810_v4 = vpop.permute.xlu0 %1809  ;;  %8769 = vmatprep.subr.bf16.mxu0 %v11189_v10  ;;  %2059 = vrot.lane.b32.xlu1 %v12034_v52, %s12477_s18  ;;  %v11173_v52 = vcombine.high %v2787_v13, %v2791_v11  ;;  %v11172_v40 = vcombine.low %v2787_v13, %v2791_v11  ;;  %v13632_v13 = vrot.slane %v1534_v5, %v12994_v22  ;;  %v2915_v11 = vld [vmem:[#allocation6 + $0xd00] sm:$0xff] }
 0x2ec   :  { %v2303_v14 = vsel %vm2252_vm8, %v2301_v27, %v1810_v4  ;;  %v12043_v4 = vcombine.high %v13581_v42, %v13581_v42  ;;  %v11300_v5 = vcombine.low %v2915_v11, %v2919_v24 }
 0x2ed   :  { %2094 = vrot.lane.b32.xlu0 %v12038_v43, %s12477_s18  ;;  %v1780_v36 = vpop.permute.xlu1 %1779  ;;  %v2783_v43 = vld [vmem:[#allocation6 + $0x8e0] sm:$0xff]  ;;  %v10866_v62 = vcombine.low %v13632_v13, %v13632_v13 }
 0x2ee   :  { %8770 = vmatpush1.bf16.msra.mxu0 %v11188_v46  ;;  %v13601_v9 = vsel %vm2255_vm9, %v2287_v50, %v1780_v36  ;;  %v12039_v46 = vcombine.high %v13578_v23, %v13578_v23  ;;  %v11165_v45 = vcombine.high %v2779_v21, %v2783_v43  ;;  %v11164_v3 = vcombine.low %v2779_v21, %v2783_v43  ;;  %v2767_v36 = vld [vmem:[#allocation6 + $0x860] sm:$0xff] }
 0x2ef   :  { %v1815_v10 = vpop.permute.xlu0 %1814  ;;  %8771 = vmatprep.subr.bf16.mxu0 %v11181_v55  ;;  %2099 = vrot.lane.b32.xlu1 %v10856_v19, %s12472_s13  ;;  %v869_v55 = vpack.i.b16 %v868_v32, %v867_v56  ;;  %v10877_v56 = vcombine.low %v13612_v53, %v13612_v53  ;;  %v13635_v19 = vrot.slane %v872_v60, %v12991_v12 }
 0x2f0   :  { %v13604_v6 = vsel %vm2255_vm9, %v2303_v14, %v1815_v10  ;;  %v12040_v32 = vcombine.high %v13549_v51, %v13549_v51  ;;  %v11301_v50 = vcombine.high %v2915_v11, %v2919_v24  ;;  %v2763_v14 = vld [vmem:[#allocation6 + $0x840] sm:$0xff]  ;;  %v1484_v21 = vcombine.high %v13540_v16, %v12473_v48 }
 0x2f1   :  { %8758 = vmatprep.mubr.bf16.mxu1 %v13604_v6  ;;  %2134 = vrot.lane.b32.xlu0 %v10863_v0, %s12472_s13  ;;  %v13621_v30 = vpop.permute.xlu1 %1819  ;;  %v13654_v10 = vrot.slane %v13635_v19, %v12994_v22  ;;  %v866_v43 = vpack.i.b16 %v13570_v1, %v13532_v17  ;;  %v11148_v60 = vcombine.low %v2763_v14, %v2767_v36 }
 0x2f2   :  { %8772 = vmatpush1.bf16.msra.mxu0 %v11180_v20  ;;  %8759 = vmatmul.mubr.bf16.vlgmr.msra.gmra.mxu1 %v13601_v9  ;;  %v2775_v20 = vld [vmem:[#allocation6 + $0x8a0] sm:$0xff] }
 0x2f3   :  { %v13623_v18 = vpop.permute.xlu0 %1854  ;;  %8773 = vmatprep.subr.bf16.mxu0 %v11173_v52  ;;  %8809 = vmatpush1.bf16.msra.mxu1 %v11324_v41  ;;  %v13641_v41 = vrot.slane %v869_v55, %v12991_v12  ;;  %v11157_v27 = vcombine.high %v2771_v29, %v2775_v20  ;;  %v11156_v0 = vcombine.low %v2771_v29, %v2775_v20 }
 0x2f4   :  { %2104 = vrot.lane.b32.xlu1 %v12039_v46, %s12460_s9  ;;  %8810 = vmatprep.subr.bf16.mxu1 %v11317_v37  ;;  %v1559_v52 = vcombine.high %v13529_v35, %v12473_v48  ;;  %v2907_v46 = vld [vmem:[#allocation6 + $0xcc0] sm:$0xff]  ;;  %v11149_v35 = vcombine.high %v2763_v14, %v2767_v36  ;;  %v12051_v16 = vcombine.high %v13654_v10, %v13654_v10 }
 0x2f5   :  { %2139 = vrot.lane.b32.xlu0 %v12043_v4, %s12460_s9  ;;  %v13643_v34 = vpop.permute.xlu1 %1824  ;;  %v13661_v51 = vrot.slane %v13641_v41, %v12994_v22  ;;  %v2911_v37 = vld [vmem:[#allocation6 + $0xce0] sm:$0xff]  ;;  %v13684_v29 = vrot.slane %v866_v43, %v12991_v12  ;;  %v1634_v43 = vcombine.high %v13635_v19, %v12473_v48 }
 0x2f6   :  { %8774 = vmatpush1.bf16.msra.mxu0 %v11172_v40  ;;  %v2755_v40 = vld [vmem:[#allocation6 + $0x800] sm:$0xff]  ;;  %v11293_v55 = vcombine.high %v2907_v46, %v2911_v37  ;;  %v13675_v17 = vrot.slane %v1559_v52, %v12994_v22  ;;  %v11292_v24 = vcombine.low %v2907_v46, %v2911_v37 }
 0x2f7   :  { %v13645_v44 = vpop.permute.xlu0 %1859  ;;  %8775 = vmatprep.subr.bf16.mxu0 %v11165_v45  ;;  %8811 = vmatpush1.bf16.msra.mxu1 %v11316_v59  ;;  %v2759_v4 = vld [vmem:[#allocation6 + $0x820] sm:$0xff]  ;;  %v10870_v1 = vcombine.low %v13661_v51, %v13661_v51  ;;  %v13681_v45 = vrot.slane %v1484_v21, %v12994_v22 }
 0x2f8   :  { %2204 = vrot.lane.b32.xlu1 %v10877_v56, %s12472_s13  ;;  %8812 = vmatprep.subr.bf16.mxu1 %v11309_v38  ;;  %v2899_v59 = vld [vmem:[#allocation6 + $0xc80] sm:$0xff]  ;;  %v11141_v11 = vcombine.high %v2755_v40, %v2759_v4  ;;  %v10867_v12 = vcombine.low %v13675_v17, %v13675_v17 }
 0x2f9   :  { %2144 = vrot.lane.b32.xlu0 %v12044_v15, %s12474_s14  ;;  %v13667_v58 = vpop.permute.xlu1 %1924  ;;  %v2903_v38 = vld [vmem:[#allocation6 + $0xca0] sm:$0xff] }
 0x2fa   :  { %8776 = vmatpush1.bf16.msra.mxu0 %v11164_v3  ;;  %v2875_v3 = vld [vmem:[#allocation6 + $0xbc0] sm:$0xff]  ;;  %v11284_v46 = vcombine.low %v2899_v59, %v2903_v38 }
 0x2fb   :  { %v13669_v61 = vpop.permute.xlu0 %1864  ;;  %8777 = vmatprep.subr.bf16.mxu0 %v11157_v27  ;;  %8813 = vmatpush1.bf16.msra.mxu1 %v11308_v39  ;;  %v2879_v15 = vld [vmem:[#allocation6 + $0xbe0] sm:$0xff]  ;;  %v1509_v27 = vcombine.high %v13520_v28, %v12473_v48  ;;  %v11285_v39 = vcombine.high %v2899_v59, %v2903_v38 }
 0x2fc   :  { %2149 = vrot.lane.b32.xlu1 %v10866_v62, %s12462_s15  ;;  %8814 = vmatprep.subr.bf16.mxu1 %v11301_v50  ;;  %v13700_v50 = vrot.slane %v13684_v29, %v12994_v22  ;;  %v2891_v14 = vld [vmem:[#allocation6 + $0xc40] sm:$0xff]  ;;  %v11261_v52 = vcombine.high %v2875_v3, %v2879_v15 }
 0x2fd   :  { %2109 = vrot.lane.b32.xlu0 %v12040_v32, %s12474_s14  ;;  %v13686_v20 = vpop.permute.xlu1 %1869  ;;  %v10859_v32 = vcombine.low %v13681_v45, %v13681_v45  ;;  %v2895_v28 = vld [vmem:[#allocation6 + $0xc60] sm:$0xff] }
 0x2fe   :  { %8778 = vmatpush1.bf16.msra.mxu0 %v11156_v0  ;;  %v11140_v0 = vcombine.low %v2755_v40, %v2759_v4  ;;  %v2867_v37 = vld [vmem:[#allocation6 + $0xb80] sm:$0xff]  ;;  %v12047_v40 = vcombine.high %v13700_v50, %v13700_v50  ;;  %v13715_v4 = vrot.slane %v1509_v27, %v12994_v22 }
 0x2ff   :  { %v13688_v56 = vpop.permute.xlu0 %1829  ;;  %8779 = vmatprep.subr.bf16.mxu0 %v11149_v35  ;;  %8815 = vmatpush1.bf16.msra.mxu1 %v11300_v5  ;;  %v2871_v21 = vld [vmem:[#allocation6 + $0xba0] sm:$0xff]  ;;  %v12052_v35 = vcombine.high %v13612_v53, %v13612_v53  ;;  %v11277_v5 = vcombine.high %v2891_v14, %v2895_v28  ;;  %v11276_v53 = vcombine.low %v2891_v14, %v2895_v28 }
 0x300   :  { %2209 = vrot.lane.b32.xlu1 %v12051_v16, %s12460_s9  ;;  %8816 = vmatprep.subr.bf16.mxu1 %v11293_v55  ;;  %v2883_v16 = vld [vmem:[#allocation6 + $0xc00] sm:$0xff]  ;;  %v11253_v59 = vcombine.high %v2867_v37, %v2871_v21  ;;  %v11252_v27 = vcombine.low %v2867_v37, %v2871_v21  ;;  %v2325_v28 = vsel %vm2236_vm3, %v13175_v31, %v13623_v18 }
 0x301   :  { %2169 = vrot.lane.b32.xlu0 %v10870_v1, %s12472_s13  ;;  %v13702_v36 = vpop.permute.xlu1 %1929  ;;  %v2887_v55 = vld [vmem:[#allocation6 + $0xc20] sm:$0xff]  ;;  %v1659_v37 = vcombine.high %v13590_v57, %v12473_v48  ;;  %v12048_v18 = vcombine.high %v13661_v51, %v13661_v51  ;;  %v2327_v57 = vsel %vm2240_vm4, %v2325_v28, %v13645_v44  ;;  %v12046_v44 = vcombine.high %v13675_v17, %v13675_v17 }
 0x302   :  { %8780 = vmatpush1.bf16.msra.mxu0 %v11148_v60  ;;  %v11260_v60 = vcombine.low %v2875_v3, %v2879_v15  ;;  %v2859_v38 = vld [vmem:[#allocation6 + $0xb40] sm:$0xff]  ;;  %v11269_v3 = vcombine.high %v2883_v16, %v2887_v55  ;;  %v13725_v15 = vrot.slane %v1634_v43, %v12994_v22 }
 0x303   :  { %v13704_v62 = vpop.permute.xlu0 %1889  ;;  %8781 = vmatprep.subr.bf16.mxu0 %v11141_v11  ;;  %8817 = vmatpush1.bf16.msra.mxu1 %v11292_v24  ;;  %v2863_v11 = vld [vmem:[#allocation6 + $0xb60] sm:$0xff]  ;;  %v12045_v24 = vcombine.high %v13632_v13, %v13632_v13 }
 0x304   :  { %2154 = vrot.lane.b32.xlu1 %v10867_v12, %s12475_s16  ;;  %8818 = vmatprep.subr.bf16.mxu1 %v11285_v39  ;;  %v10860_v12 = vcombine.low %v13715_v4, %v13715_v4  ;;  %v3003_v39 = vld [vmem:[#allocation6 + $0xfc0] sm:$0xff]  ;;  %v11245_v13 = vcombine.high %v2859_v38, %v2863_v11  ;;  %v10880_v21 = vcombine.low %v13725_v15, %v13725_v15 }
 0x305   :  { %2114 = vrot.lane.b32.xlu0 %v10859_v32, %s12462_s15  ;;  %v13717_v19 = vpop.permute.xlu1 %1874  ;;  %v2855_v43 = vld [vmem:[#allocation6 + $0xb20] sm:$0xff]  ;;  %v11244_v31 = vcombine.low %v2859_v38, %v2863_v11 }
 0x306   :  { %8782 = vmatpush1.bf16.msra.mxu0 %v11140_v0  ;;  %v3007_v0 = vld [vmem:[#allocation6 + $0xfe0] sm:$0xff] }
 0x307   :  { %v13719_v1 = vpop.permute.xlu0 %1834  ;;  %8783 = vmatprep.subr.bf16.mxu0 %v11261_v52  ;;  %8819 = vmatpush1.bf16.msra.mxu1 %v11284_v46  ;;  %v11268_v52 = vcombine.low %v2883_v16, %v2887_v55  ;;  %v2851_v46 = vld [vmem:[#allocation6 + $0xb00] sm:$0xff]  ;;  %v11388_v38 = vcombine.low %v3003_v39, %v3007_v0 }
 0x308   :  { %2214 = vrot.lane.b32.xlu1 %v12052_v35, %s12474_s14  ;;  %8820 = vmatprep.subr.bf16.mxu1 %v11277_v5  ;;  %v11389_v35 = vcombine.high %v3003_v39, %v3007_v0  ;;  %v1584_v5 = vcombine.high %v13684_v29, %v12473_v48  ;;  %v1609_v29 = vcombine.high %v13641_v41, %v12473_v48  ;;  %v2843_v11 = vld [vmem:[#allocation6 + $0xac0] sm:$0xff] }
 0x309   :  { %2174 = vrot.lane.b32.xlu0 %v12047_v40, %s12460_s9  ;;  %v13730_v32 = vpop.permute.xlu1 %1934  ;;  %v2999_v40 = vld [vmem:[#allocation6 + $0xfa0] sm:$0xff]  ;;  %v2329_v48 = vsel %vm2243_vm5, %v2327_v57, %v13669_v61  ;;  %v11236_v41 = vcombine.low %v2851_v46, %v2855_v43  ;;  %s12478_s9 = smov [#allocation12]  }
 0x30a   :  { %8784 = vmatpush2.bf16.msra.mxu0 %v11260_v60  ;;  %v2995_v60 = vld [vmem:[#allocation6 + $0xf80] sm:$0xff]  ;;  %v2331_v61 = vsel %vm2246_vm6, %v2329_v48, %v13686_v20 }
 0x30b   :  { %v13732_v14 = vpop.permute.xlu0 %1894  ;;  %8785 = vmatprep.subr.bf16.mxu0 %v11253_v59  ;;  %8821 = vmatpush1.bf16.msra.mxu1 %v11276_v53  ;;  %v11237_v59 = vcombine.high %v2851_v46, %v2855_v43  ;;  %v12041_v53 = vcombine.high %v13681_v45, %v13681_v45  ;;  %v2847_v51 = vld [vmem:[#allocation6 + $0xae0] sm:$0xff]  ;;  %v13765_v45 = vrot.slane %v1584_v5, %v12994_v22 }
 0x30c   :  { %2159 = vrot.lane.b32.xlu1 %v12045_v24, %s12476_s17  ;;  %8822 = vmatprep.subr.bf16.mxu1 %v11269_v3  ;;  %v11381_v24 = vcombine.high %v2995_v60, %v2999_v40  ;;  %v13759_v3 = vrot.slane %v1659_v37, %v12994_v22  ;;  %v11229_v17 = vcombine.high %v2843_v11, %v2847_v51  ;;  %v2987_v39 = vld [vmem:[#allocation6 + $0xf40] sm:$0xff] }
 0x30d   :  { %2119 = vrot.lane.b32.xlu0 %v10860_v12, %s12475_s16  ;;  %v1880_v16 = vpop.permute.xlu1 %1879  ;;  %v11380_v0 = vcombine.low %v2995_v60, %v2999_v40  ;;  %v2835_v28 = vld [vmem:[#allocation6 + $0xa80] sm:$0xff]  ;;  %v13777_v43 = vrot.slane %v1609_v29, %v12994_v22  ;;  %v2333_v37 = vsel %vm2249_vm7, %v2331_v61, %v13717_v19  ;;  %v12053_v61 = vcombine.high %v13725_v15, %v13725_v15 }
 0x30e   :  { %8786 = vmatpush2.bf16.msra.mxu0 %v11252_v27  ;;  %v10881_v46 = vcombine.low %v13759_v3, %v13759_v3  ;;  %v2979_v20 = vld [vmem:[#allocation6 + $0xf00] sm:$0xff] }
 0x30f   :  { %v13749_v55 = vpop.permute.xlu0 %1839  ;;  %8787 = vmatprep.subr.bf16.mxu0 %v11245_v13  ;;  %8823 = vmatpush1.bf16.msra.mxu1 %v11268_v52  ;;  %v2991_v13 = vld [vmem:[#allocation6 + $0xf60] sm:$0xff]  ;;  %v12050_v15 = vcombine.high %v13777_v43, %v13777_v43 }
 0x310   :  { %2219 = vrot.lane.b32.xlu1 %v10880_v21, %s12462_s15  ;;  %8824 = vmatprep.subr.bf16.mxu1 %v11389_v35  ;;  %v2839_v52 = vld [vmem:[#allocation6 + $0xaa0] sm:$0xff]  ;;  %v11228_v21 = vcombine.low %v2843_v11, %v2847_v51  ;;  %v10873_v35 = vcombine.low %v13765_v45, %v13765_v45  ;;  %v11373_v22 = vcombine.high %v2987_v39, %v2991_v13 }
 0x311   :  { %2179 = vrot.lane.b32.xlu0 %v12048_v18, %s12474_s14  ;;  %v13767_v27 = vpop.permute.xlu1 %1939  ;;  %v2983_v5 = vld [vmem:[#allocation6 + $0xf20] sm:$0xff]  ;;  %v11221_v40 = vcombine.high %v2835_v28, %v2839_v52  ;;  %v11372_v57 = vcombine.low %v2987_v39, %v2991_v13  ;;  %v12042_v11 = vcombine.high %v13715_v4, %v13715_v4  ;;  %v12049_v13 = vcombine.high %v13765_v45, %v13765_v45 }
 0x312   :  { %8788 = vmatpush2.bf16.msra.mxu0 %v11244_v31  ;;  %v2335_v31 = vsel %vm2252_vm8, %v2333_v37, %v1880_v16  ;;  %v2831_v29 = vld [vmem:[#allocation6 + $0xa60] sm:$0xff]  ;;  %v10874_v16 = vcombine.low %v13777_v43, %v13777_v43  ;;  %v2309_v4 = vsel %vm2236_vm3, %v13172_v47, %v13621_v30  ;;  %v2357_v45 = vsel %vm2236_vm3, %v13222_v63, %v13667_v58 }
 0x313   :  { %v13769_v12 = vpop.permute.xlu0 %1899  ;;  %8789 = vmatprep.subr.bf16.mxu0 %v11237_v59  ;;  %8825 = vmatpush2.bf16.msra.mxu1 %v11388_v38  ;;  %v2827_v59 = vld [vmem:[#allocation6 + $0xa40] sm:$0xff]  ;;  %v11220_v38 = vcombine.low %v2835_v28, %v2839_v52  ;;  %v12054_v63 = vcombine.high %v13759_v3, %v13759_v3 }
 0x314   :  { %2164 = vrot.lane.b32.xlu1 %v12046_v44, %s12477_s18  ;;  %8826 = vmatprep.subr.bf16.mxu1 %v11381_v24  ;;  %v2971_v51 = vld [vmem:[#allocation6 + $0xec0] sm:$0xff]  ;;  %v11212_v52 = vcombine.low %v2827_v59, %v2831_v29 }
 0x315   :  { %2124 = vrot.lane.b32.xlu0 %v12041_v53, %s12476_s17  ;;  %v1885_v18 = vpop.permute.xlu1 %1884  ;;  %v11365_v53 = vcombine.high %v2979_v20, %v2983_v5  ;;  %v2975_v44 = vld [vmem:[#allocation6 + $0xee0] sm:$0xff] }
 0x316   :  { %8790 = vmatpush2.bf16.msra.mxu0 %v11236_v41  ;;  %v13788_v19 = vsel %vm2255_vm9, %v2335_v31, %v1885_v18  ;;  %v11213_v41 = vcombine.high %v2827_v59, %v2831_v29  ;;  %v2819_v39 = vld [vmem:[#allocation6 + $0xa00] sm:$0xff]  ;;  %v11357_v28 = vcombine.high %v2971_v51, %v2975_v44  ;;  %v11356_v47 = vcombine.low %v2971_v51, %v2975_v44 }
 0x317   :  { %v13785_v60 = vpop.permute.xlu0 %1844  ;;  %8791 = vmatprep.subr.bf16.mxu0 %v11229_v17  ;;  %8827 = vmatpush2.bf16.msra.mxu1 %v11380_v0  ;;  %v11364_v17 = vcombine.low %v2979_v20, %v2983_v5  ;;  %v2823_v0 = vld [vmem:[#allocation6 + $0xa20] sm:$0xff]  ;;  %v2311_v31 = vsel %vm2240_vm4, %v2309_v4, %v13643_v34 }
 0x318   :  { %2224 = vrot.lane.b32.xlu1 %v10881_v46, %s12475_s16  ;;  %8799 = vmatprep.mubr.bf16.mxu0 %v13788_v19  ;;  %v2963_v46 = vld [vmem:[#allocation6 + $0xe80] sm:$0xff]  ;;  %v11205_v20 = vcombine.high %v2819_v39, %v2823_v0  ;;  %v2313_v43 = vsel %vm2243_vm5, %v2311_v31, %v13688_v56 }
 0x319   :  { %2184 = vrot.lane.b32.xlu0 %v10873_v35, %s12462_s15  ;;  %8828 = vmatprep.subr.bf16.mxu1 %v11373_v22  ;;  %v1945_v24 = vpop.permute.xlu1 %1944  ;;  %v2967_v37 = vld [vmem:[#allocation6 + $0xea0] sm:$0xff]  ;;  %v11204_v22 = vcombine.low %v2819_v39, %v2823_v0  ;;  %s10699_s15 = sshll.u32 %s12478_s9, 4  ;;  %s10700_s15 = int_to_ptr.vmem [resolvable:$true] %s10699_s15 }
 0x31a   :  { %8792 = vmatpush2.bf16.msra.mxu0 %v11228_v21  ;;  %v3067_v30 = vld [vmem:[#allocation6 + $0x11c0] sm:$0xff]  ;;  %v11349_v18 = vcombine.high %v2963_v46, %v2967_v37  ;;  %s12422_s7 = scalar_lea.vmem %s10700_s15, 32  ;;  %p12427_p13 = scmp.lt.s32.totalorder %s10700_s15, %s10700_s15 }
 0x31b   :  { %v13797_v48 = vpop.permute.xlu0 %1904  ;;  %8793 = vmatprep.subr.bf16.mxu0 %v11221_v40  ;;  %8829 = vmatpush2.bf16.msra.mxu1 %v11372_v57  ;;  %v3071_v5 = vld [vmem:[#allocation6 + $0x11e0] sm:$0xff]  ;;  %v2359_v57 = vsel %vm2240_vm4, %v2357_v45, %v13702_v36  ;;  %p12423_p12 = scmp.ne.s32.totalorder %s10700_s15, %s12422_s7  ;;  %p12428_p0 = scmp.lt.s32.totalorder %s12422_s7, %s12422_s7 }
 0x31c   :  { %2189 = vrot.lane.b32.xlu1 %v10874_v16, %s12475_s16  ;;  %8830 = vmatprep.subr.bf16.mxu1 %v11365_v53  ;;  %v2955_v58 = vld [vmem:[#allocation6 + $0xe40] sm:$0xff]  ;;  %v11453_v29 = vcombine.high %v3067_v30, %v3071_v5  ;;  %v2361_v16 = vsel %vm2243_vm5, %v2359_v57, %v13730_v32  ;;  %v11348_v53 = vcombine.low %v2963_v46, %v2967_v37 }
 0x31d   :  { %2129 = vrot.lane.b32.xlu0 %v12042_v11, %s12477_s18  ;;  %v13808_v21 = vpop.permute.xlu1 %1909  ;;  %v2959_v40 = vld [vmem:[#allocation6 + $0xe60] sm:$0xff]  ;;  %v2315_v11 = vsel %vm2246_vm6, %v2313_v43, %v13719_v1  ;;  %v2363_v36 = vsel %vm2246_vm6, %v2361_v16, %v13767_v27  ;;  %v11452_v32 = vcombine.low %v3067_v30, %v3071_v5  ;;  %p12429_p1 = por %p12428_p0, %p12427_p13 }
 0x31e   :  { %8794 = vmatpush2.bf16.msra.mxu0 %v11220_v38  ;;  %v3059_v38 = vld [vmem:[#allocation6 + $0x1180] sm:$0xff]  ;;  %v11341_v51 = vcombine.high %v2955_v58, %v2959_v40  ;;  %v2317_v56 = vsel %vm2249_vm7, %v2315_v11, %v13749_v55  ;;  %v2365_v44 = vsel %vm2249_vm7, %v2363_v36, %v1945_v24  ;;  %v11340_v24 = vcombine.low %v2955_v58, %v2959_v40 }
 0x31f   :  { %v1850_v35 = vpop.permute.xlu0 %1849  ;;  %8795 = vmatprep.subr.bf16.mxu0 %v11213_v41  ;;  %8831 = vmatpush2.bf16.msra.mxu1 %v11364_v17  ;;  %v3063_v3 = vld [vmem:[#allocation6 + $0x11a0] sm:$0xff]  ;;  %v2319_v1 = vsel %vm2252_vm8, %v2317_v56, %v13785_v60  ;;  %p12430_p2 = pnand %p12429_p1, %p12423_p12 }
 0x320   :  { %2194 = vrot.lane.b32.xlu1 %v12049_v13, %s12476_s17  ;;  %8832 = vmatprep.subr.bf16.mxu1 %v11357_v28  ;;  %v2947_v41 = vld [vmem:[#allocation6 + $0xe00] sm:$0xff]  ;;  %v11445_v13 = vcombine.high %v3059_v38, %v3063_v3  ;;  %v13842_v28 = vsel %vm2255_vm9, %v2319_v1, %v1850_v35  ;;  %v11444_v46 = vcombine.low %v3059_v38, %v3063_v3 }
 0x321   :  { %2229 = vrot.lane.b32.xlu0 %v12053_v61, %s12476_s17  ;;  %v13823_v34 = vpop.permute.xlu1 %1914  ;;  %v2951_v17 = vld [vmem:[#allocation6 + $0xe20] sm:$0xff]  ;;  %v2341_v61 = vsel %vm2236_vm3, %v13273_v7, %v13704_v62 }
 0x322   :  { %8796 = vmatpush2.bf16.msra.mxu0 %v11212_v52  ;;  %v3051_v4 = vld [vmem:[#allocation6 + $0x1140] sm:$0xff]  ;;  %v11333_v60 = vcombine.high %v2947_v41, %v2951_v17  ;;  %v11332_v30 = vcombine.low %v2947_v41, %v2951_v17 }
 0x323   :  { %v1950_v59 = vpop.permute.xlu0 %1949  ;;  %8797 = vmatprep.subr.bf16.mxu0 %v11205_v20  ;;  %8833 = vmatpush2.bf16.msra.mxu1 %v11356_v47  ;;  %v3055_v52 = vld [vmem:[#allocation6 + $0x1160] sm:$0xff] }
 0x324   :  { %2199 = vrot.lane.b32.xlu1 %v12050_v15, %s12477_s18  ;;  %8834 = vmatprep.subr.bf16.mxu1 %v11349_v18  ;;  %v2367_v27 = vsel %vm2252_vm8, %v2365_v44, %v1950_v59  ;;  %v3195_v37 = vld [vmem:[#allocation6 + $0x15c0] sm:$0xff]  ;;  %v11437_v47 = vcombine.high %v3051_v4, %v3055_v52  ;;  %v2343_v15 = vsel %vm2240_vm4, %v2341_v61, %v13732_v14 }
 0x325   :  { %2234 = vrot.lane.b32.xlu0 %v12054_v63, %s12477_s18  ;;  %v1920_v39 = vpop.permute.xlu1 %1919  ;;  %v3199_v35 = vld [vmem:[#allocation6 + $0x15e0] sm:$0xff]  ;;  %v2345_v62 = vsel %vm2243_vm5, %v2343_v15, %v13769_v12  ;;  %v11436_v18 = vcombine.low %v3051_v4, %v3055_v52 }
 0x326   :  { %8798 = vmatpush2.bf16.msra.mxu0 %v11204_v22  ;;  %v3043_v5 = vld [vmem:[#allocation6 + $0x1100] sm:$0xff]  ;;  %v11581_v7 = vcombine.high %v3195_v37, %v3199_v35  ;;  %v2347_v58 = vsel %vm2246_vm6, %v2345_v62, %v13797_v48 }
 0x327   :  { %v1955_v0 = vpop.permute.xlu0 %1954  ;;  %8849 = vmatprep.subr.bf16.mxu0 %v11453_v29  ;;  %8835 = vmatpush2.bf16.msra.mxu1 %v11348_v53  ;;  %v3047_v31 = vld [vmem:[#allocation6 + $0x1120] sm:$0xff]  ;;  %v2349_v14 = vsel %vm2249_vm7, %v2347_v58, %v13808_v21  ;;  %v11580_v29 = vcombine.low %v3195_v37, %v3199_v35 }
 0x328   :  { %v13845_v55 = vsel %vm2255_vm9, %v2367_v27, %v1955_v0  ;;  %8836 = vmatprep.subr.bf16.mxu1 %v11341_v51  ;;  %v3187_v22 = vld [vmem:[#allocation6 + $0x1580] sm:$0xff]  ;;  %v11429_v59 = vcombine.high %v3043_v5, %v3047_v31  ;;  %v2351_v16 = vsel %vm2252_vm8, %v2349_v14, %v13823_v34  ;;  %v11428_v38 = vcombine.low %v3043_v5, %v3047_v31 }
 0x329   :  { %8800 = vmatmul.mubr.bf16.vlgmr.msra.gmra.mxu0 %v13842_v28  ;;  %8840 = vmatprep.mubr.bf16.mxu1 %v13845_v55  ;;  %v13852_v20 = vpop.permute.xlu1 %1959  ;;  %v3191_v63 = vld [vmem:[#allocation6 + $0x15a0] sm:$0xff]  ;;  %v13871_v48 = vsel %vm2255_vm9, %v2351_v16, %v1920_v39 }
 0x32a   :  { %8850 = vmatpush1.bf16.msra.mxu0 %v11452_v32  ;;  %v3035_v43 = vld [vmem:[#allocation6 + $0x10c0] sm:$0xff]  ;;  %v11573_v53 = vcombine.high %v3187_v22, %v3191_v63  ;;  %v11572_v56 = vcombine.low %v3187_v22, %v3191_v63 }
 0x32b   :  { %v13854_v45 = vpop.permute.xlu0 %1994  ;;  %8851 = vmatprep.subr.bf16.mxu0 %v11445_v13  ;;  %8837 = vmatpush2.bf16.msra.mxu1 %v11340_v24  ;;  %v3039_v12 = vld [vmem:[#allocation6 + $0x10e0] sm:$0xff] }
 0x32c   :  { %8838 = vmatprep.subr.bf16.mxu1 %v11333_v60  ;;  %v3179_v3 = vld [vmem:[#allocation6 + $0x1540] sm:$0xff]  ;;  %v11421_v51 = vcombine.high %v3035_v43, %v3039_v12  ;;  %v11420_v41 = vcombine.low %v3035_v43, %v3039_v12  ;;  %v2389_v12 = vsel %vm2236_vm3, %v13345_v26, %v13854_v45 }
 0x32d   :  { %v13862_v40 = vpop.permute.xlu1 %1964  ;;  %v3183_v11 = vld [vmem:[#allocation6 + $0x1560] sm:$0xff] }
 0x32e   :  { %8852 = vmatpush1.bf16.msra.mxu0 %v11444_v46  ;;  %v3027_v34 = vld [vmem:[#allocation6 + $0x1080] sm:$0xff]  ;;  %v11565_v32 = vcombine.high %v3179_v3, %v3183_v11  ;;  %v11564_v13 = vcombine.low %v3179_v3, %v3183_v11 }
 0x32f   :  { %v13864_v57 = vpop.permute.xlu0 %1999  ;;  %8853 = vmatprep.subr.bf16.mxu0 %v11437_v47  ;;  %8839 = vmatpush2.bf16.msra.mxu1 %v11332_v30  ;;  %v3031_v44 = vld [vmem:[#allocation6 + $0x10a0] sm:$0xff] }
 0x330   :  { %8890 = vmatprep.subr.bf16.mxu1 %v11581_v7  ;;  %v3171_v17 = vld [vmem:[#allocation6 + $0x1500] sm:$0xff]  ;;  %v11413_v0 = vcombine.high %v3027_v34, %v3031_v44  ;;  %v11412_v60 = vcombine.low %v3027_v34, %v3031_v44 }
 0x331   :  { %v13874_v36 = vpop.permute.xlu1 %2064  ;;  %v3175_v1 = vld [vmem:[#allocation6 + $0x1520] sm:$0xff] }
 0x332   :  { %8854 = vmatpush1.bf16.msra.mxu0 %v11436_v18  ;;  %8841 = vmatmul.mubr.bf16.vlgmr.msra.gmra.mxu1 %v13871_v48  ;;  %v3019_v24 = vld [vmem:[#allocation6 + $0x1040] sm:$0xff]  ;;  %v11557_v52 = vcombine.high %v3171_v17, %v3175_v1  ;;  %v11556_v30 = vcombine.low %v3171_v17, %v3175_v1 }
 0x333   :  { %v13876_v21 = vpop.permute.xlu0 %2004  ;;  %8855 = vmatprep.subr.bf16.mxu0 %v11429_v59  ;;  %8891 = vmatpush1.bf16.msra.mxu1 %v11580_v29  ;;  %v3023_v4 = vld [vmem:[#allocation6 + $0x1060] sm:$0xff] }
 0x334   :  { %8892 = vmatprep.subr.bf16.mxu1 %v11573_v53  ;;  %v3163_v61 = vld [vmem:[#allocation6 + $0x14c0] sm:$0xff]  ;;  %v11405_v47 = vcombine.high %v3019_v24, %v3023_v4  ;;  %v11404_v7 = vcombine.low %v3019_v24, %v3023_v4 }
 0x335   :  { %v13878_v27 = vpop.permute.xlu1 %2009  ;;  %v3167_v46 = vld [vmem:[#allocation6 + $0x14e0] sm:$0xff] }
 0x336   :  { %8856 = vmatpush1.bf16.msra.mxu0 %v11428_v38  ;;  %v3011_v5 = vld [vmem:[#allocation6 + $0x1000] sm:$0xff]  ;;  %v11549_v15 = vcombine.high %v3163_v61, %v3167_v46  ;;  %v11548_v59 = vcombine.low %v3163_v61, %v3167_v46 }
 0x337   :  { %v13880_v39 = vpop.permute.xlu0 %1969  ;;  %8857 = vmatprep.subr.bf16.mxu0 %v11421_v51  ;;  %8893 = vmatpush1.bf16.msra.mxu1 %v11572_v56  ;;  %v3015_v31 = vld [vmem:[#allocation6 + $0x1020] sm:$0xff] }
 0x338   :  { %8894 = vmatprep.subr.bf16.mxu1 %v11565_v32  ;;  %v3155_v62 = vld [vmem:[#allocation6 + $0x1480] sm:$0xff]  ;;  %v11397_v58 = vcombine.high %v3011_v5, %v3015_v31  ;;  %v11396_v16 = vcombine.low %v3011_v5, %v3015_v31  ;;  %v2391_v32 = vsel %vm2240_vm4, %v2389_v12, %v13864_v57 }
 0x339   :  { %v13882_v37 = vpop.permute.xlu1 %2069  ;;  %v3159_v18 = vld [vmem:[#allocation6 + $0x14a0] sm:$0xff]  ;;  %v2393_v24 = vsel %vm2243_vm5, %v2391_v32, %v13876_v21 }
 0x33a   :  { %8858 = vmatpush1.bf16.msra.mxu0 %v11420_v41  ;;  %v3131_v14 = vld [vmem:[#allocation6 + $0x13c0] sm:$0xff]  ;;  %v11541_v43 = vcombine.high %v3155_v62, %v3159_v18  ;;  %v11540_v56 = vcombine.low %v3155_v62, %v3159_v18 }
 0x33b   :  { %v13884_v35 = vpop.permute.xlu0 %2029  ;;  %8859 = vmatprep.subr.bf16.mxu0 %v11413_v0  ;;  %8895 = vmatpush1.bf16.msra.mxu1 %v11564_v13  ;;  %v3135_v29 = vld [vmem:[#allocation6 + $0x13e0] sm:$0xff] }
 0x33c   :  { %8896 = vmatprep.subr.bf16.mxu1 %v11557_v52  ;;  %v3147_v53 = vld [vmem:[#allocation6 + $0x1440] sm:$0xff]  ;;  %v11517_v51 = vcombine.high %v3131_v14, %v3135_v29  ;;  %v11516_v26 = vcombine.low %v3131_v14, %v3135_v29 }
 0x33d   :  { %v2015_v22 = vpop.permute.xlu1 %2014  ;;  %v3151_v38 = vld [vmem:[#allocation6 + $0x1460] sm:$0xff] }
 0x33e   :  { %8860 = vmatpush1.bf16.msra.mxu0 %v11412_v60  ;;  %v3123_v34 = vld [vmem:[#allocation6 + $0x1380] sm:$0xff]  ;;  %v11533_v41 = vcombine.high %v3147_v53, %v3151_v38  ;;  %v11532_v4 = vcombine.low %v3147_v53, %v3151_v38 }
 0x33f   :  { %v13886_v63 = vpop.permute.xlu0 %1974  ;;  %8861 = vmatprep.subr.bf16.mxu0 %v11405_v47  ;;  %8897 = vmatpush1.bf16.msra.mxu1 %v11556_v30  ;;  %v3127_v44 = vld [vmem:[#allocation6 + $0x13a0] sm:$0xff]  ;;  %v2395_v30 = vsel %vm2246_vm6, %v2393_v24, %v13878_v27 }
 0x340   :  { %8898 = vmatprep.subr.bf16.mxu1 %v11549_v15  ;;  %v3139_v45 = vld [vmem:[#allocation6 + $0x1400] sm:$0xff]  ;;  %v11509_v13 = vcombine.high %v3123_v34, %v3127_v44  ;;  %v11508_v61 = vcombine.low %v3123_v34, %v3127_v44 }
 0x341   :  { %v13891_v3 = vpop.permute.xlu1 %2074  ;;  %v3143_v17 = vld [vmem:[#allocation6 + $0x1420] sm:$0xff] }
 0x342   :  { %8862 = vmatpush1.bf16.msra.mxu0 %v11404_v7  ;;  %v3115_v52 = vld [vmem:[#allocation6 + $0x1340] sm:$0xff]  ;;  %v11525_v57 = vcombine.high %v3139_v45, %v3143_v17  ;;  %v11524_v21 = vcombine.low %v3139_v45, %v3143_v17 }
 0x343   :  { %v13893_v11 = vpop.permute.xlu0 %2034  ;;  %8863 = vmatprep.subr.bf16.mxu0 %v11397_v58  ;;  %8899 = vmatpush1.bf16.msra.mxu1 %v11548_v59  ;;  %v3119_v60 = vld [vmem:[#allocation6 + $0x1360] sm:$0xff]  ;;  %v2397_v58 = vsel %vm2249_vm7, %v2395_v30, %v2015_v22 }
 0x344   :  { %8900 = vmatprep.subr.bf16.mxu1 %v11541_v43  ;;  %v3259_v46 = vld [vmem:[#allocation6 + $0x17c0] sm:$0xff]  ;;  %v11501_v15 = vcombine.high %v3115_v52, %v3119_v60  ;;  %v11500_v59 = vcombine.low %v3115_v52, %v3119_v60 }
 0x345   :  { %v2020_v1 = vpop.permute.xlu1 %2019  ;;  %v3263_v47 = vld [vmem:[#allocation6 + $0x17e0] sm:$0xff] }
 0x346   :  { %8864 = vmatpush1.bf16.msra.mxu0 %v11396_v16  ;;  %v3107_v7 = vld [vmem:[#allocation6 + $0x1300] sm:$0xff]  ;;  %v11645_v18 = vcombine.high %v3259_v46, %v3263_v47  ;;  %v2399_v27 = vsel %vm2252_vm8, %v2397_v58, %v2020_v1  ;;  %v11644_v38 = vcombine.low %v3259_v46, %v3263_v47 }
 0x347   :  { %v13897_v0 = vpop.permute.xlu0 %1979  ;;  %8865 = vmatprep.subr.bf16.mxu0 %v11517_v51  ;;  %8901 = vmatpush1.bf16.msra.mxu1 %v11540_v56  ;;  %v3111_v62 = vld [vmem:[#allocation6 + $0x1320] sm:$0xff] }
 0x348   :  { %8902 = vmatprep.subr.bf16.mxu1 %v11533_v41  ;;  %v3251_v14 = vld [vmem:[#allocation6 + $0x1780] sm:$0xff]  ;;  %v11493_v16 = vcombine.high %v3107_v7, %v3111_v62  ;;  %v11492_v34 = vcombine.low %v3107_v7, %v3111_v62 }
 0x349   :  { %v13903_v5 = vpop.permute.xlu1 %2079  ;;  %v3255_v29 = vld [vmem:[#allocation6 + $0x17a0] sm:$0xff] }
 0x34a   :  { %8866 = vmatpush2.bf16.msra.mxu0 %v11516_v26  ;;  %v3099_v51 = vld [vmem:[#allocation6 + $0x12c0] sm:$0xff]  ;;  %v11637_v22 = vcombine.high %v3251_v14, %v3255_v29  ;;  %v11636_v17 = vcombine.low %v3251_v14, %v3255_v29  ;;  %v2373_v14 = vsel %vm2236_vm3, %v13342_v25, %v13852_v20 }
 0x34b   :  { %v13905_v31 = vpop.permute.xlu0 %2039  ;;  %8867 = vmatprep.subr.bf16.mxu0 %v11509_v13  ;;  %8903 = vmatpush1.bf16.msra.mxu1 %v11532_v4  ;;  %v3103_v56 = vld [vmem:[#allocation6 + $0x12e0] sm:$0xff]  ;;  %v2375_v25 = vsel %vm2240_vm4, %v2373_v14, %v13862_v40 }
 0x34c   :  { %8904 = vmatprep.subr.bf16.mxu1 %v11525_v57  ;;  %v3243_v44 = vld [vmem:[#allocation6 + $0x1740] sm:$0xff]  ;;  %v11485_v26 = vcombine.high %v3099_v51, %v3103_v56  ;;  %v11484_v4 = vcombine.low %v3099_v51, %v3103_v56  ;;  %v2421_v57 = vsel %vm2236_vm3, %v13381_v8, %v13874_v36  ;;  %v2377_v40 = vsel %vm2243_vm5, %v2375_v25, %v13880_v39 }
 0x34d   :  { %v2025_v43 = vpop.permute.xlu1 %2024  ;;  %v3247_v32 = vld [vmem:[#allocation6 + $0x1760] sm:$0xff]  ;;  %v2423_v62 = vsel %vm2240_vm4, %v2421_v57, %v13882_v37 }
 0x34e   :  { %8868 = vmatpush2.bf16.msra.mxu0 %v11508_v61  ;;  %v13912_v53 = vsel %vm2255_vm9, %v2399_v27, %v2025_v43  ;;  %v3091_v1 = vld [vmem:[#allocation6 + $0x1280] sm:$0xff]  ;;  %v11629_v24 = vcombine.high %v3243_v44, %v3247_v32  ;;  %v11628_v30 = vcombine.low %v3243_v44, %v3247_v32  ;;  %v2425_v37 = vsel %vm2243_vm5, %v2423_v62, %v13891_v3 }
 0x34f   :  { %v13909_v12 = vpop.permute.xlu0 %1984  ;;  %8869 = vmatprep.subr.bf16.mxu0 %v11501_v15  ;;  %8905 = vmatpush1.bf16.msra.mxu1 %v11524_v21  ;;  %v3095_v13 = vld [vmem:[#allocation6 + $0x12a0] sm:$0xff]  ;;  %v2427_v51 = vsel %vm2246_vm6, %v2425_v37, %v13903_v5 }
 0x350   :  { %8881 = vmatprep.mubr.bf16.mxu0 %v13912_v53  ;;  %8906 = vmatprep.subr.bf16.mxu1 %v11645_v18  ;;  %v3235_v52 = vld [vmem:[#allocation6 + $0x1700] sm:$0xff]  ;;  %v11477_v46 = vcombine.high %v3091_v1, %v3095_v13  ;;  %v11476_v18 = vcombine.low %v3091_v1, %v3095_v13 }
 0x351   :  { %v2085_v41 = vpop.permute.xlu1 %2084  ;;  %v3239_v60 = vld [vmem:[#allocation6 + $0x1720] sm:$0xff] }
 0x352   :  { %8870 = vmatpush2.bf16.msra.mxu0 %v11500_v59  ;;  %v3083_v15 = vld [vmem:[#allocation6 + $0x1240] sm:$0xff]  ;;  %v11621_v7 = vcombine.high %v3235_v52, %v3239_v60  ;;  %v11620_v27 = vcombine.low %v3235_v52, %v3239_v60  ;;  %v2429_v20 = vsel %vm2249_vm7, %v2427_v51, %v2085_v41 }
 0x353   :  { %8871 = vmatprep.subr.bf16.mxu0 %v11493_v16  ;;  %8907 = vmatpush2.bf16.msra.mxu1 %v11644_v38  ;;  %v13915_v45 = vpop.permute.xlu0 %2044  ;;  %v3087_v21 = vld [vmem:[#allocation6 + $0x1260] sm:$0xff] }
 0x354   :  { %8908 = vmatprep.subr.bf16.mxu1 %v11637_v22  ;;  %v3227_v58 = vld [vmem:[#allocation6 + $0x16c0] sm:$0xff]  ;;  %v11469_v36 = vcombine.high %v3083_v15, %v3087_v21  ;;  %v11468_v56 = vcombine.low %v3083_v15, %v3087_v21 }
 0x355   :  { %v13920_v61 = vpop.permute.xlu1 %2049  ;;  %v3231_v59 = vld [vmem:[#allocation6 + $0x16e0] sm:$0xff] }
 0x356   :  { %8872 = vmatpush2.bf16.msra.mxu0 %v11492_v34  ;;  %v3075_v43 = vld [vmem:[#allocation6 + $0x1200] sm:$0xff]  ;;  %v11613_v38 = vcombine.high %v3227_v58, %v3231_v59 }
 0x357   :  { %8873 = vmatprep.subr.bf16.mxu0 %v11485_v26  ;;  %8909 = vmatpush2.bf16.msra.mxu1 %v11636_v17  ;;  %v13922_v47 = vpop.permute.xlu0 %1989  ;;  %v3079_v16 = vld [vmem:[#allocation6 + $0x1220] sm:$0xff]  ;;  %v11612_v17 = vcombine.low %v3227_v58, %v3231_v59 }
 0x358   :  { %8910 = vmatprep.subr.bf16.mxu1 %v11629_v24  ;;  %v3219_v22 = vld [vmem:[#allocation6 + $0x1680] sm:$0xff]  ;;  %v11461_v32 = vcombine.high %v3075_v43, %v3079_v16  ;;  %v11460_v41 = vcombine.low %v3075_v43, %v3079_v16 }
 0x359   :  { %v13926_v8 = vpop.permute.xlu1 %2054  ;;  %v3223_v34 = vld [vmem:[#allocation6 + $0x16a0] sm:$0xff] }
 0x35a   :  { %8874 = vmatpush2.bf16.msra.mxu0 %v11484_v4  ;;  %v3323_v1 = vld [vmem:[#allocation6 + $0x19c0] sm:$0xff]  ;;  %v11605_v24 = vcombine.high %v3219_v22, %v3223_v34 }
 0x35b   :  { %8875 = vmatprep.subr.bf16.mxu0 %v11477_v46  ;;  %8911 = vmatpush2.bf16.msra.mxu1 %v11628_v30  ;;  %v2090_v29 = vpop.permute.xlu0 %2089  ;;  %v3327_v5 = vld [vmem:[#allocation6 + $0x19e0] sm:$0xff]  ;;  %v11604_v30 = vcombine.low %v3219_v22, %v3223_v34 }
 0x35c   :  { %8912 = vmatprep.subr.bf16.mxu1 %v11621_v7  ;;  %v2431_v3 = vsel %vm2252_vm8, %v2429_v20, %v2090_v29  ;;  %v3211_v4 = vld [vmem:[#allocation6 + $0x1640] sm:$0xff]  ;;  %v11709_v57 = vcombine.high %v3323_v1, %v3327_v5  ;;  %v2379_v7 = vsel %vm2246_vm6, %v2377_v40, %v13886_v63  ;;  %v2405_v63 = vsel %vm2236_vm3, %v13409_v54, %v13884_v35 }
 0x35d   :  { %v13938_v44 = vpop.permute.xlu1 %2059  ;;  %v3215_v52 = vld [vmem:[#allocation6 + $0x1660] sm:$0xff]  ;;  %v2381_v62 = vsel %vm2249_vm7, %v2379_v7, %v13897_v0  ;;  %v2407_v54 = vsel %vm2240_vm4, %v2405_v63, %v13893_v11 }
 0x35e   :  { %8876 = vmatpush2.bf16.msra.mxu0 %v11476_v18  ;;  %v3315_v15 = vld [vmem:[#allocation6 + $0x1980] sm:$0xff]  ;;  %v11597_v39 = vcombine.high %v3211_v4, %v3215_v52  ;;  %v11708_v18 = vcombine.low %v3323_v1, %v3327_v5  ;;  %v11596_v43 = vcombine.low %v3211_v4, %v3215_v52 }
 0x35f   :  { %8877 = vmatprep.subr.bf16.mxu0 %v11469_v36  ;;  %8913 = vmatpush2.bf16.msra.mxu1 %v11620_v27  ;;  %v2095_v26 = vpop.permute.xlu0 %2094  ;;  %v3319_v21 = vld [vmem:[#allocation6 + $0x19a0] sm:$0xff]  ;;  %v2383_v36 = vsel %vm2252_vm8, %v2381_v62, %v13909_v12 }
 0x360   :  { %v13942_v13 = vsel %vm2255_vm9, %v2431_v3, %v2095_v26  ;;  %8914 = vmatprep.subr.bf16.mxu1 %v11613_v38  ;;  %v3203_v58 = vld [vmem:[#allocation6 + $0x1600] sm:$0xff]  ;;  %v11701_v29 = vcombine.high %v3315_v15, %v3319_v21  ;;  %v13964_v27 = vsel %vm2255_vm9, %v2383_v36, %v13922_v47  ;;  %v11700_v38 = vcombine.low %v3315_v15, %v3319_v21 }
 0x361   :  { %8922 = vmatprep.mubr.bf16.mxu1 %v13942_v13  ;;  %v13947_v60 = vpop.permute.xlu1 %2099  ;;  %v3207_v59 = vld [vmem:[#allocation6 + $0x1620] sm:$0xff]  ;;  %v2409_v3 = vsel %vm2243_vm5, %v2407_v54, %v13905_v31 }
 0x362   :  { %8878 = vmatpush2.bf16.msra.mxu0 %v11468_v56  ;;  %v3307_v16 = vld [vmem:[#allocation6 + $0x1940] sm:$0xff]  ;;  %v11589_v12 = vcombine.high %v3203_v58, %v3207_v59  ;;  %v11588_v34 = vcombine.low %v3203_v58, %v3207_v59  ;;  %v2411_v11 = vsel %vm2246_vm6, %v2409_v3, %v13915_v45 }
 0x363   :  { %8879 = vmatprep.subr.bf16.mxu0 %v11461_v32  ;;  %8915 = vmatpush2.bf16.msra.mxu1 %v11612_v17  ;;  %v13949_v46 = vpop.permute.xlu0 %2134  ;;  %v3311_v37 = vld [vmem:[#allocation6 + $0x1960] sm:$0xff]  ;;  %v2413_v40 = vsel %vm2249_vm7, %v2411_v11, %v13920_v61 }
 0x364   :  { %8916 = vmatprep.subr.bf16.mxu1 %v11605_v24  ;;  %v3451_v51 = vld [vmem:[#allocation6 + $0x1dc0] sm:$0xff]  ;;  %v11693_v47 = vcombine.high %v3307_v16, %v3311_v37  ;;  %v11692_v26 = vcombine.low %v3307_v16, %v3311_v37  ;;  %v2453_v16 = vsel %vm2236_vm3, %v13581_v42, %v13949_v46 }
 0x365   :  { %v3455_v56 = vld [vmem:[#allocation6 + $0x1de0] sm:$0xff] }
 0x366   :  { %8880 = vmatpush2.bf16.msra.mxu0 %v11460_v41  ;;  %v13957_v14 = vpop.permute.xlu1 %2104  ;;  %v3299_v25 = vld [vmem:[#allocation6 + $0x1900] sm:$0xff]  ;;  %v11837_v32 = vcombine.high %v3451_v51, %v3455_v56  ;;  %v11836_v4 = vcombine.low %v3451_v51, %v3455_v56 }
 0x367   :  { %8931 = vmatprep.subr.bf16.mxu0 %v11709_v57  ;;  %8917 = vmatpush2.bf16.msra.mxu1 %v11604_v30  ;;  %v13966_v0 = vpop.permute.xlu0 %2139  ;;  %v3303_v20 = vld [vmem:[#allocation6 + $0x1920] sm:$0xff]  ;;  %v2415_v57 = vsel %vm2252_vm8, %v2413_v40, %v13926_v8 }
 0x368   :  { %8918 = vmatprep.subr.bf16.mxu1 %v11597_v39  ;;  %v3443_v17 = vld [vmem:[#allocation6 + $0x1d80] sm:$0xff]  ;;  %v11685_v24 = vcombine.high %v3299_v25, %v3303_v20  ;;  %v13989_v45 = vsel %vm2255_vm9, %v2415_v57, %v13938_v44  ;;  %v11684_v15 = vcombine.low %v3299_v25, %v3303_v20  ;;  %v2455_v25 = vsel %vm2240_vm4, %v2453_v16, %v13966_v0 }
 0x369   :  { %8882 = vmatmul.mubr.bf16.vlgmr.msra.gmra.mxu0 %v13964_v27  ;;  %v3447_v1 = vld [vmem:[#allocation6 + $0x1da0] sm:$0xff] }
 0x36a   :  { %8932 = vmatpush1.bf16.msra.mxu0 %v11708_v18  ;;  %v13971_v35 = vpop.permute.xlu1 %2204  ;;  %v3291_v52 = vld [vmem:[#allocation6 + $0x18c0] sm:$0xff]  ;;  %v11829_v30 = vcombine.high %v3443_v17, %v3447_v1  ;;  %v11828_v8 = vcombine.low %v3443_v17, %v3447_v1 }
 0x36b   :  { %8933 = vmatprep.subr.bf16.mxu0 %v11701_v29  ;;  %8919 = vmatpush2.bf16.msra.mxu1 %v11596_v43  ;;  %v13973_v22 = vpop.permute.xlu0 %2144  ;;  %v3295_v31 = vld [vmem:[#allocation6 + $0x18e0] sm:$0xff] }
 0x36c   :  { %8920 = vmatprep.subr.bf16.mxu1 %v11589_v12  ;;  %v3435_v21 = vld [vmem:[#allocation6 + $0x1d40] sm:$0xff]  ;;  %v11677_v39 = vcombine.high %v3291_v52, %v3295_v31  ;;  %v11676_v44 = vcombine.low %v3291_v52, %v3295_v31  ;;  %v2457_v1 = vsel %vm2243_vm5, %v2455_v25, %v13973_v22 }
 0x36d   :  { %v3439_v7 = vld [vmem:[#allocation6 + $0x1d60] sm:$0xff] }
 0x36e   :  { %8934 = vmatpush1.bf16.msra.mxu0 %v11700_v38  ;;  %v13979_v5 = vpop.permute.xlu1 %2149  ;;  %v3283_v18 = vld [vmem:[#allocation6 + $0x1880] sm:$0xff]  ;;  %v11821_v59 = vcombine.high %v3435_v21, %v3439_v7  ;;  %v11820_v12 = vcombine.low %v3435_v21, %v3439_v7 }
 0x36f   :  { %8935 = vmatprep.subr.bf16.mxu0 %v11693_v47  ;;  %8921 = vmatpush2.bf16.msra.mxu1 %v11588_v34  ;;  %v13983_v41 = vpop.permute.xlu0 %2109  ;;  %v3287_v58 = vld [vmem:[#allocation6 + $0x18a0] sm:$0xff] }
 0x370   :  { %8972 = vmatprep.subr.bf16.mxu1 %v11837_v32  ;;  %v3427_v36 = vld [vmem:[#allocation6 + $0x1d00] sm:$0xff]  ;;  %v11669_v43 = vcombine.high %v3283_v18, %v3287_v58  ;;  %v11668_v54 = vcombine.low %v3283_v18, %v3287_v58 }
 0x371   :  { %v3431_v29 = vld [vmem:[#allocation6 + $0x1d20] sm:$0xff] }
 0x372   :  { %8936 = vmatpush1.bf16.msra.mxu0 %v11692_v26  ;;  %8923 = vmatmul.mubr.bf16.vlgmr.msra.gmra.mxu1 %v13989_v45  ;;  %v13992_v61 = vpop.permute.xlu1 %2209  ;;  %v3275_v38 = vld [vmem:[#allocation6 + $0x1840] sm:$0xff]  ;;  %v11813_v56 = vcombine.high %v3427_v36, %v3431_v29  ;;  %v11812_v46 = vcombine.low %v3427_v36, %v3431_v29 }
 0x373   :  { %8937 = vmatprep.subr.bf16.mxu0 %v11685_v24  ;;  %8973 = vmatpush1.bf16.msra.mxu1 %v11836_v4  ;;  %v13994_v62 = vpop.permute.xlu0 %2169  ;;  %v3279_v51 = vld [vmem:[#allocation6 + $0x1860] sm:$0xff] }
 0x374   :  { %8974 = vmatprep.subr.bf16.mxu1 %v11829_v30  ;;  %v3419_v47 = vld [vmem:[#allocation6 + $0x1cc0] sm:$0xff]  ;;  %v11661_v32 = vcombine.high %v3275_v38, %v3279_v51  ;;  %v11660_v11 = vcombine.low %v3275_v38, %v3279_v51 }
 0x375   :  { %v3423_v34 = vld [vmem:[#allocation6 + $0x1ce0] sm:$0xff] }
 0x376   :  { %8938 = vmatpush1.bf16.msra.mxu0 %v11684_v15  ;;  %v2155_v63 = vpop.permute.xlu1 %2154  ;;  %v3267_v3 = vld [vmem:[#allocation6 + $0x1800] sm:$0xff]  ;;  %v11805_v17 = vcombine.high %v3419_v47, %v3423_v34  ;;  %v11804_v31 = vcombine.low %v3419_v47, %v3423_v34  ;;  %v2459_v15 = vsel %vm2246_vm6, %v2457_v1, %v13979_v5 }
 0x377   :  { %8939 = vmatprep.subr.bf16.mxu0 %v11677_v39  ;;  %8975 = vmatpush1.bf16.msra.mxu1 %v11828_v8  ;;  %v13999_v37 = vpop.permute.xlu0 %2114  ;;  %v3271_v26 = vld [vmem:[#allocation6 + $0x1820] sm:$0xff]  ;;  %v2461_v58 = vsel %vm2249_vm7, %v2459_v15, %v2155_v63 }
 0x378   :  { %8976 = vmatprep.subr.bf16.mxu1 %v11821_v59  ;;  %v3411_v24 = vld [vmem:[#allocation6 + $0x1c80] sm:$0xff]  ;;  %v11653_v4 = vcombine.high %v3267_v3, %v3271_v26  ;;  %v11652_v22 = vcombine.low %v3267_v3, %v3271_v26 }
 0x379   :  { %v3415_v40 = vld [vmem:[#allocation6 + $0x1ca0] sm:$0xff] }
 0x37a   :  { %8940 = vmatpush1.bf16.msra.mxu0 %v11676_v44  ;;  %v14003_v20 = vpop.permute.xlu1 %2214  ;;  %v3387_v57 = vld [vmem:[#allocation6 + $0x1bc0] sm:$0xff]  ;;  %v11797_v21 = vcombine.high %v3411_v24, %v3415_v40  ;;  %v11796_v44 = vcombine.low %v3411_v24, %v3415_v40 }
 0x37b   :  { %8941 = vmatprep.subr.bf16.mxu0 %v11669_v43  ;;  %8977 = vmatpush1.bf16.msra.mxu1 %v11820_v12  ;;  %v14005_v42 = vpop.permute.xlu0 %2174  ;;  %v3391_v30 = vld [vmem:[#allocation6 + $0x1be0] sm:$0xff] }
 0x37c   :  { %8978 = vmatprep.subr.bf16.mxu1 %v11813_v56  ;;  %v3403_v7 = vld [vmem:[#allocation6 + $0x1c40] sm:$0xff]  ;;  %v11773_v18 = vcombine.high %v3387_v57, %v3391_v30  ;;  %v11772_v43 = vcombine.low %v3387_v57, %v3391_v30 }
 0x37d   :  { %v3407_v39 = vld [vmem:[#allocation6 + $0x1c60] sm:$0xff] }
 0x37e   :  { %8942 = vmatpush1.bf16.msra.mxu0 %v11668_v54  ;;  %v2160_v0 = vpop.permute.xlu1 %2159  ;;  %v3379_v36 = vld [vmem:[#allocation6 + $0x1b80] sm:$0xff]  ;;  %v11789_v5 = vcombine.high %v3403_v7, %v3407_v39  ;;  %v11788_v47 = vcombine.low %v3403_v7, %v3407_v39 }
 0x37f   :  { %8943 = vmatprep.subr.bf16.mxu0 %v11661_v32  ;;  %8979 = vmatpush1.bf16.msra.mxu1 %v11812_v46  ;;  %v14009_v52 = vpop.permute.xlu0 %2119  ;;  %v3383_v29 = vld [vmem:[#allocation6 + $0x1ba0] sm:$0xff]  ;;  %v2463_v38 = vsel %vm2252_vm8, %v2461_v58, %v2160_v0  ;;  %v2485_v0 = vsel %vm2236_vm3, %v13654_v10, %v13971_v35 }
 0x380   :  { %8980 = vmatprep.subr.bf16.mxu1 %v11805_v17  ;;  %v3395_v16 = vld [vmem:[#allocation6 + $0x1c00] sm:$0xff]  ;;  %v11765_v56 = vcombine.high %v3379_v36, %v3383_v29  ;;  %v11764_v46 = vcombine.low %v3379_v36, %v3383_v29 }
 0x381   :  { %v3399_v12 = vld [vmem:[#allocation6 + $0x1c20] sm:$0xff] }
 0x382   :  { %8944 = vmatpush1.bf16.msra.mxu0 %v11660_v11  ;;  %v14013_v8 = vpop.permute.xlu1 %2219  ;;  %v3371_v34 = vld [vmem:[#allocation6 + $0x1b40] sm:$0xff]  ;;  %v11781_v32 = vcombine.high %v3395_v16, %v3399_v12  ;;  %v11780_v11 = vcombine.low %v3395_v16, %v3399_v12 }
 0x383   :  { %8945 = vmatprep.subr.bf16.mxu0 %v11653_v4  ;;  %8981 = vmatpush1.bf16.msra.mxu1 %v11804_v31  ;;  %v14016_v59 = vpop.permute.xlu0 %2179  ;;  %v3375_v25 = vld [vmem:[#allocation6 + $0x1b60] sm:$0xff] }
 0x384   :  { %8982 = vmatprep.subr.bf16.mxu1 %v11797_v21  ;;  %v3515_v3 = vld [vmem:[#allocation6 + $0x1fc0] sm:$0xff]  ;;  %v11757_v17 = vcombine.high %v3371_v34, %v3375_v25  ;;  %v11756_v31 = vcombine.low %v3371_v34, %v3375_v25  ;;  %v2487_v21 = vsel %vm2240_vm4, %v2485_v0, %v13992_v61 }
 0x385   :  { %v3519_v26 = vld [vmem:[#allocation6 + $0x1fe0] sm:$0xff]  ;;  %v2489_v36 = vsel %vm2243_vm5, %v2487_v21, %v14003_v20 }
 0x386   :  { %8946 = vmatpush1.bf16.msra.mxu0 %v11652_v22  ;;  %v2165_v51 = vpop.permute.xlu1 %2164  ;;  %v3363_v24 = vld [vmem:[#allocation6 + $0x1b00] sm:$0xff]  ;;  %v11901_v4 = vcombine.high %v3515_v3, %v3519_v26  ;;  %v11900_v7 = vcombine.low %v3515_v3, %v3519_v26 }
 0x387   :  { %8947 = vmatprep.subr.bf16.mxu0 %v11773_v18  ;;  %8983 = vmatpush1.bf16.msra.mxu1 %v11796_v44  ;;  %v14020_v63 = vsel %vm2255_vm9, %v2463_v38, %v2165_v51  ;;  %v14022_v54 = vpop.permute.xlu0 %2124  ;;  %v3367_v40 = vld [vmem:[#allocation6 + $0x1b20] sm:$0xff]  ;;  %v2491_v51 = vsel %vm2246_vm6, %v2489_v36, %v14013_v8 }
 0x388   :  { %8963 = vmatprep.mubr.bf16.mxu0 %v14020_v63  ;;  %8984 = vmatprep.subr.bf16.mxu1 %v11789_v5  ;;  %v3507_v57 = vld [vmem:[#allocation6 + $0x1f80] sm:$0xff]  ;;  %v11749_v15 = vcombine.high %v3363_v24, %v3367_v40  ;;  %v11748_v10 = vcombine.low %v3363_v24, %v3367_v40  ;;  %v2437_v24 = vsel %vm2236_vm3, %v13578_v23, %v13947_v60 }
 0x389   :  { %v3511_v30 = vld [vmem:[#allocation6 + $0x1fa0] sm:$0xff]  ;;  %v2439_v21 = vsel %vm2240_vm4, %v2437_v24, %v13957_v14  ;;  %v2684_v24 = vld [vmem:[#allocation6 + $0x5c8] sm:$0xff] }
 0x38a   :  { %8948 = vmatpush2.bf16.msra.mxu0 %v11772_v43  ;;  %v3355_v39 = vld [vmem:[#allocation6 + $0x1ac0] sm:$0xff]  ;;  %v11893_v58 = vcombine.high %v3507_v57, %v3511_v30  ;;  %v2225_v5 = vpop.permute.xlu1 %2224  ;;  %v11892_v43 = vcombine.low %v3507_v57, %v3511_v30 }
 0x38b   :  { %8949 = vmatprep.subr.bf16.mxu0 %v11765_v56  ;;  %8985 = vmatpush1.bf16.msra.mxu1 %v11788_v47  ;;  %v14025_v1 = vpop.permute.xlu0 %2184  ;;  %v3359_v18 = vld [vmem:[#allocation6 + $0x1ae0] sm:$0xff]  ;;  %v2493_v25 = vsel %vm2249_vm7, %v2491_v51, %v2225_v5  ;;  %v2552_v51 = vld [vmem:[#allocation6 + $0x1a8] sm:$0xff] }
 0x38c   :  { %8986 = vmatprep.subr.bf16.mxu1 %v11781_v32  ;;  %v3499_v35 = vld [vmem:[#allocation6 + $0x1f40] sm:$0xff]  ;;  %v11741_v29 = vcombine.high %v3355_v39, %v3359_v18  ;;  %v11740_v56 = vcombine.low %v3355_v39, %v3359_v18 }
 0x38d   :  { %v3503_v44 = vld [vmem:[#allocation6 + $0x1f60] sm:$0xff] }
 0x38e   :  { %8950 = vmatpush2.bf16.msra.mxu0 %v11764_v46  ;;  %v3347_v16 = vld [vmem:[#allocation6 + $0x1a80] sm:$0xff]  ;;  %v11885_v38 = vcombine.high %v3499_v35, %v3503_v44  ;;  %v11884_v3 = vcombine.low %v3499_v35, %v3503_v44  ;;  %v2556_v35 = vld [vmem:[#allocation6 + $0x1c8] sm:$0xff] }
 0x38f   :  { %8951 = vmatprep.subr.bf16.mxu0 %v11757_v17  ;;  %8987 = vmatpush1.bf16.msra.mxu1 %v11780_v11  ;;  %v14032_v22 = vpop.permute.xlu0 %2129  ;;  %v3351_v12 = vld [vmem:[#allocation6 + $0x1aa0] sm:$0xff]  ;;  %v2560_v44 = vld [vmem:[#allocation6 + $0x1e8] sm:$0xff] }
 0x390   :  { %8988 = vmatprep.subr.bf16.mxu1 %v11901_v4  ;;  %v3491_v47 = vld [vmem:[#allocation6 + $0x1f00] sm:$0xff]  ;;  %v11733_v20 = vcombine.high %v3347_v16, %v3351_v12  ;;  %v11732_v40 = vcombine.low %v3347_v16, %v3351_v12  ;;  %v10943_v16 = vcombine.high %v2556_v35, %v2560_v44 }
 0x391   :  { %v3495_v34 = vld [vmem:[#allocation6 + $0x1f20] sm:$0xff] }
 0x392   :  { %8952 = vmatpush2.bf16.msra.mxu0 %v11756_v31  ;;  %v3339_v26 = vld [vmem:[#allocation6 + $0x1a40] sm:$0xff]  ;;  %v11877_v8 = vcombine.high %v3491_v47, %v3495_v34  ;;  %v11876_v57 = vcombine.low %v3491_v47, %v3495_v34  ;;  %v10942_v34 = vcombine.low %v2556_v35, %v2560_v44 }
 0x393   :  { %8953 = vmatprep.subr.bf16.mxu0 %v11749_v15  ;;  %8989 = vmatpush2.bf16.msra.mxu1 %v11900_v7  ;;  %v2230_v61 = vpop.permute.xlu0 %2229  ;;  %v3343_v17 = vld [vmem:[#allocation6 + $0x1a60] sm:$0xff] }
 0x394   :  { %8990 = vmatprep.subr.bf16.mxu1 %v11893_v58  ;;  %v2495_v32 = vsel %vm2252_vm8, %v2493_v25, %v2230_v61  ;;  %v3483_v0 = vld [vmem:[#allocation6 + $0x1ec0] sm:$0xff]  ;;  %v11725_v31 = vcombine.high %v3339_v26, %v3343_v17  ;;  %v11724_v39 = vcombine.low %v3339_v26, %v3343_v17  ;;  %v2441_v58 = vsel %vm2243_vm5, %v2439_v21, %v13983_v41  ;;  %v2536_v21 = vld [vmem:[#allocation6 + $0x128] sm:$0xff] }
 0x395   :  { %v3487_v4 = vld [vmem:[#allocation6 + $0x1ee0] sm:$0xff]  ;;  %v2443_v61 = vsel %vm2246_vm6, %v2441_v58, %v13999_v37  ;;  %v2469_v41 = vsel %vm2236_vm3, %v13700_v50, %v13994_v62  ;;  %v2680_v58 = vld [vmem:[#allocation6 + $0x5a8] sm:$0xff] }
 0x396   :  { %8954 = vmatpush2.bf16.msra.mxu0 %v11748_v10  ;;  %v3331_v30 = vld [vmem:[#allocation6 + $0x1a00] sm:$0xff]  ;;  %v11869_v7 = vcombine.high %v3483_v0, %v3487_v4  ;;  %v11868_v10 = vcombine.low %v3483_v0, %v3487_v4  ;;  %v2445_v47 = vsel %vm2249_vm7, %v2443_v61, %v14009_v52  ;;  %v2544_v52 = vld [vmem:[#allocation6 + $0x168] sm:$0xff] }
 0x397   :  { %8955 = vmatprep.subr.bf16.mxu0 %v11741_v29  ;;  %8991 = vmatpush2.bf16.msra.mxu1 %v11892_v43  ;;  %v2235_v46 = vpop.permute.xlu0 %2234  ;;  %v3335_v15 = vld [vmem:[#allocation6 + $0x1a20] sm:$0xff]  ;;  %v2190_v43 = vpop.permute.xlu1 %2189  ;;  %v2528_v61 = vld [vmem:[#allocation6 + $0xe8] sm:$0xff] }
 0x398   :  { %v14041_v11 = vsel %vm2255_vm9, %v2495_v32, %v2235_v46  ;;  %8992 = vmatprep.subr.bf16.mxu1 %v11885_v38  ;;  %v3475_v23 = vld [vmem:[#allocation6 + $0x1e80] sm:$0xff]  ;;  %v11717_v18 = vcombine.high %v3331_v30, %v3335_v15  ;;  %v11716_v29 = vcombine.low %v3331_v30, %v3335_v15  ;;  %v2548_v38 = vld [vmem:[#allocation6 + $0x188] sm:$0xff]  ;;  %v2447_v32 = vsel %vm2252_vm8, %v2445_v47, %v14022_v54 }
 0x399   :  { %9004 = vmatprep.mubr.bf16.mxu1 %v14041_v11  ;;  %v3479_v60 = vld [vmem:[#allocation6 + $0x1ea0] sm:$0xff]  ;;  %v10935_v50 = vcombine.high %v2548_v38, %v2552_v51  ;;  %v14064_v62 = vsel %vm2255_vm9, %v2447_v32, %v14032_v22  ;;  %v3527_v54 = vsub.s32 0, %v12988_v33  ;;  %v10934_v22 = vcombine.low %v2548_v38, %v2552_v51  ;;  %v2532_v15 = vld [vmem:[#allocation6 + $0x108] sm:$0xff] }
 0x39a   :  { %8956 = vmatpush2.bf16.msra.mxu0 %v11740_v56  ;;  %v11861_v36 = vcombine.high %v3475_v23, %v3479_v60  ;;  %v3467_v14 = vld [vmem:[#allocation6 + $0x1e40] sm:$0xff]  ;;  %v11860_v12 = vcombine.low %v3475_v23, %v3479_v60  ;;  %v10919_v44 = vcombine.high %v2532_v15, %v2536_v21  ;;  %v10918_v38 = vcombine.low %v2532_v15, %v2536_v21  ;;  %v2668_v51 = vld [vmem:[#allocation6 + $0x548] sm:$0xff] }
 0x39b   :  { %8957 = vmatprep.subr.bf16.mxu0 %v11733_v20  ;;  %8993 = vmatpush2.bf16.msra.mxu1 %v11884_v3  ;;  %v3471_v5 = vld [vmem:[#allocation6 + $0x1e60] sm:$0xff]  ;;  %v2471_v20 = vsel %vm2240_vm4, %v2469_v41, %v14005_v42  ;;  %v2540_v3 = vld [vmem:[#allocation6 + $0x148] sm:$0xff]  ;;  %v2195_v26 = vpop.permute.xlu1 %2194 }
 0x39c   :  { %8994 = vmatprep.subr.bf16.mxu1 %v11877_v8  ;;  %v11853_v56 = vcombine.high %v3467_v14, %v3471_v5  ;;  %v3459_v25 = vld [vmem:[#allocation6 + $0x1e00] sm:$0xff]  ;;  %v11852_v46 = vcombine.low %v3467_v14, %v3471_v5  ;;  %v2473_v42 = vsel %vm2243_vm5, %v2471_v20, %v14016_v59  ;;  %v10926_v60 = vcombine.low %v2540_v3, %v2544_v52  ;;  %v2524_v5 = vld [vmem:[#allocation6 + $0xc8] sm:$0xff] }
 0x39d   :  { %v3463_v37 = vld [vmem:[#allocation6 + $0x1e20] sm:$0xff]  ;;  %v2475_v59 = vsel %vm2246_vm6, %v2473_v42, %v14025_v1  ;;  %v10911_v47 = vcombine.high %v2524_v5, %v2528_v61  ;;  %v2516_v20 = vld [vmem:[#allocation6 + $0x88] sm:$0xff] }
 0x39e   :  { %8958 = vmatpush2.bf16.msra.mxu0 %v11732_v40  ;;  %v11845_v8 = vcombine.high %v3459_v25, %v3463_v37  ;;  %v2688_v40 = vld [vmem:[#allocation6 + $0x5e8] sm:$0xff]  ;;  %v3523_v0 = vld [vmem:[#allocation8] sm:$0xff]  ;;  %v11844_v30 = vcombine.low %v3459_v25, %v3463_v37 }
 0x39f   :  { %8959 = vmatprep.subr.bf16.mxu0 %v11725_v31  ;;  %8995 = vmatpush2.bf16.msra.mxu1 %v11876_v57  ;;  %v10927_v31 = vcombine.high %v2540_v3, %v2544_v52  ;;  %v3531_v57 = vsub.s32 1, %v12988_v33  ;;  %v3528_v23 = vrot.slane %v3523_v0, %v3527_v54  ;;  %v11070_v14 = vcombine.low %v2684_v24, %v2688_v40  ;;  %v2520_v32 = vld [vmem:[#allocation6 + $0xa8] sm:$0xff] }
 0x3a0   :  { %8996 = vmatprep.subr.bf16.mxu1 %v11869_v7  ;;  %v10910_v52 = vcombine.low %v2524_v5, %v2528_v61  ;;  %v10903_v42 = vcombine.high %v2516_v20, %v2520_v32  ;;  %v2500_v21 = vld [vmem:[#allocation6 + $0x8] sm:$0xff] }
 0x3a2   :  { %8960 = vmatpush2.bf16.msra.mxu0 %v11724_v39  ;;  %v11071_v39 = vcombine.high %v2684_v24, %v2688_v40  ;;  %v2512_v24 = vld [vmem:[#allocation6 + $0x68] sm:$0xff] }
 0x3a3   :  { %8961 = vmatprep.subr.bf16.mxu0 %v11717_v18  ;;  %8997 = vmatpush2.bf16.msra.mxu1 %v11868_v10  ;;  %v2676_v18 = vld [vmem:[#allocation6 + $0x588] sm:$0xff]  ;;  %v2200_v10 = vpop.permute.xlu1 %2199 }
 0x3a4   :  { %8998 = vmatprep.subr.bf16.mxu1 %v11861_v36  ;;  %v2477_v36 = vsel %vm2249_vm7, %v2475_v59, %v2190_v43  ;;  %v11062_v37 = vcombine.low %v2676_v18, %v2680_v58  ;;  %v2504_v59 = vld [vmem:[#allocation6 + $0x28] sm:$0xff] }
 0x3a5   :  { %v2479_v1 = vsel %vm2252_vm8, %v2477_v36, %v2195_v26  ;;  %v2660_v26 = vld [vmem:[#allocation6 + $0x508] sm:$0xff]  ;;  %v10886_v36 = vcombine.low %v2500_v21, %v2504_v59 }
 0x3a6   :  { %8962 = vmatpush2.bf16.msra.mxu0 %v11716_v29  ;;  %v3532_v29 = vrot.slane %v3523_v0, %v3531_v57  ;;  %v14077_v41 = vsel %vm2255_vm9, %v2479_v1, %v2200_v10  ;;  %v2656_v57 = vld [vmem:[#allocation6 + $0x4e8] sm:$0xff] }
 0x3a7   :  { %9013 = vmatprep.subr.bf16.mxu0 %v10943_v16  ;;  %8999 = vmatpush2.bf16.msra.mxu1 %v11860_v12  ;;  %v11063_v16 = vcombine.high %v2676_v18, %v2680_v58  ;;  %v10887_v18 = vcombine.high %v2500_v21, %v2504_v59  ;;  %v2620_v10 = vld [vmem:[#allocation6 + $0x3c8] sm:$0xff] }
 0x3a8   :  { %9000 = vmatprep.subr.bf16.mxu1 %v11853_v56  ;;  %v2672_v56 = vld [vmem:[#allocation6 + $0x568] sm:$0xff] }
 0x3a9   :  { %8964 = vmatmul.mubr.bf16.vlgmr.msra.gmra.mxu0 %v14064_v62  ;;  %v8719_v17 = vpop.f32.mrf.mxu0  ;;  %v11054_v54 = vcombine.low %v2668_v51, %v2672_v56  ;;  %v2612_v1 = vld [vmem:[#allocation6 + $0x388] sm:$0xff] }
 0x3aa   :  { %9014 = vmatpush1.bf16.msra.mxu0 %v10942_v34  ;;  %9045 = vmatprep.mubr.bf16.mxu0 %v13494_v49  ;;  %v8720_v12 = vadd.f32 %v8719_v17, %v3528_v23  ;;  %v2664_v17 = vld [vmem:[#allocation6 + $0x528] sm:$0xff] }
 0x3ab   :  { %v8721_v4 = vpop.f32.mrf.mxu0  ;;  %9015 = vmatprep.subr.bf16.mxu0 %v10935_v50  ;;  %9001 = vmatpush2.bf16.msra.mxu1 %v11852_v46  ;;  %v11055_v46 = vcombine.high %v2668_v51, %v2672_v56  ;;  %v11047_v0 = vcombine.high %v2660_v26, %v2664_v17  ;;  %v11046_v15 = vcombine.low %v2660_v26, %v2664_v17  ;;  %v2644_v23 = vld [vmem:[#allocation6 + $0x488] sm:$0xff] }
 0x3ac   :  { %9002 = vmatprep.subr.bf16.mxu1 %v11845_v8  ;;  %v8722_v34 = vadd.f32 %v8721_v4, %v3532_v29  ;;  %v10902_v4 = vcombine.low %v2516_v20, %v2520_v32  ;;  %v2636_v29 = vld [vmem:[#allocation6 + $0x448] sm:$0xff] }
 0x3ad   :  { %v8723_v7 = vpop.f32.mrf.mxu0  ;;  %v2628_v51 = vld [vmem:[#allocation6 + $0x408] sm:$0xff] }
 0x3ae   :  { %9016 = vmatpush1.bf16.msra.mxu0 %v10934_v22  ;;  %v2508_v22 = vld [vmem:[#allocation6 + $0x48] sm:$0xff] }
 0x3af   :  { %v8724_v35 = vpop.f32.mrf.mxu0  ;;  %9017 = vmatprep.subr.bf16.mxu0 %v10927_v31  ;;  %9003 = vmatpush2.bf16.msra.mxu1 %v11844_v30  ;;  %v2652_v31 = vld [vmem:[#allocation6 + $0x4c8] sm:$0xff]  ;;  %v10895_v30 = vcombine.high %v2508_v22, %v2512_v24 }
 0x3b0   :  { %9054 = vmatprep.subr.bf16.mxu1 %v11071_v39  ;;  %v11039_v7 = vcombine.high %v2652_v31, %v2656_v57  ;;  %v10894_v39 = vcombine.low %v2508_v22, %v2512_v24  ;;  %v11038_v58 = vcombine.low %v2652_v31, %v2656_v57  ;;  %v2624_v35 = vld [vmem:[#allocation6 + $0x3e8] sm:$0xff] }
 0x3b1   :  { %v11007_v5 = vcombine.high %v2620_v10, %v2624_v35  ;;  %v2632_v56 = vld [vmem:[#allocation6 + $0x428] sm:$0xff] }
 0x3b2   :  { %9018 = vmatpush1.bf16.msra.mxu0 %v10926_v60  ;;  %9005 = vmatmul.mubr.bf16.vlgmr.msra.gmra.mxu1 %v14077_v41  ;;  %v8760_v43 = vpop.f32.mrf.mxu1  ;;  %v2648_v60 = vld [vmem:[#allocation6 + $0x4a8] sm:$0xff]  ;;  %v11015_v20 = vcombine.high %v2628_v51, %v2632_v56  ;;  %v11014_v26 = vcombine.low %v2628_v51, %v2632_v56 }
 0x3b3   :  { %9019 = vmatprep.subr.bf16.mxu0 %v10919_v44  ;;  %v14080_v25 = vadd.f32 %v8760_v43, %v8720_v12  ;;  %9055 = vmatpush1.bf16.msra.mxu1 %v11070_v14  ;;  %v11031_v44 = vcombine.high %v2644_v23, %v2648_v60  ;;  %v2640_v14 = vld [vmem:[#allocation6 + $0x468] sm:$0xff]  ;;  %v11030_v61 = vcombine.low %v2644_v23, %v2648_v60 }
 0x3b4   :  { %9086 = vmatprep.mubr.bf16.mxu1 %v13604_v6  ;;  %v8762_v50 = vpop.f32.mrf.mxu1  ;;  %9056 = vmatprep.subr.bf16.mxu1 %v11063_v16  ;;  %v2616_v16 = vld [vmem:[#allocation6 + $0x3a8] sm:$0xff]  ;;  %v11023_v12 = vcombine.high %v2636_v29, %v2640_v14 }
 0x3b5   :  { %v14083_v3 = vadd.f32 %v8762_v50, %v8722_v34  ;;  %v10999_v43 = vcombine.high %v2612_v1, %v2616_v16  ;;  %v2604_v34 = vld [vmem:[#allocation6 + $0x348] sm:$0xff]  ;;  %v10998_v32 = vcombine.low %v2612_v1, %v2616_v16 }
 0x3b6   :  { %9020 = vmatpush1.bf16.msra.mxu0 %v10918_v38  ;;  %v8764_v8 = vpop.f32.mrf.mxu1  ;;  %v11006_v38 = vcombine.low %v2620_v10, %v2624_v35  ;;  %v2748_v50 = vld [vmem:[#allocation6 + $0x7c8] sm:$0xff] }
 0x3b7   :  { %9021 = vmatprep.subr.bf16.mxu0 %v10911_v47  ;;  %9057 = vmatpush1.bf16.msra.mxu1 %v11062_v37  ;;  %v11022_v47 = vcombine.low %v2636_v29, %v2640_v14  ;;  %v2608_v37 = vld [vmem:[#allocation6 + $0x368] sm:$0xff] }
 0x3b8   :  { %v8765_v40 = vpop.f32.mrf.mxu1  ;;  %9058 = vmatprep.subr.bf16.mxu1 %v11055_v46  ;;  %v2752_v46 = vld [vmem:[#allocation6 + $0x7e8] sm:$0xff] }
 0x3b9   :  { %v2596_v17 = vld [vmem:[#allocation6 + $0x308] sm:$0xff] }
 0x3ba   :  { %9022 = vmatpush1.bf16.msra.mxu0 %v10910_v52  ;;  %v10991_v52 = vcombine.high %v2604_v34, %v2608_v37  ;;  %v2600_v8 = vld [vmem:[#allocation6 + $0x328] sm:$0xff] }
 0x3bb   :  { %9023 = vmatprep.subr.bf16.mxu0 %v10903_v42  ;;  %9059 = vmatpush1.bf16.msra.mxu1 %v11054_v54  ;;  %v11135_v42 = vcombine.high %v2748_v50, %v2752_v46  ;;  %v10990_v54 = vcombine.low %v2604_v34, %v2608_v37  ;;  %v2740_v22 = vld [vmem:[#allocation6 + $0x788] sm:$0xff]  ;;  %v10983_v40 = vcombine.high %v2596_v17, %v2600_v8 }
 0x3bc   :  { %9060 = vmatprep.subr.bf16.mxu1 %v11047_v0  ;;  %v2744_v24 = vld [vmem:[#allocation6 + $0x7a8] sm:$0xff]  ;;  %v11134_v0 = vcombine.low %v2748_v50, %v2752_v46 }
 0x3bd   :  { %v2592_v31 = vld [vmem:[#allocation6 + $0x2e8] sm:$0xff]  ;;  %v11127_v57 = vcombine.high %v2740_v22, %v2744_v24 }
 0x3be   :  { %9024 = vmatpush1.bf16.msra.mxu0 %v10902_v4  ;;  %v2588_v4 = vld [vmem:[#allocation6 + $0x2c8] sm:$0xff] }
 0x3bf   :  { %9025 = vmatprep.subr.bf16.mxu0 %v10895_v30  ;;  %9061 = vmatpush1.bf16.msra.mxu1 %v11046_v15  ;;  %v10982_v30 = vcombine.low %v2596_v17, %v2600_v8  ;;  %v2732_v15 = vld [vmem:[#allocation6 + $0x748] sm:$0xff]  ;;  %v10975_v59 = vcombine.high %v2588_v4, %v2592_v31 }
 0x3c0   :  { %9062 = vmatprep.subr.bf16.mxu1 %v11039_v7  ;;  %v2736_v21 = vld [vmem:[#allocation6 + $0x768] sm:$0xff]  ;;  %v11126_v7 = vcombine.low %v2740_v22, %v2744_v24 }
 0x3c1   :  { %v2584_v23 = vld [vmem:[#allocation6 + $0x2a8] sm:$0xff]  ;;  %v11119_v60 = vcombine.high %v2732_v15, %v2736_v21 }
 0x3c2   :  { %9026 = vmatpush1.bf16.msra.mxu0 %v10894_v39  ;;  %v2580_v39 = vld [vmem:[#allocation6 + $0x288] sm:$0xff] }
 0x3c3   :  { %9027 = vmatprep.subr.bf16.mxu0 %v10887_v18  ;;  %9063 = vmatpush1.bf16.msra.mxu1 %v11038_v58  ;;  %v10974_v18 = vcombine.low %v2588_v4, %v2592_v31  ;;  %v2724_v58 = vld [vmem:[#allocation6 + $0x708] sm:$0xff]  ;;  %v10967_v35 = vcombine.high %v2580_v39, %v2584_v23 }
 0x3c4   :  { %9064 = vmatprep.subr.bf16.mxu1 %v11031_v44  ;;  %v2728_v10 = vld [vmem:[#allocation6 + $0x728] sm:$0xff]  ;;  %v11118_v44 = vcombine.low %v2732_v15, %v2736_v21 }
 0x3c5   :  { %v2576_v29 = vld [vmem:[#allocation6 + $0x268] sm:$0xff]  ;;  %v11111_v14 = vcombine.high %v2724_v58, %v2728_v10 }
 0x3c6   :  { %9028 = vmatpush1.bf16.msra.mxu0 %v10886_v36  ;;  %v2572_v36 = vld [vmem:[#allocation6 + $0x248] sm:$0xff] }
 0x3c7   :  { %9029 = vmatprep.subr.bf16.mxu0 %v11007_v5  ;;  %9065 = vmatpush1.bf16.msra.mxu1 %v11030_v61  ;;  %v10966_v5 = vcombine.low %v2580_v39, %v2584_v23  ;;  %v2716_v61 = vld [vmem:[#allocation6 + $0x6c8] sm:$0xff]  ;;  %v10959_v16 = vcombine.high %v2572_v36, %v2576_v29 }
 0x3c8   :  { %9066 = vmatprep.subr.bf16.mxu1 %v11023_v12  ;;  %v2720_v1 = vld [vmem:[#allocation6 + $0x6e8] sm:$0xff]  ;;  %v11110_v12 = vcombine.low %v2724_v58, %v2728_v10 }
 0x3c9   :  { %v2568_v51 = vld [vmem:[#allocation6 + $0x228] sm:$0xff]  ;;  %v11103_v56 = vcombine.high %v2716_v61, %v2720_v1 }
 0x3ca   :  { %9030 = vmatpush2.bf16.msra.mxu0 %v11006_v38  ;;  %v2564_v38 = vld [vmem:[#allocation6 + $0x208] sm:$0xff] }
 0x3cb   :  { %9031 = vmatprep.subr.bf16.mxu0 %v10999_v43  ;;  %9067 = vmatpush1.bf16.msra.mxu1 %v11022_v47  ;;  %v10958_v43 = vcombine.low %v2572_v36, %v2576_v29  ;;  %v2708_v47 = vld [vmem:[#allocation6 + $0x688] sm:$0xff]  ;;  %v10951_v37 = vcombine.high %v2564_v38, %v2568_v51 }
 0x3cc   :  { %9068 = vmatprep.subr.bf16.mxu1 %v11015_v20  ;;  %v2712_v34 = vld [vmem:[#allocation6 + $0x6a8] sm:$0xff]  ;;  %v11102_v20 = vcombine.low %v2716_v61, %v2720_v1 }
 0x3cd   :  { %v2816_v50 = vld [vmem:[#allocation6 + $0x9e8] sm:$0xff]  ;;  %v11095_v46 = vcombine.high %v2708_v47, %v2712_v34 }
 0x3ce   :  { %9032 = vmatpush2.bf16.msra.mxu0 %v10998_v32  ;;  %v2812_v32 = vld [vmem:[#allocation6 + $0x9c8] sm:$0xff] }
 0x3cf   :  { %9033 = vmatprep.subr.bf16.mxu0 %v10991_v52  ;;  %9069 = vmatpush1.bf16.msra.mxu1 %v11014_v26  ;;  %v10950_v52 = vcombine.low %v2564_v38, %v2568_v51  ;;  %v2700_v26 = vld [vmem:[#allocation6 + $0x648] sm:$0xff]  ;;  %v11199_v8 = vcombine.high %v2812_v32, %v2816_v50 }
 0x3d0   :  { %9070 = vmatprep.subr.bf16.mxu1 %v11135_v42  ;;  %v2704_v17 = vld [vmem:[#allocation6 + $0x668] sm:$0xff]  ;;  %v11094_v42 = vcombine.low %v2708_v47, %v2712_v34 }
 0x3d1   :  { %v2808_v22 = vld [vmem:[#allocation6 + $0x9a8] sm:$0xff]  ;;  %v11087_v24 = vcombine.high %v2700_v26, %v2704_v17 }
 0x3d2   :  { %9034 = vmatpush2.bf16.msra.mxu0 %v10990_v54  ;;  %v2804_v54 = vld [vmem:[#allocation6 + $0x988] sm:$0xff] }
 0x3d3   :  { %9035 = vmatprep.subr.bf16.mxu0 %v10983_v40  ;;  %9071 = vmatpush2.bf16.msra.mxu1 %v11134_v0  ;;  %v11198_v40 = vcombine.low %v2812_v32, %v2816_v50  ;;  %v2692_v0 = vld [vmem:[#allocation6 + $0x608] sm:$0xff]  ;;  %v11191_v31 = vcombine.high %v2804_v54, %v2808_v22  ;;  %v11190_v39 = vcombine.low %v2804_v54, %v2808_v22 }
 0x3d4   :  { %9072 = vmatprep.subr.bf16.mxu1 %v11127_v57  ;;  %v2696_v4 = vld [vmem:[#allocation6 + $0x628] sm:$0xff]  ;;  %v11086_v57 = vcombine.low %v2700_v26, %v2704_v17 }
 0x3d5   :  { %v2800_v15 = vld [vmem:[#allocation6 + $0x968] sm:$0xff] }
 0x3d6   :  { %9036 = vmatpush2.bf16.msra.mxu0 %v10982_v30  ;;  %v2796_v30 = vld [vmem:[#allocation6 + $0x948] sm:$0xff] }
 0x3d7   :  { %9037 = vmatprep.subr.bf16.mxu0 %v10975_v59  ;;  %9073 = vmatpush2.bf16.msra.mxu1 %v11126_v7  ;;  %v11079_v59 = vcombine.high %v2692_v0, %v2696_v4  ;;  %v2940_v23 = vld [vmem:[#allocation6 + $0xdc8] sm:$0xff]  ;;  %v11183_v58 = vcombine.high %v2796_v30, %v2800_v15 }
 0x3d8   :  { %9074 = vmatprep.subr.bf16.mxu1 %v11119_v60  ;;  %v2944_v60 = vld [vmem:[#allocation6 + $0xde8] sm:$0xff] }
 0x3d9   :  { %v2792_v36 = vld [vmem:[#allocation6 + $0x928] sm:$0xff] }
 0x3da   :  { %9038 = vmatpush2.bf16.msra.mxu0 %v10974_v18  ;;  %v2936_v61 = vld [vmem:[#allocation6 + $0xda8] sm:$0xff] }
 0x3db   :  { %9039 = vmatprep.subr.bf16.mxu0 %v10967_v35  ;;  %9075 = vmatpush2.bf16.msra.mxu1 %v11118_v44  ;;  %v11078_v35 = vcombine.low %v2692_v0, %v2696_v4  ;;  %v2788_v44 = vld [vmem:[#allocation6 + $0x908] sm:$0xff] }
 0x3dc   :  { %9076 = vmatprep.subr.bf16.mxu1 %v11111_v14  ;;  %v11327_v14 = vcombine.high %v2940_v23, %v2944_v60  ;;  %v2780_v38 = vld [vmem:[#allocation6 + $0x8c8] sm:$0xff] }
 0x3dd   :  { %v2784_v51 = vld [vmem:[#allocation6 + $0x8e8] sm:$0xff] }
 0x3de   :  { %9040 = vmatpush2.bf16.msra.mxu0 %v10966_v5  ;;  %v2932_v5 = vld [vmem:[#allocation6 + $0xd88] sm:$0xff] }
 0x3df   :  { %9041 = vmatprep.subr.bf16.mxu0 %v10959_v16  ;;  %9077 = vmatpush2.bf16.msra.mxu1 %v11110_v12  ;;  %v11175_v16 = vcombine.high %v2788_v44, %v2792_v36  ;;  %v11326_v12 = vcombine.low %v2940_v23, %v2944_v60  ;;  %v2928_v47 = vld [vmem:[#allocation6 + $0xd68] sm:$0xff]  ;;  %v11318_v32 = vcombine.low %v2932_v5, %v2936_v61 }
 0x3e0   :  { %9078 = vmatprep.subr.bf16.mxu1 %v11103_v56  ;;  %v11174_v56 = vcombine.low %v2788_v44, %v2792_v36  ;;  %v2772_v50 = vld [vmem:[#allocation6 + $0x888] sm:$0xff] }
 0x3e1   :  { %v2920_v54 = vld [vmem:[#allocation6 + $0xd28] sm:$0xff] }
 0x3e2   :  { %9042 = vmatpush2.bf16.msra.mxu0 %v10958_v43  ;;  %v2924_v43 = vld [vmem:[#allocation6 + $0xd48] sm:$0xff] }
 0x3e3   :  { %9043 = vmatprep.subr.bf16.mxu0 %v10951_v37  ;;  %9079 = vmatpush2.bf16.msra.mxu1 %v11102_v20  ;;  %v11167_v37 = vcombine.high %v2780_v38, %v2784_v51  ;;  %v11311_v26 = vcombine.high %v2924_v43, %v2928_v47  ;;  %v2764_v0 = vld [vmem:[#allocation6 + $0x848] sm:$0xff] }
 0x3e4   :  { %9080 = vmatprep.subr.bf16.mxu1 %v11095_v46  ;;  %v2776_v46 = vld [vmem:[#allocation6 + $0x8a8] sm:$0xff] }
 0x3e5   :  { %v2768_v4 = vld [vmem:[#allocation6 + $0x868] sm:$0xff] }
 0x3e6   :  { %9044 = vmatpush2.bf16.msra.mxu0 %v10950_v52  ;;  %v2760_v23 = vld [vmem:[#allocation6 + $0x828] sm:$0xff] }
 0x3e7   :  { %9095 = vmatprep.subr.bf16.mxu0 %v11199_v8  ;;  %9081 = vmatpush2.bf16.msra.mxu1 %v11094_v42  ;;  %v11166_v8 = vcombine.low %v2780_v38, %v2784_v51  ;;  %v2916_v42 = vld [vmem:[#allocation6 + $0xd08] sm:$0xff] }
 0x3e8   :  { %9082 = vmatprep.subr.bf16.mxu1 %v11087_v24  ;;  %v11159_v24 = vcombine.high %v2772_v50, %v2776_v46  ;;  %v2876_v36 = vld [vmem:[#allocation6 + $0xbc8] sm:$0xff] }
 0x3e9   :  { %v8801_v21 = vpop.f32.mrf.mxu0  ;;  %9046 = vmatmul.mubr.bf16.vlgmr.msra.gmra.mxu0 %v13535_v2  ;;  %v2872_v38 = vld [vmem:[#allocation6 + $0xba8] sm:$0xff] }
 0x3ea   :  { %v8802_v7 = vadd.f32 %v8801_v21, %v14080_v25  ;;  %9096 = vmatpush1.bf16.msra.mxu0 %v11198_v40  ;;  %9127 = vmatprep.mubr.bf16.mxu0 %v13788_v19  ;;  %v11182_v25 = vcombine.low %v2796_v30, %v2800_v15  ;;  %v11310_v40 = vcombine.low %v2924_v43, %v2928_v47  ;;  %v2908_v15 = vld [vmem:[#allocation6 + $0xcc8] sm:$0xff] }
 0x3eb   :  { %v8803_v18 = vpop.f32.mrf.mxu0  ;;  %9097 = vmatprep.subr.bf16.mxu0 %v11191_v31  ;;  %9083 = vmatpush2.bf16.msra.mxu1 %v11086_v57  ;;  %v11303_v57 = vcombine.high %v2916_v42, %v2920_v54  ;;  %v11158_v30 = vcombine.low %v2772_v50, %v2776_v46  ;;  %v2912_v21 = vld [vmem:[#allocation6 + $0xce8] sm:$0xff] }
 0x3ec   :  { %v8804_v10 = vadd.f32 %v8803_v18, %v14083_v3  ;;  %9084 = vmatprep.subr.bf16.mxu1 %v11079_v59  ;;  %v11319_v3 = vcombine.high %v2932_v5, %v2936_v61  ;;  %v11151_v59 = vcombine.high %v2764_v0, %v2768_v4  ;;  %v11295_v60 = vcombine.high %v2908_v15, %v2912_v21  ;;  %v2892_v5 = vld [vmem:[#allocation6 + $0xc48] sm:$0xff] }
 0x3ed   :  { %v8805_v29 = vpop.f32.mrf.mxu0  ;;  %v11150_v18 = vcombine.low %v2764_v0, %v2768_v4  ;;  %v11294_v44 = vcombine.low %v2908_v15, %v2912_v21  ;;  %v2896_v61 = vld [vmem:[#allocation6 + $0xc68] sm:$0xff] }
 0x3ee   :  { %9098 = vmatpush1.bf16.msra.mxu0 %v11190_v39  ;;  %v2756_v39 = vld [vmem:[#allocation6 + $0x808] sm:$0xff]  ;;  %v11279_v51 = vcombine.high %v2892_v5, %v2896_v61 }
 0x3ef   :  { %v8806_v1 = vpop.f32.mrf.mxu0  ;;  %9099 = vmatprep.subr.bf16.mxu0 %v11183_v58  ;;  %9085 = vmatpush2.bf16.msra.mxu1 %v11078_v35  ;;  %v2900_v58 = vld [vmem:[#allocation6 + $0xc88] sm:$0xff]  ;;  %v11143_v35 = vcombine.high %v2756_v39, %v2760_v23 }
 0x3f0   :  { %9136 = vmatprep.subr.bf16.mxu1 %v11327_v14  ;;  %v2880_v29 = vld [vmem:[#allocation6 + $0xbe8] sm:$0xff] }
 0x3f1   :  { %v11263_v1 = vcombine.high %v2876_v36, %v2880_v29  ;;  %v2888_v43 = vld [vmem:[#allocation6 + $0xc28] sm:$0xff] }
 0x3f2   :  { %9100 = vmatpush1.bf16.msra.mxu0 %v11182_v25  ;;  %v8842_v34 = vpop.f32.mrf.mxu1  ;;  %9087 = vmatmul.mubr.bf16.vlgmr.msra.gmra.mxu1 %v13601_v9  ;;  %v11142_v25 = vcombine.low %v2756_v39, %v2760_v23  ;;  %v2996_v0 = vld [vmem:[#allocation6 + $0xf88] sm:$0xff] }
 0x3f3   :  { %9101 = vmatprep.subr.bf16.mxu0 %v11175_v16  ;;  %v14090_v20 = vadd.f32 %v8842_v34, %v8802_v7  ;;  %9137 = vmatpush1.bf16.msra.mxu1 %v11326_v12  ;;  %v11302_v7 = vcombine.low %v2916_v42, %v2920_v54  ;;  %v2868_v12 = vld [vmem:[#allocation6 + $0xb88] sm:$0xff]  ;;  %v11278_v34 = vcombine.low %v2892_v5, %v2896_v61 }
 0x3f4   :  { %9168 = vmatprep.mubr.bf16.mxu1 %v13845_v55  ;;  %v8844_v52 = vpop.f32.mrf.mxu1  ;;  %9138 = vmatprep.subr.bf16.mxu1 %v11319_v3  ;;  %v11262_v3 = vcombine.low %v2876_v36, %v2880_v29  ;;  %v11255_v47 = vcombine.high %v2868_v12, %v2872_v38  ;;  %v11254_v46 = vcombine.low %v2868_v12, %v2872_v38  ;;  %v2852_v54 = vld [vmem:[#allocation6 + $0xb08] sm:$0xff] }
 0x3f5   :  { %v14093_v17 = vadd.f32 %v8844_v52, %v8804_v10  ;;  %v2904_v10 = vld [vmem:[#allocation6 + $0xca8] sm:$0xff] }
 0x3f6   :  { %9102 = vmatpush1.bf16.msra.mxu0 %v11174_v56  ;;  %v8846_v22 = vpop.f32.mrf.mxu1  ;;  %v11287_v14 = vcombine.high %v2900_v58, %v2904_v10  ;;  %v11286_v16 = vcombine.low %v2900_v58, %v2904_v10  ;;  %v2884_v56 = vld [vmem:[#allocation6 + $0xc08] sm:$0xff] }
 0x3f7   :  { %9103 = vmatprep.subr.bf16.mxu0 %v11167_v37  ;;  %9139 = vmatpush1.bf16.msra.mxu1 %v11318_v32  ;;  %v2860_v37 = vld [vmem:[#allocation6 + $0xb48] sm:$0xff]  ;;  %v11271_v50 = vcombine.high %v2884_v56, %v2888_v43  ;;  %v11270_v42 = vcombine.low %v2884_v56, %v2888_v43 }
 0x3f8   :  { %v8847_v31 = vpop.f32.mrf.mxu1  ;;  %9140 = vmatprep.subr.bf16.mxu1 %v11311_v26  ;;  %v2864_v32 = vld [vmem:[#allocation6 + $0xb68] sm:$0xff] }
 0x3f9   :  { %v3004_v52 = vld [vmem:[#allocation6 + $0xfc8] sm:$0xff] }
 0x3fa   :  { %9104 = vmatpush1.bf16.msra.mxu0 %v11166_v8  ;;  %v3008_v26 = vld [vmem:[#allocation6 + $0xfe8] sm:$0xff]  ;;  %v11247_v8 = vcombine.high %v2860_v37, %v2864_v32 }
 0x3fb   :  { %9105 = vmatprep.subr.bf16.mxu0 %v11159_v24  ;;  %9141 = vmatpush1.bf16.msra.mxu1 %v11310_v40  ;;  %v2856_v22 = vld [vmem:[#allocation6 + $0xb28] sm:$0xff]  ;;  %v11391_v24 = vcombine.high %v3004_v52, %v3008_v26  ;;  %v11246_v40 = vcombine.low %v2860_v37, %v2864_v32 }
 0x3fc   :  { %9142 = vmatprep.subr.bf16.mxu1 %v11303_v57  ;;  %v3000_v4 = vld [vmem:[#allocation6 + $0xfa8] sm:$0xff]  ;;  %v11239_v31 = vcombine.high %v2852_v54, %v2856_v22  ;;  %v11390_v57 = vcombine.low %v3004_v52, %v3008_v26 }
 0x3fd   :  { %v2848_v15 = vld [vmem:[#allocation6 + $0xae8] sm:$0xff]  ;;  %v11383_v21 = vcombine.high %v2996_v0, %v3000_v4 }
 0x3fe   :  { %9106 = vmatpush1.bf16.msra.mxu0 %v11158_v30  ;;  %v2844_v30 = vld [vmem:[#allocation6 + $0xac8] sm:$0xff] }
 0x3ff   :  { %9107 = vmatprep.subr.bf16.mxu0 %v11151_v59  ;;  %9143 = vmatpush1.bf16.msra.mxu1 %v11302_v7  ;;  %v11238_v59 = vcombine.low %v2852_v54, %v2856_v22  ;;  %v2988_v7 = vld [vmem:[#allocation6 + $0xf48] sm:$0xff]  ;;  %v11231_v23 = vcombine.high %v2844_v30, %v2848_v15 }
 0x400   :  { %9144 = vmatprep.subr.bf16.mxu1 %v11295_v60  ;;  %v2992_v39 = vld [vmem:[#allocation6 + $0xf68] sm:$0xff]  ;;  %v11382_v60 = vcombine.low %v2996_v0, %v3000_v4 }
 0x401   :  { %v2840_v58 = vld [vmem:[#allocation6 + $0xaa8] sm:$0xff]  ;;  %v11375_v10 = vcombine.high %v2988_v7, %v2992_v39 }
 0x402   :  { %9108 = vmatpush1.bf16.msra.mxu0 %v11150_v18  ;;  %v2836_v18 = vld [vmem:[#allocation6 + $0xa88] sm:$0xff] }
 0x403   :  { %9109 = vmatprep.subr.bf16.mxu0 %v11143_v35  ;;  %9145 = vmatpush1.bf16.msra.mxu1 %v11294_v44  ;;  %v11230_v35 = vcombine.low %v2844_v30, %v2848_v15  ;;  %v2980_v44 = vld [vmem:[#allocation6 + $0xf08] sm:$0xff]  ;;  %v11223_v29 = vcombine.high %v2836_v18, %v2840_v58 }
 0x404   :  { %9146 = vmatprep.subr.bf16.mxu1 %v11287_v14  ;;  %v2984_v36 = vld [vmem:[#allocation6 + $0xf28] sm:$0xff]  ;;  %v11374_v14 = vcombine.low %v2988_v7, %v2992_v39 }
 0x405   :  { %v2832_v5 = vld [vmem:[#allocation6 + $0xa68] sm:$0xff]  ;;  %v11367_v61 = vcombine.high %v2980_v44, %v2984_v36 }
 0x406   :  { %9110 = vmatpush1.bf16.msra.mxu0 %v11142_v25  ;;  %v2828_v25 = vld [vmem:[#allocation6 + $0xa48] sm:$0xff] }
 0x407   :  { %9111 = vmatprep.subr.bf16.mxu0 %v11263_v1  ;;  %9147 = vmatpush1.bf16.msra.mxu1 %v11286_v16  ;;  %v11222_v1 = vcombine.low %v2836_v18, %v2840_v58  ;;  %v2972_v16 = vld [vmem:[#allocation6 + $0xec8] sm:$0xff]  ;;  %v11215_v38 = vcombine.high %v2828_v25, %v2832_v5 }
 0x408   :  { %9148 = vmatprep.subr.bf16.mxu1 %v11279_v51  ;;  %v2976_v12 = vld [vmem:[#allocation6 + $0xee8] sm:$0xff]  ;;  %v11366_v51 = vcombine.low %v2980_v44, %v2984_v36 }
 0x409   :  { %v2824_v56 = vld [vmem:[#allocation6 + $0xa28] sm:$0xff]  ;;  %v11359_v43 = vcombine.high %v2972_v16, %v2976_v12 }
 0x40a   :  { %9112 = vmatpush2.bf16.msra.mxu0 %v11262_v3  ;;  %v2820_v3 = vld [vmem:[#allocation6 + $0xa08] sm:$0xff] }
 0x40b   :  { %9113 = vmatprep.subr.bf16.mxu0 %v11255_v47  ;;  %9149 = vmatpush1.bf16.msra.mxu1 %v11278_v34  ;;  %v11214_v47 = vcombine.low %v2828_v25, %v2832_v5  ;;  %v2964_v34 = vld [vmem:[#allocation6 + $0xe88] sm:$0xff]  ;;  %v11207_v32 = vcombine.high %v2820_v3, %v2824_v56 }
 0x40c   :  { %9150 = vmatprep.subr.bf16.mxu1 %v11271_v50  ;;  %v2968_v37 = vld [vmem:[#allocation6 + $0xea8] sm:$0xff]  ;;  %v11358_v50 = vcombine.low %v2972_v16, %v2976_v12 }
 0x40d   :  { %v3072_v52 = vld [vmem:[#allocation6 + $0x11e8] sm:$0xff]  ;;  %v11351_v26 = vcombine.high %v2964_v34, %v2968_v37 }
 0x40e   :  { %9114 = vmatpush2.bf16.msra.mxu0 %v11254_v46  ;;  %v3068_v46 = vld [vmem:[#allocation6 + $0x11c8] sm:$0xff] }
 0x40f   :  { %9115 = vmatprep.subr.bf16.mxu0 %v11247_v8  ;;  %9151 = vmatpush1.bf16.msra.mxu1 %v11270_v42  ;;  %v11206_v8 = vcombine.low %v2820_v3, %v2824_v56  ;;  %v2956_v42 = vld [vmem:[#allocation6 + $0xe48] sm:$0xff]  ;;  %v11455_v22 = vcombine.high %v3068_v46, %v3072_v52 }
 0x410   :  { %9152 = vmatprep.subr.bf16.mxu1 %v11391_v24  ;;  %v2960_v54 = vld [vmem:[#allocation6 + $0xe68] sm:$0xff]  ;;  %v11350_v24 = vcombine.low %v2964_v34, %v2968_v37 }
 0x411   :  { %v3064_v0 = vld [vmem:[#allocation6 + $0x11a8] sm:$0xff]  ;;  %v11343_v4 = vcombine.high %v2956_v42, %v2960_v54 }
 0x412   :  { %9116 = vmatpush2.bf16.msra.mxu0 %v11246_v40  ;;  %v3060_v40 = vld [vmem:[#allocation6 + $0x1188] sm:$0xff] }
 0x413   :  { %9117 = vmatprep.subr.bf16.mxu0 %v11239_v31  ;;  %9153 = vmatpush2.bf16.msra.mxu1 %v11390_v57  ;;  %v11454_v31 = vcombine.low %v3068_v46, %v3072_v52  ;;  %v2948_v57 = vld [vmem:[#allocation6 + $0xe08] sm:$0xff]  ;;  %v11447_v15 = vcombine.high %v3060_v40, %v3064_v0  ;;  %v11446_v18 = vcombine.low %v3060_v40, %v3064_v0 }
 0x414   :  { %9154 = vmatprep.subr.bf16.mxu1 %v11383_v21  ;;  %v2952_v30 = vld [vmem:[#allocation6 + $0xe28] sm:$0xff]  ;;  %v11342_v21 = vcombine.low %v2956_v42, %v2960_v54 }
 0x415   :  { %v3056_v7 = vld [vmem:[#allocation6 + $0x1168] sm:$0xff] }
 0x416   :  { %9118 = vmatpush2.bf16.msra.mxu0 %v11238_v59  ;;  %v3052_v59 = vld [vmem:[#allocation6 + $0x1148] sm:$0xff] }
 0x417   :  { %9119 = vmatprep.subr.bf16.mxu0 %v11231_v23  ;;  %9155 = vmatpush2.bf16.msra.mxu1 %v11382_v60  ;;  %v11335_v23 = vcombine.high %v2948_v57, %v2952_v30  ;;  %v3196_v58 = vld [vmem:[#allocation6 + $0x15c8] sm:$0xff]  ;;  %v11439_v44 = vcombine.high %v3052_v59, %v3056_v7 }
 0x418   :  { %9156 = vmatprep.subr.bf16.mxu1 %v11375_v10  ;;  %v3200_v10 = vld [vmem:[#allocation6 + $0x15e8] sm:$0xff] }
 0x419   :  { %v3048_v25 = vld [vmem:[#allocation6 + $0x1128] sm:$0xff] }
 0x41a   :  { %9120 = vmatpush2.bf16.msra.mxu0 %v11230_v35  ;;  %v3192_v16 = vld [vmem:[#allocation6 + $0x15a8] sm:$0xff] }
 0x41b   :  { %9121 = vmatprep.subr.bf16.mxu0 %v11223_v29  ;;  %9157 = vmatpush2.bf16.msra.mxu1 %v11374_v14  ;;  %v11334_v29 = vcombine.low %v2948_v57, %v2952_v30  ;;  %v3044_v14 = vld [vmem:[#allocation6 + $0x1108] sm:$0xff] }
 0x41c   :  { %9158 = vmatprep.subr.bf16.mxu1 %v11367_v61  ;;  %v11583_v61 = vcombine.high %v3196_v58, %v3200_v10  ;;  %v3036_v3 = vld [vmem:[#allocation6 + $0x10c8] sm:$0xff] }
 0x41d   :  { %v3040_v56 = vld [vmem:[#allocation6 + $0x10e8] sm:$0xff] }
 0x41e   :  { %9122 = vmatpush2.bf16.msra.mxu0 %v11222_v1  ;;  %v3188_v1 = vld [vmem:[#allocation6 + $0x1588] sm:$0xff] }
 0x41f   :  { %9123 = vmatprep.subr.bf16.mxu0 %v11215_v38  ;;  %9159 = vmatpush2.bf16.msra.mxu1 %v11366_v51  ;;  %v11431_v38 = vcombine.high %v3044_v14, %v3048_v25  ;;  %v11582_v51 = vcombine.low %v3196_v58, %v3200_v10  ;;  %v3184_v34 = vld [vmem:[#allocation6 + $0x1568] sm:$0xff]  ;;  %v11574_v46 = vcombine.low %v3188_v1, %v3192_v16 }
 0x420   :  { %9160 = vmatprep.subr.bf16.mxu1 %v11359_v43  ;;  %v11430_v43 = vcombine.low %v3044_v14, %v3048_v25  ;;  %v3028_v52 = vld [vmem:[#allocation6 + $0x1088] sm:$0xff] }
 0x421   :  { %v3176_v40 = vld [vmem:[#allocation6 + $0x1528] sm:$0xff] }
 0x422   :  { %9124 = vmatpush2.bf16.msra.mxu0 %v11214_v47  ;;  %v3180_v47 = vld [vmem:[#allocation6 + $0x1548] sm:$0xff] }
 0x423   :  { %9125 = vmatprep.subr.bf16.mxu0 %v11207_v32  ;;  %9161 = vmatpush2.bf16.msra.mxu1 %v11358_v50  ;;  %v11423_v32 = vcombine.high %v3036_v3, %v3040_v56  ;;  %v11567_v42 = vcombine.high %v3180_v47, %v3184_v34  ;;  %v3020_v57 = vld [vmem:[#allocation6 + $0x1048] sm:$0xff] }
 0x424   :  { %9162 = vmatprep.subr.bf16.mxu1 %v11351_v26  ;;  %v3032_v26 = vld [vmem:[#allocation6 + $0x10a8] sm:$0xff] }
 0x425   :  { %v3024_v30 = vld [vmem:[#allocation6 + $0x1068] sm:$0xff] }
 0x426   :  { %9126 = vmatpush2.bf16.msra.mxu0 %v11206_v8  ;;  %v3016_v58 = vld [vmem:[#allocation6 + $0x1028] sm:$0xff] }
 0x427   :  { %9177 = vmatprep.subr.bf16.mxu0 %v11455_v22  ;;  %9163 = vmatpush2.bf16.msra.mxu1 %v11350_v24  ;;  %v11422_v22 = vcombine.low %v3036_v3, %v3040_v56  ;;  %v3172_v24 = vld [vmem:[#allocation6 + $0x1508] sm:$0xff] }
 0x428   :  { %9164 = vmatprep.subr.bf16.mxu1 %v11343_v4  ;;  %v11415_v4 = vcombine.high %v3028_v52, %v3032_v26  ;;  %v3132_v25 = vld [vmem:[#allocation6 + $0x13c8] sm:$0xff] }
 0x429   :  { %v8883_v39 = vpop.f32.mrf.mxu0  ;;  %9128 = vmatmul.mubr.bf16.vlgmr.msra.gmra.mxu0 %v13842_v28  ;;  %v3128_v3 = vld [vmem:[#allocation6 + $0x13a8] sm:$0xff] }
 0x42a   :  { %v8884_v60 = vadd.f32 %v8883_v39, %v14090_v20  ;;  %9178 = vmatpush1.bf16.msra.mxu0 %v11454_v31  ;;  %9209 = vmatprep.mubr.bf16.mxu0 %v13912_v53  ;;  %v11438_v20 = vcombine.low %v3052_v59, %v3056_v7  ;;  %v11566_v31 = vcombine.low %v3180_v47, %v3184_v34  ;;  %v3164_v7 = vld [vmem:[#allocation6 + $0x14c8] sm:$0xff] }
 0x42b   :  { %v8885_v35 = vpop.f32.mrf.mxu0  ;;  %9179 = vmatprep.subr.bf16.mxu0 %v11447_v15  ;;  %9165 = vmatpush2.bf16.msra.mxu1 %v11342_v21  ;;  %v11559_v21 = vcombine.high %v3172_v24, %v3176_v40  ;;  %v11414_v59 = vcombine.low %v3028_v52, %v3032_v26  ;;  %v3168_v39 = vld [vmem:[#allocation6 + $0x14e8] sm:$0xff] }
 0x42c   :  { %v8886_v36 = vadd.f32 %v8885_v35, %v14093_v17  ;;  %9166 = vmatprep.subr.bf16.mxu1 %v11335_v23  ;;  %v11575_v17 = vcombine.high %v3188_v1, %v3192_v16  ;;  %v11407_v23 = vcombine.high %v3020_v57, %v3024_v30  ;;  %v11551_v10 = vcombine.high %v3164_v7, %v3168_v39  ;;  %v3148_v1 = vld [vmem:[#allocation6 + $0x1448] sm:$0xff] }
 0x42d   :  { %v8887_v5 = vpop.f32.mrf.mxu0  ;;  %v11406_v35 = vcombine.low %v3020_v57, %v3024_v30  ;;  %v11550_v14 = vcombine.low %v3164_v7, %v3168_v39  ;;  %v3152_v16 = vld [vmem:[#allocation6 + $0x1468] sm:$0xff] }
 0x42e   :  { %9180 = vmatpush1.bf16.msra.mxu0 %v11446_v18  ;;  %v3012_v18 = vld [vmem:[#allocation6 + $0x1008] sm:$0xff]  ;;  %v11535_v56 = vcombine.high %v3148_v1, %v3152_v16 }
 0x42f   :  { %v8888_v12 = vpop.f32.mrf.mxu0  ;;  %9181 = vmatprep.subr.bf16.mxu0 %v11439_v44  ;;  %9167 = vmatpush2.bf16.msra.mxu1 %v11334_v29  ;;  %v3156_v44 = vld [vmem:[#allocation6 + $0x1488] sm:$0xff]  ;;  %v11399_v29 = vcombine.high %v3012_v18, %v3016_v58 }
 0x430   :  { %9218 = vmatprep.subr.bf16.mxu1 %v11583_v61  ;;  %v3136_v5 = vld [vmem:[#allocation6 + $0x13e8] sm:$0xff] }
 0x431   :  { %v11519_v12 = vcombine.high %v3132_v25, %v3136_v5  ;;  %v3144_v47 = vld [vmem:[#allocation6 + $0x1428] sm:$0xff] }
 0x432   :  { %9182 = vmatpush1.bf16.msra.mxu0 %v11438_v20  ;;  %v8924_v37 = vpop.f32.mrf.mxu1  ;;  %9169 = vmatmul.mubr.bf16.vlgmr.msra.gmra.mxu1 %v13871_v48  ;;  %v11398_v20 = vcombine.low %v3012_v18, %v3016_v58  ;;  %v3252_v57 = vld [vmem:[#allocation6 + $0x1788] sm:$0xff] }
 0x433   :  { %9183 = vmatprep.subr.bf16.mxu0 %v11431_v38  ;;  %v14100_v50 = vadd.f32 %v8924_v37, %v8884_v60  ;;  %9219 = vmatpush1.bf16.msra.mxu1 %v11582_v51  ;;  %v11558_v60 = vcombine.low %v3172_v24, %v3176_v40  ;;  %v3124_v51 = vld [vmem:[#allocation6 + $0x1388] sm:$0xff]  ;;  %v11534_v37 = vcombine.low %v3148_v1, %v3152_v16 }
 0x434   :  { %9250 = vmatprep.mubr.bf16.mxu1 %v13942_v13  ;;  %v8926_v8 = vpop.f32.mrf.mxu1  ;;  %9220 = vmatprep.subr.bf16.mxu1 %v11575_v17  ;;  %v11518_v17 = vcombine.low %v3132_v25, %v3136_v5  ;;  %v11511_v34 = vcombine.high %v3124_v51, %v3128_v3  ;;  %v11510_v26 = vcombine.low %v3124_v51, %v3128_v3  ;;  %v3108_v40 = vld [vmem:[#allocation6 + $0x1308] sm:$0xff] }
 0x435   :  { %v14103_v54 = vadd.f32 %v8926_v8, %v8886_v36  ;;  %v3160_v36 = vld [vmem:[#allocation6 + $0x14a8] sm:$0xff] }
 0x436   :  { %9184 = vmatpush1.bf16.msra.mxu0 %v11430_v43  ;;  %v8928_v0 = vpop.f32.mrf.mxu1  ;;  %v11543_v61 = vcombine.high %v3156_v44, %v3160_v36  ;;  %v11542_v38 = vcombine.low %v3156_v44, %v3160_v36  ;;  %v3140_v43 = vld [vmem:[#allocation6 + $0x1408] sm:$0xff] }
 0x437   :  { %9185 = vmatprep.subr.bf16.mxu0 %v11423_v32  ;;  %9221 = vmatpush1.bf16.msra.mxu1 %v11574_v46  ;;  %v3116_v32 = vld [vmem:[#allocation6 + $0x1348] sm:$0xff]  ;;  %v11527_v52 = vcombine.high %v3140_v43, %v3144_v47  ;;  %v11526_v24 = vcombine.low %v3140_v43, %v3144_v47 }
 0x438   :  { %v8929_v15 = vpop.f32.mrf.mxu1  ;;  %9222 = vmatprep.subr.bf16.mxu1 %v11567_v42  ;;  %v3120_v46 = vld [vmem:[#allocation6 + $0x1368] sm:$0xff] }
 0x439   :  { %v3260_v8 = vld [vmem:[#allocation6 + $0x17c8] sm:$0xff] }
 0x43a   :  { %9186 = vmatpush1.bf16.msra.mxu0 %v11422_v22  ;;  %v3264_v42 = vld [vmem:[#allocation6 + $0x17e8] sm:$0xff]  ;;  %v11503_v22 = vcombine.high %v3116_v32, %v3120_v46 }
 0x43b   :  { %9187 = vmatprep.subr.bf16.mxu0 %v11415_v4  ;;  %9223 = vmatpush1.bf16.msra.mxu1 %v11566_v31  ;;  %v3112_v0 = vld [vmem:[#allocation6 + $0x1328] sm:$0xff]  ;;  %v11647_v4 = vcombine.high %v3260_v8, %v3264_v42  ;;  %v11502_v31 = vcombine.low %v3116_v32, %v3120_v46 }
 0x43c   :  { %9224 = vmatprep.subr.bf16.mxu1 %v11559_v21  ;;  %v3256_v30 = vld [vmem:[#allocation6 + $0x17a8] sm:$0xff]  ;;  %v11495_v15 = vcombine.high %v3108_v40, %v3112_v0  ;;  %v11646_v21 = vcombine.low %v3260_v8, %v3264_v42 }
 0x43d   :  { %v3104_v7 = vld [vmem:[#allocation6 + $0x12e8] sm:$0xff]  ;;  %v11639_v39 = vcombine.high %v3252_v57, %v3256_v30 }
 0x43e   :  { %9188 = vmatpush1.bf16.msra.mxu0 %v11414_v59  ;;  %v3100_v59 = vld [vmem:[#allocation6 + $0x12c8] sm:$0xff] }
 0x43f   :  { %9189 = vmatprep.subr.bf16.mxu0 %v11407_v23  ;;  %9225 = vmatpush1.bf16.msra.mxu1 %v11558_v60  ;;  %v11494_v23 = vcombine.low %v3108_v40, %v3112_v0  ;;  %v3244_v60 = vld [vmem:[#allocation6 + $0x1748] sm:$0xff]  ;;  %v11487_v58 = vcombine.high %v3100_v59, %v3104_v7 }
 0x440   :  { %9226 = vmatprep.subr.bf16.mxu1 %v11551_v10  ;;  %v3248_v18 = vld [vmem:[#allocation6 + $0x1768] sm:$0xff]  ;;  %v11638_v10 = vcombine.low %v3252_v57, %v3256_v30 }
 0x441   :  { %v3096_v44 = vld [vmem:[#allocation6 + $0x12a8] sm:$0xff]  ;;  %v11631_v36 = vcombine.high %v3244_v60, %v3248_v18 }
 0x442   :  { %9190 = vmatpush1.bf16.msra.mxu0 %v11406_v35  ;;  %v3092_v35 = vld [vmem:[#allocation6 + $0x1288] sm:$0xff] }
 0x443   :  { %9191 = vmatprep.subr.bf16.mxu0 %v11399_v29  ;;  %9227 = vmatpush1.bf16.msra.mxu1 %v11550_v14  ;;  %v11486_v29 = vcombine.low %v3100_v59, %v3104_v7  ;;  %v3236_v14 = vld [vmem:[#allocation6 + $0x1708] sm:$0xff]  ;;  %v11479_v5 = vcombine.high %v3092_v35, %v3096_v44 }
 0x444   :  { %9228 = vmatprep.subr.bf16.mxu1 %v11543_v61  ;;  %v3240_v25 = vld [vmem:[#allocation6 + $0x1728] sm:$0xff]  ;;  %v11630_v61 = vcombine.low %v3244_v60, %v3248_v18 }
 0x445   :  { %v3088_v1 = vld [vmem:[#allocation6 + $0x1268] sm:$0xff]  ;;  %v11623_v16 = vcombine.high %v3236_v14, %v3240_v25 }
 0x446   :  { %9192 = vmatpush1.bf16.msra.mxu0 %v11398_v20  ;;  %v3084_v20 = vld [vmem:[#allocation6 + $0x1248] sm:$0xff] }
 0x447   :  { %9193 = vmatprep.subr.bf16.mxu0 %v11519_v12  ;;  %9229 = vmatpush1.bf16.msra.mxu1 %v11542_v38  ;;  %v11478_v12 = vcombine.low %v3092_v35, %v3096_v44  ;;  %v3228_v38 = vld [vmem:[#allocation6 + $0x16c8] sm:$0xff]  ;;  %v11471_v3 = vcombine.high %v3084_v20, %v3088_v1 }
 0x448   :  { %9230 = vmatprep.subr.bf16.mxu1 %v11535_v56  ;;  %v3232_v51 = vld [vmem:[#allocation6 + $0x16e8] sm:$0xff]  ;;  %v11622_v56 = vcombine.low %v3236_v14, %v3240_v25 }
 0x449   :  { %v3080_v43 = vld [vmem:[#allocation6 + $0x1228] sm:$0xff]  ;;  %v11615_v47 = vcombine.high %v3228_v38, %v3232_v51 }
 0x44a   :  { %9194 = vmatpush2.bf16.msra.mxu0 %v11518_v17  ;;  %v3076_v17 = vld [vmem:[#allocation6 + $0x1208] sm:$0xff] }
 0x44b   :  { %9195 = vmatprep.subr.bf16.mxu0 %v11511_v34  ;;  %9231 = vmatpush1.bf16.msra.mxu1 %v11534_v37  ;;  %v11470_v34 = vcombine.low %v3084_v20, %v3088_v1  ;;  %v3220_v37 = vld [vmem:[#allocation6 + $0x1688] sm:$0xff]  ;;  %v11463_v46 = vcombine.high %v3076_v17, %v3080_v43 }
 0x44c   :  { %9232 = vmatprep.subr.bf16.mxu1 %v11527_v52  ;;  %v3224_v32 = vld [vmem:[#allocation6 + $0x16a8] sm:$0xff]  ;;  %v11614_v52 = vcombine.low %v3228_v38, %v3232_v51 }
 0x44d   :  { %v3328_v8 = vld [vmem:[#allocation6 + $0x19e8] sm:$0xff]  ;;  %v11607_v42 = vcombine.high %v3220_v37, %v3224_v32 }
 0x44e   :  { %9196 = vmatpush2.bf16.msra.mxu0 %v11510_v26  ;;  %v3324_v26 = vld [vmem:[#allocation6 + $0x19c8] sm:$0xff] }
 0x44f   :  { %9197 = vmatprep.subr.bf16.mxu0 %v11503_v22  ;;  %9233 = vmatpush1.bf16.msra.mxu1 %v11526_v24  ;;  %v11462_v22 = vcombine.low %v3076_v17, %v3080_v43  ;;  %v3212_v24 = vld [vmem:[#allocation6 + $0x1648] sm:$0xff]  ;;  %v11711_v0 = vcombine.high %v3324_v26, %v3328_v8 }
 0x450   :  { %9234 = vmatprep.subr.bf16.mxu1 %v11647_v4  ;;  %v3216_v40 = vld [vmem:[#allocation6 + $0x1668] sm:$0xff]  ;;  %v11606_v4 = vcombine.low %v3220_v37, %v3224_v32 }
 0x451   :  { %v3320_v57 = vld [vmem:[#allocation6 + $0x19a8] sm:$0xff]  ;;  %v11599_v30 = vcombine.high %v3212_v24, %v3216_v40 }
 0x452   :  { %9198 = vmatpush2.bf16.msra.mxu0 %v11502_v31  ;;  %v3316_v31 = vld [vmem:[#allocation6 + $0x1988] sm:$0xff] }
 0x453   :  { %9199 = vmatprep.subr.bf16.mxu0 %v11495_v15  ;;  %9235 = vmatpush2.bf16.msra.mxu1 %v11646_v21  ;;  %v11710_v15 = vcombine.low %v3324_v26, %v3328_v8  ;;  %v3204_v21 = vld [vmem:[#allocation6 + $0x1608] sm:$0xff]  ;;  %v11703_v7 = vcombine.high %v3316_v31, %v3320_v57  ;;  %v11702_v35 = vcombine.low %v3316_v31, %v3320_v57 }
 0x454   :  { %9236 = vmatprep.subr.bf16.mxu1 %v11639_v39  ;;  %v3208_v59 = vld [vmem:[#allocation6 + $0x1628] sm:$0xff]  ;;  %v11598_v39 = vcombine.low %v3212_v24, %v3216_v40 }
 0x455   :  { %v3312_v60 = vld [vmem:[#allocation6 + $0x1968] sm:$0xff] }
 0x456   :  { %9200 = vmatpush2.bf16.msra.mxu0 %v11494_v23  ;;  %v3308_v23 = vld [vmem:[#allocation6 + $0x1948] sm:$0xff] }
 0x457   :  { %9201 = vmatprep.subr.bf16.mxu0 %v11487_v58  ;;  %9237 = vmatpush2.bf16.msra.mxu1 %v11638_v10  ;;  %v11591_v58 = vcombine.high %v3204_v21, %v3208_v59  ;;  %v3452_v44 = vld [vmem:[#allocation6 + $0x1dc8] sm:$0xff]  ;;  %v11695_v14 = vcombine.high %v3308_v23, %v3312_v60 }
 0x458   :  { %9238 = vmatprep.subr.bf16.mxu1 %v11631_v36  ;;  %v3456_v36 = vld [vmem:[#allocation6 + $0x1de8] sm:$0xff] }
 0x459   :  { %v3304_v20 = vld [vmem:[#allocation6 + $0x1928] sm:$0xff] }
 0x45a   :  { %9202 = vmatpush2.bf16.msra.mxu0 %v11486_v29  ;;  %v3448_v38 = vld [vmem:[#allocation6 + $0x1da8] sm:$0xff] }
 0x45b   :  { %9203 = vmatprep.subr.bf16.mxu0 %v11479_v5  ;;  %9239 = vmatpush2.bf16.msra.mxu1 %v11630_v61  ;;  %v11590_v5 = vcombine.low %v3204_v21, %v3208_v59  ;;  %v3300_v61 = vld [vmem:[#allocation6 + $0x1908] sm:$0xff] }
 0x45c   :  { %9240 = vmatprep.subr.bf16.mxu1 %v11623_v16  ;;  %v11839_v16 = vcombine.high %v3452_v44, %v3456_v36  ;;  %v3292_v17 = vld [vmem:[#allocation6 + $0x18c8] sm:$0xff] }
 0x45d   :  { %v3296_v43 = vld [vmem:[#allocation6 + $0x18e8] sm:$0xff] }
 0x45e   :  { %9204 = vmatpush2.bf16.msra.mxu0 %v11478_v12  ;;  %v3444_v12 = vld [vmem:[#allocation6 + $0x1d88] sm:$0xff] }
 0x45f   :  { %9205 = vmatprep.subr.bf16.mxu0 %v11471_v3  ;;  %9241 = vmatpush2.bf16.msra.mxu1 %v11622_v56  ;;  %v11687_v3 = vcombine.high %v3300_v61, %v3304_v20  ;;  %v11838_v56 = vcombine.low %v3452_v44, %v3456_v36  ;;  %v3440_v37 = vld [vmem:[#allocation6 + $0x1d68] sm:$0xff]  ;;  %v11830_v26 = vcombine.low %v3444_v12, %v3448_v38 }
 0x460   :  { %9242 = vmatprep.subr.bf16.mxu1 %v11615_v47  ;;  %v11686_v47 = vcombine.low %v3300_v61, %v3304_v20  ;;  %v3284_v8 = vld [vmem:[#allocation6 + $0x1888] sm:$0xff] }
 0x461   :  { %v3432_v31 = vld [vmem:[#allocation6 + $0x1d28] sm:$0xff] }
 0x462   :  { %9206 = vmatpush2.bf16.msra.mxu0 %v11470_v34  ;;  %v3436_v34 = vld [vmem:[#allocation6 + $0x1d48] sm:$0xff] }
 0x463   :  { %9207 = vmatprep.subr.bf16.mxu0 %v11463_v46  ;;  %9243 = vmatpush2.bf16.msra.mxu1 %v11614_v52  ;;  %v11679_v46 = vcombine.high %v3292_v17, %v3296_v43  ;;  %v11823_v24 = vcombine.high %v3436_v34, %v3440_v37  ;;  %v3276_v21 = vld [vmem:[#allocation6 + $0x1848] sm:$0xff] }
 0x464   :  { %9244 = vmatprep.subr.bf16.mxu1 %v11607_v42  ;;  %v3288_v42 = vld [vmem:[#allocation6 + $0x18a8] sm:$0xff] }
 0x465   :  { %v3280_v59 = vld [vmem:[#allocation6 + $0x1868] sm:$0xff] }
 0x466   :  { %9208 = vmatpush2.bf16.msra.mxu0 %v11462_v22  ;;  %v3272_v44 = vld [vmem:[#allocation6 + $0x1828] sm:$0xff] }
 0x467   :  { %9259 = vmatprep.subr.bf16.mxu0 %v11711_v0  ;;  %9245 = vmatpush2.bf16.msra.mxu1 %v11606_v4  ;;  %v11678_v0 = vcombine.low %v3292_v17, %v3296_v43  ;;  %v3428_v4 = vld [vmem:[#allocation6 + $0x1d08] sm:$0xff] }
 0x468   :  { %9246 = vmatprep.subr.bf16.mxu1 %v11599_v30  ;;  %v11671_v30 = vcombine.high %v3284_v8, %v3288_v42  ;;  %v3388_v20 = vld [vmem:[#allocation6 + $0x1bc8] sm:$0xff] }
 0x469   :  { %v8965_v18 = vpop.f32.mrf.mxu0  ;;  %9210 = vmatmul.mubr.bf16.vlgmr.msra.gmra.mxu0 %v13964_v27  ;;  %v3384_v17 = vld [vmem:[#allocation6 + $0x1ba8] sm:$0xff] }
 0x46a   :  { %v8966_v10 = vadd.f32 %v8965_v18, %v14100_v50  ;;  %9260 = vmatpush1.bf16.msra.mxu0 %v11710_v15  ;;  %9291 = vmatprep.mubr.bf16.mxu0 %v14020_v63  ;;  %v11694_v50 = vcombine.low %v3308_v23, %v3312_v60  ;;  %v11822_v15 = vcombine.low %v3436_v34, %v3440_v37  ;;  %v3420_v60 = vld [vmem:[#allocation6 + $0x1cc8] sm:$0xff] }
 0x46b   :  { %v8967_v29 = vpop.f32.mrf.mxu0  ;;  %9261 = vmatprep.subr.bf16.mxu0 %v11703_v7  ;;  %9247 = vmatpush2.bf16.msra.mxu1 %v11598_v39  ;;  %v11815_v39 = vcombine.high %v3428_v4, %v3432_v31  ;;  %v11670_v23 = vcombine.low %v3284_v8, %v3288_v42  ;;  %v3424_v18 = vld [vmem:[#allocation6 + $0x1ce8] sm:$0xff] }
 0x46c   :  { %v8968_v25 = vadd.f32 %v8967_v29, %v14103_v54  ;;  %9248 = vmatprep.subr.bf16.mxu1 %v11591_v58  ;;  %v11831_v54 = vcombine.high %v3444_v12, %v3448_v38  ;;  %v11663_v58 = vcombine.high %v3276_v21, %v3280_v59  ;;  %v11807_v36 = vcombine.high %v3420_v60, %v3424_v18  ;;  %v3404_v12 = vld [vmem:[#allocation6 + $0x1c48] sm:$0xff] }
 0x46d   :  { %v8969_v1 = vpop.f32.mrf.mxu0  ;;  %v11662_v29 = vcombine.low %v3276_v21, %v3280_v59  ;;  %v11806_v61 = vcombine.low %v3420_v60, %v3424_v18  ;;  %v3408_v38 = vld [vmem:[#allocation6 + $0x1c68] sm:$0xff] }
 0x46e   :  { %9262 = vmatpush1.bf16.msra.mxu0 %v11702_v35  ;;  %v3268_v35 = vld [vmem:[#allocation6 + $0x1808] sm:$0xff]  ;;  %v11791_v43 = vcombine.high %v3404_v12, %v3408_v38 }
 0x46f   :  { %v8970_v51 = vpop.f32.mrf.mxu0  ;;  %9263 = vmatprep.subr.bf16.mxu0 %v11695_v14  ;;  %9249 = vmatpush2.bf16.msra.mxu1 %v11590_v5  ;;  %v3412_v14 = vld [vmem:[#allocation6 + $0x1c88] sm:$0xff]  ;;  %v11655_v5 = vcombine.high %v3268_v35, %v3272_v44 }
 0x470   :  { %9300 = vmatprep.subr.bf16.mxu1 %v11839_v16  ;;  %v3392_v1 = vld [vmem:[#allocation6 + $0x1be8] sm:$0xff] }
 0x471   :  { %v11775_v51 = vcombine.high %v3388_v20, %v3392_v1  ;;  %v3400_v34 = vld [vmem:[#allocation6 + $0x1c28] sm:$0xff] }
 0x472   :  { %9264 = vmatpush1.bf16.msra.mxu0 %v11694_v50  ;;  %v9006_v32 = vpop.f32.mrf.mxu1  ;;  %9251 = vmatmul.mubr.bf16.vlgmr.msra.gmra.mxu1 %v13989_v45  ;;  %v11654_v50 = vcombine.low %v3268_v35, %v3272_v44  ;;  %v3508_v21 = vld [vmem:[#allocation6 + $0x1f88] sm:$0xff] }
 0x473   :  { %9265 = vmatprep.subr.bf16.mxu0 %v11687_v3  ;;  %v14110_v52 = vadd.f32 %v9006_v32, %v8966_v10  ;;  %9301 = vmatpush1.bf16.msra.mxu1 %v11838_v56  ;;  %v11814_v10 = vcombine.low %v3428_v4, %v3432_v31  ;;  %v3380_v56 = vld [vmem:[#allocation6 + $0x1b88] sm:$0xff]  ;;  %v11790_v32 = vcombine.low %v3404_v12, %v3408_v38 }
 0x474   :  { %9332 = vmatprep.mubr.bf16.mxu1 %v14041_v11  ;;  %v9008_v22 = vpop.f32.mrf.mxu1  ;;  %9302 = vmatprep.subr.bf16.mxu1 %v11831_v54  ;;  %v11774_v54 = vcombine.low %v3388_v20, %v3392_v1  ;;  %v11767_v37 = vcombine.high %v3380_v56, %v3384_v17  ;;  %v11766_v42 = vcombine.low %v3380_v56, %v3384_v17  ;;  %v3364_v31 = vld [vmem:[#allocation6 + $0x1b08] sm:$0xff] }
 0x475   :  { %v14113_v40 = vadd.f32 %v9008_v22, %v8968_v25  ;;  %v3416_v25 = vld [vmem:[#allocation6 + $0x1ca8] sm:$0xff] }
 0x476   :  { %9266 = vmatpush1.bf16.msra.mxu0 %v11686_v47  ;;  %v9010_v57 = vpop.f32.mrf.mxu1  ;;  %v11799_v16 = vcombine.high %v3412_v14, %v3416_v25  ;;  %v11798_v3 = vcombine.low %v3412_v14, %v3416_v25  ;;  %v3396_v47 = vld [vmem:[#allocation6 + $0x1c08] sm:$0xff] }
 0x477   :  { %9267 = vmatprep.subr.bf16.mxu0 %v11679_v46  ;;  %9303 = vmatpush1.bf16.msra.mxu1 %v11830_v26  ;;  %v3372_v46 = vld [vmem:[#allocation6 + $0x1b48] sm:$0xff]  ;;  %v11783_v8 = vcombine.high %v3396_v47, %v3400_v34  ;;  %v11782_v4 = vcombine.low %v3396_v47, %v3400_v34 }
 0x478   :  { %v9011_v7 = vpop.f32.mrf.mxu1  ;;  %9304 = vmatprep.subr.bf16.mxu1 %v11823_v24  ;;  %v3376_v26 = vld [vmem:[#allocation6 + $0x1b68] sm:$0xff] }
 0x479   :  { %v3516_v22 = vld [vmem:[#allocation6 + $0x1fc8] sm:$0xff] }
 0x47a   :  { %9268 = vmatpush1.bf16.msra.mxu0 %v11678_v0  ;;  %v3520_v24 = vld [vmem:[#allocation6 + $0x1fe8] sm:$0xff]  ;;  %v11759_v0 = vcombine.high %v3372_v46, %v3376_v26 }
 0x47b   :  { %9269 = vmatprep.subr.bf16.mxu0 %v11671_v30  ;;  %9305 = vmatpush1.bf16.msra.mxu1 %v11822_v15  ;;  %v3368_v57 = vld [vmem:[#allocation6 + $0x1b28] sm:$0xff]  ;;  %v11903_v30 = vcombine.high %v3516_v22, %v3520_v24  ;;  %v11758_v15 = vcombine.low %v3372_v46, %v3376_v26 }
 0x47c   :  { %9306 = vmatprep.subr.bf16.mxu1 %v11815_v39  ;;  %v3512_v59 = vld [vmem:[#allocation6 + $0x1fa8] sm:$0xff]  ;;  %v11751_v7 = vcombine.high %v3364_v31, %v3368_v57  ;;  %v11902_v39 = vcombine.low %v3516_v22, %v3520_v24  ;;  %v2561_v22 = vld [vmem:[#allocation6 + $0x1f0] sm:$0xff] }
 0x47d   :  { %v3360_v60 = vld [vmem:[#allocation6 + $0x1ae8] sm:$0xff]  ;;  %v11895_v18 = vcombine.high %v3508_v21, %v3512_v59 }
 0x47e   :  { %9270 = vmatpush1.bf16.msra.mxu0 %v11670_v23  ;;  %v3356_v23 = vld [vmem:[#allocation6 + $0x1ac8] sm:$0xff] }
 0x47f   :  { %9271 = vmatprep.subr.bf16.mxu0 %v11663_v58  ;;  %9307 = vmatpush1.bf16.msra.mxu1 %v11814_v10  ;;  %v11750_v58 = vcombine.low %v3364_v31, %v3368_v57  ;;  %v3500_v10 = vld [vmem:[#allocation6 + $0x1f48] sm:$0xff]  ;;  %v11743_v44 = vcombine.high %v3356_v23, %v3360_v60 }
 0x480   :  { %9308 = vmatprep.subr.bf16.mxu1 %v11807_v36  ;;  %v3504_v35 = vld [vmem:[#allocation6 + $0x1f68] sm:$0xff]  ;;  %v11894_v36 = vcombine.low %v3508_v21, %v3512_v59  ;;  %v2553_v21 = vld [vmem:[#allocation6 + $0x1b0] sm:$0xff] }
 0x481   :  { %v3352_v14 = vld [vmem:[#allocation6 + $0x1aa8] sm:$0xff]  ;;  %v11887_v25 = vcombine.high %v3500_v10, %v3504_v35 }
 0x482   :  { %9272 = vmatpush1.bf16.msra.mxu0 %v11662_v29  ;;  %v3348_v29 = vld [vmem:[#allocation6 + $0x1a88] sm:$0xff] }
 0x483   :  { %9273 = vmatprep.subr.bf16.mxu0 %v11655_v5  ;;  %9309 = vmatpush1.bf16.msra.mxu1 %v11806_v61  ;;  %v11742_v5 = vcombine.low %v3356_v23, %v3360_v60  ;;  %v3492_v61 = vld [vmem:[#allocation6 + $0x1f08] sm:$0xff]  ;;  %v11735_v1 = vcombine.high %v3348_v29, %v3352_v14 }
 0x484   :  { %9310 = vmatprep.subr.bf16.mxu1 %v11799_v16  ;;  %v3496_v20 = vld [vmem:[#allocation6 + $0x1f28] sm:$0xff]  ;;  %v11886_v16 = vcombine.low %v3500_v10, %v3504_v35  ;;  %v2545_v10 = vld [vmem:[#allocation6 + $0x170] sm:$0xff] }
 0x485   :  { %v3344_v12 = vld [vmem:[#allocation6 + $0x1a68] sm:$0xff]  ;;  %v11879_v38 = vcombine.high %v3492_v61, %v3496_v20 }
 0x486   :  { %9274 = vmatpush1.bf16.msra.mxu0 %v11654_v50  ;;  %v3340_v50 = vld [vmem:[#allocation6 + $0x1a48] sm:$0xff] }
 0x487   :  { %9275 = vmatprep.subr.bf16.mxu0 %v11775_v51  ;;  %9311 = vmatpush1.bf16.msra.mxu1 %v11798_v3  ;;  %v11734_v51 = vcombine.low %v3348_v29, %v3352_v14  ;;  %v3484_v3 = vld [vmem:[#allocation6 + $0x1ec8] sm:$0xff]  ;;  %v11727_v17 = vcombine.high %v3340_v50, %v3344_v12  ;;  %v2685_v14 = vld [vmem:[#allocation6 + $0x5d0] sm:$0xff] }
 0x488   :  { %9312 = vmatprep.subr.bf16.mxu1 %v11791_v43  ;;  %v3488_v56 = vld [vmem:[#allocation6 + $0x1ee8] sm:$0xff]  ;;  %v11878_v43 = vcombine.low %v3492_v61, %v3496_v20  ;;  %v3539_v20 = vsub.s32 3, %v12988_v33 }
 0x489   :  { %v3336_v47 = vld [vmem:[#allocation6 + $0x1a28] sm:$0xff]  ;;  %v11871_v34 = vcombine.high %v3484_v3, %v3488_v56 }
 0x48a   :  { %9276 = vmatpush2.bf16.msra.mxu0 %v11774_v54  ;;  %v3332_v54 = vld [vmem:[#allocation6 + $0x1a08] sm:$0xff] }
 0x48b   :  { %9277 = vmatprep.subr.bf16.mxu0 %v11767_v37  ;;  %9313 = vmatpush1.bf16.msra.mxu1 %v11790_v32  ;;  %v11726_v37 = vcombine.low %v3340_v50, %v3344_v12  ;;  %v3476_v32 = vld [vmem:[#allocation6 + $0x1e88] sm:$0xff]  ;;  %v11719_v26 = vcombine.high %v3332_v54, %v3336_v47  ;;  %v2537_v50 = vld [vmem:[#allocation6 + $0x130] sm:$0xff] }
 0x48c   :  { %9314 = vmatprep.subr.bf16.mxu1 %v11783_v8  ;;  %v3480_v46 = vld [vmem:[#allocation6 + $0x1ea8] sm:$0xff]  ;;  %v11870_v8 = vcombine.low %v3484_v3, %v3488_v56 }
 0x48d   :  { %v11863_v24 = vcombine.high %v3476_v32, %v3480_v46  ;;  %v3472_v31 = vld [vmem:[#allocation6 + $0x1e68] sm:$0xff] }
 0x48e   :  { %9278 = vmatpush2.bf16.msra.mxu0 %v11766_v42  ;;  %v2557_v42 = vld [vmem:[#allocation6 + $0x1d0] sm:$0xff]  ;;  %v3464_v23 = vld [vmem:[#allocation6 + $0x1e28] sm:$0xff] }
 0x48f   :  { %9279 = vmatprep.subr.bf16.mxu0 %v11759_v0  ;;  %9315 = vmatpush1.bf16.msra.mxu1 %v11782_v4  ;;  %v11718_v0 = vcombine.low %v3332_v54, %v3336_v47  ;;  %v3468_v4 = vld [vmem:[#allocation6 + $0x1e48] sm:$0xff]  ;;  %v10945_v57 = vcombine.high %v2557_v42, %v2561_v22 }
 0x490   :  { %9316 = vmatprep.subr.bf16.mxu1 %v11903_v30  ;;  %v11862_v30 = vcombine.low %v3476_v32, %v3480_v46  ;;  %v11855_v59 = vcombine.high %v3468_v4, %v3472_v31  ;;  %v2525_v32 = vld [vmem:[#allocation6 + $0xd0] sm:$0xff] }
 0x491   :  { %v2529_v46 = vld [vmem:[#allocation6 + $0xf0] sm:$0xff] }
 0x492   :  { %9280 = vmatpush2.bf16.msra.mxu0 %v11758_v15  ;;  %v2549_v15 = vld [vmem:[#allocation6 + $0x190] sm:$0xff] }
 0x493   :  { %9281 = vmatprep.subr.bf16.mxu0 %v11751_v7  ;;  %9317 = vmatpush2.bf16.msra.mxu1 %v11902_v39  ;;  %v10944_v7 = vcombine.low %v2557_v42, %v2561_v22  ;;  %v3460_v39 = vld [vmem:[#allocation6 + $0x1e08] sm:$0xff]  ;;  %v10937_v60 = vcombine.high %v2549_v15, %v2553_v21  ;;  %v10936_v29 = vcombine.low %v2549_v15, %v2553_v21  ;;  %v2669_v22 = vld [vmem:[#allocation6 + $0x550] sm:$0xff] }
 0x494   :  { %9318 = vmatprep.subr.bf16.mxu1 %v11895_v18  ;;  %v11854_v18 = vcombine.low %v3468_v4, %v3472_v31  ;;  %v10913_v4 = vcombine.high %v2525_v32, %v2529_v46  ;;  %v2517_v15 = vld [vmem:[#allocation6 + $0x90] sm:$0xff] }
 0x495   :  { %v2521_v21 = vld [vmem:[#allocation6 + $0xb0] sm:$0xff] }
 0x496   :  { %9282 = vmatpush2.bf16.msra.mxu0 %v11750_v58  ;;  %v2541_v58 = vld [vmem:[#allocation6 + $0x150] sm:$0xff] }
 0x497   :  { %9283 = vmatprep.subr.bf16.mxu0 %v11743_v44  ;;  %9319 = vmatpush2.bf16.msra.mxu1 %v11894_v36  ;;  %v11847_v44 = vcombine.high %v3460_v39, %v3464_v23  ;;  %v3535_v36 = vsub.s32 2, %v12988_v33  ;;  %v10929_v61 = vcombine.high %v2541_v58, %v2545_v10  ;;  %v10928_v56 = vcombine.low %v2541_v58, %v2545_v10 }
 0x498   :  { %9320 = vmatprep.subr.bf16.mxu1 %v11887_v25  ;;  %v2689_v25 = vld [vmem:[#allocation6 + $0x5f0] sm:$0xff]  ;;  %v10905_v10 = vcombine.high %v2517_v15, %v2521_v21 }
 0x49a   :  { %9284 = vmatpush2.bf16.msra.mxu0 %v11742_v5 }
 0x49b   :  { %9285 = vmatprep.subr.bf16.mxu0 %v11735_v1  ;;  %9321 = vmatpush2.bf16.msra.mxu1 %v11886_v16  ;;  %v11846_v1 = vcombine.low %v3460_v39, %v3464_v23  ;;  %v2533_v16 = vld [vmem:[#allocation6 + $0x110] sm:$0xff]  ;;  %v10912_v23 = vcombine.low %v2525_v32, %v2529_v46 }
 0x49c   :  { %9322 = vmatprep.subr.bf16.mxu1 %v11879_v38  ;;  %v11073_v38 = vcombine.high %v2685_v14, %v2689_v25  ;;  %v10921_v47 = vcombine.high %v2533_v16, %v2537_v50  ;;  %v10920_v42 = vcombine.low %v2533_v16, %v2537_v50  ;;  %v2501_v16 = vld [vmem:[#allocation6 + $0x10] sm:$0xff] }
 0x49d   :  { %v2505_v50 = vld [vmem:[#allocation6 + $0x30] sm:$0xff] }
 0x49e   :  { %9286 = vmatpush2.bf16.msra.mxu0 %v11734_v51  ;;  %v12319_v51 = vld [vmem:[#allocation8] sm:$0xff]  ;;  %v2641_v32 = vld [vmem:[#allocation6 + $0x470] sm:$0xff] }
 0x49f   :  { %9287 = vmatprep.subr.bf16.mxu0 %v11727_v17  ;;  %9323 = vmatpush2.bf16.msra.mxu1 %v11878_v43  ;;  %v3536_v3 = vrot.slane %v12319_v51, %v3535_v36  ;;  %v2677_v17 = vld [vmem:[#allocation6 + $0x590] sm:$0xff] }
 0x4a0   :  { %9324 = vmatprep.subr.bf16.mxu1 %v11871_v34  ;;  %v2681_v43 = vld [vmem:[#allocation6 + $0x5b0] sm:$0xff]  ;;  %v3540_v34 = vrot.slane %v12319_v51, %v3539_v20 }
 0x4a1   :  { %v2513_v36 = vld [vmem:[#allocation6 + $0x70] sm:$0xff] }
 0x4a2   :  { %9288 = vmatpush2.bf16.msra.mxu0 %v11726_v37  ;;  %v11072_v37 = vcombine.low %v2685_v14, %v2689_v25  ;;  %v10904_v25 = vcombine.low %v2517_v15, %v2521_v21  ;;  %v2645_v51 = vld [vmem:[#allocation6 + $0x490] sm:$0xff] }
 0x4a3   :  { %9289 = vmatprep.subr.bf16.mxu0 %v11719_v26  ;;  %9325 = vmatpush2.bf16.msra.mxu1 %v11870_v8  ;;  %v11065_v26 = vcombine.high %v2677_v17, %v2681_v43  ;;  %v2605_v15 = vld [vmem:[#allocation6 + $0x350] sm:$0xff] }
 0x4a4   :  { %9326 = vmatprep.subr.bf16.mxu1 %v11863_v24  ;;  %v2673_v24 = vld [vmem:[#allocation6 + $0x570] sm:$0xff] }
 0x4a5   :  { %v2609_v21 = vld [vmem:[#allocation6 + $0x370] sm:$0xff] }
 0x4a6   :  { %9290 = vmatpush2.bf16.msra.mxu0 %v11718_v0 }
 0x4a7   :  { %9341 = vmatprep.subr.bf16.mxu0 %v10945_v57  ;;  %9327 = vmatpush2.bf16.msra.mxu1 %v11862_v30  ;;  %v11064_v30 = vcombine.low %v2677_v17, %v2681_v43  ;;  %v2621_v43 = vld [vmem:[#allocation6 + $0x3d0] sm:$0xff] }
 0x4a8   :  { %9328 = vmatprep.subr.bf16.mxu1 %v11855_v59 }
 0x4a9   :  { %v9047_v35 = vpop.f32.mrf.mxu0  ;;  %9292 = vmatmul.mubr.bf16.vlgmr.msra.gmra.mxu0 %v14064_v62 }
 0x4aa   :  { %9342 = vmatpush1.bf16.msra.mxu0 %v10944_v7  ;;  %9373 = vmatprep.mubr.bf16.mxu0 %v13494_v49  ;;  %v9048_v8 = vadd.f32 %v9047_v35, %v3536_v3  ;;  %v11057_v7 = vcombine.high %v2669_v22, %v2673_v24  ;;  %v11056_v35 = vcombine.low %v2669_v22, %v2673_v24  ;;  %v2649_v3 = vld [vmem:[#allocation6 + $0x4b0] sm:$0xff] }
 0x4ab   :  { %v9049_v5 = vpop.f32.mrf.mxu0  ;;  %9343 = vmatprep.subr.bf16.mxu0 %v10937_v60  ;;  %9329 = vmatpush2.bf16.msra.mxu1 %v11854_v18  ;;  %v2661_v60 = vld [vmem:[#allocation6 + $0x510] sm:$0xff] }
 0x4ac   :  { %9330 = vmatprep.subr.bf16.mxu1 %v11847_v44  ;;  %v9050_v31 = vadd.f32 %v9049_v5, %v3540_v34  ;;  %v2665_v18 = vld [vmem:[#allocation6 + $0x530] sm:$0xff]  ;;  %v10888_v34 = vcombine.low %v2501_v16, %v2505_v50 }
 0x4ad   :  { %v9051_v12 = vpop.f32.mrf.mxu0  ;;  %v2509_v44 = vld [vmem:[#allocation6 + $0x50] sm:$0xff]  ;;  %v11049_v14 = vcombine.high %v2661_v60, %v2665_v18 }
 0x4ae   :  { %9344 = vmatpush1.bf16.msra.mxu0 %v10936_v29  ;;  %v2653_v5 = vld [vmem:[#allocation6 + $0x4d0] sm:$0xff]  ;;  %v10897_v20 = vcombine.high %v2509_v44, %v2513_v36 }
 0x4af   :  { %v9052_v54 = vpop.f32.mrf.mxu0  ;;  %9345 = vmatprep.subr.bf16.mxu0 %v10929_v61  ;;  %9331 = vmatpush2.bf16.msra.mxu1 %v11846_v1  ;;  %v2657_v61 = vld [vmem:[#allocation6 + $0x4f0] sm:$0xff]  ;;  %v11048_v1 = vcombine.low %v2661_v60, %v2665_v18  ;;  %v10993_v18 = vcombine.high %v2605_v15, %v2609_v21 }
 0x4b0   :  { %9382 = vmatprep.subr.bf16.mxu1 %v11073_v38  ;;  %v11041_v12 = vcombine.high %v2653_v5, %v2657_v61  ;;  %v10896_v38 = vcombine.low %v2509_v44, %v2513_v36  ;;  %v11040_v17 = vcombine.low %v2653_v5, %v2657_v61  ;;  %v2625_v54 = vld [vmem:[#allocation6 + $0x3f0] sm:$0xff]  ;;  %v10992_v36 = vcombine.low %v2605_v15, %v2609_v21 }
 0x4b1   :  { %v11009_v46 = vcombine.high %v2621_v43, %v2625_v54  ;;  %v11008_v24 = vcombine.low %v2621_v43, %v2625_v54  ;;  %v2753_v60 = vld [vmem:[#allocation6 + $0x7f0] sm:$0xff] }
 0x4b2   :  { %9346 = vmatpush1.bf16.msra.mxu0 %v10928_v56  ;;  %v9088_v0 = vpop.f32.mrf.mxu1  ;;  %9333 = vmatmul.mubr.bf16.vlgmr.msra.gmra.mxu1 %v14077_v41  ;;  %v10889_v56 = vcombine.high %v2501_v16, %v2505_v50  ;;  %v2589_v61 = vld [vmem:[#allocation6 + $0x2d0] sm:$0xff] }
 0x4b3   :  { %9347 = vmatprep.subr.bf16.mxu0 %v10921_v47  ;;  %v14120_v57 = vadd.f32 %v9088_v0, %v9048_v8  ;;  %9383 = vmatpush1.bf16.msra.mxu1 %v11072_v37  ;;  %v11033_v47 = vcombine.high %v2645_v51, %v2649_v3  ;;  %v2637_v37 = vld [vmem:[#allocation6 + $0x450] sm:$0xff] }
 0x4b4   :  { %9414 = vmatprep.mubr.bf16.mxu1 %v13604_v6  ;;  %v9090_v59 = vpop.f32.mrf.mxu1  ;;  %9384 = vmatprep.subr.bf16.mxu1 %v11065_v26  ;;  %v11032_v26 = vcombine.low %v2645_v51, %v2649_v3  ;;  %v2613_v8 = vld [vmem:[#allocation6 + $0x390] sm:$0xff]  ;;  %v11025_v22 = vcombine.high %v2637_v37, %v2641_v32 }
 0x4b5   :  { %v14123_v39 = vadd.f32 %v9090_v59, %v9050_v31  ;;  %v2629_v0 = vld [vmem:[#allocation6 + $0x410] sm:$0xff] }
 0x4b6   :  { %9348 = vmatpush1.bf16.msra.mxu0 %v10920_v42  ;;  %v9092_v58 = vpop.f32.mrf.mxu1  ;;  %v2617_v42 = vld [vmem:[#allocation6 + $0x3b0] sm:$0xff] }
 0x4b7   :  { %9349 = vmatprep.subr.bf16.mxu0 %v10913_v4  ;;  %9385 = vmatpush1.bf16.msra.mxu1 %v11064_v30  ;;  %v2633_v4 = vld [vmem:[#allocation6 + $0x430] sm:$0xff]  ;;  %v11001_v31 = vcombine.high %v2613_v8, %v2617_v42  ;;  %v11024_v30 = vcombine.low %v2637_v37, %v2641_v32 }
 0x4b8   :  { %v9093_v29 = vpop.f32.mrf.mxu1  ;;  %9386 = vmatprep.subr.bf16.mxu1 %v11057_v7  ;;  %v11017_v59 = vcombine.high %v2629_v0, %v2633_v4  ;;  %v11000_v7 = vcombine.low %v2613_v8, %v2617_v42  ;;  %v11016_v58 = vcombine.low %v2629_v0, %v2633_v4  ;;  %v2733_v50 = vld [vmem:[#allocation6 + $0x750] sm:$0xff] }
 0x4b9   :  { %v2741_v29 = vld [vmem:[#allocation6 + $0x790] sm:$0xff] }
 0x4ba   :  { %9350 = vmatpush1.bf16.msra.mxu0 %v10912_v23  ;;  %v2749_v23 = vld [vmem:[#allocation6 + $0x7d0] sm:$0xff] }
 0x4bb   :  { %9351 = vmatprep.subr.bf16.mxu0 %v10905_v10  ;;  %9387 = vmatpush1.bf16.msra.mxu1 %v11056_v35  ;;  %v2597_v10 = vld [vmem:[#allocation6 + $0x310] sm:$0xff]  ;;  %v11137_v44 = vcombine.high %v2749_v23, %v2753_v60  ;;  %v11136_v5 = vcombine.low %v2749_v23, %v2753_v60 }
 0x4bc   :  { %9388 = vmatprep.subr.bf16.mxu1 %v11049_v14  ;;  %v2601_v35 = vld [vmem:[#allocation6 + $0x330] sm:$0xff] }
 0x4bd   :  { %v2745_v14 = vld [vmem:[#allocation6 + $0x7b0] sm:$0xff]  ;;  %v10984_v16 = vcombine.low %v2597_v10, %v2601_v35 }
 0x4be   :  { %9352 = vmatpush1.bf16.msra.mxu0 %v10904_v25  ;;  %v10985_v25 = vcombine.high %v2597_v10, %v2601_v35  ;;  %v11128_v51 = vcombine.low %v2741_v29, %v2745_v14  ;;  %v2581_v3 = vld [vmem:[#allocation6 + $0x290] sm:$0xff] }
 0x4bf   :  { %9353 = vmatprep.subr.bf16.mxu0 %v10897_v20  ;;  %9389 = vmatpush1.bf16.msra.mxu1 %v11048_v1  ;;  %v2593_v20 = vld [vmem:[#allocation6 + $0x2f0] sm:$0xff]  ;;  %v11129_v1 = vcombine.high %v2741_v29, %v2745_v14 }
 0x4c0   :  { %9390 = vmatprep.subr.bf16.mxu1 %v11041_v12  ;;  %v2737_v12 = vld [vmem:[#allocation6 + $0x770] sm:$0xff]  ;;  %v10976_v43 = vcombine.low %v2589_v61, %v2593_v20 }
 0x4c1   :  { %v2725_v54 = vld [vmem:[#allocation6 + $0x710] sm:$0xff]  ;;  %v11120_v37 = vcombine.low %v2733_v50, %v2737_v12 }
 0x4c2   :  { %9354 = vmatpush1.bf16.msra.mxu0 %v10896_v38  ;;  %v10977_v38 = vcombine.high %v2589_v61, %v2593_v20  ;;  %v2573_v32 = vld [vmem:[#allocation6 + $0x250] sm:$0xff] }
 0x4c3   :  { %9355 = vmatprep.subr.bf16.mxu0 %v10889_v56  ;;  %9391 = vmatpush1.bf16.msra.mxu1 %v11040_v17  ;;  %v2585_v56 = vld [vmem:[#allocation6 + $0x2b0] sm:$0xff]  ;;  %v11121_v17 = vcombine.high %v2733_v50, %v2737_v12 }
 0x4c4   :  { %9392 = vmatprep.subr.bf16.mxu1 %v11033_v47  ;;  %v2729_v47 = vld [vmem:[#allocation6 + $0x730] sm:$0xff]  ;;  %v10968_v8 = vcombine.low %v2581_v3, %v2585_v56 }
 0x4c5   :  { %v2717_v42 = vld [vmem:[#allocation6 + $0x6d0] sm:$0xff]  ;;  %v11112_v0 = vcombine.low %v2725_v54, %v2729_v47 }
 0x4c6   :  { %9356 = vmatpush1.bf16.msra.mxu0 %v10888_v34  ;;  %v10969_v34 = vcombine.high %v2581_v3, %v2585_v56  ;;  %v2565_v4 = vld [vmem:[#allocation6 + $0x210] sm:$0xff] }
 0x4c7   :  { %9357 = vmatprep.subr.bf16.mxu0 %v11009_v46  ;;  %9393 = vmatpush1.bf16.msra.mxu1 %v11032_v26  ;;  %v2577_v46 = vld [vmem:[#allocation6 + $0x270] sm:$0xff]  ;;  %v11113_v26 = vcombine.high %v2725_v54, %v2729_v47 }
 0x4c8   :  { %9394 = vmatprep.subr.bf16.mxu1 %v11025_v22  ;;  %v2721_v22 = vld [vmem:[#allocation6 + $0x6f0] sm:$0xff]  ;;  %v10960_v15 = vcombine.low %v2573_v32, %v2577_v46 }
 0x4c9   :  { %v2709_v21 = vld [vmem:[#allocation6 + $0x690] sm:$0xff]  ;;  %v11104_v23 = vcombine.low %v2717_v42, %v2721_v22 }
 0x4ca   :  { %9358 = vmatpush2.bf16.msra.mxu0 %v11008_v24  ;;  %v10961_v24 = vcombine.high %v2573_v32, %v2577_v46  ;;  %v2813_v60 = vld [vmem:[#allocation6 + $0x9d0] sm:$0xff] }
 0x4cb   :  { %9359 = vmatprep.subr.bf16.mxu0 %v11001_v31  ;;  %9395 = vmatpush1.bf16.msra.mxu1 %v11024_v30  ;;  %v2569_v31 = vld [vmem:[#allocation6 + $0x230] sm:$0xff]  ;;  %v11105_v30 = vcombine.high %v2717_v42, %v2721_v22 }
 0x4cc   :  { %9396 = vmatprep.subr.bf16.mxu1 %v11017_v59  ;;  %v2713_v59 = vld [vmem:[#allocation6 + $0x6b0] sm:$0xff]  ;;  %v10952_v10 = vcombine.low %v2565_v4, %v2569_v31 }
 0x4cd   :  { %v2701_v35 = vld [vmem:[#allocation6 + $0x650] sm:$0xff]  ;;  %v11096_v29 = vcombine.low %v2709_v21, %v2713_v59 }
 0x4ce   :  { %9360 = vmatpush2.bf16.msra.mxu0 %v11000_v7  ;;  %v10953_v7 = vcombine.high %v2565_v4, %v2569_v31  ;;  %v2805_v14 = vld [vmem:[#allocation6 + $0x990] sm:$0xff] }
 0x4cf   :  { %9361 = vmatprep.subr.bf16.mxu0 %v10993_v18  ;;  %9397 = vmatpush1.bf16.msra.mxu1 %v11016_v58  ;;  %v2817_v18 = vld [vmem:[#allocation6 + $0x9f0] sm:$0xff]  ;;  %v11097_v58 = vcombine.high %v2709_v21, %v2713_v59 }
 0x4d0   :  { %9398 = vmatprep.subr.bf16.mxu1 %v11137_v44  ;;  %v2705_v44 = vld [vmem:[#allocation6 + $0x670] sm:$0xff]  ;;  %v11200_v61 = vcombine.low %v2813_v60, %v2817_v18 }
 0x4d1   :  { %v2693_v20 = vld [vmem:[#allocation6 + $0x610] sm:$0xff]  ;;  %v11088_v50 = vcombine.low %v2701_v35, %v2705_v44 }
 0x4d2   :  { %9362 = vmatpush2.bf16.msra.mxu0 %v10992_v36  ;;  %v11201_v36 = vcombine.high %v2813_v60, %v2817_v18  ;;  %v2797_v12 = vld [vmem:[#allocation6 + $0x950] sm:$0xff] }
 0x4d3   :  { %9363 = vmatprep.subr.bf16.mxu0 %v10985_v25  ;;  %9399 = vmatpush2.bf16.msra.mxu1 %v11136_v5  ;;  %v2809_v25 = vld [vmem:[#allocation6 + $0x9b0] sm:$0xff]  ;;  %v11089_v5 = vcombine.high %v2701_v35, %v2705_v44 }
 0x4d4   :  { %9400 = vmatprep.subr.bf16.mxu1 %v11129_v1  ;;  %v2697_v1 = vld [vmem:[#allocation6 + $0x630] sm:$0xff] }
 0x4d5   :  { %v11081_v3 = vcombine.high %v2693_v20, %v2697_v1  ;;  %v2945_v54 = vld [vmem:[#allocation6 + $0xdf0] sm:$0xff]  ;;  %v11080_v32 = vcombine.low %v2693_v20, %v2697_v1 }
 0x4d6   :  { %9364 = vmatpush2.bf16.msra.mxu0 %v10984_v16  ;;  %v11193_v16 = vcombine.high %v2805_v14, %v2809_v25  ;;  %v2789_v46 = vld [vmem:[#allocation6 + $0x910] sm:$0xff] }
 0x4d7   :  { %9365 = vmatprep.subr.bf16.mxu0 %v10977_v38  ;;  %9401 = vmatpush2.bf16.msra.mxu1 %v11128_v51  ;;  %v2801_v38 = vld [vmem:[#allocation6 + $0x970] sm:$0xff] }
 0x4d8   :  { %9402 = vmatprep.subr.bf16.mxu1 %v11121_v17  ;;  %v11192_v17 = vcombine.low %v2805_v14, %v2809_v25  ;;  %v2933_v22 = vld [vmem:[#allocation6 + $0xd90] sm:$0xff] }
 0x4d9   :  { %v2925_v59 = vld [vmem:[#allocation6 + $0xd50] sm:$0xff] }
 0x4da   :  { %9366 = vmatpush2.bf16.msra.mxu0 %v10976_v43  ;;  %v2941_v43 = vld [vmem:[#allocation6 + $0xdd0] sm:$0xff] }
 0x4db   :  { %9367 = vmatprep.subr.bf16.mxu0 %v10969_v34  ;;  %9403 = vmatpush2.bf16.msra.mxu1 %v11120_v37  ;;  %v11185_v34 = vcombine.high %v2797_v12, %v2801_v38  ;;  %v11329_v42 = vcombine.high %v2941_v43, %v2945_v54  ;;  %v11328_v31 = vcombine.low %v2941_v43, %v2945_v54  ;;  %v2777_v35 = vld [vmem:[#allocation6 + $0x8b0] sm:$0xff] }
 0x4dc   :  { %9404 = vmatprep.subr.bf16.mxu1 %v11113_v26  ;;  %v2793_v26 = vld [vmem:[#allocation6 + $0x930] sm:$0xff] }
 0x4dd   :  { %v11177_v4 = vcombine.high %v2789_v46, %v2793_v26  ;;  %v11176_v21 = vcombine.low %v2789_v46, %v2793_v26  ;;  %v2917_v25 = vld [vmem:[#allocation6 + $0xd10] sm:$0xff] }
 0x4de   :  { %9368 = vmatpush2.bf16.msra.mxu0 %v10968_v8  ;;  %v2757_v54 = vld [vmem:[#allocation6 + $0x810] sm:$0xff] }
 0x4df   :  { %9369 = vmatprep.subr.bf16.mxu0 %v10961_v24  ;;  %9405 = vmatpush2.bf16.msra.mxu1 %v11112_v0  ;;  %v2937_v24 = vld [vmem:[#allocation6 + $0xdb0] sm:$0xff] }
 0x4e0   :  { %9406 = vmatprep.subr.bf16.mxu1 %v11105_v30  ;;  %v2781_v30 = vld [vmem:[#allocation6 + $0x8d0] sm:$0xff] }
 0x4e1   :  { %v2905_v46 = vld [vmem:[#allocation6 + $0xcb0] sm:$0xff] }
 0x4e2   :  { %9370 = vmatpush2.bf16.msra.mxu0 %v10960_v15  ;;  %v2785_v15 = vld [vmem:[#allocation6 + $0x8f0] sm:$0xff] }
 0x4e3   :  { %9371 = vmatprep.subr.bf16.mxu0 %v10953_v7  ;;  %9407 = vmatpush2.bf16.msra.mxu1 %v11104_v23  ;;  %v2929_v7 = vld [vmem:[#allocation6 + $0xd70] sm:$0xff]  ;;  %v11169_v60 = vcombine.high %v2781_v30, %v2785_v15  ;;  %v11168_v14 = vcombine.low %v2781_v30, %v2785_v15 }
 0x4e4   :  { %9408 = vmatprep.subr.bf16.mxu1 %v11097_v58  ;;  %v11320_v58 = vcombine.low %v2933_v22, %v2937_v24  ;;  %v11312_v1 = vcombine.low %v2925_v59, %v2929_v7  ;;  %v2869_v15 = vld [vmem:[#allocation6 + $0xb90] sm:$0xff] }
 0x4e6   :  { %9372 = vmatpush2.bf16.msra.mxu0 %v10952_v10  ;;  %v2773_v10 = vld [vmem:[#allocation6 + $0x890] sm:$0xff] }
 0x4e7   :  { %9423 = vmatprep.subr.bf16.mxu0 %v11201_v36  ;;  %9409 = vmatpush2.bf16.msra.mxu1 %v11096_v29  ;;  %v11313_v36 = vcombine.high %v2925_v59, %v2929_v7  ;;  %v11161_v20 = vcombine.high %v2773_v10, %v2777_v35  ;;  %v2885_v7 = vld [vmem:[#allocation6 + $0xc10] sm:$0xff] }
 0x4e8   :  { %9410 = vmatprep.subr.bf16.mxu1 %v11089_v5  ;;  %v2921_v5 = vld [vmem:[#allocation6 + $0xd30] sm:$0xff] }
 0x4e9   :  { %v9129_v51 = vpop.f32.mrf.mxu0  ;;  %9374 = vmatmul.mubr.bf16.vlgmr.msra.gmra.mxu0 %v13535_v2  ;;  %v11304_v43 = vcombine.low %v2917_v25, %v2921_v5 }
 0x4ea   :  { %v9130_v56 = vadd.f32 %v9129_v51, %v14120_v57  ;;  %9424 = vmatpush1.bf16.msra.mxu0 %v11200_v61  ;;  %9455 = vmatprep.mubr.bf16.mxu0 %v13788_v19  ;;  %v11184_v57 = vcombine.low %v2797_v12, %v2801_v38  ;;  %v11305_v38 = vcombine.high %v2917_v25, %v2921_v5  ;;  %v3009_v25 = vld [vmem:[#allocation6 + $0xff0] sm:$0xff] }
 0x4eb   :  { %v9131_v47 = vpop.f32.mrf.mxu0  ;;  %9425 = vmatprep.subr.bf16.mxu0 %v11193_v16  ;;  %9411 = vmatpush2.bf16.msra.mxu1 %v11088_v50  ;;  %v2765_v16 = vld [vmem:[#allocation6 + $0x850] sm:$0xff]  ;;  %v11160_v51 = vcombine.low %v2773_v10, %v2777_v35 }
 0x4ec   :  { %v9132_v37 = vadd.f32 %v9131_v47, %v14123_v39  ;;  %9412 = vmatprep.subr.bf16.mxu1 %v11081_v3  ;;  %v11321_v39 = vcombine.high %v2933_v22, %v2937_v24  ;;  %v2769_v50 = vld [vmem:[#allocation6 + $0x870] sm:$0xff] }
 0x4ed   :  { %v9133_v8 = vpop.f32.mrf.mxu0  ;;  %v2909_v3 = vld [vmem:[#allocation6 + $0xcd0] sm:$0xff] }
 0x4ee   :  { %9426 = vmatpush1.bf16.msra.mxu0 %v11192_v17  ;;  %v11153_v17 = vcombine.high %v2765_v16, %v2769_v50  ;;  %v2761_v47 = vld [vmem:[#allocation6 + $0x830] sm:$0xff] }
 0x4ef   :  { %v9134_v0 = vpop.f32.mrf.mxu0  ;;  %9427 = vmatprep.subr.bf16.mxu0 %v11185_v34  ;;  %9413 = vmatpush2.bf16.msra.mxu1 %v11080_v32  ;;  %v2901_v32 = vld [vmem:[#allocation6 + $0xc90] sm:$0xff]  ;;  %v11145_v26 = vcombine.high %v2757_v54, %v2761_v47  ;;  %v11144_v24 = vcombine.low %v2757_v54, %v2761_v47 }
 0x4f0   :  { %9464 = vmatprep.subr.bf16.mxu1 %v11329_v42  ;;  %v2877_v42 = vld [vmem:[#allocation6 + $0xbd0] sm:$0xff]  ;;  %v11289_v22 = vcombine.high %v2901_v32, %v2905_v46  ;;  %v11288_v30 = vcombine.low %v2901_v32, %v2905_v46 }
 0x4f1   :  { %v2893_v0 = vld [vmem:[#allocation6 + $0xc50] sm:$0xff] }
 0x4f2   :  { %9428 = vmatpush1.bf16.msra.mxu0 %v11184_v57  ;;  %v9170_v23 = vpop.f32.mrf.mxu1  ;;  %9415 = vmatmul.mubr.bf16.vlgmr.msra.gmra.mxu1 %v13601_v9  ;;  %v2881_v57 = vld [vmem:[#allocation6 + $0xbf0] sm:$0xff] }
 0x4f3   :  { %9429 = vmatprep.subr.bf16.mxu0 %v11177_v4  ;;  %v14130_v18 = vadd.f32 %v9170_v23, %v9130_v56  ;;  %9465 = vmatpush1.bf16.msra.mxu1 %v11328_v31  ;;  %v2913_v56 = vld [vmem:[#allocation6 + $0xcf0] sm:$0xff]  ;;  %v11265_v31 = vcombine.high %v2877_v42, %v2881_v57  ;;  %v11264_v59 = vcombine.low %v2877_v42, %v2881_v57 }
 0x4f4   :  { %9496 = vmatprep.mubr.bf16.mxu1 %v13845_v55  ;;  %v9172_v44 = vpop.f32.mrf.mxu1  ;;  %9466 = vmatprep.subr.bf16.mxu1 %v11321_v39  ;;  %v11297_v34 = vcombine.high %v2909_v3, %v2913_v56  ;;  %v11296_v8 = vcombine.low %v2909_v3, %v2913_v56  ;;  %v2897_v4 = vld [vmem:[#allocation6 + $0xc70] sm:$0xff] }
 0x4f5   :  { %v14133_v29 = vadd.f32 %v9172_v44, %v9132_v37  ;;  %v11152_v37 = vcombine.low %v2765_v16, %v2769_v50  ;;  %v2873_v39 = vld [vmem:[#allocation6 + $0xbb0] sm:$0xff] }
 0x4f6   :  { %9430 = vmatpush1.bf16.msra.mxu0 %v11176_v21  ;;  %v9174_v61 = vpop.f32.mrf.mxu1  ;;  %v11281_v21 = vcombine.high %v2893_v0, %v2897_v4  ;;  %v2889_v23 = vld [vmem:[#allocation6 + $0xc30] sm:$0xff] }
 0x4f7   :  { %9431 = vmatprep.subr.bf16.mxu0 %v11169_v60  ;;  %9467 = vmatpush1.bf16.msra.mxu1 %v11320_v58  ;;  %v11257_v60 = vcombine.high %v2869_v15, %v2873_v39  ;;  %v11280_v58 = vcombine.low %v2893_v0, %v2897_v4  ;;  %v2861_v10 = vld [vmem:[#allocation6 + $0xb50] sm:$0xff]  ;;  %v11273_v44 = vcombine.high %v2885_v7, %v2889_v23 }
 0x4f8   :  { %v9175_v12 = vpop.f32.mrf.mxu1  ;;  %9468 = vmatprep.subr.bf16.mxu1 %v11313_v36  ;;  %v2865_v35 = vld [vmem:[#allocation6 + $0xb70] sm:$0xff]  ;;  %v11256_v36 = vcombine.low %v2869_v15, %v2873_v39  ;;  %v11272_v61 = vcombine.low %v2885_v7, %v2889_v23 }
 0x4f9   :  { %v11249_v5 = vcombine.high %v2861_v10, %v2865_v35  ;;  %v11248_v50 = vcombine.low %v2861_v10, %v2865_v35  ;;  %v2997_v12 = vld [vmem:[#allocation6 + $0xf90] sm:$0xff] }
 0x4fa   :  { %9432 = vmatpush1.bf16.msra.mxu0 %v11168_v14  ;;  %v3005_v14 = vld [vmem:[#allocation6 + $0xfd0] sm:$0xff] }
 0x4fb   :  { %9433 = vmatprep.subr.bf16.mxu0 %v11161_v20  ;;  %9469 = vmatpush1.bf16.msra.mxu1 %v11312_v1  ;;  %v2853_v20 = vld [vmem:[#allocation6 + $0xb10] sm:$0xff]  ;;  %v11393_v16 = vcombine.high %v3005_v14, %v3009_v25  ;;  %v11392_v3 = vcombine.low %v3005_v14, %v3009_v25 }
 0x4fc   :  { %9470 = vmatprep.subr.bf16.mxu1 %v11305_v38  ;;  %v2857_v1 = vld [vmem:[#allocation6 + $0xb30] sm:$0xff] }
 0x4fd   :  { %v3001_v38 = vld [vmem:[#allocation6 + $0xfb0] sm:$0xff]  ;;  %v11240_v54 = vcombine.low %v2853_v20, %v2857_v1 }
 0x4fe   :  { %9434 = vmatpush1.bf16.msra.mxu0 %v11160_v51  ;;  %v11241_v51 = vcombine.high %v2853_v20, %v2857_v1  ;;  %v2845_v56 = vld [vmem:[#allocation6 + $0xad0] sm:$0xff]  ;;  %v11384_v32 = vcombine.low %v2997_v12, %v3001_v38 }
 0x4ff   :  { %9435 = vmatprep.subr.bf16.mxu0 %v11153_v17  ;;  %9471 = vmatpush1.bf16.msra.mxu1 %v11304_v43  ;;  %v2849_v17 = vld [vmem:[#allocation6 + $0xaf0] sm:$0xff]  ;;  %v11385_v43 = vcombine.high %v2997_v12, %v3001_v38 }
 0x500   :  { %9472 = vmatprep.subr.bf16.mxu1 %v11297_v34  ;;  %v2989_v47 = vld [vmem:[#allocation6 + $0xf50] sm:$0xff]  ;;  %v11232_v42 = vcombine.low %v2845_v56, %v2849_v17 }
 0x501   :  { %v2993_v34 = vld [vmem:[#allocation6 + $0xf70] sm:$0xff] }
 0x502   :  { %9436 = vmatpush1.bf16.msra.mxu0 %v11152_v37  ;;  %v11233_v37 = vcombine.high %v2845_v56, %v2849_v17  ;;  %v2837_v46 = vld [vmem:[#allocation6 + $0xa90] sm:$0xff]  ;;  %v11376_v0 = vcombine.low %v2989_v47, %v2993_v34 }
 0x503   :  { %9437 = vmatprep.subr.bf16.mxu0 %v11145_v26  ;;  %9473 = vmatpush1.bf16.msra.mxu1 %v11296_v8  ;;  %v2841_v26 = vld [vmem:[#allocation6 + $0xab0] sm:$0xff]  ;;  %v11377_v8 = vcombine.high %v2989_v47, %v2993_v34 }
 0x504   :  { %9474 = vmatprep.subr.bf16.mxu1 %v11289_v22  ;;  %v2981_v57 = vld [vmem:[#allocation6 + $0xf10] sm:$0xff]  ;;  %v11224_v15 = vcombine.low %v2837_v46, %v2841_v26 }
 0x505   :  { %v2985_v22 = vld [vmem:[#allocation6 + $0xf30] sm:$0xff] }
 0x506   :  { %9438 = vmatpush1.bf16.msra.mxu0 %v11144_v24  ;;  %v11225_v24 = vcombine.high %v2837_v46, %v2841_v26  ;;  %v2829_v4 = vld [vmem:[#allocation6 + $0xa50] sm:$0xff]  ;;  %v11368_v7 = vcombine.low %v2981_v57, %v2985_v22 }
 0x507   :  { %9439 = vmatprep.subr.bf16.mxu0 %v11265_v31  ;;  %9475 = vmatpush1.bf16.msra.mxu1 %v11288_v30  ;;  %v2833_v31 = vld [vmem:[#allocation6 + $0xa70] sm:$0xff]  ;;  %v11369_v30 = vcombine.high %v2981_v57, %v2985_v22 }
 0x508   :  { %9476 = vmatprep.subr.bf16.mxu1 %v11281_v21  ;;  %v2973_v39 = vld [vmem:[#allocation6 + $0xed0] sm:$0xff]  ;;  %v11216_v10 = vcombine.low %v2829_v4, %v2833_v31 }
 0x509   :  { %v2977_v21 = vld [vmem:[#allocation6 + $0xef0] sm:$0xff] }
 0x50a   :  { %9440 = vmatpush2.bf16.msra.mxu0 %v11264_v59  ;;  %v11217_v59 = vcombine.high %v2829_v4, %v2833_v31  ;;  %v2821_v23 = vld [vmem:[#allocation6 + $0xa10] sm:$0xff]  ;;  %v11360_v14 = vcombine.low %v2973_v39, %v2977_v21 }
 0x50b   :  { %9441 = vmatprep.subr.bf16.mxu0 %v11257_v60  ;;  %9477 = vmatpush1.bf16.msra.mxu1 %v11280_v58  ;;  %v2825_v60 = vld [vmem:[#allocation6 + $0xa30] sm:$0xff]  ;;  %v11361_v58 = vcombine.high %v2973_v39, %v2977_v21 }
 0x50c   :  { %9478 = vmatprep.subr.bf16.mxu1 %v11273_v44  ;;  %v2965_v35 = vld [vmem:[#allocation6 + $0xe90] sm:$0xff]  ;;  %v11208_v20 = vcombine.low %v2821_v23, %v2825_v60 }
 0x50d   :  { %v2969_v44 = vld [vmem:[#allocation6 + $0xeb0] sm:$0xff] }
 0x50e   :  { %9442 = vmatpush2.bf16.msra.mxu0 %v11256_v36  ;;  %v11209_v36 = vcombine.high %v2821_v23, %v2825_v60  ;;  %v3069_v25 = vld [vmem:[#allocation6 + $0x11d0] sm:$0xff]  ;;  %v11352_v12 = vcombine.low %v2965_v35, %v2969_v44 }
 0x50f   :  { %9443 = vmatprep.subr.bf16.mxu0 %v11249_v5  ;;  %9479 = vmatpush1.bf16.msra.mxu1 %v11272_v61  ;;  %v3073_v5 = vld [vmem:[#allocation6 + $0x11f0] sm:$0xff]  ;;  %v11353_v61 = vcombine.high %v2965_v35, %v2969_v44 }
 0x510   :  { %9480 = vmatprep.subr.bf16.mxu1 %v11393_v16  ;;  %v2957_v1 = vld [vmem:[#allocation6 + $0xe50] sm:$0xff]  ;;  %v11456_v56 = vcombine.low %v3069_v25, %v3073_v5 }
 0x511   :  { %v2961_v16 = vld [vmem:[#allocation6 + $0xe70] sm:$0xff] }
 0x512   :  { %9444 = vmatpush2.bf16.msra.mxu0 %v11248_v50  ;;  %v11457_v50 = vcombine.high %v3069_v25, %v3073_v5  ;;  %v3061_v38 = vld [vmem:[#allocation6 + $0x1190] sm:$0xff]  ;;  %v11344_v47 = vcombine.low %v2957_v1, %v2961_v16 }
 0x513   :  { %9445 = vmatprep.subr.bf16.mxu0 %v11241_v51  ;;  %9481 = vmatpush2.bf16.msra.mxu1 %v11392_v3  ;;  %v3065_v51 = vld [vmem:[#allocation6 + $0x11b0] sm:$0xff]  ;;  %v11345_v3 = vcombine.high %v2957_v1, %v2961_v16 }
 0x514   :  { %9482 = vmatprep.subr.bf16.mxu1 %v11385_v43  ;;  %v2949_v17 = vld [vmem:[#allocation6 + $0xe10] sm:$0xff] }
 0x515   :  { %v2953_v43 = vld [vmem:[#allocation6 + $0xe30] sm:$0xff] }
 0x516   :  { %9446 = vmatpush2.bf16.msra.mxu0 %v11240_v54  ;;  %v11449_v54 = vcombine.high %v3061_v38, %v3065_v51  ;;  %v3053_v34 = vld [vmem:[#allocation6 + $0x1150] sm:$0xff]  ;;  %v11337_v46 = vcombine.high %v2949_v17, %v2953_v43  ;;  %v11336_v4 = vcombine.low %v2949_v17, %v2953_v43 }
 0x517   :  { %9447 = vmatprep.subr.bf16.mxu0 %v11233_v37  ;;  %9483 = vmatpush2.bf16.msra.mxu1 %v11384_v32  ;;  %v3057_v37 = vld [vmem:[#allocation6 + $0x1170] sm:$0xff] }
 0x518   :  { %9484 = vmatprep.subr.bf16.mxu1 %v11377_v8  ;;  %v11448_v8 = vcombine.low %v3061_v38, %v3065_v51  ;;  %v3201_v57 = vld [vmem:[#allocation6 + $0x15f0] sm:$0xff] }
 0x519   :  { %v3045_v31 = vld [vmem:[#allocation6 + $0x1110] sm:$0xff] }
 0x51a   :  { %9448 = vmatpush2.bf16.msra.mxu0 %v11232_v42  ;;  %v3197_v42 = vld [vmem:[#allocation6 + $0x15d0] sm:$0xff] }
 0x51b   :  { %9449 = vmatprep.subr.bf16.mxu0 %v11225_v24  ;;  %9485 = vmatpush2.bf16.msra.mxu1 %v11376_v0  ;;  %v11441_v24 = vcombine.high %v3053_v34, %v3057_v37  ;;  %v11585_v39 = vcombine.high %v3197_v42, %v3201_v57  ;;  %v3189_v21 = vld [vmem:[#allocation6 + $0x1590] sm:$0xff]  ;;  %v11584_v60 = vcombine.low %v3197_v42, %v3201_v57 }
 0x51c   :  { %9486 = vmatprep.subr.bf16.mxu1 %v11369_v30  ;;  %v3049_v30 = vld [vmem:[#allocation6 + $0x1130] sm:$0xff] }
 0x51d   :  { %v11433_v23 = vcombine.high %v3045_v31, %v3049_v30  ;;  %v11432_v35 = vcombine.low %v3045_v31, %v3049_v30  ;;  %v3181_v44 = vld [vmem:[#allocation6 + $0x1550] sm:$0xff] }
 0x51e   :  { %9450 = vmatpush2.bf16.msra.mxu0 %v11224_v15  ;;  %v3033_v1 = vld [vmem:[#allocation6 + $0x10b0] sm:$0xff] }
 0x51f   :  { %9451 = vmatprep.subr.bf16.mxu0 %v11217_v59  ;;  %9487 = vmatpush2.bf16.msra.mxu1 %v11368_v7  ;;  %v3193_v59 = vld [vmem:[#allocation6 + $0x15b0] sm:$0xff] }
 0x520   :  { %9488 = vmatprep.subr.bf16.mxu1 %v11361_v58  ;;  %v3037_v58 = vld [vmem:[#allocation6 + $0x10d0] sm:$0xff] }
 0x521   :  { %v3173_v51 = vld [vmem:[#allocation6 + $0x1510] sm:$0xff] }
 0x522   :  { %9452 = vmatpush2.bf16.msra.mxu0 %v11216_v10  ;;  %v3041_v10 = vld [vmem:[#allocation6 + $0x10f0] sm:$0xff] }
 0x523   :  { %9453 = vmatprep.subr.bf16.mxu0 %v11209_v36  ;;  %9489 = vmatpush2.bf16.msra.mxu1 %v11360_v14  ;;  %v3185_v36 = vld [vmem:[#allocation6 + $0x1570] sm:$0xff]  ;;  %v11425_v25 = vcombine.high %v3037_v58, %v3041_v10  ;;  %v11424_v38 = vcombine.low %v3037_v58, %v3041_v10 }
 0x524   :  { %9490 = vmatprep.subr.bf16.mxu1 %v11353_v61  ;;  %v11576_v61 = vcombine.low %v3189_v21, %v3193_v59  ;;  %v11568_v43 = vcombine.low %v3181_v44, %v3185_v36  ;;  %v3013_v57 = vld [vmem:[#allocation6 + $0x1010] sm:$0xff] }
 0x525   :  { %v3161_v31 = vld [vmem:[#allocation6 + $0x14b0] sm:$0xff] }
 0x526   :  { %9454 = vmatpush2.bf16.msra.mxu0 %v11208_v20  ;;  %v3029_v20 = vld [vmem:[#allocation6 + $0x1090] sm:$0xff] }
 0x527   :  { %9505 = vmatprep.subr.bf16.mxu0 %v11457_v50  ;;  %9491 = vmatpush2.bf16.msra.mxu1 %v11352_v12  ;;  %v11569_v50 = vcombine.high %v3181_v44, %v3185_v36  ;;  %v11417_v17 = vcombine.high %v3029_v20, %v3033_v1  ;;  %v3125_v10 = vld [vmem:[#allocation6 + $0x1390] sm:$0xff] }
 0x528   :  { %9492 = vmatprep.subr.bf16.mxu1 %v11345_v3  ;;  %v3177_v3 = vld [vmem:[#allocation6 + $0x1530] sm:$0xff] }
 0x529   :  { %v9211_v32 = vpop.f32.mrf.mxu0  ;;  %9456 = vmatmul.mubr.bf16.vlgmr.msra.gmra.mxu0 %v13842_v28  ;;  %v11560_v42 = vcombine.low %v3173_v51, %v3177_v3  ;;  %v3141_v36 = vld [vmem:[#allocation6 + $0x1410] sm:$0xff] }
 0x52a   :  { %v9212_v26 = vadd.f32 %v9211_v32, %v14130_v18  ;;  %9506 = vmatpush1.bf16.msra.mxu0 %v11456_v56  ;;  %9537 = vmatprep.mubr.bf16.mxu0 %v13912_v53  ;;  %v11440_v18 = vcombine.low %v3053_v34, %v3057_v37  ;;  %v11561_v37 = vcombine.high %v3173_v51, %v3177_v3  ;;  %v3265_v51 = vld [vmem:[#allocation6 + $0x17f0] sm:$0xff] }
 0x52b   :  { %v9213_v22 = vpop.f32.mrf.mxu0  ;;  %9507 = vmatprep.subr.bf16.mxu0 %v11449_v54  ;;  %9493 = vmatpush2.bf16.msra.mxu1 %v11344_v47  ;;  %v3021_v54 = vld [vmem:[#allocation6 + $0x1050] sm:$0xff]  ;;  %v11416_v32 = vcombine.low %v3029_v20, %v3033_v1 }
 0x52c   :  { %v9214_v0 = vadd.f32 %v9213_v22, %v14133_v29  ;;  %9494 = vmatprep.subr.bf16.mxu1 %v11337_v46  ;;  %v11577_v29 = vcombine.high %v3189_v21, %v3193_v59  ;;  %v3025_v47 = vld [vmem:[#allocation6 + $0x1070] sm:$0xff] }
 0x52d   :  { %v9215_v15 = vpop.f32.mrf.mxu0  ;;  %v3165_v46 = vld [vmem:[#allocation6 + $0x14d0] sm:$0xff] }
 0x52e   :  { %9508 = vmatpush1.bf16.msra.mxu0 %v11448_v8  ;;  %v11409_v8 = vcombine.high %v3021_v54, %v3025_v47  ;;  %v3017_v22 = vld [vmem:[#allocation6 + $0x1030] sm:$0xff] }
 0x52f   :  { %v9216_v7 = vpop.f32.mrf.mxu0  ;;  %9509 = vmatprep.subr.bf16.mxu0 %v11441_v24  ;;  %9495 = vmatpush2.bf16.msra.mxu1 %v11336_v4  ;;  %v3157_v4 = vld [vmem:[#allocation6 + $0x1490] sm:$0xff]  ;;  %v11401_v30 = vcombine.high %v3013_v57, %v3017_v22  ;;  %v11400_v59 = vcombine.low %v3013_v57, %v3017_v22 }
 0x530   :  { %9546 = vmatprep.subr.bf16.mxu1 %v11585_v39  ;;  %v3133_v39 = vld [vmem:[#allocation6 + $0x13d0] sm:$0xff]  ;;  %v11545_v21 = vcombine.high %v3157_v4, %v3161_v31  ;;  %v11544_v58 = vcombine.low %v3157_v4, %v3161_v31 }
 0x531   :  { %v3149_v7 = vld [vmem:[#allocation6 + $0x1450] sm:$0xff] }
 0x532   :  { %9510 = vmatpush1.bf16.msra.mxu0 %v11440_v18  ;;  %v9252_v14 = vpop.f32.mrf.mxu1  ;;  %9497 = vmatmul.mubr.bf16.vlgmr.msra.gmra.mxu1 %v13871_v48  ;;  %v3137_v18 = vld [vmem:[#allocation6 + $0x13f0] sm:$0xff] }
 0x533   :  { %9511 = vmatprep.subr.bf16.mxu0 %v11433_v23  ;;  %v14140_v5 = vadd.f32 %v9252_v14, %v9212_v26  ;;  %9547 = vmatpush1.bf16.msra.mxu1 %v11584_v60  ;;  %v3169_v26 = vld [vmem:[#allocation6 + $0x14f0] sm:$0xff]  ;;  %v11521_v60 = vcombine.high %v3133_v39, %v3137_v18  ;;  %v11520_v44 = vcombine.low %v3133_v39, %v3137_v18 }
 0x534   :  { %9578 = vmatprep.mubr.bf16.mxu1 %v13942_v13  ;;  %v9254_v16 = vpop.f32.mrf.mxu1  ;;  %9548 = vmatprep.subr.bf16.mxu1 %v11577_v29  ;;  %v11553_v24 = vcombine.high %v3165_v46, %v3169_v26  ;;  %v11552_v15 = vcombine.low %v3165_v46, %v3169_v26  ;;  %v3153_v23 = vld [vmem:[#allocation6 + $0x1470] sm:$0xff] }
 0x535   :  { %v14143_v12 = vadd.f32 %v9254_v16, %v9214_v0  ;;  %v11408_v0 = vcombine.low %v3021_v54, %v3025_v47  ;;  %v3129_v29 = vld [vmem:[#allocation6 + $0x13b0] sm:$0xff] }
 0x536   :  { %9512 = vmatpush1.bf16.msra.mxu0 %v11432_v35  ;;  %v9256_v56 = vpop.f32.mrf.mxu1  ;;  %v11537_v35 = vcombine.high %v3149_v7, %v3153_v23  ;;  %v3145_v14 = vld [vmem:[#allocation6 + $0x1430] sm:$0xff] }
 0x537   :  { %9513 = vmatprep.subr.bf16.mxu0 %v11425_v25  ;;  %9549 = vmatpush1.bf16.msra.mxu1 %v11576_v61  ;;  %v11513_v25 = vcombine.high %v3125_v10, %v3129_v29  ;;  %v11536_v61 = vcombine.low %v3149_v7, %v3153_v23  ;;  %v3117_v20 = vld [vmem:[#allocation6 + $0x1350] sm:$0xff]  ;;  %v11529_v16 = vcombine.high %v3141_v36, %v3145_v14 }
 0x538   :  { %v9257_v34 = vpop.f32.mrf.mxu1  ;;  %9550 = vmatprep.subr.bf16.mxu1 %v11569_v50  ;;  %v3121_v1 = vld [vmem:[#allocation6 + $0x1370] sm:$0xff]  ;;  %v11512_v50 = vcombine.low %v3125_v10, %v3129_v29  ;;  %v11528_v56 = vcombine.low %v3141_v36, %v3145_v14 }
 0x539   :  { %v11505_v3 = vcombine.high %v3117_v20, %v3121_v1  ;;  %v11504_v47 = vcombine.low %v3117_v20, %v3121_v1  ;;  %v3253_v34 = vld [vmem:[#allocation6 + $0x1790] sm:$0xff] }
 0x53a   :  { %9514 = vmatpush1.bf16.msra.mxu0 %v11424_v38  ;;  %v3261_v38 = vld [vmem:[#allocation6 + $0x17d0] sm:$0xff] }
 0x53b   :  { %9515 = vmatprep.subr.bf16.mxu0 %v11417_v17  ;;  %9551 = vmatpush1.bf16.msra.mxu1 %v11568_v43  ;;  %v3109_v17 = vld [vmem:[#allocation6 + $0x1310] sm:$0xff]  ;;  %v11649_v54 = vcombine.high %v3261_v38, %v3265_v51  ;;  %v11648_v46 = vcombine.low %v3261_v38, %v3265_v51 }
 0x53c   :  { %9552 = vmatprep.subr.bf16.mxu1 %v11561_v37  ;;  %v3113_v43 = vld [vmem:[#allocation6 + $0x1330] sm:$0xff] }
 0x53d   :  { %v3257_v37 = vld [vmem:[#allocation6 + $0x17b0] sm:$0xff]  ;;  %v11496_v57 = vcombine.low %v3109_v17, %v3113_v43 }
 0x53e   :  { %9516 = vmatpush1.bf16.msra.mxu0 %v11416_v32  ;;  %v11497_v32 = vcombine.high %v3109_v17, %v3113_v43  ;;  %v3101_v26 = vld [vmem:[#allocation6 + $0x12d0] sm:$0xff]  ;;  %v11640_v4 = vcombine.low %v3253_v34, %v3257_v37 }
 0x53f   :  { %9517 = vmatprep.subr.bf16.mxu0 %v11409_v8  ;;  %9553 = vmatpush1.bf16.msra.mxu1 %v11560_v42  ;;  %v3105_v8 = vld [vmem:[#allocation6 + $0x12f0] sm:$0xff]  ;;  %v11641_v42 = vcombine.high %v3253_v34, %v3257_v37 }
 0x540   :  { %9554 = vmatprep.subr.bf16.mxu1 %v11553_v24  ;;  %v3245_v22 = vld [vmem:[#allocation6 + $0x1750] sm:$0xff]  ;;  %v11488_v39 = vcombine.low %v3101_v26, %v3105_v8 }
 0x541   :  { %v3249_v24 = vld [vmem:[#allocation6 + $0x1770] sm:$0xff] }
 0x542   :  { %9518 = vmatpush1.bf16.msra.mxu0 %v11408_v0  ;;  %v11489_v0 = vcombine.high %v3101_v26, %v3105_v8  ;;  %v3093_v31 = vld [vmem:[#allocation6 + $0x1290] sm:$0xff]  ;;  %v11632_v7 = vcombine.low %v3245_v22, %v3249_v24 }
 0x543   :  { %9519 = vmatprep.subr.bf16.mxu0 %v11401_v30  ;;  %9555 = vmatpush1.bf16.msra.mxu1 %v11552_v15  ;;  %v3097_v30 = vld [vmem:[#allocation6 + $0x12b0] sm:$0xff]  ;;  %v11633_v15 = vcombine.high %v3245_v22, %v3249_v24 }
 0x544   :  { %9556 = vmatprep.subr.bf16.mxu1 %v11545_v21  ;;  %v3237_v18 = vld [vmem:[#allocation6 + $0x1710] sm:$0xff]  ;;  %v11480_v10 = vcombine.low %v3093_v31, %v3097_v30 }
 0x545   :  { %v3241_v21 = vld [vmem:[#allocation6 + $0x1730] sm:$0xff] }
 0x546   :  { %9520 = vmatpush1.bf16.msra.mxu0 %v11400_v59  ;;  %v11481_v59 = vcombine.high %v3093_v31, %v3097_v30  ;;  %v3085_v23 = vld [vmem:[#allocation6 + $0x1250] sm:$0xff]  ;;  %v11624_v36 = vcombine.low %v3237_v18, %v3241_v21 }
 0x547   :  { %9521 = vmatprep.subr.bf16.mxu0 %v11521_v60  ;;  %9557 = vmatpush1.bf16.msra.mxu1 %v11544_v58  ;;  %v3089_v60 = vld [vmem:[#allocation6 + $0x1270] sm:$0xff]  ;;  %v11625_v58 = vcombine.high %v3237_v18, %v3241_v21 }
 0x548   :  { %9558 = vmatprep.subr.bf16.mxu1 %v11537_v35  ;;  %v3229_v29 = vld [vmem:[#allocation6 + $0x16d0] sm:$0xff]  ;;  %v11472_v20 = vcombine.low %v3085_v23, %v3089_v60 }
 0x549   :  { %v3233_v35 = vld [vmem:[#allocation6 + $0x16f0] sm:$0xff] }
 0x54a   :  { %9522 = vmatpush2.bf16.msra.mxu0 %v11520_v44  ;;  %v11473_v44 = vcombine.high %v3085_v23, %v3089_v60  ;;  %v3077_v14 = vld [vmem:[#allocation6 + $0x1210] sm:$0xff]  ;;  %v11616_v38 = vcombine.low %v3229_v29, %v3233_v35 }
 0x54b   :  { %9523 = vmatprep.subr.bf16.mxu0 %v11513_v25  ;;  %9559 = vmatpush1.bf16.msra.mxu1 %v11536_v61  ;;  %v3081_v25 = vld [vmem:[#allocation6 + $0x1230] sm:$0xff]  ;;  %v11617_v61 = vcombine.high %v3229_v29, %v3233_v35 }
 0x54c   :  { %9560 = vmatprep.subr.bf16.mxu1 %v11529_v16  ;;  %v3221_v1 = vld [vmem:[#allocation6 + $0x1690] sm:$0xff]  ;;  %v11464_v17 = vcombine.low %v3077_v14, %v3081_v25 }
 0x54d   :  { %v3225_v16 = vld [vmem:[#allocation6 + $0x16b0] sm:$0xff] }
 0x54e   :  { %9524 = vmatpush2.bf16.msra.mxu0 %v11512_v50  ;;  %v11465_v50 = vcombine.high %v3077_v14, %v3081_v25  ;;  %v3325_v51 = vld [vmem:[#allocation6 + $0x19d0] sm:$0xff]  ;;  %v11608_v34 = vcombine.low %v3221_v1, %v3225_v16 }
 0x54f   :  { %9525 = vmatprep.subr.bf16.mxu0 %v11505_v3  ;;  %9561 = vmatpush1.bf16.msra.mxu1 %v11528_v56  ;;  %v3329_v3 = vld [vmem:[#allocation6 + $0x19f0] sm:$0xff]  ;;  %v11609_v56 = vcombine.high %v3221_v1, %v3225_v16 }
 0x550   :  { %9562 = vmatprep.subr.bf16.mxu1 %v11649_v54  ;;  %v3213_v43 = vld [vmem:[#allocation6 + $0x1650] sm:$0xff]  ;;  %v11712_v26 = vcombine.low %v3325_v51, %v3329_v3 }
 0x551   :  { %v3217_v54 = vld [vmem:[#allocation6 + $0x1670] sm:$0xff] }
 0x552   :  { %9526 = vmatpush2.bf16.msra.mxu0 %v11504_v47  ;;  %v11713_v47 = vcombine.high %v3325_v51, %v3329_v3  ;;  %v3317_v37 = vld [vmem:[#allocation6 + $0x1990] sm:$0xff]  ;;  %v11600_v22 = vcombine.low %v3213_v43, %v3217_v54 }
 0x553   :  { %9527 = vmatprep.subr.bf16.mxu0 %v11497_v32  ;;  %9563 = vmatpush2.bf16.msra.mxu1 %v11648_v46  ;;  %v3321_v32 = vld [vmem:[#allocation6 + $0x19b0] sm:$0xff]  ;;  %v11601_v46 = vcombine.high %v3213_v43, %v3217_v54 }
 0x554   :  { %9564 = vmatprep.subr.bf16.mxu1 %v11641_v42  ;;  %v3205_v8 = vld [vmem:[#allocation6 + $0x1610] sm:$0xff] }
 0x555   :  { %v3209_v42 = vld [vmem:[#allocation6 + $0x1630] sm:$0xff] }
 0x556   :  { %9528 = vmatpush2.bf16.msra.mxu0 %v11496_v57  ;;  %v11705_v57 = vcombine.high %v3317_v37, %v3321_v32  ;;  %v3309_v24 = vld [vmem:[#allocation6 + $0x1950] sm:$0xff]  ;;  %v11593_v31 = vcombine.high %v3205_v8, %v3209_v42  ;;  %v11592_v23 = vcombine.low %v3205_v8, %v3209_v42 }
 0x557   :  { %9529 = vmatprep.subr.bf16.mxu0 %v11489_v0  ;;  %9565 = vmatpush2.bf16.msra.mxu1 %v11640_v4  ;;  %v3313_v0 = vld [vmem:[#allocation6 + $0x1970] sm:$0xff] }
 0x558   :  { %9566 = vmatprep.subr.bf16.mxu1 %v11633_v15  ;;  %v11704_v15 = vcombine.low %v3317_v37, %v3321_v32  ;;  %v3457_v18 = vld [vmem:[#allocation6 + $0x1df0] sm:$0xff] }
 0x559   :  { %v3301_v60 = vld [vmem:[#allocation6 + $0x1910] sm:$0xff] }
 0x55a   :  { %9530 = vmatpush2.bf16.msra.mxu0 %v11488_v39  ;;  %v3453_v39 = vld [vmem:[#allocation6 + $0x1dd0] sm:$0xff] }
 0x55b   :  { %9531 = vmatprep.subr.bf16.mxu0 %v11481_v59  ;;  %9567 = vmatpush2.bf16.msra.mxu1 %v11632_v7  ;;  %v11697_v59 = vcombine.high %v3309_v24, %v3313_v0  ;;  %v11841_v29 = vcombine.high %v3453_v39, %v3457_v18  ;;  %v3445_v35 = vld [vmem:[#allocation6 + $0x1d90] sm:$0xff]  ;;  %v11840_v25 = vcombine.low %v3453_v39, %v3457_v18 }
 0x55c   :  { %9568 = vmatprep.subr.bf16.mxu1 %v11625_v58  ;;  %v3305_v58 = vld [vmem:[#allocation6 + $0x1930] sm:$0xff] }
 0x55d   :  { %v11689_v14 = vcombine.high %v3301_v60, %v3305_v58  ;;  %v11688_v1 = vcombine.low %v3301_v60, %v3305_v58  ;;  %v3437_v16 = vld [vmem:[#allocation6 + $0x1d50] sm:$0xff] }
 0x55e   :  { %9532 = vmatpush2.bf16.msra.mxu0 %v11480_v10  ;;  %v3289_v43 = vld [vmem:[#allocation6 + $0x18b0] sm:$0xff] }
 0x55f   :  { %9533 = vmatprep.subr.bf16.mxu0 %v11473_v44  ;;  %9569 = vmatpush2.bf16.msra.mxu1 %v11624_v36  ;;  %v3449_v44 = vld [vmem:[#allocation6 + $0x1db0] sm:$0xff] }
 0x560   :  { %9570 = vmatprep.subr.bf16.mxu1 %v11617_v61  ;;  %v3293_v61 = vld [vmem:[#allocation6 + $0x18d0] sm:$0xff] }
 0x561   :  { %v3429_v32 = vld [vmem:[#allocation6 + $0x1d10] sm:$0xff] }
 0x562   :  { %9534 = vmatpush2.bf16.msra.mxu0 %v11472_v20  ;;  %v3297_v20 = vld [vmem:[#allocation6 + $0x18f0] sm:$0xff] }
 0x563   :  { %9535 = vmatprep.subr.bf16.mxu0 %v11465_v50  ;;  %9571 = vmatpush2.bf16.msra.mxu1 %v11616_v38  ;;  %v3441_v50 = vld [vmem:[#allocation6 + $0x1d70] sm:$0xff]  ;;  %v11681_v51 = vcombine.high %v3293_v61, %v3297_v20  ;;  %v11680_v37 = vcombine.low %v3293_v61, %v3297_v20 }
 0x564   :  { %9572 = vmatprep.subr.bf16.mxu1 %v11609_v56  ;;  %v11832_v56 = vcombine.low %v3445_v35, %v3449_v44  ;;  %v11824_v42 = vcombine.low %v3437_v16, %v3441_v50  ;;  %v3269_v18 = vld [vmem:[#allocation6 + $0x1810] sm:$0xff] }
 0x565   :  { %v3417_v60 = vld [vmem:[#allocation6 + $0x1cb0] sm:$0xff] }
 0x566   :  { %9536 = vmatpush2.bf16.msra.mxu0 %v11464_v17  ;;  %v3285_v17 = vld [vmem:[#allocation6 + $0x1890] sm:$0xff] }
 0x567   :  { %9587 = vmatprep.subr.bf16.mxu0 %v11713_v47  ;;  %9573 = vmatpush2.bf16.msra.mxu1 %v11608_v34  ;;  %v11825_v47 = vcombine.high %v3437_v16, %v3441_v50  ;;  %v11673_v8 = vcombine.high %v3285_v17, %v3289_v43  ;;  %v3381_v20 = vld [vmem:[#allocation6 + $0x1b90] sm:$0xff] }
 0x568   :  { %9574 = vmatprep.subr.bf16.mxu1 %v11601_v46  ;;  %v3433_v46 = vld [vmem:[#allocation6 + $0x1d30] sm:$0xff] }
 0x569   :  { %v9293_v4 = vpop.f32.mrf.mxu0  ;;  %9538 = vmatmul.mubr.bf16.vlgmr.msra.gmra.mxu0 %v13964_v27  ;;  %v11816_v39 = vcombine.low %v3429_v32, %v3433_v46  ;;  %v3397_v50 = vld [vmem:[#allocation6 + $0x1c10] sm:$0xff] }
 0x56a   :  { %v9294_v30 = vadd.f32 %v9293_v4, %v14140_v5  ;;  %9588 = vmatpush1.bf16.msra.mxu0 %v11712_v26  ;;  %9619 = vmatprep.mubr.bf16.mxu0 %v14020_v63  ;;  %v11696_v5 = vcombine.low %v3309_v24, %v3313_v0  ;;  %v11817_v0 = vcombine.high %v3429_v32, %v3433_v46  ;;  %v3521_v32 = vld [vmem:[#allocation6 + $0x1ff0] sm:$0xff] }
 0x56b   :  { %v9295_v21 = vpop.f32.mrf.mxu0  ;;  %9589 = vmatprep.subr.bf16.mxu0 %v11705_v57  ;;  %9575 = vmatpush2.bf16.msra.mxu1 %v11600_v22  ;;  %v3277_v57 = vld [vmem:[#allocation6 + $0x1850] sm:$0xff]  ;;  %v11672_v4 = vcombine.low %v3285_v17, %v3289_v43 }
 0x56c   :  { %v9296_v7 = vadd.f32 %v9295_v21, %v14143_v12  ;;  %9576 = vmatprep.subr.bf16.mxu1 %v11593_v31  ;;  %v11833_v12 = vcombine.high %v3445_v35, %v3449_v44  ;;  %v3281_v22 = vld [vmem:[#allocation6 + $0x1870] sm:$0xff] }
 0x56d   :  { %v9297_v10 = vpop.f32.mrf.mxu0  ;;  %v3421_v31 = vld [vmem:[#allocation6 + $0x1cd0] sm:$0xff] }
 0x56e   :  { %9590 = vmatpush1.bf16.msra.mxu0 %v11704_v15  ;;  %v11665_v15 = vcombine.high %v3277_v57, %v3281_v22  ;;  %v3273_v21 = vld [vmem:[#allocation6 + $0x1830] sm:$0xff] }
 0x56f   :  { %v9298_v36 = vpop.f32.mrf.mxu0  ;;  %9591 = vmatprep.subr.bf16.mxu0 %v11697_v59  ;;  %9577 = vmatpush2.bf16.msra.mxu1 %v11592_v23  ;;  %v3413_v23 = vld [vmem:[#allocation6 + $0x1c90] sm:$0xff]  ;;  %v11657_v58 = vcombine.high %v3269_v18, %v3273_v21  ;;  %v11656_v44 = vcombine.low %v3269_v18, %v3273_v21 }
 0x570   :  { %9628 = vmatprep.subr.bf16.mxu1 %v11841_v29  ;;  %v3389_v29 = vld [vmem:[#allocation6 + $0x1bd0] sm:$0xff]  ;;  %v11801_v35 = vcombine.high %v3413_v23, %v3417_v60  ;;  %v11800_v61 = vcombine.low %v3413_v23, %v3417_v60 }
 0x571   :  { %v3405_v36 = vld [vmem:[#allocation6 + $0x1c50] sm:$0xff] }
 0x572   :  { %9592 = vmatpush1.bf16.msra.mxu0 %v11696_v5  ;;  %v9334_v38 = vpop.f32.mrf.mxu1  ;;  %9579 = vmatmul.mubr.bf16.vlgmr.msra.gmra.mxu1 %v13989_v45  ;;  %v3393_v5 = vld [vmem:[#allocation6 + $0x1bf0] sm:$0xff] }
 0x573   :  { %9593 = vmatprep.subr.bf16.mxu0 %v11689_v14  ;;  %v14150_v3 = vadd.f32 %v9334_v38, %v9294_v30  ;;  %9629 = vmatpush1.bf16.msra.mxu1 %v11840_v25  ;;  %v3425_v30 = vld [vmem:[#allocation6 + $0x1cf0] sm:$0xff]  ;;  %v11777_v25 = vcombine.high %v3389_v29, %v3393_v5  ;;  %v11776_v16 = vcombine.low %v3389_v29, %v3393_v5 }
 0x574   :  { %9660 = vmatprep.mubr.bf16.mxu1 %v14041_v11  ;;  %v9336_v54 = vpop.f32.mrf.mxu1  ;;  %9630 = vmatprep.subr.bf16.mxu1 %v11833_v12  ;;  %v11809_v59 = vcombine.high %v3421_v31, %v3425_v30  ;;  %v11808_v10 = vcombine.low %v3421_v31, %v3425_v30  ;;  %v3409_v14 = vld [vmem:[#allocation6 + $0x1c70] sm:$0xff] }
 0x575   :  { %v14153_v34 = vadd.f32 %v9336_v54, %v9296_v7  ;;  %v11664_v7 = vcombine.low %v3277_v57, %v3281_v22  ;;  %v3385_v12 = vld [vmem:[#allocation6 + $0x1bb0] sm:$0xff] }
 0x576   :  { %9594 = vmatpush1.bf16.msra.mxu0 %v11688_v1  ;;  %v9338_v26 = vpop.f32.mrf.mxu1  ;;  %v11793_v1 = vcombine.high %v3405_v36, %v3409_v14  ;;  %v3401_v38 = vld [vmem:[#allocation6 + $0x1c30] sm:$0xff] }
 0x577   :  { %9595 = vmatprep.subr.bf16.mxu0 %v11681_v51  ;;  %9631 = vmatpush1.bf16.msra.mxu1 %v11832_v56  ;;  %v11769_v51 = vcombine.high %v3381_v20, %v3385_v12  ;;  %v11792_v56 = vcombine.low %v3405_v36, %v3409_v14  ;;  %v3373_v17 = vld [vmem:[#allocation6 + $0x1b50] sm:$0xff]  ;;  %v11785_v54 = vcombine.high %v3397_v50, %v3401_v38 }
 0x578   :  { %v9339_v24 = vpop.f32.mrf.mxu1  ;;  %9632 = vmatprep.subr.bf16.mxu1 %v11825_v47  ;;  %v3377_v43 = vld [vmem:[#allocation6 + $0x1b70] sm:$0xff]  ;;  %v11768_v47 = vcombine.low %v3381_v20, %v3385_v12  ;;  %v11784_v26 = vcombine.low %v3397_v50, %v3401_v38 }
 0x579   :  { %v11761_v46 = vcombine.high %v3373_v17, %v3377_v43  ;;  %v11760_v22 = vcombine.low %v3373_v17, %v3377_v43  ;;  %v3509_v24 = vld [vmem:[#allocation6 + $0x1f90] sm:$0xff] }
 0x57a   :  { %9596 = vmatpush1.bf16.msra.mxu0 %v11680_v37  ;;  %v3517_v37 = vld [vmem:[#allocation6 + $0x1fd0] sm:$0xff] }
 0x57b   :  { %9597 = vmatprep.subr.bf16.mxu0 %v11673_v8  ;;  %9633 = vmatpush1.bf16.msra.mxu1 %v11824_v42  ;;  %v3365_v8 = vld [vmem:[#allocation6 + $0x1b10] sm:$0xff]  ;;  %v11905_v57 = vcombine.high %v3517_v37, %v3521_v32  ;;  %v11904_v31 = vcombine.low %v3517_v37, %v3521_v32  ;;  %v2558_v32 = vld [vmem:[#allocation6 + $0x1d8] sm:$0xff] }
 0x57c   :  { %9634 = vmatprep.subr.bf16.mxu1 %v11817_v0  ;;  %v3369_v42 = vld [vmem:[#allocation6 + $0x1b30] sm:$0xff] }
 0x57d   :  { %v3513_v0 = vld [vmem:[#allocation6 + $0x1fb0] sm:$0xff]  ;;  %v11752_v18 = vcombine.low %v3365_v8, %v3369_v42 }
 0x57e   :  { %9598 = vmatpush1.bf16.msra.mxu0 %v11672_v4  ;;  %v11753_v4 = vcombine.high %v3365_v8, %v3369_v42  ;;  %v3357_v30 = vld [vmem:[#allocation6 + $0x1ad0] sm:$0xff]  ;;  %v11896_v23 = vcombine.low %v3509_v24, %v3513_v0 }
 0x57f   :  { %9599 = vmatprep.subr.bf16.mxu0 %v11665_v15  ;;  %9635 = vmatpush1.bf16.msra.mxu1 %v11816_v39  ;;  %v3361_v15 = vld [vmem:[#allocation6 + $0x1af0] sm:$0xff]  ;;  %v11897_v39 = vcombine.high %v3509_v24, %v3513_v0  ;;  %v2550_v0 = vld [vmem:[#allocation6 + $0x198] sm:$0xff] }
 0x580   :  { %9636 = vmatprep.subr.bf16.mxu1 %v11809_v59  ;;  %v3501_v21 = vld [vmem:[#allocation6 + $0x1f50] sm:$0xff]  ;;  %v11744_v29 = vcombine.low %v3357_v30, %v3361_v15 }
 0x581   :  { %v3505_v59 = vld [vmem:[#allocation6 + $0x1f70] sm:$0xff] }
 0x582   :  { %9600 = vmatpush1.bf16.msra.mxu0 %v11664_v7  ;;  %v11745_v7 = vcombine.high %v3357_v30, %v3361_v15  ;;  %v3349_v60 = vld [vmem:[#allocation6 + $0x1a90] sm:$0xff]  ;;  %v11888_v36 = vcombine.low %v3501_v21, %v3505_v59 }
 0x583   :  { %9601 = vmatprep.subr.bf16.mxu0 %v11657_v58  ;;  %9637 = vmatpush1.bf16.msra.mxu1 %v11808_v10  ;;  %v3353_v58 = vld [vmem:[#allocation6 + $0x1ab0] sm:$0xff]  ;;  %v11889_v10 = vcombine.high %v3501_v21, %v3505_v59  ;;  %v2542_v59 = vld [vmem:[#allocation6 + $0x158] sm:$0xff] }
 0x584   :  { %9638 = vmatprep.subr.bf16.mxu1 %v11801_v35  ;;  %v3493_v5 = vld [vmem:[#allocation6 + $0x1f10] sm:$0xff]  ;;  %v11736_v20 = vcombine.low %v3349_v60, %v3353_v58 }
 0x585   :  { %v3497_v35 = vld [vmem:[#allocation6 + $0x1f30] sm:$0xff] }
 0x586   :  { %9602 = vmatpush1.bf16.msra.mxu0 %v11656_v44  ;;  %v11737_v44 = vcombine.high %v3349_v60, %v3353_v58  ;;  %v3341_v14 = vld [vmem:[#allocation6 + $0x1a50] sm:$0xff]  ;;  %v11880_v50 = vcombine.low %v3493_v5, %v3497_v35  ;;  %v3543_v58 = vsub.s32 4, %v12988_v33 }
 0x587   :  { %9603 = vmatprep.subr.bf16.mxu0 %v11777_v25  ;;  %9639 = vmatpush1.bf16.msra.mxu1 %v11800_v61  ;;  %v3345_v25 = vld [vmem:[#allocation6 + $0x1a70] sm:$0xff]  ;;  %v11881_v61 = vcombine.high %v3493_v5, %v3497_v35  ;;  %v2690_v5 = vld [vmem:[#allocation6 + $0x5f8] sm:$0xff] }
 0x588   :  { %9640 = vmatprep.subr.bf16.mxu1 %v11793_v1  ;;  %v3485_v12 = vld [vmem:[#allocation6 + $0x1ed0] sm:$0xff]  ;;  %v11728_v17 = vcombine.low %v3341_v14, %v3345_v25 }
 0x589   :  { %v3489_v1 = vld [vmem:[#allocation6 + $0x1ef0] sm:$0xff] }
 0x58a   :  { %9604 = vmatpush2.bf16.msra.mxu0 %v11776_v16  ;;  %v11729_v16 = vcombine.high %v3341_v14, %v3345_v25  ;;  %v3333_v38 = vld [vmem:[#allocation6 + $0x1a10] sm:$0xff]  ;;  %v11872_v37 = vcombine.low %v3485_v12, %v3489_v1  ;;  %v2534_v25 = vld [vmem:[#allocation6 + $0x118] sm:$0xff] }
 0x58b   :  { %9605 = vmatprep.subr.bf16.mxu0 %v11769_v51  ;;  %9641 = vmatpush1.bf16.msra.mxu1 %v11792_v56  ;;  %v3337_v51 = vld [vmem:[#allocation6 + $0x1a30] sm:$0xff]  ;;  %v11873_v56 = vcombine.high %v3485_v12, %v3489_v1  ;;  %v12320_v1 = vld [vmem:[#allocation8] sm:$0xff] }
 0x58c   :  { %9642 = vmatprep.subr.bf16.mxu1 %v11785_v54  ;;  %v3477_v43 = vld [vmem:[#allocation6 + $0x1e90] sm:$0xff]  ;;  %v11720_v8 = vcombine.low %v3333_v38, %v3337_v51 }
 0x58d   :  { %v3481_v54 = vld [vmem:[#allocation6 + $0x1eb0] sm:$0xff] }
 0x58e   :  { %9606 = vmatpush2.bf16.msra.mxu0 %v11768_v47  ;;  %v11721_v47 = vcombine.high %v3333_v38, %v3337_v51  ;;  %v3469_v42 = vld [vmem:[#allocation6 + $0x1e50] sm:$0xff]  ;;  %v11864_v24 = vcombine.low %v3477_v43, %v3481_v54  ;;  %v2682_v38 = vld [vmem:[#allocation6 + $0x5b8] sm:$0xff] }
 0x58f   :  { %9607 = vmatprep.subr.bf16.mxu0 %v11761_v46  ;;  %9643 = vmatpush1.bf16.msra.mxu1 %v11784_v26  ;;  %v2562_v46 = vld [vmem:[#allocation6 + $0x1f8] sm:$0xff]  ;;  %v11865_v26 = vcombine.high %v3477_v43, %v3481_v54  ;;  %v3461_v15 = vld [vmem:[#allocation6 + $0x1e10] sm:$0xff] }
 0x590   :  { %9644 = vmatprep.subr.bf16.mxu1 %v11905_v57  ;;  %v3473_v57 = vld [vmem:[#allocation6 + $0x1e70] sm:$0xff]  ;;  %v10946_v30 = vcombine.low %v2558_v32, %v2562_v46  ;;  %v2526_v54 = vld [vmem:[#allocation6 + $0xd8] sm:$0xff] }
 0x591   :  { %v11856_v21 = vcombine.low %v3469_v42, %v3473_v57 }
 0x592   :  { %9608 = vmatpush2.bf16.msra.mxu0 %v11760_v22  ;;  %v10947_v22 = vcombine.high %v2558_v32, %v2562_v46 }
 0x593   :  { %9609 = vmatprep.subr.bf16.mxu0 %v11753_v4  ;;  %9645 = vmatpush2.bf16.msra.mxu1 %v11904_v31  ;;  %v2554_v4 = vld [vmem:[#allocation6 + $0x1b8] sm:$0xff]  ;;  %v11857_v31 = vcombine.high %v3469_v42, %v3473_v57 }
 0x594   :  { %9646 = vmatprep.subr.bf16.mxu1 %v11897_v39  ;;  %v3465_v39 = vld [vmem:[#allocation6 + $0x1e30] sm:$0xff] }
 0x595   :  { %v11849_v60 = vcombine.high %v3461_v15, %v3465_v39  ;;  %v11848_v14 = vcombine.low %v3461_v15, %v3465_v39 }
 0x596   :  { %9610 = vmatpush2.bf16.msra.mxu0 %v11752_v18  ;;  %v10939_v18 = vcombine.high %v2550_v0, %v2554_v4 }
 0x597   :  { %9611 = vmatprep.subr.bf16.mxu0 %v11745_v7  ;;  %9647 = vmatpush2.bf16.msra.mxu1 %v11896_v23  ;;  %v2546_v7 = vld [vmem:[#allocation6 + $0x178] sm:$0xff] }
 0x598   :  { %9648 = vmatprep.subr.bf16.mxu1 %v11889_v10  ;;  %v10938_v10 = vcombine.low %v2550_v0, %v2554_v4  ;;  %v2518_v4 = vld [vmem:[#allocation6 + $0x98] sm:$0xff] }
 0x59a   :  { %9612 = vmatpush2.bf16.msra.mxu0 %v11744_v29  ;;  %v2686_v29 = vld [vmem:[#allocation6 + $0x5d8] sm:$0xff] }
 0x59b   :  { %9613 = vmatprep.subr.bf16.mxu0 %v11737_v44  ;;  %9649 = vmatpush2.bf16.msra.mxu1 %v11888_v36  ;;  %v10931_v44 = vcombine.high %v2542_v59, %v2546_v7  ;;  %v3547_v36 = vsub.s32 5, %v12988_v33  ;;  %v11075_v12 = vcombine.high %v2686_v29, %v2690_v5  ;;  %v11074_v43 = vcombine.low %v2686_v29, %v2690_v5 }
 0x59c   :  { %9650 = vmatprep.subr.bf16.mxu1 %v11881_v61  ;;  %v2538_v61 = vld [vmem:[#allocation6 + $0x138] sm:$0xff] }
 0x59d   :  { %v10922_v46 = vcombine.low %v2534_v25, %v2538_v61 }
 0x59e   :  { %9614 = vmatpush2.bf16.msra.mxu0 %v11736_v20 }
 0x59f   :  { %9615 = vmatprep.subr.bf16.mxu0 %v11729_v16  ;;  %9651 = vmatpush2.bf16.msra.mxu1 %v11880_v50  ;;  %v3544_v16 = vrot.slane %v12320_v1, %v3543_v58  ;;  %v10930_v50 = vcombine.low %v2542_v59, %v2546_v7  ;;  %v2666_v59 = vld [vmem:[#allocation6 + $0x538] sm:$0xff] }
 0x5a0   :  { %9652 = vmatprep.subr.bf16.mxu1 %v11873_v56  ;;  %v10923_v56 = vcombine.high %v2534_v25, %v2538_v61  ;;  %v2510_v58 = vld [vmem:[#allocation6 + $0x58] sm:$0xff] }
 0x5a1   :  { %v2502_v25 = vld [vmem:[#allocation6 + $0x18] sm:$0xff] }
 0x5a2   :  { %9616 = vmatpush2.bf16.msra.mxu0 %v11728_v17  ;;  %v3548_v17 = vrot.slane %v12320_v1, %v3547_v36  ;;  %v2506_v61 = vld [vmem:[#allocation6 + $0x38] sm:$0xff] }
 0x5a3   :  { %9617 = vmatprep.subr.bf16.mxu0 %v11721_v47  ;;  %9653 = vmatpush2.bf16.msra.mxu1 %v11872_v37  ;;  %v2530_v47 = vld [vmem:[#allocation6 + $0xf8] sm:$0xff] }
 0x5a4   :  { %9654 = vmatprep.subr.bf16.mxu1 %v11865_v26  ;;  %v2670_v26 = vld [vmem:[#allocation6 + $0x558] sm:$0xff]  ;;  %v10915_v57 = vcombine.high %v2526_v54, %v2530_v47 }
 0x5a5   :  { %v2646_v1 = vld [vmem:[#allocation6 + $0x498] sm:$0xff] }
 0x5a6   :  { %9618 = vmatpush2.bf16.msra.mxu0 %v11720_v8  ;;  %v2674_v8 = vld [vmem:[#allocation6 + $0x578] sm:$0xff] }
 0x5a7   :  { %9669 = vmatprep.subr.bf16.mxu0 %v10947_v22  ;;  %9655 = vmatpush2.bf16.msra.mxu1 %v11864_v24  ;;  %v11059_v15 = vcombine.high %v2670_v26, %v2674_v8 }
 0x5a8   :  { %9656 = vmatprep.subr.bf16.mxu1 %v11857_v31  ;;  %v2522_v31 = vld [vmem:[#allocation6 + $0xb8] sm:$0xff] }
 0x5a9   :  { %v9375_v23 = vpop.f32.mrf.mxu0  ;;  %9620 = vmatmul.mubr.bf16.vlgmr.msra.gmra.mxu0 %v14064_v62  ;;  %v10906_v5 = vcombine.low %v2518_v4, %v2522_v31 }
 0x5aa   :  { %9670 = vmatpush1.bf16.msra.mxu0 %v10946_v30  ;;  %9701 = vmatprep.mubr.bf16.mxu0 %v13494_v49  ;;  %v2678_v49 = vld [vmem:[#allocation6 + $0x598] sm:$0xff]  ;;  %v9376_v32 = vadd.f32 %v9375_v23, %v3544_v16  ;;  %v10907_v23 = vcombine.high %v2518_v4, %v2522_v31 }
 0x5ab   :  { %v9377_v35 = vpop.f32.mrf.mxu0  ;;  %9671 = vmatprep.subr.bf16.mxu0 %v10939_v18  ;;  %9657 = vmatpush2.bf16.msra.mxu1 %v11856_v21  ;;  %v11067_v37 = vcombine.high %v2678_v49, %v2682_v38  ;;  %v11066_v0 = vcombine.low %v2678_v49, %v2682_v38  ;;  %v10914_v18 = vcombine.low %v2526_v54, %v2530_v47  ;;  %v2662_v21 = vld [vmem:[#allocation6 + $0x518] sm:$0xff] }
 0x5ac   :  { %9658 = vmatprep.subr.bf16.mxu1 %v11849_v60  ;;  %v9378_v22 = vadd.f32 %v9377_v35, %v3548_v17  ;;  %v11058_v60 = vcombine.low %v2670_v26, %v2674_v8  ;;  %v11051_v29 = vcombine.high %v2662_v21, %v2666_v59  ;;  %v2654_v35 = vld [vmem:[#allocation6 + $0x4d8] sm:$0xff]  ;;  %v10890_v17 = vcombine.low %v2502_v25, %v2506_v61 }
 0x5ad   :  { %v9379_v20 = vpop.f32.mrf.mxu0  ;;  %v2650_v16 = vld [vmem:[#allocation6 + $0x4b8] sm:$0xff] }
 0x5ae   :  { %9672 = vmatpush1.bf16.msra.mxu0 %v10938_v10  ;;  %v2514_v10 = vld [vmem:[#allocation6 + $0x78] sm:$0xff] }
 0x5af   :  { %v9380_v51 = vpop.f32.mrf.mxu0  ;;  %9673 = vmatprep.subr.bf16.mxu0 %v10931_v44  ;;  %9659 = vmatpush2.bf16.msra.mxu1 %v11848_v14  ;;  %v2658_v44 = vld [vmem:[#allocation6 + $0x4f8] sm:$0xff]  ;;  %v10899_v36 = vcombine.high %v2510_v58, %v2514_v10  ;;  %v11050_v14 = vcombine.low %v2662_v21, %v2666_v59 }
 0x5b0   :  { %9710 = vmatprep.subr.bf16.mxu1 %v11075_v12  ;;  %v11043_v20 = vcombine.high %v2654_v35, %v2658_v44  ;;  %v10898_v12 = vcombine.low %v2510_v58, %v2514_v10  ;;  %v11042_v49 = vcombine.low %v2654_v35, %v2658_v44  ;;  %v2622_v38 = vld [vmem:[#allocation6 + $0x3d8] sm:$0xff] }
 0x5b1   :  { %v2626_v51 = vld [vmem:[#allocation6 + $0x3f8] sm:$0xff] }
 0x5b2   :  { %9674 = vmatpush1.bf16.msra.mxu0 %v10930_v50  ;;  %v9416_v42 = vpop.f32.mrf.mxu1  ;;  %9661 = vmatmul.mubr.bf16.vlgmr.msra.gmra.mxu1 %v14077_v41  ;;  %v10891_v50 = vcombine.high %v2502_v25, %v2506_v61  ;;  %v2642_v54 = vld [vmem:[#allocation6 + $0x478] sm:$0xff]  ;;  %v11011_v47 = vcombine.high %v2622_v38, %v2626_v51  ;;  %v11010_v8 = vcombine.low %v2622_v38, %v2626_v51 }
 0x5b3   :  { %9675 = vmatprep.subr.bf16.mxu0 %v10923_v56  ;;  %v14160_v24 = vadd.f32 %v9416_v42, %v9376_v32  ;;  %9711 = vmatpush1.bf16.msra.mxu1 %v11074_v43  ;;  %v11035_v56 = vcombine.high %v2646_v1, %v2650_v16  ;;  %v2638_v43 = vld [vmem:[#allocation6 + $0x458] sm:$0xff] }
 0x5b4   :  { %9742 = vmatprep.mubr.bf16.mxu1 %v13604_v6  ;;  %v9418_v30 = vpop.f32.mrf.mxu1  ;;  %9712 = vmatprep.subr.bf16.mxu1 %v11067_v37  ;;  %v11034_v37 = vcombine.low %v2646_v1, %v2650_v16  ;;  %v2614_v32 = vld [vmem:[#allocation6 + $0x398] sm:$0xff]  ;;  %v11027_v26 = vcombine.high %v2638_v43, %v2642_v54 }
 0x5b5   :  { %v14163_v39 = vadd.f32 %v9418_v30, %v9378_v22  ;;  %v2630_v42 = vld [vmem:[#allocation6 + $0x418] sm:$0xff] }
 0x5b6   :  { %9676 = vmatpush1.bf16.msra.mxu0 %v10922_v46  ;;  %v9420_v7 = vpop.f32.mrf.mxu1  ;;  %v2618_v46 = vld [vmem:[#allocation6 + $0x3b8] sm:$0xff] }
 0x5b7   :  { %9677 = vmatprep.subr.bf16.mxu0 %v10915_v57  ;;  %9713 = vmatpush1.bf16.msra.mxu1 %v11066_v0  ;;  %v2634_v57 = vld [vmem:[#allocation6 + $0x438] sm:$0xff]  ;;  %v11003_v22 = vcombine.high %v2614_v32, %v2618_v46  ;;  %v11026_v0 = vcombine.low %v2638_v43, %v2642_v54 }
 0x5b8   :  { %v9421_v6 = vpop.f32.mrf.mxu1  ;;  %9714 = vmatprep.subr.bf16.mxu1 %v11059_v15  ;;  %v2606_v4 = vld [vmem:[#allocation6 + $0x358] sm:$0xff]  ;;  %v11019_v30 = vcombine.high %v2630_v42, %v2634_v57  ;;  %v11002_v15 = vcombine.low %v2614_v32, %v2618_v46  ;;  %v11018_v7 = vcombine.low %v2630_v42, %v2634_v57 }
 0x5b9   :  { %v2610_v31 = vld [vmem:[#allocation6 + $0x378] sm:$0xff] }
 0x5ba   :  { %9678 = vmatpush1.bf16.msra.mxu0 %v10914_v18  ;;  %v2750_v18 = vld [vmem:[#allocation6 + $0x7d8] sm:$0xff]  ;;  %v10995_v59 = vcombine.high %v2606_v4, %v2610_v31  ;;  %v10994_v10 = vcombine.low %v2606_v4, %v2610_v31 }
 0x5bb   :  { %9679 = vmatprep.subr.bf16.mxu0 %v10907_v23  ;;  %9715 = vmatpush1.bf16.msra.mxu1 %v11058_v60  ;;  %v2754_v21 = vld [vmem:[#allocation6 + $0x7f8] sm:$0xff] }
 0x5bc   :  { %9716 = vmatprep.subr.bf16.mxu1 %v11051_v29  ;;  %v2598_v23 = vld [vmem:[#allocation6 + $0x318] sm:$0xff]  ;;  %v11139_v58 = vcombine.high %v2750_v18, %v2754_v21  ;;  %v11138_v35 = vcombine.low %v2750_v18, %v2754_v21 }
 0x5bd   :  { %v2602_v60 = vld [vmem:[#allocation6 + $0x338] sm:$0xff] }
 0x5be   :  { %9680 = vmatpush1.bf16.msra.mxu0 %v10906_v5  ;;  %v2742_v6 = vld [vmem:[#allocation6 + $0x798] sm:$0xff]  ;;  %v10987_v5 = vcombine.high %v2598_v23, %v2602_v60  ;;  %v10986_v25 = vcombine.low %v2598_v23, %v2602_v60 }
 0x5bf   :  { %9681 = vmatprep.subr.bf16.mxu0 %v10899_v36  ;;  %9717 = vmatpush1.bf16.msra.mxu1 %v11050_v14  ;;  %v2746_v29 = vld [vmem:[#allocation6 + $0x7b8] sm:$0xff] }
 0x5c0   :  { %9718 = vmatprep.subr.bf16.mxu1 %v11043_v20  ;;  %v2590_v44 = vld [vmem:[#allocation6 + $0x2d8] sm:$0xff]  ;;  %v11131_v14 = vcombine.high %v2742_v6, %v2746_v29  ;;  %v11130_v1 = vcombine.low %v2742_v6, %v2746_v29 }
 0x5c1   :  { %v2594_v36 = vld [vmem:[#allocation6 + $0x2f8] sm:$0xff] }
 0x5c2   :  { %9682 = vmatpush1.bf16.msra.mxu0 %v10898_v12  ;;  %v2734_v61 = vld [vmem:[#allocation6 + $0x758] sm:$0xff]  ;;  %v10979_v12 = vcombine.high %v2590_v44, %v2594_v36  ;;  %v10978_v38 = vcombine.low %v2590_v44, %v2594_v36 }
 0x5c3   :  { %9683 = vmatprep.subr.bf16.mxu0 %v10891_v50  ;;  %9719 = vmatpush1.bf16.msra.mxu1 %v11042_v49  ;;  %v2738_v20 = vld [vmem:[#allocation6 + $0x778] sm:$0xff] }
 0x5c4   :  { %9720 = vmatprep.subr.bf16.mxu1 %v11035_v56  ;;  %v2582_v16 = vld [vmem:[#allocation6 + $0x298] sm:$0xff]  ;;  %v11123_v49 = vcombine.high %v2734_v61, %v2738_v20  ;;  %v11122_v43 = vcombine.low %v2734_v61, %v2738_v20 }
 0x5c5   :  { %v2586_v50 = vld [vmem:[#allocation6 + $0x2b8] sm:$0xff] }
 0x5c6   :  { %9684 = vmatpush1.bf16.msra.mxu0 %v10890_v17  ;;  %v2726_v51 = vld [vmem:[#allocation6 + $0x718] sm:$0xff]  ;;  %v10971_v17 = vcombine.high %v2582_v16, %v2586_v50  ;;  %v10970_v32 = vcombine.low %v2582_v16, %v2586_v50 }
 0x5c7   :  { %9685 = vmatprep.subr.bf16.mxu0 %v11011_v47  ;;  %9721 = vmatpush1.bf16.msra.mxu1 %v11034_v37  ;;  %v2730_v56 = vld [vmem:[#allocation6 + $0x738] sm:$0xff] }
 0x5c8   :  { %9722 = vmatprep.subr.bf16.mxu1 %v11027_v26  ;;  %v2574_v54 = vld [vmem:[#allocation6 + $0x258] sm:$0xff]  ;;  %v11115_v37 = vcombine.high %v2726_v51, %v2730_v56  ;;  %v11114_v42 = vcombine.low %v2726_v51, %v2730_v56 }
 0x5c9   :  { %v2578_v47 = vld [vmem:[#allocation6 + $0x278] sm:$0xff] }
 0x5ca   :  { %9686 = vmatpush2.bf16.msra.mxu0 %v11010_v8  ;;  %v2718_v46 = vld [vmem:[#allocation6 + $0x6d8] sm:$0xff]  ;;  %v10963_v8 = vcombine.high %v2574_v54, %v2578_v47  ;;  %v10962_v4 = vcombine.low %v2574_v54, %v2578_v47 }
 0x5cb   :  { %9687 = vmatprep.subr.bf16.mxu0 %v11003_v22  ;;  %9723 = vmatpush1.bf16.msra.mxu1 %v11026_v0  ;;  %v2722_v26 = vld [vmem:[#allocation6 + $0x6f8] sm:$0xff] }
 0x5cc   :  { %9724 = vmatprep.subr.bf16.mxu1 %v11019_v30  ;;  %v2566_v57 = vld [vmem:[#allocation6 + $0x218] sm:$0xff]  ;;  %v11107_v0 = vcombine.high %v2718_v46, %v2722_v26  ;;  %v11106_v18 = vcombine.low %v2718_v46, %v2722_v26 }
 0x5cd   :  { %v2570_v22 = vld [vmem:[#allocation6 + $0x238] sm:$0xff] }
 0x5ce   :  { %9688 = vmatpush2.bf16.msra.mxu0 %v11002_v15  ;;  %v2710_v31 = vld [vmem:[#allocation6 + $0x698] sm:$0xff]  ;;  %v10955_v15 = vcombine.high %v2566_v57, %v2570_v22  ;;  %v10954_v23 = vcombine.low %v2566_v57, %v2570_v22 }
 0x5cf   :  { %9689 = vmatprep.subr.bf16.mxu0 %v10995_v59  ;;  %9725 = vmatpush1.bf16.msra.mxu1 %v11018_v7  ;;  %v2714_v30 = vld [vmem:[#allocation6 + $0x6b8] sm:$0xff] }
 0x5d0   :  { %9726 = vmatprep.subr.bf16.mxu1 %v11139_v58  ;;  %v2814_v21 = vld [vmem:[#allocation6 + $0x9d8] sm:$0xff]  ;;  %v11099_v7 = vcombine.high %v2710_v31, %v2714_v30  ;;  %v11098_v6 = vcombine.low %v2710_v31, %v2714_v30 }
 0x5d1   :  { %v2818_v59 = vld [vmem:[#allocation6 + $0x9f8] sm:$0xff] }
 0x5d2   :  { %9690 = vmatpush2.bf16.msra.mxu0 %v10994_v10  ;;  %v2702_v60 = vld [vmem:[#allocation6 + $0x658] sm:$0xff]  ;;  %v11203_v10 = vcombine.high %v2814_v21, %v2818_v59  ;;  %v11202_v44 = vcombine.low %v2814_v21, %v2818_v59 }
 0x5d3   :  { %9691 = vmatprep.subr.bf16.mxu0 %v10987_v5  ;;  %9727 = vmatpush2.bf16.msra.mxu1 %v11138_v35  ;;  %v2706_v58 = vld [vmem:[#allocation6 + $0x678] sm:$0xff] }
 0x5d4   :  { %9728 = vmatprep.subr.bf16.mxu1 %v11131_v14  ;;  %v2806_v29 = vld [vmem:[#allocation6 + $0x998] sm:$0xff]  ;;  %v11091_v35 = vcombine.high %v2702_v60, %v2706_v58  ;;  %v11090_v61 = vcombine.low %v2702_v60, %v2706_v58 }
 0x5d5   :  { %v2810_v5 = vld [vmem:[#allocation6 + $0x9b8] sm:$0xff] }
 0x5d6   :  { %9692 = vmatpush2.bf16.msra.mxu0 %v10986_v25  ;;  %v2694_v36 = vld [vmem:[#allocation6 + $0x618] sm:$0xff]  ;;  %v11195_v25 = vcombine.high %v2806_v29, %v2810_v5 }
 0x5d7   :  { %9693 = vmatprep.subr.bf16.mxu0 %v10979_v12  ;;  %9729 = vmatpush2.bf16.msra.mxu1 %v11130_v1  ;;  %v2698_v14 = vld [vmem:[#allocation6 + $0x638] sm:$0xff] }
 0x5d8   :  { %9730 = vmatprep.subr.bf16.mxu1 %v11123_v49  ;;  %v2798_v20 = vld [vmem:[#allocation6 + $0x958] sm:$0xff]  ;;  %v11083_v16 = vcombine.high %v2694_v36, %v2698_v14  ;;  %v11194_v49 = vcombine.low %v2806_v29, %v2810_v5  ;;  %v11082_v54 = vcombine.low %v2694_v36, %v2698_v14 }
 0x5d9   :  { %v2802_v12 = vld [vmem:[#allocation6 + $0x978] sm:$0xff] }
 0x5da   :  { %9694 = vmatpush2.bf16.msra.mxu0 %v10978_v38  ;;  %v2942_v38 = vld [vmem:[#allocation6 + $0xdd8] sm:$0xff] }
 0x5db   :  { %9695 = vmatprep.subr.bf16.mxu0 %v10971_v17  ;;  %9731 = vmatpush2.bf16.msra.mxu1 %v11122_v43  ;;  %v2946_v51 = vld [vmem:[#allocation6 + $0xdf8] sm:$0xff]  ;;  %v11187_v17 = vcombine.high %v2798_v20, %v2802_v12 }
 0x5dc   :  { %9732 = vmatprep.subr.bf16.mxu1 %v11115_v37  ;;  %v2790_v47 = vld [vmem:[#allocation6 + $0x918] sm:$0xff] }
 0x5dd   :  { %v2794_v37 = vld [vmem:[#allocation6 + $0x938] sm:$0xff] }
 0x5de   :  { %9696 = vmatpush2.bf16.msra.mxu0 %v10970_v32  ;;  %v11331_v32 = vcombine.high %v2942_v38, %v2946_v51  ;;  %v2934_v46 = vld [vmem:[#allocation6 + $0xd98] sm:$0xff] }
 0x5df   :  { %9697 = vmatprep.subr.bf16.mxu0 %v10963_v8  ;;  %9733 = vmatpush2.bf16.msra.mxu1 %v11114_v42  ;;  %v2938_v26 = vld [vmem:[#allocation6 + $0xdb8] sm:$0xff]  ;;  %v11179_v8 = vcombine.high %v2790_v47, %v2794_v37  ;;  %v11330_v42 = vcombine.low %v2942_v38, %v2946_v51 }
 0x5e0   :  { %9734 = vmatprep.subr.bf16.mxu1 %v11107_v0  ;;  %v2782_v57 = vld [vmem:[#allocation6 + $0x8d8] sm:$0xff]  ;;  %v11178_v0 = vcombine.low %v2790_v47, %v2794_v37  ;;  %v11322_v21 = vcombine.low %v2934_v46, %v2938_v26 }
 0x5e1   :  { %v2786_v22 = vld [vmem:[#allocation6 + $0x8f8] sm:$0xff] }
 0x5e2   :  { %9698 = vmatpush2.bf16.msra.mxu0 %v10962_v4  ;;  %v2926_v4 = vld [vmem:[#allocation6 + $0xd58] sm:$0xff] }
 0x5e3   :  { %9699 = vmatprep.subr.bf16.mxu0 %v10955_v15  ;;  %9735 = vmatpush2.bf16.msra.mxu1 %v11106_v18  ;;  %v2930_v31 = vld [vmem:[#allocation6 + $0xd78] sm:$0xff]  ;;  %v11171_v15 = vcombine.high %v2782_v57, %v2786_v22 }
 0x5e4   :  { %9736 = vmatprep.subr.bf16.mxu1 %v11099_v7  ;;  %v2774_v59 = vld [vmem:[#allocation6 + $0x898] sm:$0xff]  ;;  %v11315_v60 = vcombine.high %v2926_v4, %v2930_v31 }
 0x5e5   :  { %v2778_v7 = vld [vmem:[#allocation6 + $0x8b8] sm:$0xff] }
 0x5e6   :  { %9700 = vmatpush2.bf16.msra.mxu0 %v10954_v23  ;;  %v2922_v29 = vld [vmem:[#allocation6 + $0xd38] sm:$0xff]  ;;  %v11163_v5 = vcombine.high %v2774_v59, %v2778_v7 }
 0x5e7   :  { %9751 = vmatprep.subr.bf16.mxu0 %v11203_v10  ;;  %9737 = vmatpush2.bf16.msra.mxu1 %v11098_v6  ;;  %v11170_v10 = vcombine.low %v2782_v57, %v2786_v22  ;;  %v2918_v6 = vld [vmem:[#allocation6 + $0xd18] sm:$0xff] }
 0x5e8   :  { %9738 = vmatprep.subr.bf16.mxu1 %v11091_v35  ;;  %v11314_v35 = vcombine.low %v2926_v4, %v2930_v31  ;;  %v2770_v36 = vld [vmem:[#allocation6 + $0x878] sm:$0xff]  ;;  %v11307_v14 = vcombine.high %v2918_v6, %v2922_v29 }
 0x5e9   :  { %v9457_v1 = vpop.f32.mrf.mxu0  ;;  %9702 = vmatmul.mubr.bf16.vlgmr.msra.gmra.mxu0 %v13535_v2  ;;  %v2902_v51 = vld [vmem:[#allocation6 + $0xc98] sm:$0xff] }
 0x5ea   :  { %v9458_v50 = vadd.f32 %v9457_v1, %v14160_v24  ;;  %9752 = vmatpush1.bf16.msra.mxu0 %v11202_v44  ;;  %9783 = vmatprep.mubr.bf16.mxu0 %v13788_v19  ;;  %v11186_v24 = vcombine.low %v2798_v20, %v2802_v12  ;;  %v2766_v44 = vld [vmem:[#allocation6 + $0x858] sm:$0xff]  ;;  %v11306_v1 = vcombine.low %v2918_v6, %v2922_v29 }
 0x5eb   :  { %v9459_v56 = vpop.f32.mrf.mxu0  ;;  %9753 = vmatprep.subr.bf16.mxu0 %v11195_v25  ;;  %9739 = vmatpush2.bf16.msra.mxu1 %v11090_v61  ;;  %v11162_v25 = vcombine.low %v2774_v59, %v2778_v7  ;;  %v2910_v61 = vld [vmem:[#allocation6 + $0xcd8] sm:$0xff]  ;;  %v11155_v12 = vcombine.high %v2766_v44, %v2770_v36  ;;  %v11154_v38 = vcombine.low %v2766_v44, %v2770_v36 }
 0x5ec   :  { %v9460_v43 = vadd.f32 %v9459_v56, %v14163_v39  ;;  %9740 = vmatprep.subr.bf16.mxu1 %v11083_v16  ;;  %v11323_v39 = vcombine.high %v2934_v46, %v2938_v26  ;;  %v2914_v20 = vld [vmem:[#allocation6 + $0xcf8] sm:$0xff] }
 0x5ed   :  { %v9461_v2 = vpop.f32.mrf.mxu0  ;;  %v2758_v16 = vld [vmem:[#allocation6 + $0x818] sm:$0xff] }
 0x5ee   :  { %9754 = vmatpush1.bf16.msra.mxu0 %v11194_v49  ;;  %v11299_v49 = vcombine.high %v2910_v61, %v2914_v20  ;;  %v2906_v56 = vld [vmem:[#allocation6 + $0xcb8] sm:$0xff] }
 0x5ef   :  { %v9462_v19 = vpop.f32.mrf.mxu0  ;;  %9755 = vmatprep.subr.bf16.mxu0 %v11187_v17  ;;  %9741 = vmatpush2.bf16.msra.mxu1 %v11082_v54  ;;  %v2878_v54 = vld [vmem:[#allocation6 + $0xbd8] sm:$0xff]  ;;  %v11291_v37 = vcombine.high %v2902_v51, %v2906_v56  ;;  %v11290_v26 = vcombine.low %v2902_v51, %v2906_v56 }
 0x5f0   :  { %9792 = vmatprep.subr.bf16.mxu1 %v11331_v32  ;;  %v2882_v47 = vld [vmem:[#allocation6 + $0xbf8] sm:$0xff] }
 0x5f1   :  { %v2894_v32 = vld [vmem:[#allocation6 + $0xc58] sm:$0xff]  ;;  %v11267_v46 = vcombine.high %v2878_v54, %v2882_v47  ;;  %v11266_v57 = vcombine.low %v2878_v54, %v2882_v47 }
 0x5f2   :  { %9756 = vmatpush1.bf16.msra.mxu0 %v11186_v24  ;;  %v9498_v30 = vpop.f32.mrf.mxu1  ;;  %9743 = vmatmul.mubr.bf16.vlgmr.msra.gmra.mxu1 %v13601_v9  ;;  %v2898_v24 = vld [vmem:[#allocation6 + $0xc78] sm:$0xff] }
 0x5f3   :  { %9757 = vmatprep.subr.bf16.mxu0 %v11179_v8  ;;  %v14170_v18 = vadd.f32 %v9498_v30, %v9458_v50  ;;  %9793 = vmatpush1.bf16.msra.mxu1 %v11330_v42  ;;  %v2762_v50 = vld [vmem:[#allocation6 + $0x838] sm:$0xff]  ;;  %v11283_v42 = vcombine.high %v2894_v32, %v2898_v24  ;;  %v11282_v4 = vcombine.low %v2894_v32, %v2898_v24 }
 0x5f4   :  { %9824 = vmatprep.mubr.bf16.mxu1 %v13845_v55  ;;  %v9500_v23 = vpop.f32.mrf.mxu1  ;;  %9794 = vmatprep.subr.bf16.mxu1 %v11323_v39  ;;  %v11147_v17 = vcombine.high %v2758_v16, %v2762_v50  ;;  %v11146_v2 = vcombine.low %v2758_v16, %v2762_v50  ;;  %v2870_v19 = vld [vmem:[#allocation6 + $0xb98] sm:$0xff] }
 0x5f5   :  { %v14173_v58 = vadd.f32 %v9500_v23, %v9460_v43  ;;  %v11298_v43 = vcombine.low %v2910_v61, %v2914_v20  ;;  %v2874_v8 = vld [vmem:[#allocation6 + $0xbb8] sm:$0xff] }
 0x5f6   :  { %9758 = vmatpush1.bf16.msra.mxu0 %v11178_v0  ;;  %v9502_v9 = vpop.f32.mrf.mxu1  ;;  %v2886_v22 = vld [vmem:[#allocation6 + $0xc18] sm:$0xff]  ;;  %v11259_v0 = vcombine.high %v2870_v19, %v2874_v8 }
 0x5f7   :  { %9759 = vmatprep.subr.bf16.mxu0 %v11171_v15  ;;  %9795 = vmatpush1.bf16.msra.mxu1 %v11322_v21  ;;  %v2890_v39 = vld [vmem:[#allocation6 + $0xc38] sm:$0xff]  ;;  %v11258_v21 = vcombine.low %v2870_v19, %v2874_v8 }
 0x5f8   :  { %v9503_v55 = vpop.f32.mrf.mxu1  ;;  %9796 = vmatprep.subr.bf16.mxu1 %v11315_v60  ;;  %v2862_v31 = vld [vmem:[#allocation6 + $0xb58] sm:$0xff]  ;;  %v11275_v15 = vcombine.high %v2886_v22, %v2890_v39  ;;  %v11274_v60 = vcombine.low %v2886_v22, %v2890_v39 }
 0x5f9   :  { %v2866_v30 = vld [vmem:[#allocation6 + $0xb78] sm:$0xff] }
 0x5fa   :  { %9760 = vmatpush1.bf16.msra.mxu0 %v11170_v10  ;;  %v3006_v59 = vld [vmem:[#allocation6 + $0xfd8] sm:$0xff]  ;;  %v11251_v23 = vcombine.high %v2862_v31, %v2866_v30  ;;  %v11250_v9 = vcombine.low %v2862_v31, %v2866_v30 }
 0x5fb   :  { %9761 = vmatprep.subr.bf16.mxu0 %v11163_v5  ;;  %9797 = vmatpush1.bf16.msra.mxu1 %v11314_v35  ;;  %v3010_v7 = vld [vmem:[#allocation6 + $0xff8] sm:$0xff] }
 0x5fc   :  { %9798 = vmatprep.subr.bf16.mxu1 %v11307_v14  ;;  %v2854_v10 = vld [vmem:[#allocation6 + $0xb18] sm:$0xff]  ;;  %v11395_v29 = vcombine.high %v3006_v59, %v3010_v7  ;;  %v11394_v36 = vcombine.low %v3006_v59, %v3010_v7 }
 0x5fd   :  { %v2858_v6 = vld [vmem:[#allocation6 + $0xb38] sm:$0xff] }
 0x5fe   :  { %9762 = vmatpush1.bf16.msra.mxu0 %v11162_v25  ;;  %v2998_v5 = vld [vmem:[#allocation6 + $0xf98] sm:$0xff]  ;;  %v11243_v44 = vcombine.high %v2854_v10, %v2858_v6  ;;  %v11242_v61 = vcombine.low %v2854_v10, %v2858_v6 }
 0x5ff   :  { %9763 = vmatprep.subr.bf16.mxu0 %v11155_v12  ;;  %9799 = vmatpush1.bf16.msra.mxu1 %v11306_v1  ;;  %v3002_v35 = vld [vmem:[#allocation6 + $0xfb8] sm:$0xff] }
 0x600   :  { %9800 = vmatprep.subr.bf16.mxu1 %v11299_v49  ;;  %v2846_v55 = vld [vmem:[#allocation6 + $0xad8] sm:$0xff]  ;;  %v11387_v25 = vcombine.high %v2998_v5, %v3002_v35  ;;  %v11386_v16 = vcombine.low %v2998_v5, %v3002_v35 }
 0x601   :  { %v2850_v14 = vld [vmem:[#allocation6 + $0xaf8] sm:$0xff] }
 0x602   :  { %9764 = vmatpush1.bf16.msra.mxu0 %v11154_v38  ;;  %v2990_v20 = vld [vmem:[#allocation6 + $0xf58] sm:$0xff]  ;;  %v11235_v1 = vcombine.high %v2846_v55, %v2850_v14  ;;  %v11234_v51 = vcombine.low %v2846_v55, %v2850_v14 }
 0x603   :  { %9765 = vmatprep.subr.bf16.mxu0 %v11147_v17  ;;  %9801 = vmatpush1.bf16.msra.mxu1 %v11298_v43  ;;  %v2994_v12 = vld [vmem:[#allocation6 + $0xf78] sm:$0xff] }
 0x604   :  { %9802 = vmatprep.subr.bf16.mxu1 %v11291_v37  ;;  %v2838_v50 = vld [vmem:[#allocation6 + $0xa98] sm:$0xff]  ;;  %v11379_v38 = vcombine.high %v2990_v20, %v2994_v12  ;;  %v11378_v54 = vcombine.low %v2990_v20, %v2994_v12 }
 0x605   :  { %v2842_v49 = vld [vmem:[#allocation6 + $0xab8] sm:$0xff] }
 0x606   :  { %9766 = vmatpush1.bf16.msra.mxu0 %v11146_v2  ;;  %v2982_v56 = vld [vmem:[#allocation6 + $0xf18] sm:$0xff]  ;;  %v11227_v43 = vcombine.high %v2838_v50, %v2842_v49  ;;  %v11226_v32 = vcombine.low %v2838_v50, %v2842_v49 }
 0x607   :  { %9767 = vmatprep.subr.bf16.mxu0 %v11267_v46  ;;  %9803 = vmatpush1.bf16.msra.mxu1 %v11290_v26  ;;  %v2986_v17 = vld [vmem:[#allocation6 + $0xf38] sm:$0xff] }
 0x608   :  { %9804 = vmatprep.subr.bf16.mxu1 %v11283_v42  ;;  %v2830_v47 = vld [vmem:[#allocation6 + $0xa58] sm:$0xff]  ;;  %v11371_v2 = vcombine.high %v2982_v56, %v2986_v17  ;;  %v11370_v19 = vcombine.low %v2982_v56, %v2986_v17 }
 0x609   :  { %v2834_v37 = vld [vmem:[#allocation6 + $0xa78] sm:$0xff] }
 0x60a   :  { %9768 = vmatpush2.bf16.msra.mxu0 %v11266_v57  ;;  %v2974_v24 = vld [vmem:[#allocation6 + $0xed8] sm:$0xff]  ;;  %v11219_v26 = vcombine.high %v2830_v47, %v2834_v37  ;;  %v11218_v22 = vcombine.low %v2830_v47, %v2834_v37 }
 0x60b   :  { %9769 = vmatprep.subr.bf16.mxu0 %v11259_v0  ;;  %9805 = vmatpush1.bf16.msra.mxu1 %v11282_v4  ;;  %v2978_v46 = vld [vmem:[#allocation6 + $0xef8] sm:$0xff] }
 0x60c   :  { %9806 = vmatprep.subr.bf16.mxu1 %v11275_v15  ;;  %v2822_v8 = vld [vmem:[#allocation6 + $0xa18] sm:$0xff]  ;;  %v11363_v57 = vcombine.high %v2974_v24, %v2978_v46  ;;  %v11362_v31 = vcombine.low %v2974_v24, %v2978_v46 }
 0x60d   :  { %v2826_v42 = vld [vmem:[#allocation6 + $0xa38] sm:$0xff] }
 0x60e   :  { %9770 = vmatpush2.bf16.msra.mxu0 %v11258_v21  ;;  %v2966_v39 = vld [vmem:[#allocation6 + $0xe98] sm:$0xff]  ;;  %v11211_v4 = vcombine.high %v2822_v8, %v2826_v42  ;;  %v11210_v59 = vcombine.low %v2822_v8, %v2826_v42 }
 0x60f   :  { %9771 = vmatprep.subr.bf16.mxu0 %v11251_v23  ;;  %9807 = vmatpush1.bf16.msra.mxu1 %v11274_v60  ;;  %v2970_v0 = vld [vmem:[#allocation6 + $0xeb8] sm:$0xff] }
 0x610   :  { %9808 = vmatprep.subr.bf16.mxu1 %v11395_v29  ;;  %v3070_v30 = vld [vmem:[#allocation6 + $0x11d8] sm:$0xff]  ;;  %v11355_v21 = vcombine.high %v2966_v39, %v2970_v0  ;;  %v11354_v10 = vcombine.low %v2966_v39, %v2970_v0 }
 0x611   :  { %v3074_v15 = vld [vmem:[#allocation6 + $0x11f8] sm:$0xff] }
 0x612   :  { %9772 = vmatpush2.bf16.msra.mxu0 %v11250_v9  ;;  %v2958_v7 = vld [vmem:[#allocation6 + $0xe58] sm:$0xff]  ;;  %v11459_v60 = vcombine.high %v3070_v30, %v3074_v15  ;;  %v11458_v5 = vcombine.low %v3070_v30, %v3074_v15 }
 0x613   :  { %9773 = vmatprep.subr.bf16.mxu0 %v11243_v44  ;;  %9809 = vmatpush2.bf16.msra.mxu1 %v11394_v36  ;;  %v2962_v23 = vld [vmem:[#allocation6 + $0xe78] sm:$0xff] }
 0x614   :  { %9810 = vmatprep.subr.bf16.mxu1 %v11387_v25  ;;  %v3062_v6 = vld [vmem:[#allocation6 + $0x1198] sm:$0xff]  ;;  %v11347_v9 = vcombine.high %v2958_v7, %v2962_v23  ;;  %v11346_v55 = vcombine.low %v2958_v7, %v2962_v23 }
 0x615   :  { %v3066_v29 = vld [vmem:[#allocation6 + $0x11b8] sm:$0xff] }
 0x616   :  { %9774 = vmatpush2.bf16.msra.mxu0 %v11242_v61  ;;  %v2950_v35 = vld [vmem:[#allocation6 + $0xe18] sm:$0xff]  ;;  %v11451_v36 = vcombine.high %v3062_v6, %v3066_v29 }
 0x617   :  { %9775 = vmatprep.subr.bf16.mxu0 %v11235_v1  ;;  %9811 = vmatpush2.bf16.msra.mxu1 %v11386_v16  ;;  %v2954_v44 = vld [vmem:[#allocation6 + $0xe38] sm:$0xff]  ;;  %v11450_v1 = vcombine.low %v3062_v6, %v3066_v29 }
 0x618   :  { %9812 = vmatprep.subr.bf16.mxu1 %v11379_v38  ;;  %v3054_v14 = vld [vmem:[#allocation6 + $0x1158] sm:$0xff]  ;;  %v11339_v20 = vcombine.high %v2950_v35, %v2954_v44  ;;  %v11338_v56 = vcombine.low %v2950_v35, %v2954_v44 }
 0x619   :  { %v3058_v25 = vld [vmem:[#allocation6 + $0x1178] sm:$0xff] }
 0x61a   :  { %9776 = vmatpush2.bf16.msra.mxu0 %v11234_v51  ;;  %v3198_v16 = vld [vmem:[#allocation6 + $0x15d8] sm:$0xff]  ;;  %v11443_v38 = vcombine.high %v3054_v14, %v3058_v25 }
 0x61b   :  { %9777 = vmatprep.subr.bf16.mxu0 %v11227_v43  ;;  %9813 = vmatpush2.bf16.msra.mxu1 %v11378_v54  ;;  %v3202_v50 = vld [vmem:[#allocation6 + $0x15f8] sm:$0xff] }
 0x61c   :  { %9814 = vmatprep.subr.bf16.mxu1 %v11371_v2  ;;  %v3046_v17 = vld [vmem:[#allocation6 + $0x1118] sm:$0xff]  ;;  %v11587_v54 = vcombine.high %v3198_v16, %v3202_v50 }
 0x61d   :  { %v3050_v43 = vld [vmem:[#allocation6 + $0x1138] sm:$0xff] }
 0x61e   :  { %9778 = vmatpush2.bf16.msra.mxu0 %v11226_v32  ;;  %v3190_v47 = vld [vmem:[#allocation6 + $0x1598] sm:$0xff]  ;;  %v11435_v2 = vcombine.high %v3046_v17, %v3050_v43  ;;  %v11586_v32 = vcombine.low %v3198_v16, %v3202_v50 }
 0x61f   :  { %9779 = vmatprep.subr.bf16.mxu0 %v11219_v26  ;;  %9815 = vmatpush2.bf16.msra.mxu1 %v11370_v19  ;;  %v3194_v37 = vld [vmem:[#allocation6 + $0x15b8] sm:$0xff]  ;;  %v11434_v26 = vcombine.low %v3046_v17, %v3050_v43 }
 0x620   :  { %9816 = vmatprep.subr.bf16.mxu1 %v11363_v57  ;;  %v3038_v24 = vld [vmem:[#allocation6 + $0x10d8] sm:$0xff]  ;;  %v11578_v39 = vcombine.low %v3190_v47, %v3194_v37 }
 0x621   :  { %v3042_v46 = vld [vmem:[#allocation6 + $0x10f8] sm:$0xff] }
 0x622   :  { %9780 = vmatpush2.bf16.msra.mxu0 %v11218_v22  ;;  %v3182_v19 = vld [vmem:[#allocation6 + $0x1558] sm:$0xff]  ;;  %v11427_v57 = vcombine.high %v3038_v24, %v3042_v46 }
 0x623   :  { %9781 = vmatprep.subr.bf16.mxu0 %v11211_v4  ;;  %9817 = vmatpush2.bf16.msra.mxu1 %v11362_v31  ;;  %v3186_v8 = vld [vmem:[#allocation6 + $0x1578] sm:$0xff] }
 0x624   :  { %9818 = vmatprep.subr.bf16.mxu1 %v11355_v21  ;;  %v3030_v0 = vld [vmem:[#allocation6 + $0x1098] sm:$0xff]  ;;  %v11571_v30 = vcombine.high %v3182_v19, %v3186_v8  ;;  %v11426_v21 = vcombine.low %v3038_v24, %v3042_v46 }
 0x625   :  { %v3034_v4 = vld [vmem:[#allocation6 + $0x10b8] sm:$0xff] }
 0x626   :  { %9782 = vmatpush2.bf16.msra.mxu0 %v11210_v59  ;;  %v3174_v59 = vld [vmem:[#allocation6 + $0x1518] sm:$0xff]  ;;  %v11419_v23 = vcombine.high %v3030_v0, %v3034_v4 }
 0x627   :  { %9833 = vmatprep.subr.bf16.mxu0 %v11459_v60  ;;  %9819 = vmatpush2.bf16.msra.mxu1 %v11354_v10  ;;  %v3178_v7 = vld [vmem:[#allocation6 + $0x1538] sm:$0xff]  ;;  %v11570_v60 = vcombine.low %v3182_v19, %v3186_v8 }
 0x628   :  { %9820 = vmatprep.subr.bf16.mxu1 %v11347_v9  ;;  %v3022_v10 = vld [vmem:[#allocation6 + $0x1058] sm:$0xff]  ;;  %v11563_v29 = vcombine.high %v3174_v59, %v3178_v7  ;;  %v11418_v9 = vcombine.low %v3030_v0, %v3034_v4 }
 0x629   :  { %v9539_v61 = vpop.f32.mrf.mxu0  ;;  %9784 = vmatmul.mubr.bf16.vlgmr.msra.gmra.mxu0 %v13842_v28  ;;  %v3026_v6 = vld [vmem:[#allocation6 + $0x1078] sm:$0xff] }
 0x62a   :  { %v9540_v12 = vadd.f32 %v9539_v61, %v14170_v18  ;;  %9834 = vmatpush1.bf16.msra.mxu0 %v11458_v5  ;;  %9865 = vmatprep.mubr.bf16.mxu0 %v13912_v53  ;;  %v11442_v18 = vcombine.low %v3054_v14, %v3058_v25  ;;  %v3166_v5 = vld [vmem:[#allocation6 + $0x14d8] sm:$0xff]  ;;  %v11411_v44 = vcombine.high %v3022_v10, %v3026_v6 }
 0x62b   :  { %v9541_v49 = vpop.f32.mrf.mxu0  ;;  %9835 = vmatprep.subr.bf16.mxu0 %v11451_v36  ;;  %9821 = vmatpush2.bf16.msra.mxu1 %v11346_v55  ;;  %v3170_v35 = vld [vmem:[#allocation6 + $0x14f8] sm:$0xff]  ;;  %v11562_v36 = vcombine.low %v3174_v59, %v3178_v7  ;;  %v11410_v61 = vcombine.low %v3022_v10, %v3026_v6 }
 0x62c   :  { %v9542_v51 = vadd.f32 %v9541_v49, %v14173_v58  ;;  %9822 = vmatprep.subr.bf16.mxu1 %v11339_v20  ;;  %v11579_v58 = vcombine.high %v3190_v47, %v3194_v37  ;;  %v3014_v55 = vld [vmem:[#allocation6 + $0x1018] sm:$0xff]  ;;  %v11555_v25 = vcombine.high %v3166_v5, %v3170_v35  ;;  %v11554_v16 = vcombine.low %v3166_v5, %v3170_v35 }
 0x62d   :  { %v9543_v28 = vpop.f32.mrf.mxu0  ;;  %v3018_v14 = vld [vmem:[#allocation6 + $0x1038] sm:$0xff] }
 0x62e   :  { %9836 = vmatpush1.bf16.msra.mxu0 %v11450_v1  ;;  %v3158_v20 = vld [vmem:[#allocation6 + $0x1498] sm:$0xff]  ;;  %v11403_v1 = vcombine.high %v3014_v55, %v3018_v14 }
 0x62f   :  { %v9544_v53 = vpop.f32.mrf.mxu0  ;;  %9837 = vmatprep.subr.bf16.mxu0 %v11443_v38  ;;  %9823 = vmatpush2.bf16.msra.mxu1 %v11338_v56  ;;  %v3134_v50 = vld [vmem:[#allocation6 + $0x13d8] sm:$0xff] }
 0x630   :  { %9874 = vmatprep.subr.bf16.mxu1 %v11587_v54  ;;  %v3138_v49 = vld [vmem:[#allocation6 + $0x13f8] sm:$0xff] }
 0x631   :  { %v3150_v56 = vld [vmem:[#allocation6 + $0x1458] sm:$0xff]  ;;  %v11523_v43 = vcombine.high %v3134_v50, %v3138_v49  ;;  %v11522_v37 = vcombine.low %v3134_v50, %v3138_v49 }
 0x632   :  { %9838 = vmatpush1.bf16.msra.mxu0 %v11442_v18  ;;  %v9580_v42 = vpop.f32.mrf.mxu1  ;;  %9825 = vmatmul.mubr.bf16.vlgmr.msra.gmra.mxu1 %v13871_v48  ;;  %v3154_v17 = vld [vmem:[#allocation6 + $0x1478] sm:$0xff] }
 0x633   :  { %9839 = vmatprep.subr.bf16.mxu0 %v11435_v2  ;;  %v14180_v22 = vadd.f32 %v9580_v42, %v9540_v12  ;;  %9875 = vmatpush1.bf16.msra.mxu1 %v11586_v32  ;;  %v3162_v12 = vld [vmem:[#allocation6 + $0x14b8] sm:$0xff]  ;;  %v11539_v47 = vcombine.high %v3150_v56, %v3154_v17  ;;  %v11538_v24 = vcombine.low %v3150_v56, %v3154_v17 }
 0x634   :  { %9906 = vmatprep.mubr.bf16.mxu1 %v13942_v13  ;;  %v9582_v31 = vpop.f32.mrf.mxu1  ;;  %9876 = vmatprep.subr.bf16.mxu1 %v11579_v58  ;;  %v11547_v38 = vcombine.high %v3158_v20, %v3162_v12  ;;  %v11546_v28 = vcombine.low %v3158_v20, %v3162_v12  ;;  %v3126_v54 = vld [vmem:[#allocation6 + $0x1398] sm:$0xff] }
 0x635   :  { %v14183_v15 = vadd.f32 %v9582_v31, %v9542_v51  ;;  %v11402_v51 = vcombine.low %v3014_v55, %v3018_v14  ;;  %v3130_v18 = vld [vmem:[#allocation6 + $0x13b8] sm:$0xff] }
 0x636   :  { %9840 = vmatpush1.bf16.msra.mxu0 %v11434_v26  ;;  %v9584_v48 = vpop.f32.mrf.mxu1  ;;  %v3142_v53 = vld [vmem:[#allocation6 + $0x1418] sm:$0xff]  ;;  %v11515_v32 = vcombine.high %v3126_v54, %v3130_v18  ;;  %v11514_v19 = vcombine.low %v3126_v54, %v3130_v18 }
 0x637   :  { %9841 = vmatprep.subr.bf16.mxu0 %v11427_v57  ;;  %9877 = vmatpush1.bf16.msra.mxu1 %v11578_v39  ;;  %v3146_v2 = vld [vmem:[#allocation6 + $0x1438] sm:$0xff] }
 0x638   :  { %v9585_v13 = vpop.f32.mrf.mxu1  ;;  %9878 = vmatprep.subr.bf16.mxu1 %v11571_v30  ;;  %v3118_v46 = vld [vmem:[#allocation6 + $0x1358] sm:$0xff]  ;;  %v11531_v26 = vcombine.high %v3142_v53, %v3146_v2  ;;  %v11530_v39 = vcombine.low %v3142_v53, %v3146_v2 }
 0x639   :  { %v3122_v58 = vld [vmem:[#allocation6 + $0x1378] sm:$0xff] }
 0x63a   :  { %9842 = vmatpush1.bf16.msra.mxu0 %v11426_v21  ;;  %v3262_v8 = vld [vmem:[#allocation6 + $0x17d8] sm:$0xff]  ;;  %v11507_v57 = vcombine.high %v3118_v46, %v3122_v58  ;;  %v11506_v30 = vcombine.low %v3118_v46, %v3122_v58 }
 0x63b   :  { %9843 = vmatprep.subr.bf16.mxu0 %v11419_v23  ;;  %9879 = vmatpush1.bf16.msra.mxu1 %v11570_v60  ;;  %v3266_v42 = vld [vmem:[#allocation6 + $0x17f8] sm:$0xff] }
 0x63c   :  { %9880 = vmatprep.subr.bf16.mxu1 %v11563_v29  ;;  %v3110_v0 = vld [vmem:[#allocation6 + $0x1318] sm:$0xff]  ;;  %v11651_v31 = vcombine.high %v3262_v8, %v3266_v42  ;;  %v11650_v48 = vcombine.low %v3262_v8, %v3266_v42 }
 0x63d   :  { %v3114_v4 = vld [vmem:[#allocation6 + $0x1338] sm:$0xff] }
 0x63e   :  { %9844 = vmatpush1.bf16.msra.mxu0 %v11418_v9  ;;  %v3254_v21 = vld [vmem:[#allocation6 + $0x1798] sm:$0xff]  ;;  %v11499_v7 = vcombine.high %v3110_v0, %v3114_v4  ;;  %v11498_v6 = vcombine.low %v3110_v0, %v3114_v4 }
 0x63f   :  { %9845 = vmatprep.subr.bf16.mxu0 %v11411_v44  ;;  %9881 = vmatpush1.bf16.msra.mxu1 %v11562_v36  ;;  %v3258_v59 = vld [vmem:[#allocation6 + $0x17b8] sm:$0xff] }
 0x640   :  { %9882 = vmatprep.subr.bf16.mxu1 %v11555_v25  ;;  %v3102_v23 = vld [vmem:[#allocation6 + $0x12d8] sm:$0xff]  ;;  %v11643_v10 = vcombine.high %v3254_v21, %v3258_v59  ;;  %v11642_v5 = vcombine.low %v3254_v21, %v3258_v59 }
 0x641   :  { %v3106_v60 = vld [vmem:[#allocation6 + $0x12f8] sm:$0xff] }
 0x642   :  { %9846 = vmatpush1.bf16.msra.mxu0 %v11410_v61  ;;  %v3246_v13 = vld [vmem:[#allocation6 + $0x1758] sm:$0xff]  ;;  %v11491_v9 = vcombine.high %v3102_v23, %v3106_v60  ;;  %v11490_v55 = vcombine.low %v3102_v23, %v3106_v60 }
 0x643   :  { %9847 = vmatprep.subr.bf16.mxu0 %v11403_v1  ;;  %9883 = vmatpush1.bf16.msra.mxu1 %v11554_v16  ;;  %v3250_v29 = vld [vmem:[#allocation6 + $0x1778] sm:$0xff] }
 0x644   :  { %9884 = vmatprep.subr.bf16.mxu1 %v11547_v38  ;;  %v3094_v35 = vld [vmem:[#allocation6 + $0x1298] sm:$0xff]  ;;  %v11635_v36 = vcombine.high %v3246_v13, %v3250_v29  ;;  %v11634_v20 = vcombine.low %v3246_v13, %v3250_v29 }
 0x645   :  { %v3098_v44 = vld [vmem:[#allocation6 + $0x12b8] sm:$0xff] }
 0x646   :  { %9848 = vmatpush1.bf16.msra.mxu0 %v11402_v51  ;;  %v3238_v14 = vld [vmem:[#allocation6 + $0x1718] sm:$0xff]  ;;  %v11483_v61 = vcombine.high %v3094_v35, %v3098_v44  ;;  %v11482_v50 = vcombine.low %v3094_v35, %v3098_v44 }
 0x647   :  { %9849 = vmatprep.subr.bf16.mxu0 %v11523_v43  ;;  %9885 = vmatpush1.bf16.msra.mxu1 %v11546_v28  ;;  %v3242_v25 = vld [vmem:[#allocation6 + $0x1738] sm:$0xff] }
 0x648   :  { %9886 = vmatprep.subr.bf16.mxu1 %v11539_v47  ;;  %v3086_v12 = vld [vmem:[#allocation6 + $0x1258] sm:$0xff]  ;;  %v11627_v16 = vcombine.high %v3238_v14, %v3242_v25  ;;  %v11626_v56 = vcombine.low %v3238_v14, %v3242_v25 }
 0x649   :  { %v3090_v1 = vld [vmem:[#allocation6 + $0x1278] sm:$0xff] }
 0x64a   :  { %9850 = vmatpush2.bf16.msra.mxu0 %v11522_v37  ;;  %v3230_v49 = vld [vmem:[#allocation6 + $0x16d8] sm:$0xff]  ;;  %v11475_v51 = vcombine.high %v3086_v12, %v3090_v1  ;;  %v11474_v54 = vcombine.low %v3086_v12, %v3090_v1 }
 0x64b   :  { %9851 = vmatprep.subr.bf16.mxu0 %v11515_v32  ;;  %9887 = vmatpush1.bf16.msra.mxu1 %v11538_v24  ;;  %v3234_v38 = vld [vmem:[#allocation6 + $0x16f8] sm:$0xff] }
 0x64c   :  { %9888 = vmatprep.subr.bf16.mxu1 %v11531_v26  ;;  %v3078_v17 = vld [vmem:[#allocation6 + $0x1218] sm:$0xff]  ;;  %v11619_v28 = vcombine.high %v3230_v49, %v3234_v38  ;;  %v11618_v53 = vcombine.low %v3230_v49, %v3234_v38 }
 0x64d   :  { %v3082_v43 = vld [vmem:[#allocation6 + $0x1238] sm:$0xff] }
 0x64e   :  { %9852 = vmatpush2.bf16.msra.mxu0 %v11514_v19  ;;  %v3222_v18 = vld [vmem:[#allocation6 + $0x1698] sm:$0xff]  ;;  %v11467_v37 = vcombine.high %v3078_v17, %v3082_v43  ;;  %v11466_v46 = vcombine.low %v3078_v17, %v3082_v43 }
 0x64f   :  { %9853 = vmatprep.subr.bf16.mxu0 %v11507_v57  ;;  %9889 = vmatpush1.bf16.msra.mxu1 %v11530_v39  ;;  %v3226_v47 = vld [vmem:[#allocation6 + $0x16b8] sm:$0xff] }
 0x650   :  { %9890 = vmatprep.subr.bf16.mxu1 %v11651_v31  ;;  %v3326_v2 = vld [vmem:[#allocation6 + $0x19d8] sm:$0xff]  ;;  %v11611_v24 = vcombine.high %v3222_v18, %v3226_v47  ;;  %v11610_v8 = vcombine.low %v3222_v18, %v3226_v47 }
 0x651   :  { %v3330_v32 = vld [vmem:[#allocation6 + $0x19f8] sm:$0xff] }
 0x652   :  { %9854 = vmatpush2.bf16.msra.mxu0 %v11506_v30  ;;  %v3214_v58 = vld [vmem:[#allocation6 + $0x1658] sm:$0xff]  ;;  %v11715_v19 = vcombine.high %v3326_v2, %v3330_v32  ;;  %v11714_v0 = vcombine.low %v3326_v2, %v3330_v32 }
 0x653   :  { %9855 = vmatprep.subr.bf16.mxu0 %v11499_v7  ;;  %9891 = vmatpush2.bf16.msra.mxu1 %v11650_v48  ;;  %v3218_v26 = vld [vmem:[#allocation6 + $0x1678] sm:$0xff] }
 0x654   :  { %9892 = vmatprep.subr.bf16.mxu1 %v11643_v10  ;;  %v3318_v42 = vld [vmem:[#allocation6 + $0x1998] sm:$0xff]  ;;  %v11603_v39 = vcombine.high %v3214_v58, %v3218_v26  ;;  %v11602_v21 = vcombine.low %v3214_v58, %v3218_v26 }
 0x655   :  { %v3322_v57 = vld [vmem:[#allocation6 + $0x19b8] sm:$0xff] }
 0x656   :  { %9856 = vmatpush2.bf16.msra.mxu0 %v11498_v6  ;;  %v3206_v4 = vld [vmem:[#allocation6 + $0x1618] sm:$0xff]  ;;  %v11707_v30 = vcombine.high %v3318_v42, %v3322_v57  ;;  %v11706_v10 = vcombine.low %v3318_v42, %v3322_v57 }
 0x657   :  { %9857 = vmatprep.subr.bf16.mxu0 %v11491_v9  ;;  %9893 = vmatpush2.bf16.msra.mxu1 %v11642_v5  ;;  %v3210_v31 = vld [vmem:[#allocation6 + $0x1638] sm:$0xff] }
 0x658   :  { %9894 = vmatprep.subr.bf16.mxu1 %v11635_v36  ;;  %v3310_v59 = vld [vmem:[#allocation6 + $0x1958] sm:$0xff]  ;;  %v11595_v23 = vcombine.high %v3206_v4, %v3210_v31  ;;  %v11594_v35 = vcombine.low %v3206_v4, %v3210_v31 }
 0x659   :  { %v3314_v7 = vld [vmem:[#allocation6 + $0x1978] sm:$0xff] }
 0x65a   :  { %9858 = vmatpush2.bf16.msra.mxu0 %v11490_v55  ;;  %v3454_v6 = vld [vmem:[#allocation6 + $0x1dd8] sm:$0xff]  ;;  %v11699_v9 = vcombine.high %v3310_v59, %v3314_v7 }
 0x65b   :  { %9859 = vmatprep.subr.bf16.mxu0 %v11483_v61  ;;  %9895 = vmatpush2.bf16.msra.mxu1 %v11634_v20  ;;  %v3458_v13 = vld [vmem:[#allocation6 + $0x1df8] sm:$0xff] }
 0x65c   :  { %9896 = vmatprep.subr.bf16.mxu1 %v11627_v16  ;;  %v3302_v44 = vld [vmem:[#allocation6 + $0x1918] sm:$0xff]  ;;  %v11843_v55 = vcombine.high %v3454_v6, %v3458_v13  ;;  %v11842_v20 = vcombine.low %v3454_v6, %v3458_v13 }
 0x65d   :  { %v3306_v36 = vld [vmem:[#allocation6 + $0x1938] sm:$0xff] }
 0x65e   :  { %9860 = vmatpush2.bf16.msra.mxu0 %v11482_v50  ;;  %v3446_v14 = vld [vmem:[#allocation6 + $0x1d98] sm:$0xff]  ;;  %v11691_v61 = vcombine.high %v3302_v44, %v3306_v36  ;;  %v11690_v16 = vcombine.low %v3302_v44, %v3306_v36 }
 0x65f   :  { %9861 = vmatprep.subr.bf16.mxu0 %v11475_v51  ;;  %9897 = vmatpush2.bf16.msra.mxu1 %v11626_v56  ;;  %v3450_v25 = vld [vmem:[#allocation6 + $0x1db8] sm:$0xff] }
 0x660   :  { %9898 = vmatprep.subr.bf16.mxu1 %v11619_v28  ;;  %v3294_v12 = vld [vmem:[#allocation6 + $0x18d8] sm:$0xff]  ;;  %v11834_v17 = vcombine.low %v3446_v14, %v3450_v25 }
 0x661   :  { %v3298_v1 = vld [vmem:[#allocation6 + $0x18f8] sm:$0xff] }
 0x662   :  { %9862 = vmatpush2.bf16.msra.mxu0 %v11474_v54  ;;  %v3438_v50 = vld [vmem:[#allocation6 + $0x1d58] sm:$0xff]  ;;  %v11683_v51 = vcombine.high %v3294_v12, %v3298_v1 }
 0x663   :  { %9863 = vmatprep.subr.bf16.mxu0 %v11467_v37  ;;  %9899 = vmatpush2.bf16.msra.mxu1 %v11618_v53  ;;  %v3442_v49 = vld [vmem:[#allocation6 + $0x1d78] sm:$0xff]  ;;  %v11682_v37 = vcombine.low %v3294_v12, %v3298_v1 }
 0x664   :  { %9900 = vmatprep.subr.bf16.mxu1 %v11611_v24  ;;  %v3286_v43 = vld [vmem:[#allocation6 + $0x1898] sm:$0xff]  ;;  %v11827_v18 = vcombine.high %v3438_v50, %v3442_v49  ;;  %v11826_v24 = vcombine.low %v3438_v50, %v3442_v49 }
 0x665   :  { %v3290_v28 = vld [vmem:[#allocation6 + $0x18b8] sm:$0xff] }
 0x666   :  { %9864 = vmatpush2.bf16.msra.mxu0 %v11466_v46  ;;  %v3430_v53 = vld [vmem:[#allocation6 + $0x1d18] sm:$0xff]  ;;  %v11675_v32 = vcombine.high %v3286_v43, %v3290_v28 }
 0x667   :  { %9915 = vmatprep.subr.bf16.mxu0 %v11715_v19  ;;  %9901 = vmatpush2.bf16.msra.mxu1 %v11610_v8  ;;  %v3434_v2 = vld [vmem:[#allocation6 + $0x1d38] sm:$0xff]  ;;  %v11674_v19 = vcombine.low %v3286_v43, %v3290_v28 }
 0x668   :  { %9902 = vmatprep.subr.bf16.mxu1 %v11603_v39  ;;  %v3278_v46 = vld [vmem:[#allocation6 + $0x1858] sm:$0xff]  ;;  %v11819_v26 = vcombine.high %v3430_v53, %v3434_v2  ;;  %v11818_v39 = vcombine.low %v3430_v53, %v3434_v2 }
 0x669   :  { %v9621_v48 = vpop.f32.mrf.mxu0  ;;  %9866 = vmatmul.mubr.bf16.vlgmr.msra.gmra.mxu0 %v13964_v27  ;;  %v3282_v58 = vld [vmem:[#allocation6 + $0x1878] sm:$0xff] }
 0x66a   :  { %v9622_v60 = vadd.f32 %v9621_v48, %v14180_v22  ;;  %9916 = vmatpush1.bf16.msra.mxu0 %v11714_v0  ;;  %9947 = vmatprep.mubr.bf16.mxu0 %v14020_v63  ;;  %v11698_v22 = vcombine.low %v3310_v59, %v3314_v7  ;;  %v3422_v8 = vld [vmem:[#allocation6 + $0x1cd8] sm:$0xff]  ;;  %v11667_v57 = vcombine.high %v3278_v46, %v3282_v58 }
 0x66b   :  { %v9623_v29 = vpop.f32.mrf.mxu0  ;;  %9917 = vmatprep.subr.bf16.mxu0 %v11707_v30  ;;  %9903 = vmatpush2.bf16.msra.mxu1 %v11602_v21  ;;  %v3426_v42 = vld [vmem:[#allocation6 + $0x1cf8] sm:$0xff]  ;;  %v11666_v30 = vcombine.low %v3278_v46, %v3282_v58 }
 0x66c   :  { %v9624_v5 = vadd.f32 %v9623_v29, %v14183_v15  ;;  %9904 = vmatprep.subr.bf16.mxu1 %v11595_v23  ;;  %v11835_v15 = vcombine.high %v3446_v14, %v3450_v25  ;;  %v3270_v0 = vld [vmem:[#allocation6 + $0x1818] sm:$0xff]  ;;  %v11811_v31 = vcombine.high %v3422_v8, %v3426_v42  ;;  %v11810_v48 = vcombine.low %v3422_v8, %v3426_v42 }
 0x66d   :  { %v9625_v27 = vpop.f32.mrf.mxu0  ;;  %v3274_v4 = vld [vmem:[#allocation6 + $0x1838] sm:$0xff] }
 0x66e   :  { %9918 = vmatpush1.bf16.msra.mxu0 %v11706_v10  ;;  %v3414_v21 = vld [vmem:[#allocation6 + $0x1c98] sm:$0xff]  ;;  %v11659_v7 = vcombine.high %v3270_v0, %v3274_v4  ;;  %v11658_v6 = vcombine.low %v3270_v0, %v3274_v4 }
 0x66f   :  { %v9626_v63 = vpop.f32.mrf.mxu0  ;;  %9919 = vmatprep.subr.bf16.mxu0 %v11699_v9  ;;  %9905 = vmatpush2.bf16.msra.mxu1 %v11594_v35  ;;  %v3418_v59 = vld [vmem:[#allocation6 + $0x1cb8] sm:$0xff] }
 0x670   :  { %9956 = vmatprep.subr.bf16.mxu1 %v11843_v55  ;;  %v3390_v23 = vld [vmem:[#allocation6 + $0x1bd8] sm:$0xff]  ;;  %v11803_v10 = vcombine.high %v3414_v21, %v3418_v59 }
 0x671   :  { %v3406_v13 = vld [vmem:[#allocation6 + $0x1c58] sm:$0xff] }
 0x672   :  { %9920 = vmatpush1.bf16.msra.mxu0 %v11698_v22  ;;  %v9662_v38 = vpop.f32.mrf.mxu1  ;;  %9907 = vmatmul.mubr.bf16.vlgmr.msra.gmra.mxu1 %v13989_v45  ;;  %v3410_v29 = vld [vmem:[#allocation6 + $0x1c78] sm:$0xff] }
 0x673   :  { %9921 = vmatprep.subr.bf16.mxu0 %v11691_v61  ;;  %v14190_v56 = vadd.f32 %v9662_v38, %v9622_v60  ;;  %9957 = vmatpush1.bf16.msra.mxu1 %v11842_v20  ;;  %v3394_v60 = vld [vmem:[#allocation6 + $0x1bf8] sm:$0xff]  ;;  %v11795_v36 = vcombine.high %v3406_v13, %v3410_v29  ;;  %v11794_v25 = vcombine.low %v3406_v13, %v3410_v29 }
 0x674   :  { %9988 = vmatprep.mubr.bf16.mxu1 %v14041_v11  ;;  %v9664_v54 = vpop.f32.mrf.mxu1  ;;  %9958 = vmatprep.subr.bf16.mxu1 %v11835_v15  ;;  %v11779_v9 = vcombine.high %v3390_v23, %v3394_v60  ;;  %v3382_v35 = vld [vmem:[#allocation6 + $0x1b98] sm:$0xff]  ;;  %v11778_v27 = vcombine.low %v3390_v23, %v3394_v60 }
 0x675   :  { %v14193_v47 = vadd.f32 %v9664_v54, %v9624_v5  ;;  %v11802_v5 = vcombine.low %v3414_v21, %v3418_v59  ;;  %v3386_v44 = vld [vmem:[#allocation6 + $0x1bb8] sm:$0xff] }
 0x676   :  { %9922 = vmatpush1.bf16.msra.mxu0 %v11690_v16  ;;  %v9666_v45 = vpop.f32.mrf.mxu1  ;;  %v3398_v55 = vld [vmem:[#allocation6 + $0x1c18] sm:$0xff]  ;;  %v11771_v14 = vcombine.high %v3382_v35, %v3386_v44  ;;  %v11770_v12 = vcombine.low %v3382_v35, %v3386_v44 }
 0x677   :  { %9923 = vmatprep.subr.bf16.mxu0 %v11683_v51  ;;  %9959 = vmatpush1.bf16.msra.mxu1 %v11834_v17  ;;  %v3402_v22 = vld [vmem:[#allocation6 + $0x1c38] sm:$0xff] }
 0x678   :  { %v9667_v11 = vpop.f32.mrf.mxu1  ;;  %9960 = vmatprep.subr.bf16.mxu1 %v11827_v18  ;;  %v3374_v63 = vld [vmem:[#allocation6 + $0x1b58] sm:$0xff]  ;;  %v11787_v20 = vcombine.high %v3398_v55, %v3402_v22  ;;  %v11786_v50 = vcombine.low %v3398_v55, %v3402_v22  ;;  %v12255_v22 = vld [vmem:[#allocation9 + $0x78] sm:$0xff]  }
 0x679   :  { %v3378_v61 = vld [vmem:[#allocation6 + $0x1b78] sm:$0xff] }
 0x67a   :  { %9924 = vmatpush1.bf16.msra.mxu0 %v11682_v37  ;;  %v3518_v1 = vld [vmem:[#allocation6 + $0x1fd8] sm:$0xff]  ;;  %v11763_v16 = vcombine.high %v3374_v63, %v3378_v61  ;;  %v11762_v17 = vcombine.low %v3374_v63, %v3378_v61  ;;  %v12256_v61 = vld [vmem:[#allocation9 + $0x38] sm:$0xff]  }
 0x67b   :  { %9925 = vmatprep.subr.bf16.mxu0 %v11675_v32  ;;  %9961 = vmatpush1.bf16.msra.mxu1 %v11826_v24  ;;  %v3522_v15 = vld [vmem:[#allocation6 + $0x1ff8] sm:$0xff] }
 0x67c   :  { %9962 = vmatprep.subr.bf16.mxu1 %v11819_v26  ;;  %v3366_v49 = vld [vmem:[#allocation6 + $0x1b18] sm:$0xff]  ;;  %v11907_v51 = vcombine.high %v3518_v1, %v3522_v15  ;;  %v11906_v18 = vcombine.low %v3518_v1, %v3522_v15 }
 0x67d   :  { %v3370_v38 = vld [vmem:[#allocation6 + $0x1b38] sm:$0xff] }
 0x67e   :  { %9926 = vmatpush1.bf16.msra.mxu0 %v11674_v19  ;;  %v3510_v43 = vld [vmem:[#allocation6 + $0x1f98] sm:$0xff]  ;;  %v11755_v54 = vcombine.high %v3366_v49, %v3370_v38  ;;  %v11754_v45 = vcombine.low %v3366_v49, %v3370_v38 }
 0x67f   :  { %9927 = vmatprep.subr.bf16.mxu0 %v11667_v57  ;;  %9963 = vmatpush1.bf16.msra.mxu1 %v11818_v39  ;;  %v3514_v28 = vld [vmem:[#allocation6 + $0x1fb8] sm:$0xff] }
 0x680   :  { %9964 = vmatprep.subr.bf16.mxu1 %v11811_v31  ;;  %v3358_v37 = vld [vmem:[#allocation6 + $0x1ad8] sm:$0xff]  ;;  %v11899_v2 = vcombine.high %v3510_v43, %v3514_v28  ;;  %v11898_v58 = vcombine.low %v3510_v43, %v3514_v28  ;;  %v3555_v43 = vsub.s32 7, %v12988_v33 }
 0x681   :  { %v3362_v53 = vld [vmem:[#allocation6 + $0x1af8] sm:$0xff] }
 0x682   :  { %9928 = vmatpush1.bf16.msra.mxu0 %v11666_v30  ;;  %v3502_v32 = vld [vmem:[#allocation6 + $0x1f58] sm:$0xff]  ;;  %v11747_v46 = vcombine.high %v3358_v37, %v3362_v53  ;;  %v11746_v8 = vcombine.low %v3358_v37, %v3362_v53  ;;  %v10000_v37 = vmax.f32 %v14153_v34, 0.0  ;;  %v12267_v34 = vld [vmem:[#allocation9 + $0x58] sm:$0xff]  }
 0x683   :  { %9929 = vmatprep.subr.bf16.mxu0 %v11659_v7  ;;  %9965 = vmatpush1.bf16.msra.mxu1 %v11810_v48  ;;  %v3506_v24 = vld [vmem:[#allocation6 + $0x1f78] sm:$0xff] }
 0x684   :  { %9966 = vmatprep.subr.bf16.mxu1 %v11803_v10  ;;  %v3350_v11 = vld [vmem:[#allocation6 + $0x1a98] sm:$0xff]  ;;  %v11891_v19 = vcombine.high %v3502_v32, %v3506_v24  ;;  %v11890_v0 = vcombine.low %v3502_v32, %v3506_v24  ;;  %v12263_v32 = vld [vmem:[#allocation9 + $0x60] sm:$0xff]  }
 0x685   :  { %v3354_v26 = vld [vmem:[#allocation6 + $0x1ab8] sm:$0xff] }
 0x686   :  { %9930 = vmatpush1.bf16.msra.mxu0 %v11658_v6  ;;  %v3494_v42 = vld [vmem:[#allocation6 + $0x1f18] sm:$0xff]  ;;  %v11739_v39 = vcombine.high %v3350_v11, %v3354_v26  ;;  %v11738_v21 = vcombine.low %v3350_v11, %v3354_v26  ;;  %v12264_v26 = vld [vmem:[#allocation9 + $0x20] sm:$0xff]  }
 0x687   :  { %9931 = vmatprep.subr.bf16.mxu0 %v11779_v9  ;;  %9967 = vmatpush1.bf16.msra.mxu1 %v11802_v5  ;;  %v3498_v57 = vld [vmem:[#allocation6 + $0x1f38] sm:$0xff] }
 0x688   :  { %9968 = vmatprep.subr.bf16.mxu1 %v11795_v36  ;;  %v3342_v4 = vld [vmem:[#allocation6 + $0x1a58] sm:$0xff]  ;;  %v11883_v30 = vcombine.high %v3494_v42, %v3498_v57  ;;  %v11882_v23 = vcombine.low %v3494_v42, %v3498_v57 }
 0x689   :  { %v3346_v31 = vld [vmem:[#allocation6 + $0x1a78] sm:$0xff] }
 0x68a   :  { %9932 = vmatpush2.bf16.msra.mxu0 %v11778_v27  ;;  %v3486_v59 = vld [vmem:[#allocation6 + $0x1ed8] sm:$0xff]  ;;  %v11731_v48 = vcombine.high %v3342_v4, %v3346_v31  ;;  %v11730_v13 = vcombine.low %v3342_v4, %v3346_v31  ;;  %v12268_v31 = vld [vmem:[#allocation9 + $0x18] sm:$0xff]  }
 0x68b   :  { %9933 = vmatprep.subr.bf16.mxu0 %v11771_v14  ;;  %9969 = vmatpush1.bf16.msra.mxu1 %v11794_v25  ;;  %v3490_v7 = vld [vmem:[#allocation6 + $0x1ef8] sm:$0xff]  ;;  %v9998_v14 = vmax.f32 %v14113_v40, 0.0  ;;  %v3551_v40 = vsub.s32 6, %v12988_v33  ;;  %v10008_v33 = vpack.c.bf16 %v10000_v37, %v10000_v37  ;;  %v12309_v37 = vld [vmem:[#allocation9 + $0x1e0] sm:$0xff]  }
 0x68c   :  { %9970 = vmatprep.subr.bf16.mxu1 %v11787_v20  ;;  %v3334_v60 = vld [vmem:[#allocation6 + $0x1a18] sm:$0xff]  ;;  %v11875_v6 = vcombine.high %v3486_v59, %v3490_v7  ;;  %v11874_v35 = vcombine.low %v3486_v59, %v3490_v7  ;;  %v12273_v7 = vld [vmem:[#allocation9 + $0xe0] sm:$0xff]  }
 0x68d   :  { %v3338_v10 = vld [vmem:[#allocation6 + $0x1a38] sm:$0xff]  ;;  %v10006_v15 = vpack.c.bf16 %v9998_v14, %v9998_v14 }
 0x68e   :  { %9934 = vmatpush2.bf16.msra.mxu0 %v11770_v12  ;;  %v3478_v29 = vld [vmem:[#allocation6 + $0x1e98] sm:$0xff]  ;;  %v11723_v5 = vcombine.high %v3334_v60, %v3338_v10  ;;  %v11722_v36 = vcombine.low %v3334_v60, %v3338_v10  ;;  %v12274_v60 = vld [vmem:[#allocation9 + $0xa0] sm:$0xff]   ;;  %v12277_v10 = vld [vmem:[#allocation9 + $0xd8] sm:$0xff]  }
 0x68f   :  { %9935 = vmatprep.subr.bf16.mxu0 %v11763_v16  ;;  %9971 = vmatpush1.bf16.msra.mxu1 %v11786_v50  ;;  %v3482_v9 = vld [vmem:[#allocation6 + $0x1eb8] sm:$0xff] }
 0x690   :  { %9972 = vmatprep.subr.bf16.mxu1 %v11907_v51  ;;  %v11867_v44 = vcombine.high %v3478_v29, %v3482_v9  ;;  %v3470_v27 = vld [vmem:[#allocation6 + $0x1e58] sm:$0xff]  ;;  %v11866_v25 = vcombine.low %v3478_v29, %v3482_v9  ;;  %v12278_v29 = vld [vmem:[#allocation9 + $0x98] sm:$0xff]  }
 0x691   :  { %v3474_v55 = vld [vmem:[#allocation6 + $0x1e78] sm:$0xff] }
 0x692   :  { %9936 = vmatpush2.bf16.msra.mxu0 %v11762_v17  ;;  %v11859_v63 = vcombine.high %v3470_v27, %v3474_v55  ;;  %v3462_v20 = vld [vmem:[#allocation6 + $0x1e18] sm:$0xff]  ;;  %v11858_v16 = vcombine.low %v3470_v27, %v3474_v55  ;;  %v12259_v17 = vld [vmem:[#allocation9 + $0x68] sm:$0xff]  }
 0x693   :  { %9937 = vmatprep.subr.bf16.mxu0 %v11755_v54  ;;  %9973 = vmatpush2.bf16.msra.mxu1 %v11906_v18  ;;  %v3466_v12 = vld [vmem:[#allocation6 + $0x1e38] sm:$0xff]  ;;  %v12261_v18 = vld [vmem:[#allocation9 + $0xf8] sm:$0xff]   ;;  %v12284_v55 = vld [vmem:[#allocation9 + $0xc8] sm:$0xff]  }
 0x694   :  { %9974 = vmatprep.subr.bf16.mxu1 %v11899_v2  ;;  %v12257_v1 = vld [vmem:[#allocation9 + $0x70] sm:$0xff]   ;;  %v11851_v49 = vcombine.high %v3462_v20, %v3466_v12  ;;  %v11850_v28 = vcombine.low %v3462_v20, %v3466_v12  ;;  %v12260_v2 = vld [vmem:[#allocation9 + $0x28] sm:$0xff]   ;;  %v12288_v20 = vld [vmem:[#allocation9 + $0xc0] sm:$0xff]  }
 0x695   :  { %v12258_v38 = vld [vmem:[#allocation9 + $0x30] sm:$0xff]   ;;  %v12290_v12 = vld [vmem:[#allocation9 + $0x80] sm:$0xff]  }
 0x696   :  { %9938 = vmatpush2.bf16.msra.mxu0 %v11754_v45  ;;  %v12266_v57 = vld [vmem:[#allocation9 + $0xb0] sm:$0xff]  }
 0x697   :  { %9939 = vmatprep.subr.bf16.mxu0 %v11747_v46  ;;  %9975 = vmatpush2.bf16.msra.mxu1 %v11898_v58  ;;  %v12262_v46 = vld [vmem:[#allocation9 + $0xb8] sm:$0xff]   ;;  %v12265_v58 = vld [vmem:[#allocation9 + $0xf0] sm:$0xff]  }
 0x698   :  { %9976 = vmatprep.subr.bf16.mxu1 %v11891_v19  ;;  %v12281_v9 = vld [vmem:[#allocation9 + $0xd0] sm:$0xff]  }
 0x699   :  { %v12282_v27 = vld [vmem:[#allocation9 + $0x90] sm:$0xff]  }
 0x69a   :  { %9940 = vmatpush2.bf16.msra.mxu0 %v11746_v8 }
 0x69b   :  { %9941 = vmatprep.subr.bf16.mxu0 %v11739_v39  ;;  %9977 = vmatpush2.bf16.msra.mxu1 %v11890_v0  ;;  %v12269_v0 = vld [vmem:[#allocation9 + $0xe8] sm:$0xff]  }
 0x69c   :  { %9978 = vmatprep.subr.bf16.mxu1 %v11883_v30 }
 0x69e   :  { %9942 = vmatpush2.bf16.msra.mxu0 %v11738_v21  ;;  %v12271_v21 = vld [vmem:[#allocation9 + $0x50] sm:$0xff]  }
 0x69f   :  { %9943 = vmatprep.subr.bf16.mxu0 %v11731_v48  ;;  %9979 = vmatpush2.bf16.msra.mxu1 %v11882_v23  ;;  %v12272_v48 = vld [vmem:[#allocation9 + $0x10] sm:$0xff]   ;;  %v12275_v23 = vld [vmem:[#allocation9 + $0x48] sm:$0xff]  }
 0x6a0   :  { %9980 = vmatprep.subr.bf16.mxu1 %v11875_v6  ;;  %v12276_v6 = vld [vmem:[#allocation9 + $0x8] sm:$0xff]  }
 0x6a2   :  { %9944 = vmatpush2.bf16.msra.mxu0 %v11730_v13  ;;  %v12279_v13 = vld [vmem:[#allocation9 + $0x40] sm:$0xff]  }
 0x6a3   :  { %9945 = vmatprep.subr.bf16.mxu0 %v11723_v5  ;;  %9981 = vmatpush2.bf16.msra.mxu1 %v11874_v35  ;;  %v12280_v5 = vld [vmem:[#allocation9] sm:$0xff]   ;;  %v9997_v35 = vmax.f32 %v14110_v52, 0.0  ;;  %v12289_v52 = vld [vmem:[#allocation9 + $0x130] sm:$0xff]  }
 0x6a4   :  { %9982 = vmatprep.subr.bf16.mxu1 %v11867_v44  ;;  %v12283_v44 = vld [vmem:[#allocation9 + $0x178] sm:$0xff]  }
 0x6a5   :  { %v10005_v14 = vpack.c.bf16 %v9997_v35, %v9997_v35 }
 0x6a6   :  { %9946 = vmatpush2.bf16.msra.mxu0 %v11722_v36  ;;  %v10002_v36 = vmax.f32 %v14193_v47, 0.0  ;;  %v12291_v47 = vld [vmem:[#allocation9 + $0x168] sm:$0xff]  }
 0x6a7   :  { %12119 = vmatprep.subr.bf16.mxu0 %v12255_v22  ;;  %9983 = vmatpush2.bf16.msra.mxu1 %v11866_v25  ;;  %v12285_v22 = vld [vmem:[#allocation9 + $0x138] sm:$0xff]   ;;  %v12287_v25 = vld [vmem:[#allocation9 + $0x170] sm:$0xff]  }
 0x6a8   :  { %9984 = vmatprep.subr.bf16.mxu1 %v11859_v63  ;;  %v10010_v63 = vpack.c.bf16 %v10002_v36, %v10002_v36 }
 0x6a9   :  { %v9703_v50 = vpop.f32.mrf.mxu0  ;;  %9948 = vmatmul.mubr.bf16.vlgmr.msra.gmra.mxu0 %v14064_v62  ;;  %v12321_v62 = vld [vmem:[#allocation8] sm:$0xff] }
 0x6aa   :  { %12120 = vmatpush3.bf16.msra.mxu0 %v12256_v61  ;;  %10564 = vmatprep.mubr.bf16.mxu0 %v10006_v15  ;;  %v3552_v53 = vrot.slane %v12321_v62, %v3551_v40  ;;  %v3556_v24 = vrot.slane %v12321_v62, %v3555_v43  ;;  %v12286_v61 = vld [vmem:[#allocation9 + $0x88] sm:$0xff]   ;;  %v12303_v15 = vld [vmem:[#allocation9 + $0x1f8] sm:$0xff]   ;;  %v12306_v43 = vld [vmem:[#allocation9 + $0x1b0] sm:$0xff]  }
 0x6ab   :  { %v9705_v51 = vpop.f32.mrf.mxu0  ;;  %12121 = vmatprep.subr.bf16.mxu0 %v12257_v1  ;;  %9985 = vmatpush2.bf16.msra.mxu1 %v11858_v16  ;;  %v9999_v1 = vmax.f32 %v14150_v3, 0.0  ;;  %v12292_v16 = vld [vmem:[#allocation9 + $0x128] sm:$0xff]   ;;  %v12298_v62 = vld [vmem:[#allocation9 + $0x110] sm:$0xff]  }
 0x6ac   :  { %9986 = vmatprep.subr.bf16.mxu1 %v11851_v49  ;;  %v9704_v11 = vadd.f32 %v9703_v50, %v3552_v53  ;;  %v9706_v8 = vadd.f32 %v9705_v51, %v3556_v24  ;;  %v12293_v50 = vld [vmem:[#allocation9 + $0x160] sm:$0xff]   ;;  %v12304_v49 = vld [vmem:[#allocation9 + $0x1b8] sm:$0xff]   ;;  %v12307_v3 = vld [vmem:[#allocation9 + $0x1e8] sm:$0xff]   ;;  %v10001_v24 = vmax.f32 %v14190_v56, 0.0 }
 0x6ad   :  { %v9707_v54 = vpop.f32.mrf.mxu0  ;;  %v10007_v40 = vpack.c.bf16 %v9999_v1, %v9999_v1  ;;  %v12294_v51 = vld [vmem:[#allocation9 + $0x120] sm:$0xff]   ;;  %v12299_v53 = vld [vmem:[#allocation9 + $0x148] sm:$0xff]   ;;  %v12314_v56 = vld [vmem:[#allocation9 + $0x190] sm:$0xff]  }
 0x6ae   :  { %12122 = vmatpush3.bf16.msra.mxu0 %v12258_v38  ;;  %v12305_v38 = vld [vmem:[#allocation9 + $0x1f0] sm:$0xff]  }
 0x6af   :  { %v9708_v45 = vpop.f32.mrf.mxu0  ;;  %12123 = vmatprep.subr.bf16.mxu0 %v12259_v17  ;;  %9987 = vmatpush2.bf16.msra.mxu1 %v11850_v28  ;;  %v12295_v17 = vld [vmem:[#allocation9 + $0x158] sm:$0xff]   ;;  %v12297_v54 = vld [vmem:[#allocation9 + $0x150] sm:$0xff]  }
 0x6b0   :  { %12141 = vmatprep.subr.bf16.mxu1 %v12261_v18  ;;  %v12296_v28 = vld [vmem:[#allocation9 + $0x118] sm:$0xff]   ;;  %v12308_v18 = vld [vmem:[#allocation9 + $0x1a8] sm:$0xff]   ;;  %v12301_v45 = vld [vmem:[#allocation9 + $0x140] sm:$0xff]  }
 0x6b2   :  { %12124 = vmatpush3.bf16.msra.mxu0 %v12260_v2  ;;  %v9744_v19 = vpop.f32.mrf.mxu1  ;;  %9989 = vmatmul.mubr.bf16.vlgmr.msra.gmra.mxu1 %v14077_v41  ;;  %v12270_v41 = vld [vmem:[#allocation9 + $0xa8] sm:$0xff]  }
 0x6b3   :  { %12125 = vmatprep.subr.bf16.mxu0 %v12263_v32  ;;  %v14201_v42 = vadd.f32 %v9744_v19, %v9704_v11  ;;  %12142 = vmatpush3.bf16.msra.mxu1 %v12262_v46  ;;  %v12300_v2 = vld [vmem:[#allocation9 + $0x108] sm:$0xff]   ;;  %v12302_v32 = vld [vmem:[#allocation9 + $0x100] sm:$0xff]   ;;  %v10009_v46 = vpack.c.bf16 %v10001_v24, %v10001_v24  ;;  %v12311_v19 = vld [vmem:[#allocation9 + $0x1d8] sm:$0xff]  }
 0x6b4   :  { %10604 = vmatprep.mubr.bf16.mxu1 %v10008_v33  ;;  %v9746_v39 = vpop.f32.mrf.mxu1  ;;  %12143 = vmatprep.subr.bf16.mxu1 %v12265_v58  ;;  %v12310_v58 = vld [vmem:[#allocation9 + $0x1a0] sm:$0xff]  }
 0x6b5   :  { %v14203_v4 = vadd.f32 %v9746_v39, %v9706_v8  ;;  %v12312_v8 = vld [vmem:[#allocation9 + $0x198] sm:$0xff]  }
 0x6b6   :  { %12126 = vmatpush3.bf16.msra.mxu0 %v12264_v26  ;;  %v9748_v30 = vpop.f32.mrf.mxu1 }
 0x6b7   :  { %12127 = vmatprep.subr.bf16.mxu0 %v12267_v34  ;;  %12144 = vmatpush3.bf16.msra.mxu1 %v12266_v57  ;;  %v12315_v30 = vld [vmem:[#allocation9 + $0x1c8] sm:$0xff]  }
 0x6b8   :  { %v9749_v59 = vpop.f32.mrf.mxu1  ;;  %12145 = vmatprep.subr.bf16.mxu1 %v12269_v0  ;;  %v12313_v0 = vld [vmem:[#allocation9 + $0x1d0] sm:$0xff]  }
 0x6ba   :  { %12128 = vmatpush3.bf16.msra.mxu0 %v12268_v31 }
 0x6bb   :  { %12129 = vmatprep.subr.bf16.mxu0 %v12271_v21  ;;  %12146 = vmatpush3.bf16.msra.mxu1 %v12270_v41  ;;  %v12316_v41 = vld [vmem:[#allocation9 + $0x188] sm:$0xff]  }
 0x6bc   :  { %12147 = vmatprep.subr.bf16.mxu1 %v12273_v7 }
 0x6be   :  { %12130 = vmatpush3.bf16.msra.mxu0 %v12272_v48  ;;  %v12317_v48 = vld [vmem:[#allocation9 + $0x1c0] sm:$0xff]  }
 0x6bf   :  { %12131 = vmatprep.subr.bf16.mxu0 %v12275_v23  ;;  %12148 = vmatpush3.bf16.msra.mxu1 %v12274_v60 }
 0x6c0   :  { %12149 = vmatprep.subr.bf16.mxu1 %v12277_v10 }
 0x6c2   :  { %12132 = vmatpush3.bf16.msra.mxu0 %v12276_v6 }
 0x6c3   :  { %12133 = vmatprep.subr.bf16.mxu0 %v12279_v13  ;;  %12150 = vmatpush3.bf16.msra.mxu1 %v12278_v29 }
 0x6c4   :  { %12151 = vmatprep.subr.bf16.mxu1 %v12281_v9 }
 0x6c6   :  { %12134 = vmatpush3.bf16.msra.mxu0 %v12280_v5 }
 0x6c7   :  { %12163 = vmatprep.subr.bf16.mxu0 %v12283_v44  ;;  %12152 = vmatpush3.bf16.msra.mxu1 %v12282_v27 }
 0x6c8   :  { %12153 = vmatprep.subr.bf16.mxu1 %v12284_v55 }
 0x6c9   :  { %10565 = vmatmul.mubr.bf16.vlgmr.msra.gmra.mxu0 %v10005_v14 }
 0x6ca   :  { %12164 = vmatpush3.bf16.msra.mxu0 %v12285_v22  ;;  %10644 = vmatprep.mubr.bf16.mxu0 %v10010_v63 }
 0x6cb   :  { %12165 = vmatprep.subr.bf16.mxu0 %v12287_v25  ;;  %12154 = vmatpush3.bf16.msra.mxu1 %v12286_v61 }
 0x6cc   :  { %12155 = vmatprep.subr.bf16.mxu1 %v12288_v20 }
 0x6ce   :  { %12166 = vmatpush3.bf16.msra.mxu0 %v12289_v52 }
 0x6cf   :  { %12167 = vmatprep.subr.bf16.mxu0 %v12291_v47  ;;  %12156 = vmatpush3.bf16.msra.mxu1 %v12290_v12 }
 0x6d0   :  { %12185 = vmatprep.subr.bf16.mxu1 %v12303_v15 }
 0x6d2   :  { %12168 = vmatpush3.bf16.msra.mxu0 %v12292_v16  ;;  %10605 = vmatmul.mubr.bf16.vlgmr.msra.gmra.mxu1 %v10007_v40 }
 0x6d3   :  { %12169 = vmatprep.subr.bf16.mxu0 %v12293_v50  ;;  %12186 = vmatpush3.bf16.msra.mxu1 %v12304_v49 }
 0x6d4   :  { %12187 = vmatprep.subr.bf16.mxu1 %v12305_v38 }
 0x6d6   :  { %12170 = vmatpush3.bf16.msra.mxu0 %v12294_v51 }
 0x6d7   :  { %12171 = vmatprep.subr.bf16.mxu0 %v12295_v17  ;;  %12188 = vmatpush3.bf16.msra.mxu1 %v12306_v43 }
 0x6d8   :  { %12189 = vmatprep.subr.bf16.mxu1 %v12307_v3 }
 0x6da   :  { %12172 = vmatpush3.bf16.msra.mxu0 %v12296_v28 }
 0x6db   :  { %12173 = vmatprep.subr.bf16.mxu0 %v12297_v54  ;;  %12190 = vmatpush3.bf16.msra.mxu1 %v12308_v18  ;;  %v11908_v54 = vld [vmem:[#allocation11] ss:$0 sm:$0xff] }
 0x6dc   :  { %12191 = vmatprep.subr.bf16.mxu1 %v12309_v37 }
 0x6de   :  { %12174 = vmatpush3.bf16.msra.mxu0 %v12298_v62 }
 0x6df   :  { %12175 = vmatprep.subr.bf16.mxu0 %v12299_v53  ;;  %12192 = vmatpush3.bf16.msra.mxu1 %v12310_v58 }
 0x6e0   :  { %12193 = vmatprep.subr.bf16.mxu1 %v12311_v19 }
 0x6e2   :  { %12176 = vmatpush3.bf16.msra.mxu0 %v12300_v2 }
 0x6e3   :  { %12177 = vmatprep.subr.bf16.mxu0 %v12301_v45  ;;  %12194 = vmatpush3.bf16.msra.mxu1 %v12312_v8 }
 0x6e4   :  { %12195 = vmatprep.subr.bf16.mxu1 %v12313_v0 }
 0x6e6   :  { %12178 = vmatpush3.bf16.msra.mxu0 %v12302_v32 }
 0x6e7   :  { %12196 = vmatpush3.bf16.msra.mxu1 %v12314_v56 }
 0x6e8   :  { %12197 = vmatprep.subr.bf16.mxu1 %v12315_v30 }
 0x6e9   :  { %v9785_v33 = vpop.f32.mrf.mxu0  ;;  %10645 = vmatmul.mubr.bf16.vlgmr.msra.gmra.mxu0 %v10009_v46 }
 0x6ea   :  { %v9786_v11 = vadd.f32 %v9785_v33, %v14201_v42 }
 0x6eb   :  { %v9787_v26 = vpop.f32.mrf.mxu0  ;;  %12198 = vmatpush3.bf16.msra.mxu1 %v12316_v41 }
 0x6ec   :  { %v9788_v34 = vadd.f32 %v9787_v26, %v14203_v4  ;;  %v12318_v4 = vld [vmem:[#allocation9 + $0x180] sm:$0xff]   ;;  %12199 = vmatprep.subr.bf16.mxu1 %v12317_v48 }
 0x6ed   :  { %v9789_v57 = vpop.f32.mrf.mxu0 }
 0x6ef   :  { %v9790_v39 = vpop.f32.mrf.mxu0  ;;  %12200 = vmatpush3.bf16.msra.mxu1 %v12318_v4 }
 0x6f2   :  { %v9826_v31 = vpop.f32.mrf.mxu1 }
 0x6f3   :  { %v9827_v21 = vadd.f32 %v9826_v31, %v9786_v11 }
 0x6f4   :  { %v9828_v59 = vpop.f32.mrf.mxu1 }
 0x6f5   :  { %v9829_v42 = vadd.f32 %v9828_v59, %v9788_v34 }
 0x6f6   :  { %v9830_v7 = vpop.f32.mrf.mxu1 }
 0x6f8   :  { %v9831_v23 = vpop.f32.mrf.mxu1 }
 0x729   :  { %v9867_v60 = vpop.f32.mrf.mxu0 }
 0x72a   :  { %v9868_v10 = vadd.f32 %v9867_v60, %v9827_v21 }
 0x72b   :  { %v9869_v6 = vpop.f32.mrf.mxu0 }
 0x72c   :  { %v9870_v13 = vadd.f32 %v9869_v6, %v9829_v42 }
 0x72d   :  { %v9871_v29 = vpop.f32.mrf.mxu0 }
 0x72f   :  { %v9872_v9 = vpop.f32.mrf.mxu0 }
 0x732   :  { %v9908_v5 = vpop.f32.mrf.mxu1 }
 0x733   :  { %v9909_v25 = vadd.f32 %v9908_v5, %v9868_v10 }
 0x734   :  { %v9910_v35 = vpop.f32.mrf.mxu1 }
 0x735   :  { %v9911_v63 = vadd.f32 %v9910_v35, %v9870_v13 }
 0x736   :  { %v9912_v44 = vpop.f32.mrf.mxu1 }
 0x738   :  { %v9913_v36 = vpop.f32.mrf.mxu1 }
 0x769   :  { %v9949_v27 = vpop.f32.mrf.mxu0 }
 0x76a   :  { %v9950_v61 = vadd.f32 %v9949_v27, %v9909_v25 }
 0x76b   :  { %v9951_v55 = vpop.f32.mrf.mxu0 }
 0x76c   :  { %v9952_v52 = vadd.f32 %v9951_v55, %v9911_v63 }
 0x76d   :  { %v9953_v22 = vpop.f32.mrf.mxu0 }
 0x76f   :  { %v9954_v14 = vpop.f32.mrf.mxu0 }
 0x772   :  { %v9990_v20 = vpop.f32.mrf.mxu1 }
 0x773   :  { %v9991_v47 = vadd.f32 %v9990_v20, %v9950_v61 }
 0x774   :  { %v9992_v12 = vpop.f32.mrf.mxu1 }
 0x775   :  { %v9993_v1 = vadd.f32 %v9992_v12, %v9952_v52  ;;  %v10003_v15 = vmax.f32 %v9991_v47, 0.0 }
 0x776   :  { %v9994_v16 = vpop.f32.mrf.mxu1 }
 0x777   :  { %v10004_v50 = vmax.f32 %v9993_v1, 0.0  ;;  %v10011_v38 = vpack.c.bf16 %v10003_v15, %v10003_v15 }
 0x778   :  { %v9995_v49 = vpop.f32.mrf.mxu1 }
 0x779   :  { %v10012_v40 = vpack.c.bf16 %v10004_v50, %v10004_v50 }
 0x77b   :  { %10684 = vmatprep.mubr.bf16.mxu1 %v10012_v40 }
 0x77c   :  { %10685 = vmatmul.mubr.bf16.vlgmr.msra.gmra.mxu1 %v10011_v38 }
 0x789   :  { %v12135_v51 = vpop.f32.mrf.mxu0 }
 0x78b   :  { %v12136_v17 = vpop.f32.mrf.mxu0 }
 0x78c   :  { %v12137_v43 = vadd.f32 %v12136_v17, %v12135_v51 }
 0x78d   :  { %v12138_v3 = vpop.f32.mrf.mxu0 }
 0x78e   :  { %v10567_v62 = vadd.f32 %v12137_v43, %v11908_v54 }
 0x78f   :  { %v12139_v28 = vpop.f32.mrf.mxu0 }
 0x792   :  { %v12157_v18 = vpop.f32.mrf.mxu1 }
 0x794   :  { %v12158_v37 = vpop.f32.mrf.mxu1 }
 0x795   :  { %v12159_v53 = vadd.f32 %v12158_v37, %v12157_v18 }
 0x796   :  { %v12160_v2 = vpop.f32.mrf.mxu1 }
 0x797   :  { %v10607_v45 = vadd.f32 %v12159_v53, %v10567_v62 }
 0x798   :  { %v12161_v32 = vpop.f32.mrf.mxu1 }
 0x7a9   :  { %v12179_v24 = vpop.f32.mrf.mxu0 }
 0x7ab   :  { %v12180_v46 = vpop.f32.mrf.mxu0 }
 0x7ac   :  { %v12181_v58 = vadd.f32 %v12180_v46, %v12179_v24 }
 0x7ad   :  { %v12182_v33 = vpop.f32.mrf.mxu0 }
 0x7ae   :  { %v10647_v11 = vadd.f32 %v12181_v58, %v10607_v45 }
 0x7af   :  { %v12183_v26 = vpop.f32.mrf.mxu0 }
 0x83c   :  { %v12201_v19 = vpop.f32.mrf.mxu1 }
 0x83e   :  { %v12202_v34 = vpop.f32.mrf.mxu1 }
 0x83f   :  { %v12203_v8 = vadd.f32 %v12202_v34, %v12201_v19 }
 0x840   :  { %v12204_v57 = vpop.f32.mrf.mxu1 }
 0x841   :  { %v10687_v39 = vadd.f32 %v12203_v8, %v10647_v11 }
 0x842   :  { %v12205_v0 = vpop.f32.mrf.mxu1 }
 0x843   :  { %10692 = vst [vmem:[#allocation12] sm:$0x3] %v10687_v39 }
 0x844   :  { %12433 = shalt.err (!%p12430_p2)
}
 0x845   :  { %10702 = dma.vmem_to_hbm [thread:$0]  %s10700_s15, 32, %s14222_s8, [#allocation5]  }
 0x846   :  { %12452 = dma.done.wait [#allocation5], 32  }
 0x847   :  { %12453 = vsyncadd [#allocation5], 4294967264 }
 0x848   :  { %10706 = vsyncpa [#allocation4], 1 }
 0x849   :  { %10707 = vsyncpa [#allocation7], 1 }
 0x84a   :  { %10708 = vsyncpa [#allocation10], 1 }
 0x84b   :  { %10709 = vsyncpa [#allocation5], 1 }

</bundles_post_ra>
